<compile_context>
chip_gen: v7x
topology: tpu7x:2x2x1
jax: 0.10.0
libtpu: 0.0.40
codegen_flags: <defaults>
</compile_context>

<pallas_src>
import functools

import jax
import jax.numpy as jnp
from jax import lax
from jax.experimental import pallas as pl
from jax.experimental.pallas import tpu as pltpu

KSIZE = 4  # every conv is 4x4 with padding 1


# ----------------------------------------------------------------------------
# In-kernel helpers
# ----------------------------------------------------------------------------
def _inorm_lrelu(y):
    """InstanceNorm2d(affine=False, eps=1e-5, biased var) + LeakyReLU(0.2).

    y: (ms, C) f32 -- rows = spatial positions of ONE sample, lanes = channels.
    Per-sample/per-channel stats are simple sublane reductions (no matmuls).
    """
    mean = jnp.mean(y, axis=0, keepdims=True)                       # (1, C)
    var = jnp.maximum(jnp.mean(y * y, axis=0, keepdims=True) - mean * mean, 0.0)
    a = (y - mean) * lax.rsqrt(var + 1e-5)
    return jnp.where(a >= 0.0, a, 0.2 * a)


def _scatter_into_padded(act, pad_ref, h, w):
    """Write the (h*w, C) activation into a zero-padded ((h+2)*(w+2), C) ref.

    Padded pixel (hp, wp) lives at flat row hp*(w+2)+wp (padding = 1 border of
    zeros); one contiguous row-block store per image row.
    """
    wp = w + 2
    for r in range(h):
        pad_ref[pl.ds((r + 1) * wp + 1, w), :] = act[r * w:(r + 1) * w, :]


def _build_patch_slab(pad_ref, slab_ref, h, w, c, stride):
    """im2col folded into the kernel: 16 shifted-slice taps -> (Ho*Wo, 16*C).

    For tap t = i*4+j and output row oh, the needed padded rows are
    (stride*oh + i)*(w+2) + j + stride*ow, ow = 0..Wo-1, i.e. one contiguous
    (stride=1) or stride-2 sublane slice of the padded activation.  Each slice
    is copied straight into the patch-slab scratch (fully overwritten).
    """
    wp = w + 2
    ho = (h + 2 - KSIZE) // stride + 1
    wo = (w + 2 - KSIZE) // stride + 1
    for oh in range(ho):
        for i in range(KSIZE):
            for j in range(KSIZE):
                start = (stride * oh + i) * wp + j
                if stride == 1:
                    piece = pad_ref[pl.ds(start, wo), :]
                else:
                    piece = pad_ref[pl.ds(start, wo, stride=stride), :]
                slab_ref[pl.ds(oh * wo, wo),
                         pl.ds((i * KSIZE + j) * c, c)] = piece


# ----------------------------------------------------------------------------
# Fused kernel: conv1..conv4 + InstanceNorm + LeakyReLU + sigmoid partial sum
# (one program = one sample)
# ----------------------------------------------------------------------------
def _disc_kernel(p1_ref, w1_ref, w2_ref, w3_ref, w4_ref,
                 f1_ref, f2_ref, f3_ref, f4_ref, psum_ref,
                 a1_ref, a2_ref, a3_ref, p2_ref, p3_ref, p4_ref,
                 *, spatial):
    (h1, w1sp), (h2, w2sp), (h3, w3sp) = spatial
    c1 = w1_ref.shape[1]
    c2 = w2_ref.shape[1]
    c3 = w3_ref.shape[1]

    # ---- conv1 (patch slab of the raw 4-channel input built by the wrapper)
    y1 = jnp.dot(p1_ref[...], w1_ref[...], preferred_element_type=jnp.float32)
    a1 = _inorm_lrelu(y1)                                # (ms1, 64) f32
    f1_ref[...] = a1                                     # lane-dense store
    a1_ref[...] = jnp.zeros_like(a1_ref)
    _scatter_into_padded(a1, a1_ref, h1, w1sp)

    # ---- conv2 (stride 2): in-kernel im2col + one K=16*64 matmul
    _build_patch_slab(a1_ref, p2_ref, h1, w1sp, c1, stride=2)
    y2 = jnp.dot(p2_ref[...].astype(jnp.bfloat16), w2_ref[...],
                 preferred_element_type=jnp.float32)     # (ms2, 128)
    a2 = _inorm_lrelu(y2)
    f2_ref[...] = a2
    a2_ref[...] = jnp.zeros_like(a2_ref)
    _scatter_into_padded(a2, a2_ref, h2, w2sp)

    # ---- conv3 (stride 1): one K=16*128 matmul
    _build_patch_slab(a2_ref, p3_ref, h2, w2sp, c2, stride=1)
    y3 = jnp.dot(p3_ref[...].astype(jnp.bfloat16), w3_ref[...],
                 preferred_element_type=jnp.float32)     # (ms3, 256)
    a3 = _inorm_lrelu(y3)
    f3_ref[...] = a3
    a3_ref[...] = jnp.zeros_like(a3_ref)
    _scatter_into_padded(a3, a3_ref, h3, w3sp)

    # ---- conv4 (stride 1, conv only): one K=16*256 matmul
    _build_patch_slab(a3_ref, p4_ref, h3, w3sp, c3, stride=1)
    y4 = jnp.dot(p4_ref[...].astype(jnp.bfloat16), w4_ref[...],
                 preferred_element_type=jnp.float32)     # (ms4, 1)
    f4_ref[...] = y4

    # exact sigmoid + per-program partial sum; global mean finished in wrapper
    sig = 1.0 / (1.0 + jnp.exp(-y4))
    psum_ref[...] = jnp.sum(sig, keepdims=True)


# ----------------------------------------------------------------------------
# JAX glue: conv1 im2col, weight reordering, spectral norm, init
# ----------------------------------------------------------------------------
def im2col(x_nhwc, kh, kw, stride, pad):
    N, H, W, C = x_nhwc.shape
    xp = jnp.pad(x_nhwc, ((0, 0), (pad, pad), (pad, pad), (0, 0)))
    Ho = (H + 2 * pad - kh) // stride + 1
    Wo = (W + 2 * pad - kw) // stride + 1
    cols = []
    for i in range(kh):
        for j in range(kw):
            cols.append(xp[:, i:i + stride * (Ho - 1) + 1:stride,
                           j:j + stride * (Wo - 1) + 1:stride, :])
    p = jnp.stack(cols, axis=3)                          # (N, Ho, Wo, 16, C)
    return p.reshape(N, Ho * Wo, kh * kw * C), Ho, Wo


def reorder_weight(w_oihw):
    # torch (Cout, Cin, kh, kw) -> (kh*kw*Cin, Cout); row = (i*kw+j)*Cin + cin
    cout, cin, kh, kw = w_oihw.shape
    return jnp.transpose(w_oihw, (2, 3, 1, 0)).reshape(kh * kw * cin, cout)


def spectral_normalize(w_oihw, key, n_iter=10):
    # NOTE: host-side stand-in for nn.utils.spectral_norm (fresh power
    # iteration instead of torch's persistent-u single step).
    cout = w_oihw.shape[0]
    w2d = w_oihw.reshape(cout, -1)
    u = jax.random.normal(key, (cout,), jnp.float32)
    u = u / (jnp.linalg.norm(u) + 1e-12)
    v = None
    for _ in range(n_iter):
        v = w2d.T @ u
        v = v / (jnp.linalg.norm(v) + 1e-12)
        u = w2d @ v
        u = u / (jnp.linalg.norm(u) + 1e-12)
    sigma = u @ (w2d @ v)
    return w_oihw / sigma


def init_params(key, in_channels):
    # init_weights('normal', gain=0.02); spectral_norm path => bias=False.
    specs = [(64, in_channels), (128, 64), (256, 128), (1, 256)]
    keys = jax.random.split(key, 2 * len(specs))
    params = []
    for i, (cout, cin) in enumerate(specs):
        w = 0.02 * jax.random.normal(keys[2 * i], (cout, cin, 4, 4), jnp.float32)
        w = spectral_normalize(w, keys[2 * i + 1])
        params.append(w)
    return params


def _conv_out_hw(h, w, stride):
    return (h + 2 - KSIZE) // stride + 1, (w + 2 - KSIZE) // stride + 1


# ----------------------------------------------------------------------------
# Forward pass (matches LocalDiscriminator.forward)
# ----------------------------------------------------------------------------
@jax.jit
def local_discriminator_forward(x_nchw, w1, w2, w3, w4):
    n, cin, _, _ = x_nchw.shape
    c1, c2, c3, c4 = w1.shape[0], w2.shape[0], w3.shape[0], w4.shape[0]
    x = jnp.transpose(x_nchw, (0, 2, 3, 1)).astype(jnp.float32)      # NHWC

    # conv1 im2col on the raw input only (tiny one-time prep, fuses in XLA)
    p1, h1, w1sp = im2col(x, KSIZE, KSIZE, 2, 1)          # (N, ms1, 16*cin)
    p1 = p1.astype(jnp.bfloat16)
    h2, w2sp = _conv_out_hw(h1, w1sp, 2)
    h3, w3sp = _conv_out_hw(h2, w2sp, 1)
    h4, w4sp = _conv_out_hw(h3, w3sp, 1)
    ms1, ms2, ms3, ms4 = h1 * w1sp, h2 * w2sp, h3 * w3sp, h4 * w4sp

    w1m = reorder_weight(w1).astype(jnp.bfloat16)         # (16*cin, 64)
    w2m = reorder_weight(w2).astype(jnp.bfloat16)         # (1024, 128)
    w3m = reorder_weight(w3).astype(jnp.bfloat16)         # (2048, 256)
    w4m = reorder_weight(w4).astype(jnp.bfloat16)         # (4096, 1)

    flops = 2 * n * (ms1 * 16 * cin * c1 + ms2 * 16 * c1 * c2
                     + ms3 * 16 * c2 * c3 + ms4 * 16 * c3 * c4)
    bytes_accessed = (4 * n * (ms1 * c1 + ms2 * c2 + ms3 * c3 + ms4 * c4)
                      + 2 * (n * ms1 * 16 * cin + 16 * cin * c1
                             + 16 * c1 * c2 + 16 * c2 * c3 + 16 * c3 * c4))

    kernel = functools.partial(
        _disc_kernel, spatial=((h1, w1sp), (h2, w2sp), (h3, w3sp)))

    f1, f2, f3, f4, psum = pl.pallas_call(
        kernel,
        grid=(n,),
        in_specs=[
            pl.BlockSpec((None, ms1, 16 * cin), lambda b: (b, 0, 0)),
            pl.BlockSpec((16 * cin, c1), lambda b: (0, 0)),
            pl.BlockSpec((16 * c1, c2), lambda b: (0, 0)),
            pl.BlockSpec((16 * c2, c3), lambda b: (0, 0)),
            pl.BlockSpec((16 * c3, c4), lambda b: (0, 0)),
        ],
        out_specs=[
            pl.BlockSpec((None, ms1, c1), lambda b: (b, 0, 0)),
            pl.BlockSpec((None, ms2, c2), lambda b: (b, 0, 0)),
            pl.BlockSpec((None, ms3, c3), lambda b: (b, 0, 0)),
            pl.BlockSpec((None, ms4, c4), lambda b: (b, 0, 0)),
            pl.BlockSpec((None, 1, 1), lambda b: (b, 0, 0)),
        ],
        out_shape=(
            jax.ShapeDtypeStruct((n, ms1, c1), jnp.float32),
            jax.ShapeDtypeStruct((n, ms2, c2), jnp.float32),
            jax.ShapeDtypeStruct((n, ms3, c3), jnp.float32),
            jax.ShapeDtypeStruct((n, ms4, c4), jnp.float32),
            jax.ShapeDtypeStruct((n, 1, 1), jnp.float32),
        ),
        scratch_shapes=[
            pltpu.VMEM(((h1 + 2) * (w1sp + 2), c1), jnp.float32),  # padded act1
            pltpu.VMEM(((h2 + 2) * (w2sp + 2), c2), jnp.float32),  # padded act2
            pltpu.VMEM(((h3 + 2) * (w3sp + 2), c3), jnp.float32),  # padded act3
            pltpu.VMEM((ms2, 16 * c1), jnp.float32),               # conv2 slab
            pltpu.VMEM((ms3, 16 * c2), jnp.float32),               # conv3 slab
            pltpu.VMEM((ms4, 16 * c3), jnp.float32),               # conv4 slab
        ],
        compiler_params=pltpu.CompilerParams(
            dimension_semantics=("parallel",),
            vmem_limit_bytes=64 * 1024 * 1024,
        ),
        cost_estimate=pl.CostEstimate(
            flops=flops, transcendentals=n * ms4,
            bytes_accessed=bytes_accessed),
    )(p1, w1m, w2m, w3m, w4m)

    # NCHW transposes live in the wrapper (XLA fuses them); kernel stays
    # lane-dense.
    feats = [
        jnp.transpose(f1.reshape(n, h1, w1sp, c1), (0, 3, 1, 2)),
        jnp.transpose(f2.reshape(n, h2, w2sp, c2), (0, 3, 1, 2)),
        jnp.transpose(f3.reshape(n, h3, w3sp, c3), (0, 3, 1, 2)),
        jnp.transpose(f4.reshape(n, h4, w4sp, c4), (0, 3, 1, 2)),
    ]
    mean_out = jnp.sum(psum) / (n * ms4 * c4)
    return mean_out, feats


# ----------------------------------------------------------------------------
# Pure-JAX reference (same bf16 operand rounding) for a numerical sanity check
# ----------------------------------------------------------------------------
def _reference_forward(x_nchw, weights):
    def q(v):  # bf16 rounding, math in f32 (mirrors the kernel's operands)
        return v.astype(jnp.bfloat16).astype(jnp.float32)

    x = q(jnp.transpose(x_nchw, (0, 2, 3, 1)))
    strides = (2, 2, 1, 1)
    feats = []
    out = None
    for li, (w, s) in enumerate(zip(weights, strides)):
        w_hwio = q(jnp.transpose(w, (2, 3, 1, 0)))
        y = lax.conv_general_dilated(
            x, w_hwio, window_strides=(s, s), padding=[(1, 1), (1, 1)],
            dimension_numbers=("NHWC", "HWIO", "NHWC"))
        if li < 3:
            mean = jnp.mean(y, axis=(1, 2), keepdims=True)
            var = jnp.maximum(
                jnp.mean(y * y, axis=(1, 2), keepdims=True) - mean * mean, 0.0)
            a = (y - mean) * lax.rsqrt(var + 1e-5)
            a = jnp.where(a >= 0.0, a, 0.2 * a)
            feats.append(jnp.transpose(a, (0, 3, 1, 2)))
            x = q(a)
        else:
            feats.append(jnp.transpose(y, (0, 3, 1, 2)))
            out = jnp.mean(1.0 / (1.0 + jnp.exp(-y)))
    return out, feats


if __name__ == "__main__":
    key = jax.random.PRNGKey(0)
    kx, kp = jax.random.split(key)

    N, C, H, W = 2, 4, 16, 16
    x = jax.random.normal(kx, (N, C, H, W), jnp.float32)
    w1, w2, w3, w4 = init_params(kp, C)

    mean_out, feats = local_discriminator_forward(x, w1, w2, w3, w4)
    jax.block_until_ready(mean_out)
    jax.block_until_ready(feats)

    # shape sanity (16x16 input -> 8 -> 4 -> 3 -> 2)
    assert feats[0].shape == (N, 64, 8, 8)
    assert feats[1].shape == (N, 128, 4, 4)
    assert feats[2].shape == (N, 256, 3, 3)
    assert feats[3].shape == (N, 1, 2, 2)
    assert mean_out.shape == ()
    assert bool(jnp.isfinite(mean_out))

    # numerical sanity vs. a pure-JAX reference with identical operand rounding
    mean_ref, feats_ref = _reference_forward(x, (w1, w2, w3, w4))
    for got, want in zip(feats, feats_ref):
        assert got.shape == want.shape
        assert float(jnp.max(jnp.abs(got - want))) < 5e-2
    assert abs(float(mean_out) - float(mean_ref)) < 1e-2

    print("KERNEL_OK")
</pallas_src>

<mosaic_0001>
module attributes {stable_mosaic.version = 11 : i64} {
  func.func @_disc_kernel(%arg0: i32, %arg1: memref<1x64x64xbf16, #tpu.memory_space<vmem>>, %arg2: memref<64x64xbf16, #tpu.memory_space<vmem>>, %arg3: memref<1024x128xbf16, #tpu.memory_space<vmem>>, %arg4: memref<2048x256xbf16, #tpu.memory_space<vmem>>, %arg5: memref<4096x1xbf16, #tpu.memory_space<vmem>>, %arg6: memref<1x64x64xf32, #tpu.memory_space<vmem>>, %arg7: memref<1x16x128xf32, #tpu.memory_space<vmem>>, %arg8: memref<1x9x256xf32, #tpu.memory_space<vmem>>, %arg9: memref<1x4x1xf32, #tpu.memory_space<vmem>>, %arg10: memref<1x1x1xf32, #tpu.memory_space<vmem>>, %arg11: memref<100x64xf32, #tpu.memory_space<vmem>>, %arg12: memref<36x128xf32, #tpu.memory_space<vmem>>, %arg13: memref<25x256xf32, #tpu.memory_space<vmem>>, %arg14: memref<16x1024xf32, #tpu.memory_space<vmem>>, %arg15: memref<9x2048xf32, #tpu.memory_space<vmem>>, %arg16: memref<4x4096xf32, #tpu.memory_space<vmem>>) attributes {dimension_semantics = [#tpu.dimension_semantics<parallel>], iteration_bounds = array<i64: 2>, scalar_prefetch = 0 : i64, scratch_operands = 6 : i64, tpu.core_type = #tpu.core_type<tc>, window_params = [{transform_indices = @transform_0, window_bounds = array<i64: 1, 64, 64>}, {pipeline_mode = #tpu.pipeline_mode<synchronous>, transform_indices = @transform_1, window_bounds = array<i64: 64, 64>}, {pipeline_mode = #tpu.pipeline_mode<synchronous>, transform_indices = @transform_2, window_bounds = array<i64: 1024, 128>}, {pipeline_mode = #tpu.pipeline_mode<synchronous>, transform_indices = @transform_3, window_bounds = array<i64: 2048, 256>}, {pipeline_mode = #tpu.pipeline_mode<synchronous>, transform_indices = @transform_4, window_bounds = array<i64: 4096, 1>}, {transform_indices = @transform_5, window_bounds = array<i64: 1, 64, 64>}, {transform_indices = @transform_6, window_bounds = array<i64: 1, 16, 128>}, {transform_indices = @transform_7, window_bounds = array<i64: 1, 9, 256>}, {transform_indices = @transform_8, window_bounds = array<i64: 1, 4, 1>}, {transform_indices = @transform_9, window_bounds = array<i64: 1, 1, 1>}]} {
    %c0 = arith.constant 0 : index
    %c0_0 = arith.constant 0 : index
    %c0_1 = arith.constant 0 : index
    %0 = vector.load %arg1[%c0, %c0_0, %c0_1] : memref<1x64x64xbf16, #tpu.memory_space<vmem>>, vector<1x64x64xbf16>
    %1 = vector.shape_cast %0 : vector<1x64x64xbf16> to vector<64x64xbf16>
    %c0_2 = arith.constant 0 : index
    %c0_3 = arith.constant 0 : index
    %2 = vector.load %arg2[%c0_2, %c0_3] : memref<64x64xbf16, #tpu.memory_space<vmem>>, vector<64x64xbf16>
    %cst = arith.constant dense<0.000000e+00> : vector<64x64xf32>
    %3 = tpu.matmul %1, %2, %cst {dimension_numbers = #tpu.dot_dimension_numbers<[1], [0], [0], [1], [0, 0, 1, 1], [], []>} : vector<64x64xbf16>, vector<64x64xbf16>, vector<64x64xf32> -> vector<64x64xf32>
    %cst_4 = arith.constant dense<0.000000e+00> : vector<64xf32>
    %4 = vector.multi_reduction <add>, %3, %cst_4 [0] : vector<64x64xf32> to vector<64xf32>
    %5 = vector.shape_cast %4 : vector<64xf32> to vector<1x64xf32>
    %cst_5 = arith.constant 6.400000e+01 : f32
    %6 = vector.broadcast %cst_5 : f32 to vector<1x64xf32>
    %7 = arith.divf %5, %6 : vector<1x64xf32>
    %8 = arith.mulf %3, %3 : vector<64x64xf32>
    %cst_6 = arith.constant dense<0.000000e+00> : vector<64xf32>
    %9 = vector.multi_reduction <add>, %8, %cst_6 [0] : vector<64x64xf32> to vector<64xf32>
    %10 = vector.shape_cast %9 : vector<64xf32> to vector<1x64xf32>
    %cst_7 = arith.constant 6.400000e+01 : f32
    %11 = vector.broadcast %cst_7 : f32 to vector<1x64xf32>
    %12 = arith.divf %10, %11 : vector<1x64xf32>
    %13 = arith.mulf %7, %7 : vector<1x64xf32>
    %14 = arith.subf %12, %13 : vector<1x64xf32>
    %cst_8 = arith.constant 0.000000e+00 : f32
    %15 = vector.broadcast %cst_8 : f32 to vector<1x64xf32>
    %16 = arith.maximumf %14, %15 : vector<1x64xf32>
    %17 = vector.broadcast %7 : vector<1x64xf32> to vector<64x64xf32>
    %18 = arith.subf %3, %17 : vector<64x64xf32>
    %cst_9 = arith.constant 9.99999974E-6 : f32
    %19 = vector.broadcast %cst_9 : f32 to vector<1x64xf32>
    %20 = arith.addf %16, %19 : vector<1x64xf32>
    %21 = math.rsqrt %20 : vector<1x64xf32>
    %22 = vector.broadcast %21 : vector<1x64xf32> to vector<64x64xf32>
    %23 = arith.mulf %18, %22 : vector<64x64xf32>
    %cst_10 = arith.constant 0.000000e+00 : f32
    %24 = vector.broadcast %cst_10 : f32 to vector<64x64xf32>
    %25 = arith.cmpf oge, %23, %24 : vector<64x64xf32>
    %cst_11 = arith.constant 2.000000e-01 : f32
    %26 = vector.broadcast %cst_11 : f32 to vector<64x64xf32>
    %27 = arith.mulf %26, %23 : vector<64x64xf32>
    %28 = arith.select %25, %23, %27 : vector<64x64xi1>, vector<64x64xf32>
    %c0_12 = arith.constant 0 : index
    %c0_13 = arith.constant 0 : index
    %c0_14 = arith.constant 0 : index
    %29 = vector.load %arg6[%c0_12, %c0_13, %c0_14] : memref<1x64x64xf32, #tpu.memory_space<vmem>>, vector<1x64x64xf32>
    %30 = vector.shape_cast %29 : vector<1x64x64xf32> to vector<64x64xf32>
    %31 = vector.shape_cast %28 : vector<64x64xf32> to vector<1x64x64xf32>
    tpu.vector_store %arg6[%c0_12, %c0_13, %c0_14], %31 {strides = array<i32>} : memref<1x64x64xf32, #tpu.memory_space<vmem>>, vector<1x64x64xf32>,
    %cst_15 = arith.constant 0.000000e+00 : f32
    %32 = vector.broadcast %cst_15 : f32 to vector<100x64xf32>
    %c0_16 = arith.constant 0 : index
    %c0_17 = arith.constant 0 : index
    %33 = vector.load %arg11[%c0_16, %c0_17] : memref<100x64xf32, #tpu.memory_space<vmem>>, vector<100x64xf32>
    tpu.vector_store %arg11[%c0_16, %c0_17], %32 {strides = array<i32>} : memref<100x64xf32, #tpu.memory_space<vmem>>, vector<100x64xf32>,
    %34 = vector.extract_strided_slice %28 {offsets = [0, 0], sizes = [8, 64], strides = [1, 1]} : vector<64x64xf32> to vector<8x64xf32>
    %c11 = arith.constant 11 : index
    %c0_18 = arith.constant 0 : index
    %35 = vector.load %arg11[%c11, %c0_18] : memref<100x64xf32, #tpu.memory_space<vmem>>, vector<8x64xf32>
    tpu.vector_store %arg11[%c11, %c0_18], %34 {strides = array<i32>} : memref<100x64xf32, #tpu.memory_space<vmem>>, vector<8x64xf32>,
    %36 = vector.extract_strided_slice %28 {offsets = [8, 0], sizes = [8, 64], strides = [1, 1]} : vector<64x64xf32> to vector<8x64xf32>
    %c21 = arith.constant 21 : index
    %c0_19 = arith.constant 0 : index
    %37 = vector.load %arg11[%c21, %c0_19] : memref<100x64xf32, #tpu.memory_space<vmem>>, vector<8x64xf32>
    tpu.vector_store %arg11[%c21, %c0_19], %36 {strides = array<i32>} : memref<100x64xf32, #tpu.memory_space<vmem>>, vector<8x64xf32>,
    %38 = vector.extract_strided_slice %28 {offsets = [16, 0], sizes = [8, 64], strides = [1, 1]} : vector<64x64xf32> to vector<8x64xf32>
    %c31 = arith.constant 31 : index
    %c0_20 = arith.constant 0 : index
    %39 = vector.load %arg11[%c31, %c0_20] : memref<100x64xf32, #tpu.memory_space<vmem>>, vector<8x64xf32>
    tpu.vector_store %arg11[%c31, %c0_20], %38 {strides = array<i32>} : memref<100x64xf32, #tpu.memory_space<vmem>>, vector<8x64xf32>,
    %40 = vector.extract_strided_slice %28 {offsets = [24, 0], sizes = [8, 64], strides = [1, 1]} : vector<64x64xf32> to vector<8x64xf32>
    %c41 = arith.constant 41 : index
    %c0_21 = arith.constant 0 : index
    %41 = vector.load %arg11[%c41, %c0_21] : memref<100x64xf32, #tpu.memory_space<vmem>>, vector<8x64xf32>
    tpu.vector_store %arg11[%c41, %c0_21], %40 {strides = array<i32>} : memref<100x64xf32, #tpu.memory_space<vmem>>, vector<8x64xf32>,
    %42 = vector.extract_strided_slice %28 {offsets = [32, 0], sizes = [8, 64], strides = [1, 1]} : vector<64x64xf32> to vector<8x64xf32>
    %c51 = arith.constant 51 : index
    %c0_22 = arith.constant 0 : index
    %43 = vector.load %arg11[%c51, %c0_22] : memref<100x64xf32, #tpu.memory_space<vmem>>, vector<8x64xf32>
    tpu.vector_store %arg11[%c51, %c0_22], %42 {strides = array<i32>} : memref<100x64xf32, #tpu.memory_space<vmem>>, vector<8x64xf32>,
    %44 = vector.extract_strided_slice %28 {offsets = [40, 0], sizes = [8, 64], strides = [1, 1]} : vector<64x64xf32> to vector<8x64xf32>
    %c61 = arith.constant 61 : index
    %c0_23 = arith.constant 0 : index
    %45 = vector.load %arg11[%c61, %c0_23] : memref<100x64xf32, #tpu.memory_space<vmem>>, vector<8x64xf32>
    tpu.vector_store %arg11[%c61, %c0_23], %44 {strides = array<i32>} : memref<100x64xf32, #tpu.memory_space<vmem>>, vector<8x64xf32>,
    %46 = vector.extract_strided_slice %28 {offsets = [48, 0], sizes = [8, 64], strides = [1, 1]} : vector<64x64xf32> to vector<8x64xf32>
    %c71 = arith.constant 71 : index
    %c0_24 = arith.constant 0 : index
    %47 = vector.load %arg11[%c71, %c0_24] : memref<100x64xf32, #tpu.memory_space<vmem>>, vector<8x64xf32>
    tpu.vector_store %arg11[%c71, %c0_24], %46 {strides = array<i32>} : memref<100x64xf32, #tpu.memory_space<vmem>>, vector<8x64xf32>,
    %48 = vector.extract_strided_slice %28 {offsets = [56, 0], sizes = [8, 64], strides = [1, 1]} : vector<64x64xf32> to vector<8x64xf32>
    %c81 = arith.constant 81 : index
    %c0_25 = arith.constant 0 : index
    %49 = vector.load %arg11[%c81, %c0_25] : memref<100x64xf32, #tpu.memory_space<vmem>>, vector<8x64xf32>
    tpu.vector_store %arg11[%c81, %c0_25], %48 {strides = array<i32>} : memref<100x64xf32, #tpu.memory_space<vmem>>, vector<8x64xf32>,
    %c0_26 = arith.constant 0 : index
    %c0_27 = arith.constant 0 : index
    %50 = tpu.strided_load %arg11[%c0_26, %c0_27] {strides = array<i32: 2, 1>} : memref<100x64xf32, #tpu.memory_space<vmem>>, vector<4x64xf32>
    %c0_28 = arith.constant 0 : index
    %c0_29 = arith.constant 0 : index
    %51 = vector.load %arg14[%c0_28, %c0_29] : memref<16x1024xf32, #tpu.memory_space<vmem>>, vector<4x64xf32>
    tpu.vector_store %arg14[%c0_28, %c0_29], %50 {strides = array<i32>} : memref<16x1024xf32, #tpu.memory_space<vmem>>, vector<4x64xf32>,
    %c1 = arith.constant 1 : index
    %c0_30 = arith.constant 0 : index
    %52 = tpu.strided_load %arg11[%c1, %c0_30] {strides = array<i32: 2, 1>} : memref<100x64xf32, #tpu.memory_space<vmem>>, vector<4x64xf32>
    %c0_31 = arith.constant 0 : index
    %c64 = arith.constant 64 : index
    %53 = vector.load %arg14[%c0_31, %c64] : memref<16x1024xf32, #tpu.memory_space<vmem>>, vector<4x64xf32>
    tpu.vector_store %arg14[%c0_31, %c64], %52 {strides = array<i32>} : memref<16x1024xf32, #tpu.memory_space<vmem>>, vector<4x64xf32>,
    %c2 = arith.constant 2 : index
    %c0_32 = arith.constant 0 : index
    %54 = tpu.strided_load %arg11[%c2, %c0_32] {strides = array<i32: 2, 1>} : memref<100x64xf32, #tpu.memory_space<vmem>>, vector<4x64xf32>
    %c0_33 = arith.constant 0 : index
    %c128 = arith.constant 128 : index
    %55 = vector.load %arg14[%c0_33, %c128] : memref<16x1024xf32, #tpu.memory_space<vmem>>, vector<4x64xf32>
    tpu.vector_store %arg14[%c0_33, %c128], %54 {strides = array<i32>} : memref<16x1024xf32, #tpu.memory_space<vmem>>, vector<4x64xf32>,
    %c3 = arith.constant 3 : index
    %c0_34 = arith.constant 0 : index
    %56 = tpu.strided_load %arg11[%c3, %c0_34] {strides = array<i32: 2, 1>} : memref<100x64xf32, #tpu.memory_space<vmem>>, vector<4x64xf32>
    %c0_35 = arith.constant 0 : index
    %c192 = arith.constant 192 : index
    %57 = vector.load %arg14[%c0_35, %c192] : memref<16x1024xf32, #tpu.memory_space<vmem>>, vector<4x64xf32>
    tpu.vector_store %arg14[%c0_35, %c192], %56 {strides = array<i32>} : memref<16x1024xf32, #tpu.memory_space<vmem>>, vector<4x64xf32>,
    %c10 = arith.constant 10 : index
    %c0_36 = arith.constant 0 : index
    %58 = tpu.strided_load %arg11[%c10, %c0_36] {strides = array<i32: 2, 1>} : memref<100x64xf32, #tpu.memory_space<vmem>>, vector<4x64xf32>
    %c0_37 = arith.constant 0 : index
    %c256 = arith.constant 256 : index
    %59 = vector.load %arg14[%c0_37, %c256] : memref<16x1024xf32, #tpu.memory_space<vmem>>, vector<4x64xf32>
    tpu.vector_store %arg14[%c0_37, %c256], %58 {strides = array<i32>} : memref<16x1024xf32, #tpu.memory_space<vmem>>, vector<4x64xf32>,
    %c11_38 = arith.constant 11 : index
    %c0_39 = arith.constant 0 : index
    %60 = tpu.strided_load %arg11[%c11_38, %c0_39] {strides = array<i32: 2, 1>} : memref<100x64xf32, #tpu.memory_space<vmem>>, vector<4x64xf32>
    %c0_40 = arith.constant 0 : index
    %c320 = arith.constant 320 : index
    %61 = vector.load %arg14[%c0_40, %c320] : memref<16x1024xf32, #tpu.memory_space<vmem>>, vector<4x64xf32>
    tpu.vector_store %arg14[%c0_40, %c320], %60 {strides = array<i32>} : memref<16x1024xf32, #tpu.memory_space<vmem>>, vector<4x64xf32>,
    %c12 = arith.constant 12 : index
    %c0_41 = arith.constant 0 : index
    %62 = tpu.strided_load %arg11[%c12, %c0_41] {strides = array<i32: 2, 1>} : memref<100x64xf32, #tpu.memory_space<vmem>>, vector<4x64xf32>
    %c0_42 = arith.constant 0 : index
    %c384 = arith.constant 384 : index
    %63 = vector.load %arg14[%c0_42, %c384] : memref<16x1024xf32, #tpu.memory_space<vmem>>, vector<4x64xf32>
    tpu.vector_store %arg14[%c0_42, %c384], %62 {strides = array<i32>} : memref<16x1024xf32, #tpu.memory_space<vmem>>, vector<4x64xf32>,
    %c13 = arith.constant 13 : index
    %c0_43 = arith.constant 0 : index
    %64 = tpu.strided_load %arg11[%c13, %c0_43] {strides = array<i32: 2, 1>} : memref<100x64xf32, #tpu.memory_space<vmem>>, vector<4x64xf32>
    %c0_44 = arith.constant 0 : index
    %c448 = arith.constant 448 : index
    %65 = vector.load %arg14[%c0_44, %c448] : memref<16x1024xf32, #tpu.memory_space<vmem>>, vector<4x64xf32>
    tpu.vector_store %arg14[%c0_44, %c448], %64 {strides = array<i32>} : memref<16x1024xf32, #tpu.memory_space<vmem>>, vector<4x64xf32>,
    %c20 = arith.constant 20 : index
    %c0_45 = arith.constant 0 : index
    %66 = tpu.strided_load %arg11[%c20, %c0_45] {strides = array<i32: 2, 1>} : memref<100x64xf32, #tpu.memory_space<vmem>>, vector<4x64xf32>
    %c0_46 = arith.constant 0 : index
    %c512 = arith.constant 512 : index
    %67 = vector.load %arg14[%c0_46, %c512] : memref<16x1024xf32, #tpu.memory_space<vmem>>, vector<4x64xf32>
    tpu.vector_store %arg14[%c0_46, %c512], %66 {strides = array<i32>} : memref<16x1024xf32, #tpu.memory_space<vmem>>, vector<4x64xf32>,
    %c21_47 = arith.constant 21 : index
    %c0_48 = arith.constant 0 : index
    %68 = tpu.strided_load %arg11[%c21_47, %c0_48] {strides = array<i32: 2, 1>} : memref<100x64xf32, #tpu.memory_space<vmem>>, vector<4x64xf32>
    %c0_49 = arith.constant 0 : index
    %c576 = arith.constant 576 : index
    %69 = vector.load %arg14[%c0_49, %c576] : memref<16x1024xf32, #tpu.memory_space<vmem>>, vector<4x64xf32>
    tpu.vector_store %arg14[%c0_49, %c576], %68 {strides = array<i32>} : memref<16x1024xf32, #tpu.memory_space<vmem>>, vector<4x64xf32>,
    %c22 = arith.constant 22 : index
    %c0_50 = arith.constant 0 : index
    %70 = tpu.strided_load %arg11[%c22, %c0_50] {strides = array<i32: 2, 1>} : memref<100x64xf32, #tpu.memory_space<vmem>>, vector<4x64xf32>
    %c0_51 = arith.constant 0 : index
    %c640 = arith.constant 640 : index
    %71 = vector.load %arg14[%c0_51, %c640] : memref<16x1024xf32, #tpu.memory_space<vmem>>, vector<4x64xf32>
    tpu.vector_store %arg14[%c0_51, %c640], %70 {strides = array<i32>} : memref<16x1024xf32, #tpu.memory_space<vmem>>, vector<4x64xf32>,
    %c23 = arith.constant 23 : index
    %c0_52 = arith.constant 0 : index
    %72 = tpu.strided_load %arg11[%c23, %c0_52] {strides = array<i32: 2, 1>} : memref<100x64xf32, #tpu.memory_space<vmem>>, vector<4x64xf32>
    %c0_53 = arith.constant 0 : index
    %c704 = arith.constant 704 : index
    %73 = vector.load %arg14[%c0_53, %c704] : memref<16x1024xf32, #tpu.memory_space<vmem>>, vector<4x64xf32>
    tpu.vector_store %arg14[%c0_53, %c704], %72 {strides = array<i32>} : memref<16x1024xf32, #tpu.memory_space<vmem>>, vector<4x64xf32>,
    %c30 = arith.constant 30 : index
    %c0_54 = arith.constant 0 : index
    %74 = tpu.strided_load %arg11[%c30, %c0_54] {strides = array<i32: 2, 1>} : memref<100x64xf32, #tpu.memory_space<vmem>>, vector<4x64xf32>
    %c0_55 = arith.constant 0 : index
    %c768 = arith.constant 768 : index
    %75 = vector.load %arg14[%c0_55, %c768] : memref<16x1024xf32, #tpu.memory_space<vmem>>, vector<4x64xf32>
    tpu.vector_store %arg14[%c0_55, %c768], %74 {strides = array<i32>} : memref<16x1024xf32, #tpu.memory_space<vmem>>, vector<4x64xf32>,
    %c31_56 = arith.constant 31 : index
    %c0_57 = arith.constant 0 : index
    %76 = tpu.strided_load %arg11[%c31_56, %c0_57] {strides = array<i32: 2, 1>} : memref<100x64xf32, #tpu.memory_space<vmem>>, vector<4x64xf32>
    %c0_58 = arith.constant 0 : index
    %c832 = arith.constant 832 : index
    %77 = vector.load %arg14[%c0_58, %c832] : memref<16x1024xf32, #tpu.memory_space<vmem>>, vector<4x64xf32>
    tpu.vector_store %arg14[%c0_58, %c832], %76 {strides = array<i32>} : memref<16x1024xf32, #tpu.memory_space<vmem>>, vector<4x64xf32>,
    %c32 = arith.constant 32 : index
    %c0_59 = arith.constant 0 : index
    %78 = tpu.strided_load %arg11[%c32, %c0_59] {strides = array<i32: 2, 1>} : memref<100x64xf32, #tpu.memory_space<vmem>>, vector<4x64xf32>
    %c0_60 = arith.constant 0 : index
    %c896 = arith.constant 896 : index
    %79 = vector.load %arg14[%c0_60, %c896] : memref<16x1024xf32, #tpu.memory_space<vmem>>, vector<4x64xf32>
    tpu.vector_store %arg14[%c0_60, %c896], %78 {strides = array<i32>} : memref<16x1024xf32, #tpu.memory_space<vmem>>, vector<4x64xf32>,
    %c33 = arith.constant 33 : index
    %c0_61 = arith.constant 0 : index
    %80 = tpu.strided_load %arg11[%c33, %c0_61] {strides = array<i32: 2, 1>} : memref<100x64xf32, #tpu.memory_space<vmem>>, vector<4x64xf32>
    %c0_62 = arith.constant 0 : index
    %c960 = arith.constant 960 : index
    %81 = vector.load %arg14[%c0_62, %c960] : memref<16x1024xf32, #tpu.memory_space<vmem>>, vector<4x64xf32>
    tpu.vector_store %arg14[%c0_62, %c960], %80 {strides = array<i32>} : memref<16x1024xf32, #tpu.memory_space<vmem>>, vector<4x64xf32>,
    %c20_63 = arith.constant 20 : index
    %c0_64 = arith.constant 0 : index
    %82 = tpu.strided_load %arg11[%c20_63, %c0_64] {strides = array<i32: 2, 1>} : memref<100x64xf32, #tpu.memory_space<vmem>>, vector<4x64xf32>
    %c4 = arith.constant 4 : index
    %c0_65 = arith.constant 0 : index
    %83 = vector.load %arg14[%c4, %c0_65] : memref<16x1024xf32, #tpu.memory_space<vmem>>, vector<4x64xf32>
    tpu.vector_store %arg14[%c4, %c0_65], %82 {strides = array<i32>} : memref<16x1024xf32, #tpu.memory_space<vmem>>, vector<4x64xf32>,
    %c21_66 = arith.constant 21 : index
    %c0_67 = arith.constant 0 : index
    %84 = tpu.strided_load %arg11[%c21_66, %c0_67] {strides = array<i32: 2, 1>} : memref<100x64xf32, #tpu.memory_space<vmem>>, vector<4x64xf32>
    %c4_68 = arith.constant 4 : index
    %c64_69 = arith.constant 64 : index
    %85 = vector.load %arg14[%c4_68, %c64_69] : memref<16x1024xf32, #tpu.memory_space<vmem>>, vector<4x64xf32>
    tpu.vector_store %arg14[%c4_68, %c64_69], %84 {strides = array<i32>} : memref<16x1024xf32, #tpu.memory_space<vmem>>, vector<4x64xf32>,
    %c22_70 = arith.constant 22 : index
    %c0_71 = arith.constant 0 : index
    %86 = tpu.strided_load %arg11[%c22_70, %c0_71] {strides = array<i32: 2, 1>} : memref<100x64xf32, #tpu.memory_space<vmem>>, vector<4x64xf32>
    %c4_72 = arith.constant 4 : index
    %c128_73 = arith.constant 128 : index
    %87 = vector.load %arg14[%c4_72, %c128_73] : memref<16x1024xf32, #tpu.memory_space<vmem>>, vector<4x64xf32>
    tpu.vector_store %arg14[%c4_72, %c128_73], %86 {strides = array<i32>} : memref<16x1024xf32, #tpu.memory_space<vmem>>, vector<4x64xf32>,
    %c23_74 = arith.constant 23 : index
    %c0_75 = arith.constant 0 : index
    %88 = tpu.strided_load %arg11[%c23_74, %c0_75] {strides = array<i32: 2, 1>} : memref<100x64xf32, #tpu.memory_space<vmem>>, vector<4x64xf32>
    %c4_76 = arith.constant 4 : index
    %c192_77 = arith.constant 192 : index
    %89 = vector.load %arg14[%c4_76, %c192_77] : memref<16x1024xf32, #tpu.memory_space<vmem>>, vector<4x64xf32>
    tpu.vector_store %arg14[%c4_76, %c192_77], %88 {strides = array<i32>} : memref<16x1024xf32, #tpu.memory_space<vmem>>, vector<4x64xf32>,
    %c30_78 = arith.constant 30 : index
    %c0_79 = arith.constant 0 : index
    %90 = tpu.strided_load %arg11[%c30_78, %c0_79] {strides = array<i32: 2, 1>} : memref<100x64xf32, #tpu.memory_space<vmem>>, vector<4x64xf32>
    %c4_80 = arith.constant 4 : index
    %c256_81 = arith.constant 256 : index
    %91 = vector.load %arg14[%c4_80, %c256_81] : memref<16x1024xf32, #tpu.memory_space<vmem>>, vector<4x64xf32>
    tpu.vector_store %arg14[%c4_80, %c256_81], %90 {strides = array<i32>} : memref<16x1024xf32, #tpu.memory_space<vmem>>, vector<4x64xf32>,
    %c31_82 = arith.constant 31 : index
    %c0_83 = arith.constant 0 : index
    %92 = tpu.strided_load %arg11[%c31_82, %c0_83] {strides = array<i32: 2, 1>} : memref<100x64xf32, #tpu.memory_space<vmem>>, vector<4x64xf32>
    %c4_84 = arith.constant 4 : index
    %c320_85 = arith.constant 320 : index
    %93 = vector.load %arg14[%c4_84, %c320_85] : memref<16x1024xf32, #tpu.memory_space<vmem>>, vector<4x64xf32>
    tpu.vector_store %arg14[%c4_84, %c320_85], %92 {strides = array<i32>} : memref<16x1024xf32, #tpu.memory_space<vmem>>, vector<4x64xf32>,
    %c32_86 = arith.constant 32 : index
    %c0_87 = arith.constant 0 : index
    %94 = tpu.strided_load %arg11[%c32_86, %c0_87] {strides = array<i32: 2, 1>} : memref<100x64xf32, #tpu.memory_space<vmem>>, vector<4x64xf32>
    %c4_88 = arith.constant 4 : index
    %c384_89 = arith.constant 384 : index
    %95 = vector.load %arg14[%c4_88, %c384_89] : memref<16x1024xf32, #tpu.memory_space<vmem>>, vector<4x64xf32>
    tpu.vector_store %arg14[%c4_88, %c384_89], %94 {strides = array<i32>} : memref<16x1024xf32, #tpu.memory_space<vmem>>, vector<4x64xf32>,
    %c33_90 = arith.constant 33 : index
    %c0_91 = arith.constant 0 : index
    %96 = tpu.strided_load %arg11[%c33_90, %c0_91] {strides = array<i32: 2, 1>} : memref<100x64xf32, #tpu.memory_space<vmem>>, vector<4x64xf32>
    %c4_92 = arith.constant 4 : index
    %c448_93 = arith.constant 448 : index
    %97 = vector.load %arg14[%c4_92, %c448_93] : memref<16x1024xf32, #tpu.memory_space<vmem>>, vector<4x64xf32>
    tpu.vector_store %arg14[%c4_92, %c448_93], %96 {strides = array<i32>} : memref<16x1024xf32, #tpu.memory_space<vmem>>, vector<4x64xf32>,
    %c40 = arith.constant 40 : index
    %c0_94 = arith.constant 0 : index
    %98 = tpu.strided_load %arg11[%c40, %c0_94] {strides = array<i32: 2, 1>} : memref<100x64xf32, #tpu.memory_space<vmem>>, vector<4x64xf32>
    %c4_95 = arith.constant 4 : index
    %c512_96 = arith.constant 512 : index
    %99 = vector.load %arg14[%c4_95, %c512_96] : memref<16x1024xf32, #tpu.memory_space<vmem>>, vector<4x64xf32>
    tpu.vector_store %arg14[%c4_95, %c512_96], %98 {strides = array<i32>} : memref<16x1024xf32, #tpu.memory_space<vmem>>, vector<4x64xf32>,
    %c41_97 = arith.constant 41 : index
    %c0_98 = arith.constant 0 : index
    %100 = tpu.strided_load %arg11[%c41_97, %c0_98] {strides = array<i32: 2, 1>} : memref<100x64xf32, #tpu.memory_space<vmem>>, vector<4x64xf32>
    %c4_99 = arith.constant 4 : index
    %c576_100 = arith.constant 576 : index
    %101 = vector.load %arg14[%c4_99, %c576_100] : memref<16x1024xf32, #tpu.memory_space<vmem>>, vector<4x64xf32>
    tpu.vector_store %arg14[%c4_99, %c576_100], %100 {strides = array<i32>} : memref<16x1024xf32, #tpu.memory_space<vmem>>, vector<4x64xf32>,
    %c42 = arith.constant 42 : index
    %c0_101 = arith.constant 0 : index
    %102 = tpu.strided_load %arg11[%c42, %c0_101] {strides = array<i32: 2, 1>} : memref<100x64xf32, #tpu.memory_space<vmem>>, vector<4x64xf32>
    %c4_102 = arith.constant 4 : index
    %c640_103 = arith.constant 640 : index
    %103 = vector.load %arg14[%c4_102, %c640_103] : memref<16x1024xf32, #tpu.memory_space<vmem>>, vector<4x64xf32>
    tpu.vector_store %arg14[%c4_102, %c640_103], %102 {strides = array<i32>} : memref<16x1024xf32, #tpu.memory_space<vmem>>, vector<4x64xf32>,
    %c43 = arith.constant 43 : index
    %c0_104 = arith.constant 0 : index
    %104 = tpu.strided_load %arg11[%c43, %c0_104] {strides = array<i32: 2, 1>} : memref<100x64xf32, #tpu.memory_space<vmem>>, vector<4x64xf32>
    %c4_105 = arith.constant 4 : index
    %c704_106 = arith.constant 704 : index
    %105 = vector.load %arg14[%c4_105, %c704_106] : memref<16x1024xf32, #tpu.memory_space<vmem>>, vector<4x64xf32>
    tpu.vector_store %arg14[%c4_105, %c704_106], %104 {strides = array<i32>} : memref<16x1024xf32, #tpu.memory_space<vmem>>, vector<4x64xf32>,
    %c50 = arith.constant 50 : index
    %c0_107 = arith.constant 0 : index
    %106 = tpu.strided_load %arg11[%c50, %c0_107] {strides = array<i32: 2, 1>} : memref<100x64xf32, #tpu.memory_space<vmem>>, vector<4x64xf32>
    %c4_108 = arith.constant 4 : index
    %c768_109 = arith.constant 768 : index
    %107 = vector.load %arg14[%c4_108, %c768_109] : memref<16x1024xf32, #tpu.memory_space<vmem>>, vector<4x64xf32>
    tpu.vector_store %arg14[%c4_108, %c768_109], %106 {strides = array<i32>} : memref<16x1024xf32, #tpu.memory_space<vmem>>, vector<4x64xf32>,
    %c51_110 = arith.constant 51 : index
    %c0_111 = arith.constant 0 : index
    %108 = tpu.strided_load %arg11[%c51_110, %c0_111] {strides = array<i32: 2, 1>} : memref<100x64xf32, #tpu.memory_space<vmem>>, vector<4x64xf32>
    %c4_112 = arith.constant 4 : index
    %c832_113 = arith.constant 832 : index
    %109 = vector.load %arg14[%c4_112, %c832_113] : memref<16x1024xf32, #tpu.memory_space<vmem>>, vector<4x64xf32>
    tpu.vector_store %arg14[%c4_112, %c832_113], %108 {strides = array<i32>} : memref<16x1024xf32, #tpu.memory_space<vmem>>, vector<4x64xf32>,
    %c52 = arith.constant 52 : index
    %c0_114 = arith.constant 0 : index
    %110 = tpu.strided_load %arg11[%c52, %c0_114] {strides = array<i32: 2, 1>} : memref<100x64xf32, #tpu.memory_space<vmem>>, vector<4x64xf32>
    %c4_115 = arith.constant 4 : index
    %c896_116 = arith.constant 896 : index
    %111 = vector.load %arg14[%c4_115, %c896_116] : memref<16x1024xf32, #tpu.memory_space<vmem>>, vector<4x64xf32>
    tpu.vector_store %arg14[%c4_115, %c896_116], %110 {strides = array<i32>} : memref<16x1024xf32, #tpu.memory_space<vmem>>, vector<4x64xf32>,
    %c53 = arith.constant 53 : index
    %c0_117 = arith.constant 0 : index
    %112 = tpu.strided_load %arg11[%c53, %c0_117] {strides = array<i32: 2, 1>} : memref<100x64xf32, #tpu.memory_space<vmem>>, vector<4x64xf32>
    %c4_118 = arith.constant 4 : index
    %c960_119 = arith.constant 960 : index
    %113 = vector.load %arg14[%c4_118, %c960_119] : memref<16x1024xf32, #tpu.memory_space<vmem>>, vector<4x64xf32>
    tpu.vector_store %arg14[%c4_118, %c960_119], %112 {strides = array<i32>} : memref<16x1024xf32, #tpu.memory_space<vmem>>, vector<4x64xf32>,
    %c40_120 = arith.constant 40 : index
    %c0_121 = arith.constant 0 : index
    %114 = tpu.strided_load %arg11[%c40_120, %c0_121] {strides = array<i32: 2, 1>} : memref<100x64xf32, #tpu.memory_space<vmem>>, vector<4x64xf32>
    %c8 = arith.constant 8 : index
    %c0_122 = arith.constant 0 : index
    %115 = vector.load %arg14[%c8, %c0_122] : memref<16x1024xf32, #tpu.memory_space<vmem>>, vector<4x64xf32>
    tpu.vector_store %arg14[%c8, %c0_122], %114 {strides = array<i32>} : memref<16x1024xf32, #tpu.memory_space<vmem>>, vector<4x64xf32>,
    %c41_123 = arith.constant 41 : index
    %c0_124 = arith.constant 0 : index
    %116 = tpu.strided_load %arg11[%c41_123, %c0_124] {strides = array<i32: 2, 1>} : memref<100x64xf32, #tpu.memory_space<vmem>>, vector<4x64xf32>
    %c8_125 = arith.constant 8 : index
    %c64_126 = arith.constant 64 : index
    %117 = vector.load %arg14[%c8_125, %c64_126] : memref<16x1024xf32, #tpu.memory_space<vmem>>, vector<4x64xf32>
    tpu.vector_store %arg14[%c8_125, %c64_126], %116 {strides = array<i32>} : memref<16x1024xf32, #tpu.memory_space<vmem>>, vector<4x64xf32>,
    %c42_127 = arith.constant 42 : index
    %c0_128 = arith.constant 0 : index
    %118 = tpu.strided_load %arg11[%c42_127, %c0_128] {strides = array<i32: 2, 1>} : memref<100x64xf32, #tpu.memory_space<vmem>>, vector<4x64xf32>
    %c8_129 = arith.constant 8 : index
    %c128_130 = arith.constant 128 : index
    %119 = vector.load %arg14[%c8_129, %c128_130] : memref<16x1024xf32, #tpu.memory_space<vmem>>, vector<4x64xf32>
    tpu.vector_store %arg14[%c8_129, %c128_130], %118 {strides = array<i32>} : memref<16x1024xf32, #tpu.memory_space<vmem>>, vector<4x64xf32>,
    %c43_131 = arith.constant 43 : index
    %c0_132 = arith.constant 0 : index
    %120 = tpu.strided_load %arg11[%c43_131, %c0_132] {strides = array<i32: 2, 1>} : memref<100x64xf32, #tpu.memory_space<vmem>>, vector<4x64xf32>
    %c8_133 = arith.constant 8 : index
    %c192_134 = arith.constant 192 : index
    %121 = vector.load %arg14[%c8_133, %c192_134] : memref<16x1024xf32, #tpu.memory_space<vmem>>, vector<4x64xf32>
    tpu.vector_store %arg14[%c8_133, %c192_134], %120 {strides = array<i32>} : memref<16x1024xf32, #tpu.memory_space<vmem>>, vector<4x64xf32>,
    %c50_135 = arith.constant 50 : index
    %c0_136 = arith.constant 0 : index
    %122 = tpu.strided_load %arg11[%c50_135, %c0_136] {strides = array<i32: 2, 1>} : memref<100x64xf32, #tpu.memory_space<vmem>>, vector<4x64xf32>
    %c8_137 = arith.constant 8 : index
    %c256_138 = arith.constant 256 : index
    %123 = vector.load %arg14[%c8_137, %c256_138] : memref<16x1024xf32, #tpu.memory_space<vmem>>, vector<4x64xf32>
    tpu.vector_store %arg14[%c8_137, %c256_138], %122 {strides = array<i32>} : memref<16x1024xf32, #tpu.memory_space<vmem>>, vector<4x64xf32>,
    %c51_139 = arith.constant 51 : index
    %c0_140 = arith.constant 0 : index
    %124 = tpu.strided_load %arg11[%c51_139, %c0_140] {strides = array<i32: 2, 1>} : memref<100x64xf32, #tpu.memory_space<vmem>>, vector<4x64xf32>
    %c8_141 = arith.constant 8 : index
    %c320_142 = arith.constant 320 : index
    %125 = vector.load %arg14[%c8_141, %c320_142] : memref<16x1024xf32, #tpu.memory_space<vmem>>, vector<4x64xf32>
    tpu.vector_store %arg14[%c8_141, %c320_142], %124 {strides = array<i32>} : memref<16x1024xf32, #tpu.memory_space<vmem>>, vector<4x64xf32>,
    %c52_143 = arith.constant 52 : index
    %c0_144 = arith.constant 0 : index
    %126 = tpu.strided_load %arg11[%c52_143, %c0_144] {strides = array<i32: 2, 1>} : memref<100x64xf32, #tpu.memory_space<vmem>>, vector<4x64xf32>
    %c8_145 = arith.constant 8 : index
    %c384_146 = arith.constant 384 : index
    %127 = vector.load %arg14[%c8_145, %c384_146] : memref<16x1024xf32, #tpu.memory_space<vmem>>, vector<4x64xf32>
    tpu.vector_store %arg14[%c8_145, %c384_146], %126 {strides = array<i32>} : memref<16x1024xf32, #tpu.memory_space<vmem>>, vector<4x64xf32>,
    %c53_147 = arith.constant 53 : index
    %c0_148 = arith.constant 0 : index
    %128 = tpu.strided_load %arg11[%c53_147, %c0_148] {strides = array<i32: 2, 1>} : memref<100x64xf32, #tpu.memory_space<vmem>>, vector<4x64xf32>
    %c8_149 = arith.constant 8 : index
    %c448_150 = arith.constant 448 : index
    %129 = vector.load %arg14[%c8_149, %c448_150] : memref<16x1024xf32, #tpu.memory_space<vmem>>, vector<4x64xf32>
    tpu.vector_store %arg14[%c8_149, %c448_150], %128 {strides = array<i32>} : memref<16x1024xf32, #tpu.memory_space<vmem>>, vector<4x64xf32>,
    %c60 = arith.constant 60 : index
    %c0_151 = arith.constant 0 : index
    %130 = tpu.strided_load %arg11[%c60, %c0_151] {strides = array<i32: 2, 1>} : memref<100x64xf32, #tpu.memory_space<vmem>>, vector<4x64xf32>
    %c8_152 = arith.constant 8 : index
    %c512_153 = arith.constant 512 : index
    %131 = vector.load %arg14[%c8_152, %c512_153] : memref<16x1024xf32, #tpu.memory_space<vmem>>, vector<4x64xf32>
    tpu.vector_store %arg14[%c8_152, %c512_153], %130 {strides = array<i32>} : memref<16x1024xf32, #tpu.memory_space<vmem>>, vector<4x64xf32>,
    %c61_154 = arith.constant 61 : index
    %c0_155 = arith.constant 0 : index
    %132 = tpu.strided_load %arg11[%c61_154, %c0_155] {strides = array<i32: 2, 1>} : memref<100x64xf32, #tpu.memory_space<vmem>>, vector<4x64xf32>
    %c8_156 = arith.constant 8 : index
    %c576_157 = arith.constant 576 : index
    %133 = vector.load %arg14[%c8_156, %c576_157] : memref<16x1024xf32, #tpu.memory_space<vmem>>, vector<4x64xf32>
    tpu.vector_store %arg14[%c8_156, %c576_157], %132 {strides = array<i32>} : memref<16x1024xf32, #tpu.memory_space<vmem>>, vector<4x64xf32>,
    %c62 = arith.constant 62 : index
    %c0_158 = arith.constant 0 : index
    %134 = tpu.strided_load %arg11[%c62, %c0_158] {strides = array<i32: 2, 1>} : memref<100x64xf32, #tpu.memory_space<vmem>>, vector<4x64xf32>
    %c8_159 = arith.constant 8 : index
    %c640_160 = arith.constant 640 : index
    %135 = vector.load %arg14[%c8_159, %c640_160] : memref<16x1024xf32, #tpu.memory_space<vmem>>, vector<4x64xf32>
    tpu.vector_store %arg14[%c8_159, %c640_160], %134 {strides = array<i32>} : memref<16x1024xf32, #tpu.memory_space<vmem>>, vector<4x64xf32>,
    %c63 = arith.constant 63 : index
    %c0_161 = arith.constant 0 : index
    %136 = tpu.strided_load %arg11[%c63, %c0_161] {strides = array<i32: 2, 1>} : memref<100x64xf32, #tpu.memory_space<vmem>>, vector<4x64xf32>
    %c8_162 = arith.constant 8 : index
    %c704_163 = arith.constant 704 : index
    %137 = vector.load %arg14[%c8_162, %c704_163] : memref<16x1024xf32, #tpu.memory_space<vmem>>, vector<4x64xf32>
    tpu.vector_store %arg14[%c8_162, %c704_163], %136 {strides = array<i32>} : memref<16x1024xf32, #tpu.memory_space<vmem>>, vector<4x64xf32>,
    %c70 = arith.constant 70 : index
    %c0_164 = arith.constant 0 : index
    %138 = tpu.strided_load %arg11[%c70, %c0_164] {strides = array<i32: 2, 1>} : memref<100x64xf32, #tpu.memory_space<vmem>>, vector<4x64xf32>
    %c8_165 = arith.constant 8 : index
    %c768_166 = arith.constant 768 : index
    %139 = vector.load %arg14[%c8_165, %c768_166] : memref<16x1024xf32, #tpu.memory_space<vmem>>, vector<4x64xf32>
    tpu.vector_store %arg14[%c8_165, %c768_166], %138 {strides = array<i32>} : memref<16x1024xf32, #tpu.memory_space<vmem>>, vector<4x64xf32>,
    %c71_167 = arith.constant 71 : index
    %c0_168 = arith.constant 0 : index
    %140 = tpu.strided_load %arg11[%c71_167, %c0_168] {strides = array<i32: 2, 1>} : memref<100x64xf32, #tpu.memory_space<vmem>>, vector<4x64xf32>
    %c8_169 = arith.constant 8 : index
    %c832_170 = arith.constant 832 : index
    %141 = vector.load %arg14[%c8_169, %c832_170] : memref<16x1024xf32, #tpu.memory_space<vmem>>, vector<4x64xf32>
    tpu.vector_store %arg14[%c8_169, %c832_170], %140 {strides = array<i32>} : memref<16x1024xf32, #tpu.memory_space<vmem>>, vector<4x64xf32>,
    %c72 = arith.constant 72 : index
    %c0_171 = arith.constant 0 : index
    %142 = tpu.strided_load %arg11[%c72, %c0_171] {strides = array<i32: 2, 1>} : memref<100x64xf32, #tpu.memory_space<vmem>>, vector<4x64xf32>
    %c8_172 = arith.constant 8 : index
    %c896_173 = arith.constant 896 : index
    %143 = vector.load %arg14[%c8_172, %c896_173] : memref<16x1024xf32, #tpu.memory_space<vmem>>, vector<4x64xf32>
    tpu.vector_store %arg14[%c8_172, %c896_173], %142 {strides = array<i32>} : memref<16x1024xf32, #tpu.memory_space<vmem>>, vector<4x64xf32>,
    %c73 = arith.constant 73 : index
    %c0_174 = arith.constant 0 : index
    %144 = tpu.strided_load %arg11[%c73, %c0_174] {strides = array<i32: 2, 1>} : memref<100x64xf32, #tpu.memory_space<vmem>>, vector<4x64xf32>
    %c8_175 = arith.constant 8 : index
    %c960_176 = arith.constant 960 : index
    %145 = vector.load %arg14[%c8_175, %c960_176] : memref<16x1024xf32, #tpu.memory_space<vmem>>, vector<4x64xf32>
    tpu.vector_store %arg14[%c8_175, %c960_176], %144 {strides = array<i32>} : memref<16x1024xf32, #tpu.memory_space<vmem>>, vector<4x64xf32>,
    %c60_177 = arith.constant 60 : index
    %c0_178 = arith.constant 0 : index
    %146 = tpu.strided_load %arg11[%c60_177, %c0_178] {strides = array<i32: 2, 1>} : memref<100x64xf32, #tpu.memory_space<vmem>>, vector<4x64xf32>
    %c12_179 = arith.constant 12 : index
    %c0_180 = arith.constant 0 : index
    %147 = vector.load %arg14[%c12_179, %c0_180] : memref<16x1024xf32, #tpu.memory_space<vmem>>, vector<4x64xf32>
    tpu.vector_store %arg14[%c12_179, %c0_180], %146 {strides = array<i32>} : memref<16x1024xf32, #tpu.memory_space<vmem>>, vector<4x64xf32>,
    %c61_181 = arith.constant 61 : index
    %c0_182 = arith.constant 0 : index
    %148 = tpu.strided_load %arg11[%c61_181, %c0_182] {strides = array<i32: 2, 1>} : memref<100x64xf32, #tpu.memory_space<vmem>>, vector<4x64xf32>
    %c12_183 = arith.constant 12 : index
    %c64_184 = arith.constant 64 : index
    %149 = vector.load %arg14[%c12_183, %c64_184] : memref<16x1024xf32, #tpu.memory_space<vmem>>, vector<4x64xf32>
    tpu.vector_store %arg14[%c12_183, %c64_184], %148 {strides = array<i32>} : memref<16x1024xf32, #tpu.memory_space<vmem>>, vector<4x64xf32>,
    %c62_185 = arith.constant 62 : index
    %c0_186 = arith.constant 0 : index
    %150 = tpu.strided_load %arg11[%c62_185, %c0_186] {strides = array<i32: 2, 1>} : memref<100x64xf32, #tpu.memory_space<vmem>>, vector<4x64xf32>
    %c12_187 = arith.constant 12 : index
    %c128_188 = arith.constant 128 : index
    %151 = vector.load %arg14[%c12_187, %c128_188] : memref<16x1024xf32, #tpu.memory_space<vmem>>, vector<4x64xf32>
    tpu.vector_store %arg14[%c12_187, %c128_188], %150 {strides = array<i32>} : memref<16x1024xf32, #tpu.memory_space<vmem>>, vector<4x64xf32>,
    %c63_189 = arith.constant 63 : index
    %c0_190 = arith.constant 0 : index
    %152 = tpu.strided_load %arg11[%c63_189, %c0_190] {strides = array<i32: 2, 1>} : memref<100x64xf32, #tpu.memory_space<vmem>>, vector<4x64xf32>
    %c12_191 = arith.constant 12 : index
    %c192_192 = arith.constant 192 : index
    %153 = vector.load %arg14[%c12_191, %c192_192] : memref<16x1024xf32, #tpu.memory_space<vmem>>, vector<4x64xf32>
    tpu.vector_store %arg14[%c12_191, %c192_192], %152 {strides = array<i32>} : memref<16x1024xf32, #tpu.memory_space<vmem>>, vector<4x64xf32>,
    %c70_193 = arith.constant 70 : index
    %c0_194 = arith.constant 0 : index
    %154 = tpu.strided_load %arg11[%c70_193, %c0_194] {strides = array<i32: 2, 1>} : memref<100x64xf32, #tpu.memory_space<vmem>>, vector<4x64xf32>
    %c12_195 = arith.constant 12 : index
    %c256_196 = arith.constant 256 : index
    %155 = vector.load %arg14[%c12_195, %c256_196] : memref<16x1024xf32, #tpu.memory_space<vmem>>, vector<4x64xf32>
    tpu.vector_store %arg14[%c12_195, %c256_196], %154 {strides = array<i32>} : memref<16x1024xf32, #tpu.memory_space<vmem>>, vector<4x64xf32>,
    %c71_197 = arith.constant 71 : index
    %c0_198 = arith.constant 0 : index
    %156 = tpu.strided_load %arg11[%c71_197, %c0_198] {strides = array<i32: 2, 1>} : memref<100x64xf32, #tpu.memory_space<vmem>>, vector<4x64xf32>
    %c12_199 = arith.constant 12 : index
    %c320_200 = arith.constant 320 : index
    %157 = vector.load %arg14[%c12_199, %c320_200] : memref<16x1024xf32, #tpu.memory_space<vmem>>, vector<4x64xf32>
    tpu.vector_store %arg14[%c12_199, %c320_200], %156 {strides = array<i32>} : memref<16x1024xf32, #tpu.memory_space<vmem>>, vector<4x64xf32>,
    %c72_201 = arith.constant 72 : index
    %c0_202 = arith.constant 0 : index
    %158 = tpu.strided_load %arg11[%c72_201, %c0_202] {strides = array<i32: 2, 1>} : memref<100x64xf32, #tpu.memory_space<vmem>>, vector<4x64xf32>
    %c12_203 = arith.constant 12 : index
    %c384_204 = arith.constant 384 : index
    %159 = vector.load %arg14[%c12_203, %c384_204] : memref<16x1024xf32, #tpu.memory_space<vmem>>, vector<4x64xf32>
    tpu.vector_store %arg14[%c12_203, %c384_204], %158 {strides = array<i32>} : memref<16x1024xf32, #tpu.memory_space<vmem>>, vector<4x64xf32>,
    %c73_205 = arith.constant 73 : index
    %c0_206 = arith.constant 0 : index
    %160 = tpu.strided_load %arg11[%c73_205, %c0_206] {strides = array<i32: 2, 1>} : memref<100x64xf32, #tpu.memory_space<vmem>>, vector<4x64xf32>
    %c12_207 = arith.constant 12 : index
    %c448_208 = arith.constant 448 : index
    %161 = vector.load %arg14[%c12_207, %c448_208] : memref<16x1024xf32, #tpu.memory_space<vmem>>, vector<4x64xf32>
    tpu.vector_store %arg14[%c12_207, %c448_208], %160 {strides = array<i32>} : memref<16x1024xf32, #tpu.memory_space<vmem>>, vector<4x64xf32>,
    %c80 = arith.constant 80 : index
    %c0_209 = arith.constant 0 : index
    %162 = tpu.strided_load %arg11[%c80, %c0_209] {strides = array<i32: 2, 1>} : memref<100x64xf32, #tpu.memory_space<vmem>>, vector<4x64xf32>
    %c12_210 = arith.constant 12 : index
    %c512_211 = arith.constant 512 : index
    %163 = vector.load %arg14[%c12_210, %c512_211] : memref<16x1024xf32, #tpu.memory_space<vmem>>, vector<4x64xf32>
    tpu.vector_store %arg14[%c12_210, %c512_211], %162 {strides = array<i32>} : memref<16x1024xf32, #tpu.memory_space<vmem>>, vector<4x64xf32>,
    %c81_212 = arith.constant 81 : index
    %c0_213 = arith.constant 0 : index
    %164 = tpu.strided_load %arg11[%c81_212, %c0_213] {strides = array<i32: 2, 1>} : memref<100x64xf32, #tpu.memory_space<vmem>>, vector<4x64xf32>
    %c12_214 = arith.constant 12 : index
    %c576_215 = arith.constant 576 : index
    %165 = vector.load %arg14[%c12_214, %c576_215] : memref<16x1024xf32, #tpu.memory_space<vmem>>, vector<4x64xf32>
    tpu.vector_store %arg14[%c12_214, %c576_215], %164 {strides = array<i32>} : memref<16x1024xf32, #tpu.memory_space<vmem>>, vector<4x64xf32>,
    %c82 = arith.constant 82 : index
    %c0_216 = arith.constant 0 : index
    %166 = tpu.strided_load %arg11[%c82, %c0_216] {strides = array<i32: 2, 1>} : memref<100x64xf32, #tpu.memory_space<vmem>>, vector<4x64xf32>
    %c12_217 = arith.constant 12 : index
    %c640_218 = arith.constant 640 : index
    %167 = vector.load %arg14[%c12_217, %c640_218] : memref<16x1024xf32, #tpu.memory_space<vmem>>, vector<4x64xf32>
    tpu.vector_store %arg14[%c12_217, %c640_218], %166 {strides = array<i32>} : memref<16x1024xf32, #tpu.memory_space<vmem>>, vector<4x64xf32>,
    %c83 = arith.constant 83 : index
    %c0_219 = arith.constant 0 : index
    %168 = tpu.strided_load %arg11[%c83, %c0_219] {strides = array<i32: 2, 1>} : memref<100x64xf32, #tpu.memory_space<vmem>>, vector<4x64xf32>
    %c12_220 = arith.constant 12 : index
    %c704_221 = arith.constant 704 : index
    %169 = vector.load %arg14[%c12_220, %c704_221] : memref<16x1024xf32, #tpu.memory_space<vmem>>, vector<4x64xf32>
    tpu.vector_store %arg14[%c12_220, %c704_221], %168 {strides = array<i32>} : memref<16x1024xf32, #tpu.memory_space<vmem>>, vector<4x64xf32>,
    %c90 = arith.constant 90 : index
    %c0_222 = arith.constant 0 : index
    %170 = tpu.strided_load %arg11[%c90, %c0_222] {strides = array<i32: 2, 1>} : memref<100x64xf32, #tpu.memory_space<vmem>>, vector<4x64xf32>
    %c12_223 = arith.constant 12 : index
    %c768_224 = arith.constant 768 : index
    %171 = vector.load %arg14[%c12_223, %c768_224] : memref<16x1024xf32, #tpu.memory_space<vmem>>, vector<4x64xf32>
    tpu.vector_store %arg14[%c12_223, %c768_224], %170 {strides = array<i32>} : memref<16x1024xf32, #tpu.memory_space<vmem>>, vector<4x64xf32>,
    %c91 = arith.constant 91 : index
    %c0_225 = arith.constant 0 : index
    %172 = tpu.strided_load %arg11[%c91, %c0_225] {strides = array<i32: 2, 1>} : memref<100x64xf32, #tpu.memory_space<vmem>>, vector<4x64xf32>
    %c12_226 = arith.constant 12 : index
    %c832_227 = arith.constant 832 : index
    %173 = vector.load %arg14[%c12_226, %c832_227] : memref<16x1024xf32, #tpu.memory_space<vmem>>, vector<4x64xf32>
    tpu.vector_store %arg14[%c12_226, %c832_227], %172 {strides = array<i32>} : memref<16x1024xf32, #tpu.memory_space<vmem>>, vector<4x64xf32>,
    %c92 = arith.constant 92 : index
    %c0_228 = arith.constant 0 : index
    %174 = tpu.strided_load %arg11[%c92, %c0_228] {strides = array<i32: 2, 1>} : memref<100x64xf32, #tpu.memory_space<vmem>>, vector<4x64xf32>
    %c12_229 = arith.constant 12 : index
    %c896_230 = arith.constant 896 : index
    %175 = vector.load %arg14[%c12_229, %c896_230] : memref<16x1024xf32, #tpu.memory_space<vmem>>, vector<4x64xf32>
    tpu.vector_store %arg14[%c12_229, %c896_230], %174 {strides = array<i32>} : memref<16x1024xf32, #tpu.memory_space<vmem>>, vector<4x64xf32>,
    %c93 = arith.constant 93 : index
    %c0_231 = arith.constant 0 : index
    %176 = tpu.strided_load %arg11[%c93, %c0_231] {strides = array<i32: 2, 1>} : memref<100x64xf32, #tpu.memory_space<vmem>>, vector<4x64xf32>
    %c12_232 = arith.constant 12 : index
    %c960_233 = arith.constant 960 : index
    %177 = vector.load %arg14[%c12_232, %c960_233] : memref<16x1024xf32, #tpu.memory_space<vmem>>, vector<4x64xf32>
    tpu.vector_store %arg14[%c12_232, %c960_233], %176 {strides = array<i32>} : memref<16x1024xf32, #tpu.memory_space<vmem>>, vector<4x64xf32>,
    %c0_234 = arith.constant 0 : index
    %c0_235 = arith.constant 0 : index
    %178 = vector.load %arg14[%c0_234, %c0_235] : memref<16x1024xf32, #tpu.memory_space<vmem>>, vector<16x1024xf32>
    %179 = arith.truncf %178 : vector<16x1024xf32> to vector<16x1024xbf16>
    %c0_236 = arith.constant 0 : index
    %c0_237 = arith.constant 0 : index
    %180 = vector.load %arg3[%c0_236, %c0_237] : memref<1024x128xbf16, #tpu.memory_space<vmem>>, vector<1024x128xbf16>
    %cst_238 = arith.constant dense<0.000000e+00> : vector<16x128xf32>
    %181 = tpu.matmul %179, %180, %cst_238 {dimension_numbers = #tpu.dot_dimension_numbers<[1], [0], [0], [1], [0, 0, 1, 1], [], []>} : vector<16x1024xbf16>, vector<1024x128xbf16>, vector<16x128xf32> -> vector<16x128xf32>
    %cst_239 = arith.constant dense<0.000000e+00> : vector<128xf32>
    %182 = vector.multi_reduction <add>, %181, %cst_239 [0] : vector<16x128xf32> to vector<128xf32>
    %183 = vector.shape_cast %182 : vector<128xf32> to vector<1x128xf32>
    %cst_240 = arith.constant 1.600000e+01 : f32
    %184 = vector.broadcast %cst_240 : f32 to vector<1x128xf32>
    %185 = arith.divf %183, %184 : vector<1x128xf32>
    %186 = arith.mulf %181, %181 : vector<16x128xf32>
    %cst_241 = arith.constant dense<0.000000e+00> : vector<128xf32>
    %187 = vector.multi_reduction <add>, %186, %cst_241 [0] : vector<16x128xf32> to vector<128xf32>
    %188 = vector.shape_cast %187 : vector<128xf32> to vector<1x128xf32>
    %cst_242 = arith.constant 1.600000e+01 : f32
    %189 = vector.broadcast %cst_242 : f32 to vector<1x128xf32>
    %190 = arith.divf %188, %189 : vector<1x128xf32>
    %191 = arith.mulf %185, %185 : vector<1x128xf32>
    %192 = arith.subf %190, %191 : vector<1x128xf32>
    %cst_243 = arith.constant 0.000000e+00 : f32
    %193 = vector.broadcast %cst_243 : f32 to vector<1x128xf32>
    %194 = arith.maximumf %192, %193 : vector<1x128xf32>
    %195 = vector.broadcast %185 : vector<1x128xf32> to vector<16x128xf32>
    %196 = arith.subf %181, %195 : vector<16x128xf32>
    %cst_244 = arith.constant 9.99999974E-6 : f32
    %197 = vector.broadcast %cst_244 : f32 to vector<1x128xf32>
    %198 = arith.addf %194, %197 : vector<1x128xf32>
    %199 = math.rsqrt %198 : vector<1x128xf32>
    %200 = vector.broadcast %199 : vector<1x128xf32> to vector<16x128xf32>
    %201 = arith.mulf %196, %200 : vector<16x128xf32>
    %cst_245 = arith.constant 0.000000e+00 : f32
    %202 = vector.broadcast %cst_245 : f32 to vector<16x128xf32>
    %203 = arith.cmpf oge, %201, %202 : vector<16x128xf32>
    %cst_246 = arith.constant 2.000000e-01 : f32
    %204 = vector.broadcast %cst_246 : f32 to vector<16x128xf32>
    %205 = arith.mulf %204, %201 : vector<16x128xf32>
    %206 = arith.select %203, %201, %205 : vector<16x128xi1>, vector<16x128xf32>
    %c0_247 = arith.constant 0 : index
    %c0_248 = arith.constant 0 : index
    %c0_249 = arith.constant 0 : index
    %207 = vector.load %arg7[%c0_247, %c0_248, %c0_249] : memref<1x16x128xf32, #tpu.memory_space<vmem>>, vector<1x16x128xf32>
    %208 = vector.shape_cast %207 : vector<1x16x128xf32> to vector<16x128xf32>
    %209 = vector.shape_cast %206 : vector<16x128xf32> to vector<1x16x128xf32>
    tpu.vector_store %arg7[%c0_247, %c0_248, %c0_249], %209 {strides = array<i32>} : memref<1x16x128xf32, #tpu.memory_space<vmem>>, vector<1x16x128xf32>,
    %cst_250 = arith.constant 0.000000e+00 : f32
    %210 = vector.broadcast %cst_250 : f32 to vector<36x128xf32>
    %c0_251 = arith.constant 0 : index
    %c0_252 = arith.constant 0 : index
    %211 = vector.load %arg12[%c0_251, %c0_252] : memref<36x128xf32, #tpu.memory_space<vmem>>, vector<36x128xf32>
    tpu.vector_store %arg12[%c0_251, %c0_252], %210 {strides = array<i32>} : memref<36x128xf32, #tpu.memory_space<vmem>>, vector<36x128xf32>,
    %212 = vector.extract_strided_slice %206 {offsets = [0, 0], sizes = [4, 128], strides = [1, 1]} : vector<16x128xf32> to vector<4x128xf32>
    %c7 = arith.constant 7 : index
    %c0_253 = arith.constant 0 : index
    %213 = vector.load %arg12[%c7, %c0_253] : memref<36x128xf32, #tpu.memory_space<vmem>>, vector<4x128xf32>
    tpu.vector_store %arg12[%c7, %c0_253], %212 {strides = array<i32>} : memref<36x128xf32, #tpu.memory_space<vmem>>, vector<4x128xf32>,
    %214 = vector.extract_strided_slice %206 {offsets = [4, 0], sizes = [4, 128], strides = [1, 1]} : vector<16x128xf32> to vector<4x128xf32>
    %c13_254 = arith.constant 13 : index
    %c0_255 = arith.constant 0 : index
    %215 = vector.load %arg12[%c13_254, %c0_255] : memref<36x128xf32, #tpu.memory_space<vmem>>, vector<4x128xf32>
    tpu.vector_store %arg12[%c13_254, %c0_255], %214 {strides = array<i32>} : memref<36x128xf32, #tpu.memory_space<vmem>>, vector<4x128xf32>,
    %216 = vector.extract_strided_slice %206 {offsets = [8, 0], sizes = [4, 128], strides = [1, 1]} : vector<16x128xf32> to vector<4x128xf32>
    %c19 = arith.constant 19 : index
    %c0_256 = arith.constant 0 : index
    %217 = vector.load %arg12[%c19, %c0_256] : memref<36x128xf32, #tpu.memory_space<vmem>>, vector<4x128xf32>
    tpu.vector_store %arg12[%c19, %c0_256], %216 {strides = array<i32>} : memref<36x128xf32, #tpu.memory_space<vmem>>, vector<4x128xf32>,
    %218 = vector.extract_strided_slice %206 {offsets = [12, 0], sizes = [4, 128], strides = [1, 1]} : vector<16x128xf32> to vector<4x128xf32>
    %c25 = arith.constant 25 : index
    %c0_257 = arith.constant 0 : index
    %219 = vector.load %arg12[%c25, %c0_257] : memref<36x128xf32, #tpu.memory_space<vmem>>, vector<4x128xf32>
    tpu.vector_store %arg12[%c25, %c0_257], %218 {strides = array<i32>} : memref<36x128xf32, #tpu.memory_space<vmem>>, vector<4x128xf32>,
    %c0_258 = arith.constant 0 : index
    %c0_259 = arith.constant 0 : index
    %220 = vector.load %arg12[%c0_258, %c0_259] : memref<36x128xf32, #tpu.memory_space<vmem>>, vector<3x128xf32>
    %c0_260 = arith.constant 0 : index
    %c0_261 = arith.constant 0 : index
    %221 = vector.load %arg15[%c0_260, %c0_261] : memref<9x2048xf32, #tpu.memory_space<vmem>>, vector<3x128xf32>
    tpu.vector_store %arg15[%c0_260, %c0_261], %220 {strides = array<i32>} : memref<9x2048xf32, #tpu.memory_space<vmem>>, vector<3x128xf32>,
    %c1_262 = arith.constant 1 : index
    %c0_263 = arith.constant 0 : index
    %222 = vector.load %arg12[%c1_262, %c0_263] : memref<36x128xf32, #tpu.memory_space<vmem>>, vector<3x128xf32>
    %c0_264 = arith.constant 0 : index
    %c128_265 = arith.constant 128 : index
    %223 = vector.load %arg15[%c0_264, %c128_265] : memref<9x2048xf32, #tpu.memory_space<vmem>>, vector<3x128xf32>
    tpu.vector_store %arg15[%c0_264, %c128_265], %222 {strides = array<i32>} : memref<9x2048xf32, #tpu.memory_space<vmem>>, vector<3x128xf32>,
    %c2_266 = arith.constant 2 : index
    %c0_267 = arith.constant 0 : index
    %224 = vector.load %arg12[%c2_266, %c0_267] : memref<36x128xf32, #tpu.memory_space<vmem>>, vector<3x128xf32>
    %c0_268 = arith.constant 0 : index
    %c256_269 = arith.constant 256 : index
    %225 = vector.load %arg15[%c0_268, %c256_269] : memref<9x2048xf32, #tpu.memory_space<vmem>>, vector<3x128xf32>
    tpu.vector_store %arg15[%c0_268, %c256_269], %224 {strides = array<i32>} : memref<9x2048xf32, #tpu.memory_space<vmem>>, vector<3x128xf32>,
    %c3_270 = arith.constant 3 : index
    %c0_271 = arith.constant 0 : index
    %226 = vector.load %arg12[%c3_270, %c0_271] : memref<36x128xf32, #tpu.memory_space<vmem>>, vector<3x128xf32>
    %c0_272 = arith.constant 0 : index
    %c384_273 = arith.constant 384 : index
    %227 = vector.load %arg15[%c0_272, %c384_273] : memref<9x2048xf32, #tpu.memory_space<vmem>>, vector<3x128xf32>
    tpu.vector_store %arg15[%c0_272, %c384_273], %226 {strides = array<i32>} : memref<9x2048xf32, #tpu.memory_space<vmem>>, vector<3x128xf32>,
    %c6 = arith.constant 6 : index
    %c0_274 = arith.constant 0 : index
    %228 = vector.load %arg12[%c6, %c0_274] : memref<36x128xf32, #tpu.memory_space<vmem>>, vector<3x128xf32>
    %c0_275 = arith.constant 0 : index
    %c512_276 = arith.constant 512 : index
    %229 = vector.load %arg15[%c0_275, %c512_276] : memref<9x2048xf32, #tpu.memory_space<vmem>>, vector<3x128xf32>
    tpu.vector_store %arg15[%c0_275, %c512_276], %228 {strides = array<i32>} : memref<9x2048xf32, #tpu.memory_space<vmem>>, vector<3x128xf32>,
    %c7_277 = arith.constant 7 : index
    %c0_278 = arith.constant 0 : index
    %230 = vector.load %arg12[%c7_277, %c0_278] : memref<36x128xf32, #tpu.memory_space<vmem>>, vector<3x128xf32>
    %c0_279 = arith.constant 0 : index
    %c640_280 = arith.constant 640 : index
    %231 = vector.load %arg15[%c0_279, %c640_280] : memref<9x2048xf32, #tpu.memory_space<vmem>>, vector<3x128xf32>
    tpu.vector_store %arg15[%c0_279, %c640_280], %230 {strides = array<i32>} : memref<9x2048xf32, #tpu.memory_space<vmem>>, vector<3x128xf32>,
    %c8_281 = arith.constant 8 : index
    %c0_282 = arith.constant 0 : index
    %232 = vector.load %arg12[%c8_281, %c0_282] : memref<36x128xf32, #tpu.memory_space<vmem>>, vector<3x128xf32>
    %c0_283 = arith.constant 0 : index
    %c768_284 = arith.constant 768 : index
    %233 = vector.load %arg15[%c0_283, %c768_284] : memref<9x2048xf32, #tpu.memory_space<vmem>>, vector<3x128xf32>
    tpu.vector_store %arg15[%c0_283, %c768_284], %232 {strides = array<i32>} : memref<9x2048xf32, #tpu.memory_space<vmem>>, vector<3x128xf32>,
    %c9 = arith.constant 9 : index
    %c0_285 = arith.constant 0 : index
    %234 = vector.load %arg12[%c9, %c0_285] : memref<36x128xf32, #tpu.memory_space<vmem>>, vector<3x128xf32>
    %c0_286 = arith.constant 0 : index
    %c896_287 = arith.constant 896 : index
    %235 = vector.load %arg15[%c0_286, %c896_287] : memref<9x2048xf32, #tpu.memory_space<vmem>>, vector<3x128xf32>
    tpu.vector_store %arg15[%c0_286, %c896_287], %234 {strides = array<i32>} : memref<9x2048xf32, #tpu.memory_space<vmem>>, vector<3x128xf32>,
    %c12_288 = arith.constant 12 : index
    %c0_289 = arith.constant 0 : index
    %236 = vector.load %arg12[%c12_288, %c0_289] : memref<36x128xf32, #tpu.memory_space<vmem>>, vector<3x128xf32>
    %c0_290 = arith.constant 0 : index
    %c1024 = arith.constant 1024 : index
    %237 = vector.load %arg15[%c0_290, %c1024] : memref<9x2048xf32, #tpu.memory_space<vmem>>, vector<3x128xf32>
    tpu.vector_store %arg15[%c0_290, %c1024], %236 {strides = array<i32>} : memref<9x2048xf32, #tpu.memory_space<vmem>>, vector<3x128xf32>,
    %c13_291 = arith.constant 13 : index
    %c0_292 = arith.constant 0 : index
    %238 = vector.load %arg12[%c13_291, %c0_292] : memref<36x128xf32, #tpu.memory_space<vmem>>, vector<3x128xf32>
    %c0_293 = arith.constant 0 : index
    %c1152 = arith.constant 1152 : index
    %239 = vector.load %arg15[%c0_293, %c1152] : memref<9x2048xf32, #tpu.memory_space<vmem>>, vector<3x128xf32>
    tpu.vector_store %arg15[%c0_293, %c1152], %238 {strides = array<i32>} : memref<9x2048xf32, #tpu.memory_space<vmem>>, vector<3x128xf32>,
    %c14 = arith.constant 14 : index
    %c0_294 = arith.constant 0 : index
    %240 = vector.load %arg12[%c14, %c0_294] : memref<36x128xf32, #tpu.memory_space<vmem>>, vector<3x128xf32>
    %c0_295 = arith.constant 0 : index
    %c1280 = arith.constant 1280 : index
    %241 = vector.load %arg15[%c0_295, %c1280] : memref<9x2048xf32, #tpu.memory_space<vmem>>, vector<3x128xf32>
    tpu.vector_store %arg15[%c0_295, %c1280], %240 {strides = array<i32>} : memref<9x2048xf32, #tpu.memory_space<vmem>>, vector<3x128xf32>,
    %c15 = arith.constant 15 : index
    %c0_296 = arith.constant 0 : index
    %242 = vector.load %arg12[%c15, %c0_296] : memref<36x128xf32, #tpu.memory_space<vmem>>, vector<3x128xf32>
    %c0_297 = arith.constant 0 : index
    %c1408 = arith.constant 1408 : index
    %243 = vector.load %arg15[%c0_297, %c1408] : memref<9x2048xf32, #tpu.memory_space<vmem>>, vector<3x128xf32>
    tpu.vector_store %arg15[%c0_297, %c1408], %242 {strides = array<i32>} : memref<9x2048xf32, #tpu.memory_space<vmem>>, vector<3x128xf32>,
    %c18 = arith.constant 18 : index
    %c0_298 = arith.constant 0 : index
    %244 = vector.load %arg12[%c18, %c0_298] : memref<36x128xf32, #tpu.memory_space<vmem>>, vector<3x128xf32>
    %c0_299 = arith.constant 0 : index
    %c1536 = arith.constant 1536 : index
    %245 = vector.load %arg15[%c0_299, %c1536] : memref<9x2048xf32, #tpu.memory_space<vmem>>, vector<3x128xf32>
    tpu.vector_store %arg15[%c0_299, %c1536], %244 {strides = array<i32>} : memref<9x2048xf32, #tpu.memory_space<vmem>>, vector<3x128xf32>,
    %c19_300 = arith.constant 19 : index
    %c0_301 = arith.constant 0 : index
    %246 = vector.load %arg12[%c19_300, %c0_301] : memref<36x128xf32, #tpu.memory_space<vmem>>, vector<3x128xf32>
    %c0_302 = arith.constant 0 : index
    %c1664 = arith.constant 1664 : index
    %247 = vector.load %arg15[%c0_302, %c1664] : memref<9x2048xf32, #tpu.memory_space<vmem>>, vector<3x128xf32>
    tpu.vector_store %arg15[%c0_302, %c1664], %246 {strides = array<i32>} : memref<9x2048xf32, #tpu.memory_space<vmem>>, vector<3x128xf32>,
    %c20_303 = arith.constant 20 : index
    %c0_304 = arith.constant 0 : index
    %248 = vector.load %arg12[%c20_303, %c0_304] : memref<36x128xf32, #tpu.memory_space<vmem>>, vector<3x128xf32>
    %c0_305 = arith.constant 0 : index
    %c1792 = arith.constant 1792 : index
    %249 = vector.load %arg15[%c0_305, %c1792] : memref<9x2048xf32, #tpu.memory_space<vmem>>, vector<3x128xf32>
    tpu.vector_store %arg15[%c0_305, %c1792], %248 {strides = array<i32>} : memref<9x2048xf32, #tpu.memory_space<vmem>>, vector<3x128xf32>,
    %c21_306 = arith.constant 21 : index
    %c0_307 = arith.constant 0 : index
    %250 = vector.load %arg12[%c21_306, %c0_307] : memref<36x128xf32, #tpu.memory_space<vmem>>, vector<3x128xf32>
    %c0_308 = arith.constant 0 : index
    %c1920 = arith.constant 1920 : index
    %251 = vector.load %arg15[%c0_308, %c1920] : memref<9x2048xf32, #tpu.memory_space<vmem>>, vector<3x128xf32>
    tpu.vector_store %arg15[%c0_308, %c1920], %250 {strides = array<i32>} : memref<9x2048xf32, #tpu.memory_space<vmem>>, vector<3x128xf32>,
    %c6_309 = arith.constant 6 : index
    %c0_310 = arith.constant 0 : index
    %252 = vector.load %arg12[%c6_309, %c0_310] : memref<36x128xf32, #tpu.memory_space<vmem>>, vector<3x128xf32>
    %c3_311 = arith.constant 3 : index
    %c0_312 = arith.constant 0 : index
    %253 = vector.load %arg15[%c3_311, %c0_312] : memref<9x2048xf32, #tpu.memory_space<vmem>>, vector<3x128xf32>
    tpu.vector_store %arg15[%c3_311, %c0_312], %252 {strides = array<i32>} : memref<9x2048xf32, #tpu.memory_space<vmem>>, vector<3x128xf32>,
    %c7_313 = arith.constant 7 : index
    %c0_314 = arith.constant 0 : index
    %254 = vector.load %arg12[%c7_313, %c0_314] : memref<36x128xf32, #tpu.memory_space<vmem>>, vector<3x128xf32>
    %c3_315 = arith.constant 3 : index
    %c128_316 = arith.constant 128 : index
    %255 = vector.load %arg15[%c3_315, %c128_316] : memref<9x2048xf32, #tpu.memory_space<vmem>>, vector<3x128xf32>
    tpu.vector_store %arg15[%c3_315, %c128_316], %254 {strides = array<i32>} : memref<9x2048xf32, #tpu.memory_space<vmem>>, vector<3x128xf32>,
    %c8_317 = arith.constant 8 : index
    %c0_318 = arith.constant 0 : index
    %256 = vector.load %arg12[%c8_317, %c0_318] : memref<36x128xf32, #tpu.memory_space<vmem>>, vector<3x128xf32>
    %c3_319 = arith.constant 3 : index
    %c256_320 = arith.constant 256 : index
    %257 = vector.load %arg15[%c3_319, %c256_320] : memref<9x2048xf32, #tpu.memory_space<vmem>>, vector<3x128xf32>
    tpu.vector_store %arg15[%c3_319, %c256_320], %256 {strides = array<i32>} : memref<9x2048xf32, #tpu.memory_space<vmem>>, vector<3x128xf32>,
    %c9_321 = arith.constant 9 : index
    %c0_322 = arith.constant 0 : index
    %258 = vector.load %arg12[%c9_321, %c0_322] : memref<36x128xf32, #tpu.memory_space<vmem>>, vector<3x128xf32>
    %c3_323 = arith.constant 3 : index
    %c384_324 = arith.constant 384 : index
    %259 = vector.load %arg15[%c3_323, %c384_324] : memref<9x2048xf32, #tpu.memory_space<vmem>>, vector<3x128xf32>
    tpu.vector_store %arg15[%c3_323, %c384_324], %258 {strides = array<i32>} : memref<9x2048xf32, #tpu.memory_space<vmem>>, vector<3x128xf32>,
    %c12_325 = arith.constant 12 : index
    %c0_326 = arith.constant 0 : index
    %260 = vector.load %arg12[%c12_325, %c0_326] : memref<36x128xf32, #tpu.memory_space<vmem>>, vector<3x128xf32>
    %c3_327 = arith.constant 3 : index
    %c512_328 = arith.constant 512 : index
    %261 = vector.load %arg15[%c3_327, %c512_328] : memref<9x2048xf32, #tpu.memory_space<vmem>>, vector<3x128xf32>
    tpu.vector_store %arg15[%c3_327, %c512_328], %260 {strides = array<i32>} : memref<9x2048xf32, #tpu.memory_space<vmem>>, vector<3x128xf32>,
    %c13_329 = arith.constant 13 : index
    %c0_330 = arith.constant 0 : index
    %262 = vector.load %arg12[%c13_329, %c0_330] : memref<36x128xf32, #tpu.memory_space<vmem>>, vector<3x128xf32>
    %c3_331 = arith.constant 3 : index
    %c640_332 = arith.constant 640 : index
    %263 = vector.load %arg15[%c3_331, %c640_332] : memref<9x2048xf32, #tpu.memory_space<vmem>>, vector<3x128xf32>
    tpu.vector_store %arg15[%c3_331, %c640_332], %262 {strides = array<i32>} : memref<9x2048xf32, #tpu.memory_space<vmem>>, vector<3x128xf32>,
    %c14_333 = arith.constant 14 : index
    %c0_334 = arith.constant 0 : index
    %264 = vector.load %arg12[%c14_333, %c0_334] : memref<36x128xf32, #tpu.memory_space<vmem>>, vector<3x128xf32>
    %c3_335 = arith.constant 3 : index
    %c768_336 = arith.constant 768 : index
    %265 = vector.load %arg15[%c3_335, %c768_336] : memref<9x2048xf32, #tpu.memory_space<vmem>>, vector<3x128xf32>
    tpu.vector_store %arg15[%c3_335, %c768_336], %264 {strides = array<i32>} : memref<9x2048xf32, #tpu.memory_space<vmem>>, vector<3x128xf32>,
    %c15_337 = arith.constant 15 : index
    %c0_338 = arith.constant 0 : index
    %266 = vector.load %arg12[%c15_337, %c0_338] : memref<36x128xf32, #tpu.memory_space<vmem>>, vector<3x128xf32>
    %c3_339 = arith.constant 3 : index
    %c896_340 = arith.constant 896 : index
    %267 = vector.load %arg15[%c3_339, %c896_340] : memref<9x2048xf32, #tpu.memory_space<vmem>>, vector<3x128xf32>
    tpu.vector_store %arg15[%c3_339, %c896_340], %266 {strides = array<i32>} : memref<9x2048xf32, #tpu.memory_space<vmem>>, vector<3x128xf32>,
    %c18_341 = arith.constant 18 : index
    %c0_342 = arith.constant 0 : index
    %268 = vector.load %arg12[%c18_341, %c0_342] : memref<36x128xf32, #tpu.memory_space<vmem>>, vector<3x128xf32>
    %c3_343 = arith.constant 3 : index
    %c1024_344 = arith.constant 1024 : index
    %269 = vector.load %arg15[%c3_343, %c1024_344] : memref<9x2048xf32, #tpu.memory_space<vmem>>, vector<3x128xf32>
    tpu.vector_store %arg15[%c3_343, %c1024_344], %268 {strides = array<i32>} : memref<9x2048xf32, #tpu.memory_space<vmem>>, vector<3x128xf32>,
    %c19_345 = arith.constant 19 : index
    %c0_346 = arith.constant 0 : index
    %270 = vector.load %arg12[%c19_345, %c0_346] : memref<36x128xf32, #tpu.memory_space<vmem>>, vector<3x128xf32>
    %c3_347 = arith.constant 3 : index
    %c1152_348 = arith.constant 1152 : index
    %271 = vector.load %arg15[%c3_347, %c1152_348] : memref<9x2048xf32, #tpu.memory_space<vmem>>, vector<3x128xf32>
    tpu.vector_store %arg15[%c3_347, %c1152_348], %270 {strides = array<i32>} : memref<9x2048xf32, #tpu.memory_space<vmem>>, vector<3x128xf32>,
    %c20_349 = arith.constant 20 : index
    %c0_350 = arith.constant 0 : index
    %272 = vector.load %arg12[%c20_349, %c0_350] : memref<36x128xf32, #tpu.memory_space<vmem>>, vector<3x128xf32>
    %c3_351 = arith.constant 3 : index
    %c1280_352 = arith.constant 1280 : index
    %273 = vector.load %arg15[%c3_351, %c1280_352] : memref<9x2048xf32, #tpu.memory_space<vmem>>, vector<3x128xf32>
    tpu.vector_store %arg15[%c3_351, %c1280_352], %272 {strides = array<i32>} : memref<9x2048xf32, #tpu.memory_space<vmem>>, vector<3x128xf32>,
    %c21_353 = arith.constant 21 : index
    %c0_354 = arith.constant 0 : index
    %274 = vector.load %arg12[%c21_353, %c0_354] : memref<36x128xf32, #tpu.memory_space<vmem>>, vector<3x128xf32>
    %c3_355 = arith.constant 3 : index
    %c1408_356 = arith.constant 1408 : index
    %275 = vector.load %arg15[%c3_355, %c1408_356] : memref<9x2048xf32, #tpu.memory_space<vmem>>, vector<3x128xf32>
    tpu.vector_store %arg15[%c3_355, %c1408_356], %274 {strides = array<i32>} : memref<9x2048xf32, #tpu.memory_space<vmem>>, vector<3x128xf32>,
    %c24 = arith.constant 24 : index
    %c0_357 = arith.constant 0 : index
    %276 = vector.load %arg12[%c24, %c0_357] : memref<36x128xf32, #tpu.memory_space<vmem>>, vector<3x128xf32>
    %c3_358 = arith.constant 3 : index
    %c1536_359 = arith.constant 1536 : index
    %277 = vector.load %arg15[%c3_358, %c1536_359] : memref<9x2048xf32, #tpu.memory_space<vmem>>, vector<3x128xf32>
    tpu.vector_store %arg15[%c3_358, %c1536_359], %276 {strides = array<i32>} : memref<9x2048xf32, #tpu.memory_space<vmem>>, vector<3x128xf32>,
    %c25_360 = arith.constant 25 : index
    %c0_361 = arith.constant 0 : index
    %278 = vector.load %arg12[%c25_360, %c0_361] : memref<36x128xf32, #tpu.memory_space<vmem>>, vector<3x128xf32>
    %c3_362 = arith.constant 3 : index
    %c1664_363 = arith.constant 1664 : index
    %279 = vector.load %arg15[%c3_362, %c1664_363] : memref<9x2048xf32, #tpu.memory_space<vmem>>, vector<3x128xf32>
    tpu.vector_store %arg15[%c3_362, %c1664_363], %278 {strides = array<i32>} : memref<9x2048xf32, #tpu.memory_space<vmem>>, vector<3x128xf32>,
    %c26 = arith.constant 26 : index
    %c0_364 = arith.constant 0 : index
    %280 = vector.load %arg12[%c26, %c0_364] : memref<36x128xf32, #tpu.memory_space<vmem>>, vector<3x128xf32>
    %c3_365 = arith.constant 3 : index
    %c1792_366 = arith.constant 1792 : index
    %281 = vector.load %arg15[%c3_365, %c1792_366] : memref<9x2048xf32, #tpu.memory_space<vmem>>, vector<3x128xf32>
    tpu.vector_store %arg15[%c3_365, %c1792_366], %280 {strides = array<i32>} : memref<9x2048xf32, #tpu.memory_space<vmem>>, vector<3x128xf32>,
    %c27 = arith.constant 27 : index
    %c0_367 = arith.constant 0 : index
    %282 = vector.load %arg12[%c27, %c0_367] : memref<36x128xf32, #tpu.memory_space<vmem>>, vector<3x128xf32>
    %c3_368 = arith.constant 3 : index
    %c1920_369 = arith.constant 1920 : index
    %283 = vector.load %arg15[%c3_368, %c1920_369] : memref<9x2048xf32, #tpu.memory_space<vmem>>, vector<3x128xf32>
    tpu.vector_store %arg15[%c3_368, %c1920_369], %282 {strides = array<i32>} : memref<9x2048xf32, #tpu.memory_space<vmem>>, vector<3x128xf32>,
    %c12_370 = arith.constant 12 : index
    %c0_371 = arith.constant 0 : index
    %284 = vector.load %arg12[%c12_370, %c0_371] : memref<36x128xf32, #tpu.memory_space<vmem>>, vector<3x128xf32>
    %c6_372 = arith.constant 6 : index
    %c0_373 = arith.constant 0 : index
    %285 = vector.load %arg15[%c6_372, %c0_373] : memref<9x2048xf32, #tpu.memory_space<vmem>>, vector<3x128xf32>
    tpu.vector_store %arg15[%c6_372, %c0_373], %284 {strides = array<i32>} : memref<9x2048xf32, #tpu.memory_space<vmem>>, vector<3x128xf32>,
    %c13_374 = arith.constant 13 : index
    %c0_375 = arith.constant 0 : index
    %286 = vector.load %arg12[%c13_374, %c0_375] : memref<36x128xf32, #tpu.memory_space<vmem>>, vector<3x128xf32>
    %c6_376 = arith.constant 6 : index
    %c128_377 = arith.constant 128 : index
    %287 = vector.load %arg15[%c6_376, %c128_377] : memref<9x2048xf32, #tpu.memory_space<vmem>>, vector<3x128xf32>
    tpu.vector_store %arg15[%c6_376, %c128_377], %286 {strides = array<i32>} : memref<9x2048xf32, #tpu.memory_space<vmem>>, vector<3x128xf32>,
    %c14_378 = arith.constant 14 : index
    %c0_379 = arith.constant 0 : index
    %288 = vector.load %arg12[%c14_378, %c0_379] : memref<36x128xf32, #tpu.memory_space<vmem>>, vector<3x128xf32>
    %c6_380 = arith.constant 6 : index
    %c256_381 = arith.constant 256 : index
    %289 = vector.load %arg15[%c6_380, %c256_381] : memref<9x2048xf32, #tpu.memory_space<vmem>>, vector<3x128xf32>
    tpu.vector_store %arg15[%c6_380, %c256_381], %288 {strides = array<i32>} : memref<9x2048xf32, #tpu.memory_space<vmem>>, vector<3x128xf32>,
    %c15_382 = arith.constant 15 : index
    %c0_383 = arith.constant 0 : index
    %290 = vector.load %arg12[%c15_382, %c0_383] : memref<36x128xf32, #tpu.memory_space<vmem>>, vector<3x128xf32>
    %c6_384 = arith.constant 6 : index
    %c384_385 = arith.constant 384 : index
    %291 = vector.load %arg15[%c6_384, %c384_385] : memref<9x2048xf32, #tpu.memory_space<vmem>>, vector<3x128xf32>
    tpu.vector_store %arg15[%c6_384, %c384_385], %290 {strides = array<i32>} : memref<9x2048xf32, #tpu.memory_space<vmem>>, vector<3x128xf32>,
    %c18_386 = arith.constant 18 : index
    %c0_387 = arith.constant 0 : index
    %292 = vector.load %arg12[%c18_386, %c0_387] : memref<36x128xf32, #tpu.memory_space<vmem>>, vector<3x128xf32>
    %c6_388 = arith.constant 6 : index
    %c512_389 = arith.constant 512 : index
    %293 = vector.load %arg15[%c6_388, %c512_389] : memref<9x2048xf32, #tpu.memory_space<vmem>>, vector<3x128xf32>
    tpu.vector_store %arg15[%c6_388, %c512_389], %292 {strides = array<i32>} : memref<9x2048xf32, #tpu.memory_space<vmem>>, vector<3x128xf32>,
    %c19_390 = arith.constant 19 : index
    %c0_391 = arith.constant 0 : index
    %294 = vector.load %arg12[%c19_390, %c0_391] : memref<36x128xf32, #tpu.memory_space<vmem>>, vector<3x128xf32>
    %c6_392 = arith.constant 6 : index
    %c640_393 = arith.constant 640 : index
    %295 = vector.load %arg15[%c6_392, %c640_393] : memref<9x2048xf32, #tpu.memory_space<vmem>>, vector<3x128xf32>
    tpu.vector_store %arg15[%c6_392, %c640_393], %294 {strides = array<i32>} : memref<9x2048xf32, #tpu.memory_space<vmem>>, vector<3x128xf32>,
    %c20_394 = arith.constant 20 : index
    %c0_395 = arith.constant 0 : index
    %296 = vector.load %arg12[%c20_394, %c0_395] : memref<36x128xf32, #tpu.memory_space<vmem>>, vector<3x128xf32>
    %c6_396 = arith.constant 6 : index
    %c768_397 = arith.constant 768 : index
    %297 = vector.load %arg15[%c6_396, %c768_397] : memref<9x2048xf32, #tpu.memory_space<vmem>>, vector<3x128xf32>
    tpu.vector_store %arg15[%c6_396, %c768_397], %296 {strides = array<i32>} : memref<9x2048xf32, #tpu.memory_space<vmem>>, vector<3x128xf32>,
    %c21_398 = arith.constant 21 : index
    %c0_399 = arith.constant 0 : index
    %298 = vector.load %arg12[%c21_398, %c0_399] : memref<36x128xf32, #tpu.memory_space<vmem>>, vector<3x128xf32>
    %c6_400 = arith.constant 6 : index
    %c896_401 = arith.constant 896 : index
    %299 = vector.load %arg15[%c6_400, %c896_401] : memref<9x2048xf32, #tpu.memory_space<vmem>>, vector<3x128xf32>
    tpu.vector_store %arg15[%c6_400, %c896_401], %298 {strides = array<i32>} : memref<9x2048xf32, #tpu.memory_space<vmem>>, vector<3x128xf32>,
    %c24_402 = arith.constant 24 : index
    %c0_403 = arith.constant 0 : index
    %300 = vector.load %arg12[%c24_402, %c0_403] : memref<36x128xf32, #tpu.memory_space<vmem>>, vector<3x128xf32>
    %c6_404 = arith.constant 6 : index
    %c1024_405 = arith.constant 1024 : index
    %301 = vector.load %arg15[%c6_404, %c1024_405] : memref<9x2048xf32, #tpu.memory_space<vmem>>, vector<3x128xf32>
    tpu.vector_store %arg15[%c6_404, %c1024_405], %300 {strides = array<i32>} : memref<9x2048xf32, #tpu.memory_space<vmem>>, vector<3x128xf32>,
    %c25_406 = arith.constant 25 : index
    %c0_407 = arith.constant 0 : index
    %302 = vector.load %arg12[%c25_406, %c0_407] : memref<36x128xf32, #tpu.memory_space<vmem>>, vector<3x128xf32>
    %c6_408 = arith.constant 6 : index
    %c1152_409 = arith.constant 1152 : index
    %303 = vector.load %arg15[%c6_408, %c1152_409] : memref<9x2048xf32, #tpu.memory_space<vmem>>, vector<3x128xf32>
    tpu.vector_store %arg15[%c6_408, %c1152_409], %302 {strides = array<i32>} : memref<9x2048xf32, #tpu.memory_space<vmem>>, vector<3x128xf32>,
    %c26_410 = arith.constant 26 : index
    %c0_411 = arith.constant 0 : index
    %304 = vector.load %arg12[%c26_410, %c0_411] : memref<36x128xf32, #tpu.memory_space<vmem>>, vector<3x128xf32>
    %c6_412 = arith.constant 6 : index
    %c1280_413 = arith.constant 1280 : index
    %305 = vector.load %arg15[%c6_412, %c1280_413] : memref<9x2048xf32, #tpu.memory_space<vmem>>, vector<3x128xf32>
    tpu.vector_store %arg15[%c6_412, %c1280_413], %304 {strides = array<i32>} : memref<9x2048xf32, #tpu.memory_space<vmem>>, vector<3x128xf32>,
    %c27_414 = arith.constant 27 : index
    %c0_415 = arith.constant 0 : index
    %306 = vector.load %arg12[%c27_414, %c0_415] : memref<36x128xf32, #tpu.memory_space<vmem>>, vector<3x128xf32>
    %c6_416 = arith.constant 6 : index
    %c1408_417 = arith.constant 1408 : index
    %307 = vector.load %arg15[%c6_416, %c1408_417] : memref<9x2048xf32, #tpu.memory_space<vmem>>, vector<3x128xf32>
    tpu.vector_store %arg15[%c6_416, %c1408_417], %306 {strides = array<i32>} : memref<9x2048xf32, #tpu.memory_space<vmem>>, vector<3x128xf32>,
    %c30_418 = arith.constant 30 : index
    %c0_419 = arith.constant 0 : index
    %308 = vector.load %arg12[%c30_418, %c0_419] : memref<36x128xf32, #tpu.memory_space<vmem>>, vector<3x128xf32>
    %c6_420 = arith.constant 6 : index
    %c1536_421 = arith.constant 1536 : index
    %309 = vector.load %arg15[%c6_420, %c1536_421] : memref<9x2048xf32, #tpu.memory_space<vmem>>, vector<3x128xf32>
    tpu.vector_store %arg15[%c6_420, %c1536_421], %308 {strides = array<i32>} : memref<9x2048xf32, #tpu.memory_space<vmem>>, vector<3x128xf32>,
    %c31_422 = arith.constant 31 : index
    %c0_423 = arith.constant 0 : index
    %310 = vector.load %arg12[%c31_422, %c0_423] : memref<36x128xf32, #tpu.memory_space<vmem>>, vector<3x128xf32>
    %c6_424 = arith.constant 6 : index
    %c1664_425 = arith.constant 1664 : index
    %311 = vector.load %arg15[%c6_424, %c1664_425] : memref<9x2048xf32, #tpu.memory_space<vmem>>, vector<3x128xf32>
    tpu.vector_store %arg15[%c6_424, %c1664_425], %310 {strides = array<i32>} : memref<9x2048xf32, #tpu.memory_space<vmem>>, vector<3x128xf32>,
    %c32_426 = arith.constant 32 : index
    %c0_427 = arith.constant 0 : index
    %312 = vector.load %arg12[%c32_426, %c0_427] : memref<36x128xf32, #tpu.memory_space<vmem>>, vector<3x128xf32>
    %c6_428 = arith.constant 6 : index
    %c1792_429 = arith.constant 1792 : index
    %313 = vector.load %arg15[%c6_428, %c1792_429] : memref<9x2048xf32, #tpu.memory_space<vmem>>, vector<3x128xf32>
    tpu.vector_store %arg15[%c6_428, %c1792_429], %312 {strides = array<i32>} : memref<9x2048xf32, #tpu.memory_space<vmem>>, vector<3x128xf32>,
    %c33_430 = arith.constant 33 : index
    %c0_431 = arith.constant 0 : index
    %314 = vector.load %arg12[%c33_430, %c0_431] : memref<36x128xf32, #tpu.memory_space<vmem>>, vector<3x128xf32>
    %c6_432 = arith.constant 6 : index
    %c1920_433 = arith.constant 1920 : index
    %315 = vector.load %arg15[%c6_432, %c1920_433] : memref<9x2048xf32, #tpu.memory_space<vmem>>, vector<3x128xf32>
    tpu.vector_store %arg15[%c6_432, %c1920_433], %314 {strides = array<i32>} : memref<9x2048xf32, #tpu.memory_space<vmem>>, vector<3x128xf32>,
    %c0_434 = arith.constant 0 : index
    %c0_435 = arith.constant 0 : index
    %316 = vector.load %arg15[%c0_434, %c0_435] : memref<9x2048xf32, #tpu.memory_space<vmem>>, vector<9x2048xf32>
    %317 = arith.truncf %316 : vector<9x2048xf32> to vector<9x2048xbf16>
    %c0_436 = arith.constant 0 : index
    %c0_437 = arith.constant 0 : index
    %318 = vector.load %arg4[%c0_436, %c0_437] : memref<2048x256xbf16, #tpu.memory_space<vmem>>, vector<2048x256xbf16>
    %cst_438 = arith.constant dense<0.000000e+00> : vector<9x256xf32>
    %319 = tpu.matmul %317, %318, %cst_438 {dimension_numbers = #tpu.dot_dimension_numbers<[1], [0], [0], [1], [0, 0, 1, 1], [], []>} : vector<9x2048xbf16>, vector<2048x256xbf16>, vector<9x256xf32> -> vector<9x256xf32>
    %cst_439 = arith.constant dense<0.000000e+00> : vector<256xf32>
    %320 = vector.multi_reduction <add>, %319, %cst_439 [0] : vector<9x256xf32> to vector<256xf32>
    %321 = vector.shape_cast %320 : vector<256xf32> to vector<1x256xf32>
    %cst_440 = arith.constant 9.000000e+00 : f32
    %322 = vector.broadcast %cst_440 : f32 to vector<1x256xf32>
    %323 = arith.divf %321, %322 : vector<1x256xf32>
    %324 = arith.mulf %319, %319 : vector<9x256xf32>
    %cst_441 = arith.constant dense<0.000000e+00> : vector<256xf32>
    %325 = vector.multi_reduction <add>, %324, %cst_441 [0] : vector<9x256xf32> to vector<256xf32>
    %326 = vector.shape_cast %325 : vector<256xf32> to vector<1x256xf32>
    %cst_442 = arith.constant 9.000000e+00 : f32
    %327 = vector.broadcast %cst_442 : f32 to vector<1x256xf32>
    %328 = arith.divf %326, %327 : vector<1x256xf32>
    %329 = arith.mulf %323, %323 : vector<1x256xf32>
    %330 = arith.subf %328, %329 : vector<1x256xf32>
    %cst_443 = arith.constant 0.000000e+00 : f32
    %331 = vector.broadcast %cst_443 : f32 to vector<1x256xf32>
    %332 = arith.maximumf %330, %331 : vector<1x256xf32>
    %333 = vector.broadcast %323 : vector<1x256xf32> to vector<9x256xf32>
    %334 = arith.subf %319, %333 : vector<9x256xf32>
    %cst_444 = arith.constant 9.99999974E-6 : f32
    %335 = vector.broadcast %cst_444 : f32 to vector<1x256xf32>
    %336 = arith.addf %332, %335 : vector<1x256xf32>
    %337 = math.rsqrt %336 : vector<1x256xf32>
    %338 = vector.broadcast %337 : vector<1x256xf32> to vector<9x256xf32>
    %339 = arith.mulf %334, %338 : vector<9x256xf32>
    %cst_445 = arith.constant 0.000000e+00 : f32
    %340 = vector.broadcast %cst_445 : f32 to vector<9x256xf32>
    %341 = arith.cmpf oge, %339, %340 : vector<9x256xf32>
    %cst_446 = arith.constant 2.000000e-01 : f32
    %342 = vector.broadcast %cst_446 : f32 to vector<9x256xf32>
    %343 = arith.mulf %342, %339 : vector<9x256xf32>
    %344 = arith.select %341, %339, %343 : vector<9x256xi1>, vector<9x256xf32>
    %c0_447 = arith.constant 0 : index
    %c0_448 = arith.constant 0 : index
    %c0_449 = arith.constant 0 : index
    %345 = vector.load %arg8[%c0_447, %c0_448, %c0_449] : memref<1x9x256xf32, #tpu.memory_space<vmem>>, vector<1x9x256xf32>
    %346 = vector.shape_cast %345 : vector<1x9x256xf32> to vector<9x256xf32>
    %347 = vector.shape_cast %344 : vector<9x256xf32> to vector<1x9x256xf32>
    tpu.vector_store %arg8[%c0_447, %c0_448, %c0_449], %347 {strides = array<i32>} : memref<1x9x256xf32, #tpu.memory_space<vmem>>, vector<1x9x256xf32>,
    %cst_450 = arith.constant 0.000000e+00 : f32
    %348 = vector.broadcast %cst_450 : f32 to vector<25x256xf32>
    %c0_451 = arith.constant 0 : index
    %c0_452 = arith.constant 0 : index
    %349 = vector.load %arg13[%c0_451, %c0_452] : memref<25x256xf32, #tpu.memory_space<vmem>>, vector<25x256xf32>
    tpu.vector_store %arg13[%c0_451, %c0_452], %348 {strides = array<i32>} : memref<25x256xf32, #tpu.memory_space<vmem>>, vector<25x256xf32>,
    %350 = vector.extract_strided_slice %344 {offsets = [0, 0], sizes = [3, 256], strides = [1, 1]} : vector<9x256xf32> to vector<3x256xf32>
    %c6_453 = arith.constant 6 : index
    %c0_454 = arith.constant 0 : index
    %351 = vector.load %arg13[%c6_453, %c0_454] : memref<25x256xf32, #tpu.memory_space<vmem>>, vector<3x256xf32>
    tpu.vector_store %arg13[%c6_453, %c0_454], %350 {strides = array<i32>} : memref<25x256xf32, #tpu.memory_space<vmem>>, vector<3x256xf32>,
    %352 = vector.extract_strided_slice %344 {offsets = [3, 0], sizes = [3, 256], strides = [1, 1]} : vector<9x256xf32> to vector<3x256xf32>
    %c11_455 = arith.constant 11 : index
    %c0_456 = arith.constant 0 : index
    %353 = vector.load %arg13[%c11_455, %c0_456] : memref<25x256xf32, #tpu.memory_space<vmem>>, vector<3x256xf32>
    tpu.vector_store %arg13[%c11_455, %c0_456], %352 {strides = array<i32>} : memref<25x256xf32, #tpu.memory_space<vmem>>, vector<3x256xf32>,
    %354 = vector.extract_strided_slice %344 {offsets = [6, 0], sizes = [3, 256], strides = [1, 1]} : vector<9x256xf32> to vector<3x256xf32>
    %c16 = arith.constant 16 : index
    %c0_457 = arith.constant 0 : index
    %355 = vector.load %arg13[%c16, %c0_457] : memref<25x256xf32, #tpu.memory_space<vmem>>, vector<3x256xf32>
    tpu.vector_store %arg13[%c16, %c0_457], %354 {strides = array<i32>} : memref<25x256xf32, #tpu.memory_space<vmem>>, vector<3x256xf32>,
    %c0_458 = arith.constant 0 : index
    %c0_459 = arith.constant 0 : index
    %356 = vector.load %arg13[%c0_458, %c0_459] : memref<25x256xf32, #tpu.memory_space<vmem>>, vector<2x256xf32>
    %c0_460 = arith.constant 0 : index
    %c0_461 = arith.constant 0 : index
    %357 = vector.load %arg16[%c0_460, %c0_461] : memref<4x4096xf32, #tpu.memory_space<vmem>>, vector<2x256xf32>
    tpu.vector_store %arg16[%c0_460, %c0_461], %356 {strides = array<i32>} : memref<4x4096xf32, #tpu.memory_space<vmem>>, vector<2x256xf32>,
    %c1_462 = arith.constant 1 : index
    %c0_463 = arith.constant 0 : index
    %358 = vector.load %arg13[%c1_462, %c0_463] : memref<25x256xf32, #tpu.memory_space<vmem>>, vector<2x256xf32>
    %c0_464 = arith.constant 0 : index
    %c256_465 = arith.constant 256 : index
    %359 = vector.load %arg16[%c0_464, %c256_465] : memref<4x4096xf32, #tpu.memory_space<vmem>>, vector<2x256xf32>
    tpu.vector_store %arg16[%c0_464, %c256_465], %358 {strides = array<i32>} : memref<4x4096xf32, #tpu.memory_space<vmem>>, vector<2x256xf32>,
    %c2_466 = arith.constant 2 : index
    %c0_467 = arith.constant 0 : index
    %360 = vector.load %arg13[%c2_466, %c0_467] : memref<25x256xf32, #tpu.memory_space<vmem>>, vector<2x256xf32>
    %c0_468 = arith.constant 0 : index
    %c512_469 = arith.constant 512 : index
    %361 = vector.load %arg16[%c0_468, %c512_469] : memref<4x4096xf32, #tpu.memory_space<vmem>>, vector<2x256xf32>
    tpu.vector_store %arg16[%c0_468, %c512_469], %360 {strides = array<i32>} : memref<4x4096xf32, #tpu.memory_space<vmem>>, vector<2x256xf32>,
    %c3_470 = arith.constant 3 : index
    %c0_471 = arith.constant 0 : index
    %362 = vector.load %arg13[%c3_470, %c0_471] : memref<25x256xf32, #tpu.memory_space<vmem>>, vector<2x256xf32>
    %c0_472 = arith.constant 0 : index
    %c768_473 = arith.constant 768 : index
    %363 = vector.load %arg16[%c0_472, %c768_473] : memref<4x4096xf32, #tpu.memory_space<vmem>>, vector<2x256xf32>
    tpu.vector_store %arg16[%c0_472, %c768_473], %362 {strides = array<i32>} : memref<4x4096xf32, #tpu.memory_space<vmem>>, vector<2x256xf32>,
    %c5 = arith.constant 5 : index
    %c0_474 = arith.constant 0 : index
    %364 = vector.load %arg13[%c5, %c0_474] : memref<25x256xf32, #tpu.memory_space<vmem>>, vector<2x256xf32>
    %c0_475 = arith.constant 0 : index
    %c1024_476 = arith.constant 1024 : index
    %365 = vector.load %arg16[%c0_475, %c1024_476] : memref<4x4096xf32, #tpu.memory_space<vmem>>, vector<2x256xf32>
    tpu.vector_store %arg16[%c0_475, %c1024_476], %364 {strides = array<i32>} : memref<4x4096xf32, #tpu.memory_space<vmem>>, vector<2x256xf32>,
    %c6_477 = arith.constant 6 : index
    %c0_478 = arith.constant 0 : index
    %366 = vector.load %arg13[%c6_477, %c0_478] : memref<25x256xf32, #tpu.memory_space<vmem>>, vector<2x256xf32>
    %c0_479 = arith.constant 0 : index
    %c1280_480 = arith.constant 1280 : index
    %367 = vector.load %arg16[%c0_479, %c1280_480] : memref<4x4096xf32, #tpu.memory_space<vmem>>, vector<2x256xf32>
    tpu.vector_store %arg16[%c0_479, %c1280_480], %366 {strides = array<i32>} : memref<4x4096xf32, #tpu.memory_space<vmem>>, vector<2x256xf32>,
    %c7_481 = arith.constant 7 : index
    %c0_482 = arith.constant 0 : index
    %368 = vector.load %arg13[%c7_481, %c0_482] : memref<25x256xf32, #tpu.memory_space<vmem>>, vector<2x256xf32>
    %c0_483 = arith.constant 0 : index
    %c1536_484 = arith.constant 1536 : index
    %369 = vector.load %arg16[%c0_483, %c1536_484] : memref<4x4096xf32, #tpu.memory_space<vmem>>, vector<2x256xf32>
    tpu.vector_store %arg16[%c0_483, %c1536_484], %368 {strides = array<i32>} : memref<4x4096xf32, #tpu.memory_space<vmem>>, vector<2x256xf32>,
    %c8_485 = arith.constant 8 : index
    %c0_486 = arith.constant 0 : index
    %370 = vector.load %arg13[%c8_485, %c0_486] : memref<25x256xf32, #tpu.memory_space<vmem>>, vector<2x256xf32>
    %c0_487 = arith.constant 0 : index
    %c1792_488 = arith.constant 1792 : index
    %371 = vector.load %arg16[%c0_487, %c1792_488] : memref<4x4096xf32, #tpu.memory_space<vmem>>, vector<2x256xf32>
    tpu.vector_store %arg16[%c0_487, %c1792_488], %370 {strides = array<i32>} : memref<4x4096xf32, #tpu.memory_space<vmem>>, vector<2x256xf32>,
    %c10_489 = arith.constant 10 : index
    %c0_490 = arith.constant 0 : index
    %372 = vector.load %arg13[%c10_489, %c0_490] : memref<25x256xf32, #tpu.memory_space<vmem>>, vector<2x256xf32>
    %c0_491 = arith.constant 0 : index
    %c2048 = arith.constant 2048 : index
    %373 = vector.load %arg16[%c0_491, %c2048] : memref<4x4096xf32, #tpu.memory_space<vmem>>, vector<2x256xf32>
    tpu.vector_store %arg16[%c0_491, %c2048], %372 {strides = array<i32>} : memref<4x4096xf32, #tpu.memory_space<vmem>>, vector<2x256xf32>,
    %c11_492 = arith.constant 11 : index
    %c0_493 = arith.constant 0 : index
    %374 = vector.load %arg13[%c11_492, %c0_493] : memref<25x256xf32, #tpu.memory_space<vmem>>, vector<2x256xf32>
    %c0_494 = arith.constant 0 : index
    %c2304 = arith.constant 2304 : index
    %375 = vector.load %arg16[%c0_494, %c2304] : memref<4x4096xf32, #tpu.memory_space<vmem>>, vector<2x256xf32>
    tpu.vector_store %arg16[%c0_494, %c2304], %374 {strides = array<i32>} : memref<4x4096xf32, #tpu.memory_space<vmem>>, vector<2x256xf32>,
    %c12_495 = arith.constant 12 : index
    %c0_496 = arith.constant 0 : index
    %376 = vector.load %arg13[%c12_495, %c0_496] : memref<25x256xf32, #tpu.memory_space<vmem>>, vector<2x256xf32>
    %c0_497 = arith.constant 0 : index
    %c2560 = arith.constant 2560 : index
    %377 = vector.load %arg16[%c0_497, %c2560] : memref<4x4096xf32, #tpu.memory_space<vmem>>, vector<2x256xf32>
    tpu.vector_store %arg16[%c0_497, %c2560], %376 {strides = array<i32>} : memref<4x4096xf32, #tpu.memory_space<vmem>>, vector<2x256xf32>,
    %c13_498 = arith.constant 13 : index
    %c0_499 = arith.constant 0 : index
    %378 = vector.load %arg13[%c13_498, %c0_499] : memref<25x256xf32, #tpu.memory_space<vmem>>, vector<2x256xf32>
    %c0_500 = arith.constant 0 : index
    %c2816 = arith.constant 2816 : index
    %379 = vector.load %arg16[%c0_500, %c2816] : memref<4x4096xf32, #tpu.memory_space<vmem>>, vector<2x256xf32>
    tpu.vector_store %arg16[%c0_500, %c2816], %378 {strides = array<i32>} : memref<4x4096xf32, #tpu.memory_space<vmem>>, vector<2x256xf32>,
    %c15_501 = arith.constant 15 : index
    %c0_502 = arith.constant 0 : index
    %380 = vector.load %arg13[%c15_501, %c0_502] : memref<25x256xf32, #tpu.memory_space<vmem>>, vector<2x256xf32>
    %c0_503 = arith.constant 0 : index
    %c3072 = arith.constant 3072 : index
    %381 = vector.load %arg16[%c0_503, %c3072] : memref<4x4096xf32, #tpu.memory_space<vmem>>, vector<2x256xf32>
    tpu.vector_store %arg16[%c0_503, %c3072], %380 {strides = array<i32>} : memref<4x4096xf32, #tpu.memory_space<vmem>>, vector<2x256xf32>,
    %c16_504 = arith.constant 16 : index
    %c0_505 = arith.constant 0 : index
    %382 = vector.load %arg13[%c16_504, %c0_505] : memref<25x256xf32, #tpu.memory_space<vmem>>, vector<2x256xf32>
    %c0_506 = arith.constant 0 : index
    %c3328 = arith.constant 3328 : index
    %383 = vector.load %arg16[%c0_506, %c3328] : memref<4x4096xf32, #tpu.memory_space<vmem>>, vector<2x256xf32>
    tpu.vector_store %arg16[%c0_506, %c3328], %382 {strides = array<i32>} : memref<4x4096xf32, #tpu.memory_space<vmem>>, vector<2x256xf32>,
    %c17 = arith.constant 17 : index
    %c0_507 = arith.constant 0 : index
    %384 = vector.load %arg13[%c17, %c0_507] : memref<25x256xf32, #tpu.memory_space<vmem>>, vector<2x256xf32>
    %c0_508 = arith.constant 0 : index
    %c3584 = arith.constant 3584 : index
    %385 = vector.load %arg16[%c0_508, %c3584] : memref<4x4096xf32, #tpu.memory_space<vmem>>, vector<2x256xf32>
    tpu.vector_store %arg16[%c0_508, %c3584], %384 {strides = array<i32>} : memref<4x4096xf32, #tpu.memory_space<vmem>>, vector<2x256xf32>,
    %c18_509 = arith.constant 18 : index
    %c0_510 = arith.constant 0 : index
    %386 = vector.load %arg13[%c18_509, %c0_510] : memref<25x256xf32, #tpu.memory_space<vmem>>, vector<2x256xf32>
    %c0_511 = arith.constant 0 : index
    %c3840 = arith.constant 3840 : index
    %387 = vector.load %arg16[%c0_511, %c3840] : memref<4x4096xf32, #tpu.memory_space<vmem>>, vector<2x256xf32>
    tpu.vector_store %arg16[%c0_511, %c3840], %386 {strides = array<i32>} : memref<4x4096xf32, #tpu.memory_space<vmem>>, vector<2x256xf32>,
    %c5_512 = arith.constant 5 : index
    %c0_513 = arith.constant 0 : index
    %388 = vector.load %arg13[%c5_512, %c0_513] : memref<25x256xf32, #tpu.memory_space<vmem>>, vector<2x256xf32>
    %c2_514 = arith.constant 2 : index
    %c0_515 = arith.constant 0 : index
    %389 = vector.load %arg16[%c2_514, %c0_515] : memref<4x4096xf32, #tpu.memory_space<vmem>>, vector<2x256xf32>
    tpu.vector_store %arg16[%c2_514, %c0_515], %388 {strides = array<i32>} : memref<4x4096xf32, #tpu.memory_space<vmem>>, vector<2x256xf32>,
    %c6_516 = arith.constant 6 : index
    %c0_517 = arith.constant 0 : index
    %390 = vector.load %arg13[%c6_516, %c0_517] : memref<25x256xf32, #tpu.memory_space<vmem>>, vector<2x256xf32>
    %c2_518 = arith.constant 2 : index
    %c256_519 = arith.constant 256 : index
    %391 = vector.load %arg16[%c2_518, %c256_519] : memref<4x4096xf32, #tpu.memory_space<vmem>>, vector<2x256xf32>
    tpu.vector_store %arg16[%c2_518, %c256_519], %390 {strides = array<i32>} : memref<4x4096xf32, #tpu.memory_space<vmem>>, vector<2x256xf32>,
    %c7_520 = arith.constant 7 : index
    %c0_521 = arith.constant 0 : index
    %392 = vector.load %arg13[%c7_520, %c0_521] : memref<25x256xf32, #tpu.memory_space<vmem>>, vector<2x256xf32>
    %c2_522 = arith.constant 2 : index
    %c512_523 = arith.constant 512 : index
    %393 = vector.load %arg16[%c2_522, %c512_523] : memref<4x4096xf32, #tpu.memory_space<vmem>>, vector<2x256xf32>
    tpu.vector_store %arg16[%c2_522, %c512_523], %392 {strides = array<i32>} : memref<4x4096xf32, #tpu.memory_space<vmem>>, vector<2x256xf32>,
    %c8_524 = arith.constant 8 : index
    %c0_525 = arith.constant 0 : index
    %394 = vector.load %arg13[%c8_524, %c0_525] : memref<25x256xf32, #tpu.memory_space<vmem>>, vector<2x256xf32>
    %c2_526 = arith.constant 2 : index
    %c768_527 = arith.constant 768 : index
    %395 = vector.load %arg16[%c2_526, %c768_527] : memref<4x4096xf32, #tpu.memory_space<vmem>>, vector<2x256xf32>
    tpu.vector_store %arg16[%c2_526, %c768_527], %394 {strides = array<i32>} : memref<4x4096xf32, #tpu.memory_space<vmem>>, vector<2x256xf32>,
    %c10_528 = arith.constant 10 : index
    %c0_529 = arith.constant 0 : index
    %396 = vector.load %arg13[%c10_528, %c0_529] : memref<25x256xf32, #tpu.memory_space<vmem>>, vector<2x256xf32>
    %c2_530 = arith.constant 2 : index
    %c1024_531 = arith.constant 1024 : index
    %397 = vector.load %arg16[%c2_530, %c1024_531] : memref<4x4096xf32, #tpu.memory_space<vmem>>, vector<2x256xf32>
    tpu.vector_store %arg16[%c2_530, %c1024_531], %396 {strides = array<i32>} : memref<4x4096xf32, #tpu.memory_space<vmem>>, vector<2x256xf32>,
    %c11_532 = arith.constant 11 : index
    %c0_533 = arith.constant 0 : index
    %398 = vector.load %arg13[%c11_532, %c0_533] : memref<25x256xf32, #tpu.memory_space<vmem>>, vector<2x256xf32>
    %c2_534 = arith.constant 2 : index
    %c1280_535 = arith.constant 1280 : index
    %399 = vector.load %arg16[%c2_534, %c1280_535] : memref<4x4096xf32, #tpu.memory_space<vmem>>, vector<2x256xf32>
    tpu.vector_store %arg16[%c2_534, %c1280_535], %398 {strides = array<i32>} : memref<4x4096xf32, #tpu.memory_space<vmem>>, vector<2x256xf32>,
    %c12_536 = arith.constant 12 : index
    %c0_537 = arith.constant 0 : index
    %400 = vector.load %arg13[%c12_536, %c0_537] : memref<25x256xf32, #tpu.memory_space<vmem>>, vector<2x256xf32>
    %c2_538 = arith.constant 2 : index
    %c1536_539 = arith.constant 1536 : index
    %401 = vector.load %arg16[%c2_538, %c1536_539] : memref<4x4096xf32, #tpu.memory_space<vmem>>, vector<2x256xf32>
    tpu.vector_store %arg16[%c2_538, %c1536_539], %400 {strides = array<i32>} : memref<4x4096xf32, #tpu.memory_space<vmem>>, vector<2x256xf32>,
    %c13_540 = arith.constant 13 : index
    %c0_541 = arith.constant 0 : index
    %402 = vector.load %arg13[%c13_540, %c0_541] : memref<25x256xf32, #tpu.memory_space<vmem>>, vector<2x256xf32>
    %c2_542 = arith.constant 2 : index
    %c1792_543 = arith.constant 1792 : index
    %403 = vector.load %arg16[%c2_542, %c1792_543] : memref<4x4096xf32, #tpu.memory_space<vmem>>, vector<2x256xf32>
    tpu.vector_store %arg16[%c2_542, %c1792_543], %402 {strides = array<i32>} : memref<4x4096xf32, #tpu.memory_space<vmem>>, vector<2x256xf32>,
    %c15_544 = arith.constant 15 : index
    %c0_545 = arith.constant 0 : index
    %404 = vector.load %arg13[%c15_544, %c0_545] : memref<25x256xf32, #tpu.memory_space<vmem>>, vector<2x256xf32>
    %c2_546 = arith.constant 2 : index
    %c2048_547 = arith.constant 2048 : index
    %405 = vector.load %arg16[%c2_546, %c2048_547] : memref<4x4096xf32, #tpu.memory_space<vmem>>, vector<2x256xf32>
    tpu.vector_store %arg16[%c2_546, %c2048_547], %404 {strides = array<i32>} : memref<4x4096xf32, #tpu.memory_space<vmem>>, vector<2x256xf32>,
    %c16_548 = arith.constant 16 : index
    %c0_549 = arith.constant 0 : index
    %406 = vector.load %arg13[%c16_548, %c0_549] : memref<25x256xf32, #tpu.memory_space<vmem>>, vector<2x256xf32>
    %c2_550 = arith.constant 2 : index
    %c2304_551 = arith.constant 2304 : index
    %407 = vector.load %arg16[%c2_550, %c2304_551] : memref<4x4096xf32, #tpu.memory_space<vmem>>, vector<2x256xf32>
    tpu.vector_store %arg16[%c2_550, %c2304_551], %406 {strides = array<i32>} : memref<4x4096xf32, #tpu.memory_space<vmem>>, vector<2x256xf32>,
    %c17_552 = arith.constant 17 : index
    %c0_553 = arith.constant 0 : index
    %408 = vector.load %arg13[%c17_552, %c0_553] : memref<25x256xf32, #tpu.memory_space<vmem>>, vector<2x256xf32>
    %c2_554 = arith.constant 2 : index
    %c2560_555 = arith.constant 2560 : index
    %409 = vector.load %arg16[%c2_554, %c2560_555] : memref<4x4096xf32, #tpu.memory_space<vmem>>, vector<2x256xf32>
    tpu.vector_store %arg16[%c2_554, %c2560_555], %408 {strides = array<i32>} : memref<4x4096xf32, #tpu.memory_space<vmem>>, vector<2x256xf32>,
    %c18_556 = arith.constant 18 : index
    %c0_557 = arith.constant 0 : index
    %410 = vector.load %arg13[%c18_556, %c0_557] : memref<25x256xf32, #tpu.memory_space<vmem>>, vector<2x256xf32>
    %c2_558 = arith.constant 2 : index
    %c2816_559 = arith.constant 2816 : index
    %411 = vector.load %arg16[%c2_558, %c2816_559] : memref<4x4096xf32, #tpu.memory_space<vmem>>, vector<2x256xf32>
    tpu.vector_store %arg16[%c2_558, %c2816_559], %410 {strides = array<i32>} : memref<4x4096xf32, #tpu.memory_space<vmem>>, vector<2x256xf32>,
    %c20_560 = arith.constant 20 : index
    %c0_561 = arith.constant 0 : index
    %412 = vector.load %arg13[%c20_560, %c0_561] : memref<25x256xf32, #tpu.memory_space<vmem>>, vector<2x256xf32>
    %c2_562 = arith.constant 2 : index
    %c3072_563 = arith.constant 3072 : index
    %413 = vector.load %arg16[%c2_562, %c3072_563] : memref<4x4096xf32, #tpu.memory_space<vmem>>, vector<2x256xf32>
    tpu.vector_store %arg16[%c2_562, %c3072_563], %412 {strides = array<i32>} : memref<4x4096xf32, #tpu.memory_space<vmem>>, vector<2x256xf32>,
    %c21_564 = arith.constant 21 : index
    %c0_565 = arith.constant 0 : index
    %414 = vector.load %arg13[%c21_564, %c0_565] : memref<25x256xf32, #tpu.memory_space<vmem>>, vector<2x256xf32>
    %c2_566 = arith.constant 2 : index
    %c3328_567 = arith.constant 3328 : index
    %415 = vector.load %arg16[%c2_566, %c3328_567] : memref<4x4096xf32, #tpu.memory_space<vmem>>, vector<2x256xf32>
    tpu.vector_store %arg16[%c2_566, %c3328_567], %414 {strides = array<i32>} : memref<4x4096xf32, #tpu.memory_space<vmem>>, vector<2x256xf32>,
    %c22_568 = arith.constant 22 : index
    %c0_569 = arith.constant 0 : index
    %416 = vector.load %arg13[%c22_568, %c0_569] : memref<25x256xf32, #tpu.memory_space<vmem>>, vector<2x256xf32>
    %c2_570 = arith.constant 2 : index
    %c3584_571 = arith.constant 3584 : index
    %417 = vector.load %arg16[%c2_570, %c3584_571] : memref<4x4096xf32, #tpu.memory_space<vmem>>, vector<2x256xf32>
    tpu.vector_store %arg16[%c2_570, %c3584_571], %416 {strides = array<i32>} : memref<4x4096xf32, #tpu.memory_space<vmem>>, vector<2x256xf32>,
    %c23_572 = arith.constant 23 : index
    %c0_573 = arith.constant 0 : index
    %418 = vector.load %arg13[%c23_572, %c0_573] : memref<25x256xf32, #tpu.memory_space<vmem>>, vector<2x256xf32>
    %c2_574 = arith.constant 2 : index
    %c3840_575 = arith.constant 3840 : index
    %419 = vector.load %arg16[%c2_574, %c3840_575] : memref<4x4096xf32, #tpu.memory_space<vmem>>, vector<2x256xf32>
    tpu.vector_store %arg16[%c2_574, %c3840_575], %418 {strides = array<i32>} : memref<4x4096xf32, #tpu.memory_space<vmem>>, vector<2x256xf32>,
    %c0_576 = arith.constant 0 : index
    %c0_577 = arith.constant 0 : index
    %420 = vector.load %arg16[%c0_576, %c0_577] : memref<4x4096xf32, #tpu.memory_space<vmem>>, vector<4x4096xf32>
    %421 = arith.truncf %420 : vector<4x4096xf32> to vector<4x4096xbf16>
    %c0_578 = arith.constant 0 : index
    %c0_579 = arith.constant 0 : index
    %422 = vector.load %arg5[%c0_578, %c0_579] : memref<4096x1xbf16, #tpu.memory_space<vmem>>, vector<4096x1xbf16>
    %cst_580 = arith.constant dense<0.000000e+00> : vector<4x1xf32>
    %423 = tpu.matmul %421, %422, %cst_580 {dimension_numbers = #tpu.dot_dimension_numbers<[1], [0], [0], [1], [0, 0, 1, 1], [], []>} : vector<4x4096xbf16>, vector<4096x1xbf16>, vector<4x1xf32> -> vector<4x1xf32>
    %c0_581 = arith.constant 0 : index
    %c0_582 = arith.constant 0 : index
    %c0_583 = arith.constant 0 : index
    %424 = vector.load %arg9[%c0_581, %c0_582, %c0_583] : memref<1x4x1xf32, #tpu.memory_space<vmem>>, vector<1x4x1xf32>
    %425 = vector.shape_cast %424 : vector<1x4x1xf32> to vector<4x1xf32>
    %426 = vector.shape_cast %423 : vector<4x1xf32> to vector<1x4x1xf32>
    tpu.vector_store %arg9[%c0_581, %c0_582, %c0_583], %426 {strides = array<i32>} : memref<1x4x1xf32, #tpu.memory_space<vmem>>, vector<1x4x1xf32>,
    %cst_584 = arith.constant 0.000000e+00 : f32
    %427 = vector.broadcast %cst_584 : f32 to vector<4x1xf32>
    %428 = arith.subf %427, %423 : vector<4x1xf32>
    %429 = math.exp %428 : vector<4x1xf32>
    %cst_585 = arith.constant 1.000000e+00 : f32
    %430 = vector.broadcast %cst_585 : f32 to vector<4x1xf32>
    %431 = arith.addf %430, %429 : vector<4x1xf32>
    %cst_586 = arith.constant 1.000000e+00 : f32
    %432 = vector.broadcast %cst_586 : f32 to vector<4x1xf32>
    %433 = arith.divf %432, %431 : vector<4x1xf32>
    %434 = vector.shape_cast %433 : vector<4x1xf32> to vector<1x4x1xf32>
    %cst_587 = arith.constant dense<0.000000e+00> : vector<1xf32>
    %435 = vector.multi_reduction <add>, %434, %cst_587 [1, 2] : vector<1x4x1xf32> to vector<1xf32>
    %436 = vector.shape_cast %435 : vector<1xf32> to vector<1x1x1xf32>
    %437 = vector.extract %436[0, 0, 0] : f32 from vector<1x1x1xf32>
    %438 = vector.broadcast %437 : f32 to vector<1x1xf32>
    %c0_588 = arith.constant 0 : index
    %c0_589 = arith.constant 0 : index
    %c0_590 = arith.constant 0 : index
    %439 = vector.load %arg10[%c0_588, %c0_589, %c0_590] : memref<1x1x1xf32, #tpu.memory_space<vmem>>, vector<1x1x1xf32>
    %440 = vector.shape_cast %439 : vector<1x1x1xf32> to vector<1x1xf32>
    %441 = vector.shape_cast %438 : vector<1x1xf32> to vector<1x1x1xf32>
    tpu.vector_store %arg10[%c0_588, %c0_589, %c0_590], %441 {strides = array<i32>} : memref<1x1x1xf32, #tpu.memory_space<vmem>>, vector<1x1x1xf32>,
    return
  }
  func.func @transform_0(%arg0: i32) -> (i32, i32, i32) {
    %c0_i32 = arith.constant 0 : i32
    %c0_i32_0 = arith.constant 0 : i32
    %c0_i32_1 = arith.constant 0 : i32
    return %arg0, %c0_i32, %c0_i32_0 : i32, i32, i32
  }
  func.func @transform_1(%arg0: i32) -> (i32, i32) {
    %c0_i32 = arith.constant 0 : i32
    %c0_i32_0 = arith.constant 0 : i32
    %c0_i32_1 = arith.constant 0 : i32
    return %c0_i32, %c0_i32_0 : i32, i32
  }
  func.func @transform_2(%arg0: i32) -> (i32, i32) {
    %c0_i32 = arith.constant 0 : i32
    %c0_i32_0 = arith.constant 0 : i32
    %c0_i32_1 = arith.constant 0 : i32
    return %c0_i32, %c0_i32_0 : i32, i32
  }
  func.func @transform_3(%arg0: i32) -> (i32, i32) {
    %c0_i32 = arith.constant 0 : i32
    %c0_i32_0 = arith.constant 0 : i32
    %c0_i32_1 = arith.constant 0 : i32
    return %c0_i32, %c0_i32_0 : i32, i32
  }
  func.func @transform_4(%arg0: i32) -> (i32, i32) {
    %c0_i32 = arith.constant 0 : i32
    %c0_i32_0 = arith.constant 0 : i32
    %c0_i32_1 = arith.constant 0 : i32
    return %c0_i32, %c0_i32_0 : i32, i32
  }
  func.func @transform_5(%arg0: i32) -> (i32, i32, i32) {
    %c0_i32 = arith.constant 0 : i32
    %c0_i32_0 = arith.constant 0 : i32
    %c0_i32_1 = arith.constant 0 : i32
    return %arg0, %c0_i32, %c0_i32_0 : i32, i32, i32
  }
  func.func @transform_6(%arg0: i32) -> (i32, i32, i32) {
    %c0_i32 = arith.constant 0 : i32
    %c0_i32_0 = arith.constant 0 : i32
    %c0_i32_1 = arith.constant 0 : i32
    return %arg0, %c0_i32, %c0_i32_0 : i32, i32, i32
  }
  func.func @transform_7(%arg0: i32) -> (i32, i32, i32) {
    %c0_i32 = arith.constant 0 : i32
    %c0_i32_0 = arith.constant 0 : i32
    %c0_i32_1 = arith.constant 0 : i32
    return %arg0, %c0_i32, %c0_i32_0 : i32, i32, i32
  }
  func.func @transform_8(%arg0: i32) -> (i32, i32, i32) {
    %c0_i32 = arith.constant 0 : i32
    %c0_i32_0 = arith.constant 0 : i32
    %c0_i32_1 = arith.constant 0 : i32
    return %arg0, %c0_i32, %c0_i32_0 : i32, i32, i32
  }
  func.func @transform_9(%arg0: i32) -> (i32, i32, i32) {
    %c0_i32 = arith.constant 0 : i32
    %c0_i32_0 = arith.constant 0 : i32
    %c0_i32_1 = arith.constant 0 : i32
    return %arg0, %c0_i32, %c0_i32_0 : i32, i32, i32
  }
}

</mosaic_0001>

<bundles_post_ra>
// kernel: local_discriminator_forward.1
= control target key start
LH: loop header
LB: loop body
LE: loop exit
PB: predicated region body
PF: predicated region fallthrough
CT: control target
= control target key end

     0   :  { %s10627_s0 = inlined_call_operand.hbm [shape: bf16[2,64,64], index: 0, kind: input, shape index: {}]   ;;  %s10628_s1 = inlined_call_operand.hbm [shape: bf16[64,64], index: 1, kind: input, shape index: {}]   ;;  %s10629_s2 = inlined_call_operand.hbm [shape: bf16[1024,128], index: 2, kind: input, shape index: {}]   ;;  %s10630_s3 = inlined_call_operand.hbm [shape: bf16[2048,256], index: 3, kind: input, shape index: {}]   ;;  %s10631_s4 = inlined_call_operand.hbm [shape: bf16[4096,1], index: 4, kind: input, shape index: {}]   ;;  %s10632_s5 = inlined_call_operand.hbm [shape: f32[2,64,64], index: 5, kind: output, shape index: {0}]   ;;  %s10633_s6 = inlined_call_operand.hbm [shape: f32[2,16,128], index: 6, kind: output, shape index: {1}]   ;;  %s10634_s7 = inlined_call_operand.hbm [shape: f32[2,9,256], index: 7, kind: output, shape index: {2}]   ;;  %s10635_s8 = inlined_call_operand.hbm [shape: f32[2,4,1], index: 8, kind: output, shape index: {3}]   ;;  %s10636_s9 = inlined_call_operand.hbm [shape: f32[2,1,1], index: 9, kind: output, shape index: {4}]  }
   0x1   :  { %10648 = sst [smem:[#allocation32_spill]] %s10627_s0 }
   0x2   :  { %10649 = sst [smem:[#allocation33_spill]] %s10628_s1 }
   0x3   :  { %10650 = sst [smem:[#allocation34_spill]] %s10629_s2 }
   0x4   :  { %10651 = sst [smem:[#allocation35_spill]] %s10630_s3 }
   0x5   :  { %10652 = sst [smem:[#allocation36_spill]] %s10631_s4 }
   0x6   :  { %15 = vsyncpa [#allocation9], 0 }
   0x7   :  { %17 = vsyncpa [#allocation9 + $0x1], 0 }
   0x8   :  { %18 = vsyncpa [#allocation12], 0 }
   0x9   :  { %19 = vsyncpa [#allocation15], 0 }
   0xa   :  { %20 = vsyncpa [#allocation10], 0 }
   0xb   :  { %22 = vsyncpa [#allocation10 + $0x1], 0 }
   0xc   :  { %23 = vsyncpa [#allocation19], 0 }
   0xd   :  { %25 = vsyncpa [#allocation19 + $0x1], 0 }
   0xe   :  { %26 = vsyncpa [#allocation22], 0 }
   0xf   :  { %28 = vsyncpa [#allocation22 + $0x1], 0  ;;  %s9944_s30 = smov 0   ;;  %s9946_s10 = smov 0  }
  0x10   :  { %s9948_s11 = smov 0   ;;  %s9950_s12 = smov 0  }
  0x11 LB: > { %10653 = sst [smem:[#allocation30_spill]] %s9860_s30  ;;  %s9965_s13 = sadd.s32 4294967295, %s9872_s12   ;;  %s9872_s12 = sphi %s9950_s12, %s10689_s12   ;;  %s9868_s11 = sphi %s9948_s11, %s10688_s11   ;;  %s9864_s10 = sphi %s9946_s10, %s10687_s10   ;;  %s9860_s30 = sphi %s9944_s30, %s10686_s30  }
  0x12   : > { %s10638_s14 = sadd.s32 4294967294, %s9872_s12   ;;  %p54_p0 = scmp.ne.s32.totalorder %s9864_s10, %s9860_s30 }
  0x13   : > { %p10637_p1 = scmp.eq.s32.totalorder %s9965_s13, 0  ;;  %p168_p3 = scmp.eq.s32.totalorder %s10638_s14, 1 }
  0x14   : > { %p7501_p5 = scmp.ge.s32.totalorder %s9872_s12, 1  ;;  %p279_p7 = scmp.lt.s32.totalorder %s9872_s12, 3 }
  0x15   : > { %p9976_p4 = por %p10637_p1, %p54_p0  ;;  %p9981_p6 = por %p168_p3, %p54_p0 }
  0x16   : > { %p9986_p8 = pnand %p7501_p5, %p279_p7  ;;  %s9874_s18 = smov [#allocation11]  }
  0x17   : > { %s10654_s15 = scalar_select %p9976_p4, 1, 0 }
  0x18   : > { %s10655_s16 = scalar_select %p9981_p6, 1, 0 }
  0x19   : > { %s10657_s17 = scalar_select %p9986_p8, 1, 0 }
  0x1a   : > { %10656 = sst [smem:[#allocation31_spill]] %s10655_s16  ;;  %s291_s19 = sshll.u32 %s9874_s18, 4  ;;  %s9990_s19 = int_to_ptr.vmem [resolvable:$true] %s291_s19 }
  0x1b   : > { %p8664_p9 = pneg %p9986_p8  ;;  %s9875_s21 = smov [#allocation14]  }
  0x1c   : > { %s317_s22 = sshll.u32 %s9875_s21, 4  ;;  %s10659_s1 = sld [smem:[#allocation33_spill]]  ;;  %s10001_s22 = int_to_ptr.vmem [resolvable:$true] %s317_s22 }
  0x1d   : > { %p9997_p11 = pnand %p8664_p9, %p10637_p1 }
  0x1f   : > { %p10011_p13 = pneg %p9997_p11 }
  0x22   : > { %s9536_s25 = scalar_lea.hbm %s10659_s1, 512 }
  0x23   : > { %p9537_p12 = scmp.ne.s32.totalorder %s10659_s1, %s9536_s25  ;;  %p9543_p5 = scmp.lt.u32.totalorder %s9536_s25, %s10659_s1 }
  0x25   : > { %p9539_p0 = pnand %p10011_p13, %p9537_p12 }
  0x27   : > { %p9540_p3 = pneg %p9539_p0 }
  0x29   : > { %p9545_p7 = pnand %p9543_p5, %p9540_p3 }
  0x2b   : > { %9548 = shalt.err (!%p9545_p7)
}
  0x2c   : > { %s9549_s21 = scalar_lea.vmem %s9990_s19, 512  ;;  %p9557_p2 = scmp.lt.s32.totalorder %s9990_s19, %s9990_s19 }
  0x2d   : > { %p9550_p9 = scmp.ne.s32.totalorder %s9990_s19, %s9549_s21  ;;  %p9558_p6 = scmp.lt.s32.totalorder %s9549_s21, %s9549_s21 }
  0x2f   : > { %p9552_p10 = pnand %p9550_p9, %p10011_p13  ;;  %p9559_p12 = por %p9558_p6, %p9557_p2 }
  0x31   : > { %p9553_p1 = pneg %p9552_p10 }
  0x33   : > { %p9560_p0 = pnand %p9559_p12, %p9553_p1 }
  0x35   : > { %9563 = shalt.err (!%p9560_p0)
}
  0x36   : > { %s10641_s23 = smov 64   ;;  %s10643_s24 = smov 4  }
  0x37   : > { %8667 = dma.hbm_to_vmem [thread:$0]  (!%p9997_p11), %s10659_s1, 512, %s9990_s19, [#allocation12], %s10641_s23, %s10641_s23, %s10643_s24  }
  0x38   : > { %s10661_s3 = sld [smem:[#allocation35_spill]] }
  0x3e   : > { %s9564_s18 = scalar_lea.hbm %s10661_s3, 32768 }
  0x3f   : > { %p9565_p1 = scmp.ne.s32.totalorder %s10661_s3, %s9564_s18  ;;  %p9571_p10 = scmp.lt.u32.totalorder %s9564_s18, %s10661_s3 }
  0x41   : > { %p9567_p2 = pnand %p9565_p1, %p10011_p13 }
  0x43   : > { %p9568_p6 = pneg %p9567_p2 }
  0x45   : > { %p9573_p3 = pnand %p9571_p10, %p9568_p6 }
  0x47   : > { %9576 = shalt.err (!%p9573_p3)
}
  0x48   : > { %s9577_s19 = scalar_lea.vmem %s10001_s22, 32768  ;;  %p9585_p12 = scmp.lt.s32.totalorder %s10001_s22, %s10001_s22 }
  0x49   : > { %p9578_p5 = scmp.ne.s32.totalorder %s10001_s22, %s9577_s19  ;;  %p9586_p0 = scmp.lt.s32.totalorder %s9577_s19, %s9577_s19 }
  0x4b   : > { %p9580_p7 = pnand %p9578_p5, %p10011_p13  ;;  %p9587_p1 = por %p9586_p0, %p9585_p12 }
  0x4d   : > { %p9581_p9 = pneg %p9580_p7 }
  0x4f   : > { %p9588_p2 = pnand %p9587_p1, %p9581_p9 }
  0x51   : > { %9591 = shalt.err (!%p9588_p2)
}
  0x52   : > { %s9878_s14 = smov 128   ;;  %s9879_s30 = smov 8  }
  0x53   : > { %8673 = dma.hbm_to_vmem [thread:$0]  (!%p9997_p11), %s10661_s3, 32768, %s10001_s22, [#allocation15], %s9878_s14, %s9878_s14, %s9879_s30  }
  0x54   : > { %s9880_s26 = smov [#allocation13]   ;;  %s9881_s29 = smov [#allocation16]  }
  0x55   : > { %s304_s27 = sshll.u32 %s9880_s26, 4  ;;  %s330_s18 = sshll.u32 %s9881_s29, 4  ;;  %s305_s27 = int_to_ptr.vmem [resolvable:$true] %s304_s27  ;;  %s10058_s18 = int_to_ptr.vmem [resolvable:$true] %s330_s18 }
  0x56   : > { %s10662_s2 = sld [smem:[#allocation34_spill]] }
  0x5c   : > { %s9592_s23 = scalar_lea.hbm %s10662_s2, 8192 }
  0x5d   : > { %p9593_p6 = scmp.ne.s32.totalorder %s10662_s2, %s9592_s23  ;;  %p9599_p5 = scmp.lt.u32.totalorder %s9592_s23, %s10662_s2 }
  0x5f   : > { %p9595_p10 = pnand %p9593_p6, %p10011_p13 }
  0x61   : > { %p9596_p3 = pneg %p9595_p10 }
  0x63   : > { %p9601_p7 = pnand %p9599_p5, %p9596_p3 }
  0x65   : > { %9604 = shalt.err (!%p9601_p7)
}
  0x66   : > { %s9605_s14 = scalar_lea.vmem %s305_s27, 8192  ;;  %p9613_p1 = scmp.lt.s32.totalorder %s305_s27, %s305_s27 }
  0x67   : > { %p9606_p9 = scmp.ne.s32.totalorder %s305_s27, %s9605_s14  ;;  %p9614_p2 = scmp.lt.s32.totalorder %s9605_s14, %s9605_s14 }
  0x69   : > { %p9608_p12 = pnand %p9606_p9, %p10011_p13  ;;  %p9615_p4 = por %p9614_p2, %p9613_p1 }
  0x6b   : > { %p9609_p0 = pneg %p9608_p12 }
  0x6d   : > { %p9616_p8 = pnand %p9615_p4, %p9609_p0 }
  0x6f   : > { %9619 = shalt.err (!%p9616_p8)
}
  0x70   : > { %s10663_s1 = smov 4   ;;  %s10664_s24 = smov 64  }
  0x71   : > { %8670 = dma.hbm_to_vmem [thread:$0]  (!%p9997_p11), %s10662_s2, 8192, %s305_s27, [#allocation12], %s10664_s24, %s10664_s24, %s10663_s1  }
  0x72   : > { %s10665_s4 = sld [smem:[#allocation36_spill]] }
  0x78   : > { %s9620_s29 = scalar_lea.hbm %s10665_s4, 32768 }
  0x79   : > { %p9621_p6 = scmp.ne.s32.totalorder %s10665_s4, %s9620_s29  ;;  %p9627_p10 = scmp.lt.u32.totalorder %s9620_s29, %s10665_s4 }
  0x7b   : > { %p9623_p4 = pnand %p9621_p6, %p10011_p13 }
  0x7d   : > { %p9624_p8 = pneg %p9623_p4 }
  0x7f   : > { %p9629_p3 = pnand %p9627_p10, %p9624_p8 }
  0x81   : > { %9632 = shalt.err (!%p9629_p3)
}
  0x82   : > { %s9633_s27 = scalar_lea.vmem %s10058_s18, 32768  ;;  %p9641_p12 = scmp.lt.s32.totalorder %s10058_s18, %s10058_s18 }
  0x83   : > { %p9634_p5 = scmp.ne.s32.totalorder %s10058_s18, %s9633_s27  ;;  %p9642_p0 = scmp.lt.s32.totalorder %s9633_s27, %s9633_s27 }
  0x85   : > { %p9636_p7 = pnand %p9634_p5, %p10011_p13  ;;  %p9643_p1 = por %p9642_p0, %p9641_p12 }
  0x87   : > { %p9637_p9 = pneg %p9636_p7 }
  0x89   : > { %p9644_p2 = pnand %p9643_p1, %p9637_p9 }
  0x8b   : > { %9647 = shalt.err (!%p9644_p2)
}
  0x8c   : > { %8676 = dma.hbm_to_vmem [thread:$0]  (!%p9997_p11), %s10665_s4, 32768, %s10058_s18, [#allocation15], %s10664_s24, %s10664_s24, %s10663_s1  }
  0x8d   : > { %s10108_s20 = sadd.s32 1, %s9872_s12   ;;  %s41_s23 = sadd.s32 1, %s9868_s11 }
  0x8e   : > { %s38_s28 = ssub.s32 %s9872_s12, %s10108_s20  ;;  %p48_p6 = scmp.ne.s32.totalorder %s9868_s11, %s9864_s10 }
  0x8f   : > { %p39_p13 = scmp.eq.s32.totalorder %s38_s28, 0  ;;  %p49_p4 = scmp.eq.s32.totalorder %s9872_s12, 0 }
  0x90   : > { %p10666_p10 = scmp.eq.s32.totalorder %s9965_s13, 1  ;;  %p8701_p5 = scmp.lt.s32.totalorder %s9872_s12, 2 }
  0x91   : > { %s10117_s25 = scalar_select %p39_p13, %s9868_s11, %s41_s23  }
  0x92   : > { %p50_p8 = por %p49_p4, %p48_p6  ;;  %p10121_p3 = por %p10666_p10, %p48_p6 }
  0x93   : > { %s344_s29 = sand.u32 1, %s9868_s11   ;;  %s8138_s18 = sshll.u32 %s9872_s12, 9 }
  0x94   : > { %s7507_s21 = sshll.u32 %s344_s29, 5  ;;  %s10668_s0 = sld [smem:[#allocation32_spill]] }
  0x95   : > { %s348_s27 = scalar_lea.vmem [#allocation8], %s7507_s21  ;;  %p10135_p11 = pnand %p8701_p5, %p50_p8 }
  0x96   : > { %s355_s14 = sshll.u32 %s348_s27, 4  ;;  %s10139_s28 = scalar_lea.sflag [#allocation9], %s344_s29  ;;  %s10133_s14 = int_to_ptr.vmem [resolvable:$true] %s355_s14 }
  0x97   : > { %p9650_p9 = pneg %p10135_p11 }
  0x9a   : > { %s10131_s22 = scalar_lea.hbm %s10668_s0, %s8138_s18  ;;  %s9653_s19 = scalar_lea.hbm %s10668_s0, 1024 }
  0x9b   : > { %s9648_s23 = scalar_lea.hbm %s10131_s22, 512  ;;  %p9654_p1 = scmp.lt.u32.totalorder %s10131_s22, %s10668_s0 }
  0x9c   : > { %p9649_p7 = scmp.ne.s32.totalorder %s10131_s22, %s9648_s23  ;;  %p9655_p2 = scmp.lt.u32.totalorder %s9653_s19, %s9648_s23 }
  0x9d   : > { %p9657_p6 = scmp.lt.u32.totalorder %s9648_s23, %s10131_s22 }
  0x9e   : > { %p9651_p12 = pnand %p9650_p9, %p9649_p7  ;;  %p9656_p13 = por %p9655_p2, %p9654_p1 }
  0xa0   : > { %p9652_p0 = pneg %p9651_p12  ;;  %p9658_p4 = por %p9657_p6, %p9656_p13 }
  0xa2   : > { %p9659_p8 = pnand %p9658_p4, %p9652_p0 }
  0xa4   : > { %9662 = shalt.err (!%p9659_p8)
}
  0xa5   : > { %s9663_s29 = scalar_lea.vmem %s10133_s14, 512  ;;  %s9882_s21 = smov [#allocation8]  }
  0xa6   : > { %p9664_p10 = scmp.ne.s32.totalorder %s10133_s14, %s9663_s29  ;;  %s9668_s18 = sshll.u32 %s9882_s21, 4  ;;  %s9669_s18 = int_to_ptr.vmem [resolvable:$false] %s9668_s18 }
  0xa7   : > { %s9670_s16 = scalar_lea.vmem %s9669_s18, 1024  ;;  %p9671_p12 = scmp.lt.s32.totalorder %s10133_s14, %s9669_s18 }
  0xa8   : > { %p9666_p5 = pnand %p9664_p10, %p9650_p9  ;;  %p9672_p1 = scmp.lt.s32.totalorder %s9670_s16, %s9663_s29 }
  0xaa   : > { %p9667_p7 = pneg %p9666_p5  ;;  %p9673_p2 = por %p9672_p1, %p9671_p12 }
  0xac   : > { %p9674_p13 = pnand %p9673_p2, %p9667_p7 }
  0xae   : > { %9677 = shalt.err (!%p9674_p13)
}
  0xaf   : > { %8680 = dma.hbm_to_vmem [thread:$0]  (!%p10135_p11), %s10131_s22, 512, %s10133_s14, %s10139_s28, %s10664_s24, %s10664_s24, %s10663_s1  }
  0xb0   : > { %p10670_p9 = scmp.ne.s32.totalorder %s10657_s17, 0 }
  0xb1   : > { %s10173_s23 = sand.u32 (!%p10670_p9), 1, %s9864_s10   ;;  %p10671_p0 = scmp.ne.s32.totalorder (!%p10670_p9), %s10654_s15, 0 }
  0xb2   : > { %367 = sbr.rel (%p10670_p9) target bundleno = 2632 (0xa48), region = 40  ;;  %s7511_s19 = sshll.u32 (!%p10670_p9), %s10173_s23, 5 }
  0xb3   : > { %s370_s27 = scalar_lea.sflag (!%p10670_p9), [#allocation9], %s10173_s23  ;;  %s373_s30 = scalar_lea.vmem (!%p10670_p9), [#allocation8], %s7511_s19 }
  0xb9   : > { %9835 = dma.done.wait (%p10671_p0), %s370_s27, 512  }
  0xba   : > { %9837 = vsyncadd (%p10671_p0), %s370_s27, 4294966784  ;;  %p10672_p11 = scmp.eq.s32.totalorder %s9965_s13, 0 }
  0xbc   : > { %9839 = dma.done.wait (%p10672_p11), [#allocation12], 8704   ;;  %p10673_p6 = pmov %p10672_p11 }
  0xbe   : > { %9841 = vsyncadd (%p10673_p6), [#allocation12], 4294958592  ;;  %p10674_p4 = pmov %p10673_p6 }
  0xc0   : > { %9843 = dma.done.wait (%p10674_p4), [#allocation15], 65536   ;;  %p10675_p8 = pmov %p10674_p4 }
  0xc1   : > { %v8753_v0 = vld [vmem:[#allocation11] sm:$0xff]   ;;  %v8754_v1 = vld [vmem:[#allocation11 + $0x8] sm:$0xff]   ;;  %v8755_v2 = vld [vmem:[#allocation11 + $0x10] sm:$0xff]   ;;  %vm504_vm0 = vcmask 523264   ;;  %v9883_v8 = vmov 0.0   ;;  %s9884_s15 = smov 64  }
  0xc2   : > { %9845 = vsyncadd (%p10675_p8), [#allocation15], 4294901760  ;;  %8590 = vmatprep.subr.bf16.mxu0 %v8753_v0  ;;  %v8757_v3 = vld [vmem:[%s373_s30] sm:$0xff]   ;;  %v8756_v4 = vld [vmem:[#allocation11 + $0x18] sm:$0xff]   ;;  %695 = vst.msk [vmem:[#allocation2 + $0x38] sm:$0xff] %vm504_vm0, %v9883_v8  ;;  %vm700_vm1 = vcmask 519168  }
  0xc3   : > { %8591 = vmatpush3.bf16.msra.mxu0 %v8753_v0  ;;  %8598 = vmatprep.mubr.msk.bf16.mxu0 %vm504_vm0, %v8757_v3  ;;  %v8758_v5 = vld [vmem:[%s373_s30 + $0x8] sm:$0xff]   ;;  %v8759_v6 = vld [vmem:[%s373_s30 + $0x10] sm:$0xff]   ;;  %v8760_v7 = vld [vmem:[%s373_s30 + $0x18] sm:$0xff]   ;;  %696 = vst.msk [vmem:[#allocation2 + $0x40] sm:$0xff] %vm504_vm0, %v9883_v8  ;;  %s7516_s17 = sshll.u32 %s10173_s23, 6  ;;  %vm718_vm2 = vcmask 1043968  }
  0xc4   : > { %8592 = vmatprep.subr.bf16.mxu0 %v8754_v1  ;;  %697 = vst.msk [vmem:[#allocation2 + $0x48] sm:$0xff] %vm504_vm0, %v9883_v8  ;;  %688 = vst.msk [vmem:[#allocation2] sm:$0xff] %vm504_vm0, %v9883_v8  ;;  %v8761_v12 = vld [vmem:[#allocation13 + $0x40] sm:$0xff]   ;;  %v8763_v15 = vld [vmem:[#allocation13 + $0x48] sm:$0xff]   ;;  %s10269_s1 = scalar_lea.vmem [#allocation17], %s7516_s17  ;;  %vm794_vm11 = vcmask 523268  }
  0xc5   : > { %689 = vst.msk [vmem:[#allocation2 + $0x8] sm:$0xff] %vm504_vm0, %v9883_v8  ;;  %690 = vst.msk [vmem:[#allocation2 + $0x10] sm:$0xff] %vm504_vm0, %v9883_v8  ;;  %v8762_v13 = vld [vmem:[#allocation13] sm:$0xff]   ;;  %8150 = vmatprep.subr.bf16.mxu1 %v8761_v12  ;;  %v8764_v19 = vld [vmem:[#allocation13 + $0x8] sm:$0xff]   ;;  %vm802_vm12 = vcmask 1048068   ;;  %s7517_s24 = sshll.u32 %s10173_s23, 4 }
  0xc6   : > { %691 = vst.msk [vmem:[#allocation2 + $0x18] sm:$0xff] %vm504_vm0, %v9883_v8  ;;  %692 = vst.msk [vmem:[#allocation2 + $0x20] sm:$0xff] %vm504_vm0, %v9883_v8  ;;  %8151 = vmatpush3.bf16.msra.mxu1 %v8762_v13  ;;  %s10388_s22 = scalar_lea.vmem [#allocation18], %s7517_s24  ;;  %vm3953_vm15 = vcmask 1040384   ;;  %s10411_s14 = scalar_lea.vmem [#allocation20], %s7511_s19 }
  0xc7   : > { %8593 = vmatpush3.bf16.msra.mxu0 %v8754_v1  ;;  %693 = vst.msk [vmem:[#allocation2 + $0x28] sm:$0xff] %vm504_vm0, %v9883_v8  ;;  %694 = vst.msk [vmem:[#allocation2 + $0x30] sm:$0xff] %vm504_vm0, %v9883_v8  ;;  %8152 = vmatprep.subr.bf16.mxu1 %v8763_v15  ;;  %s7519_s28 = sshll.u32 %s10173_s23, 2  ;;  %s7245_s21 = sshll.u32 %s10411_s14, 4  ;;  %s10442_s21 = int_to_ptr.vmem [resolvable:$true] %s7245_s21 }
  0xc8   : > { %8594 = vmatprep.subr.bf16.mxu0 %v8755_v2  ;;  %698 = vst.msk [vmem:[#allocation2 + $0x50] sm:$0xff] %vm504_vm0, %v9883_v8  ;;  %699 = vst.msk [vmem:[#allocation2 + $0x58] sm:$0xff] %vm504_vm0, %v9883_v8  ;;  %s10438_s29 = scalar_lea.vmem [#allocation21], %s7519_s28  ;;  %s10647_s18 = sand.u32 1, %s9965_s13  }
  0xc9   : > { %1808 = vst [vmem:[#allocation3] sm:$0xff] %v9883_v8  ;;  %1809 = vst [vmem:[#allocation3 + $0x8] sm:$0xff] %v9883_v8  ;;  %s8140_s16 = sshll.u32 %s9965_s13, 8  ;;  %s7229_s19 = sshll.u32 %s10388_s22, 4  ;;  %s10452_s19 = int_to_ptr.vmem [resolvable:$true] %s7229_s19 }
  0xca   : > { %1810 = vst [vmem:[#allocation3 + $0x10] sm:$0xff] %v9883_v8  ;;  %1811 = vst [vmem:[#allocation3 + $0x18] sm:$0xff] %v9883_v8  ;;  %8153 = vmatpush3.bf16.msra.mxu1 %v8764_v19  ;;  %s10456_s17 = scalar_lea.sflag [#allocation19], %s10647_s18  ;;  %s9678_s24 = scalar_lea.vmem %s10452_s19, 256 }
  0xcb   : > { %8595 = vmatpush3.bf16.msra.mxu0 %v8755_v2  ;;  %1812 = vst [vmem:[#allocation3 + $0x20] sm:$0xf] %v9883_v8  ;;  %4029 = vst [vmem:[#allocation4] sm:$0xff] %v9883_v8  ;;  %v713_v10 = vld [vmem:[#allocation2 + $0x1] ss:$2 sm:$0xf]  ;;  %p9679_p10 = scmp.ne.s32.totalorder %s10452_s19, %s9678_s24 }
  0xcc   : > { %8596 = vmatprep.subr.bf16.mxu0 %v8756_v4  ;;  %4030 = vst [vmem:[#allocation4 + $0x8] sm:$0xff] %v9883_v8  ;;  %4031 = vst [vmem:[#allocation4 + $0x10] sm:$0xff] %v9883_v8  ;;  %v724_v9 = vld [vmem:[#allocation2 + $0x3] ss:$2 sm:$0xf] }
  0xcd   : > { %4032 = vst [vmem:[#allocation4 + $0x18] sm:$0xff] %v9883_v8  ;;  %4033 = vst [vmem:[#allocation4 + $0x20] sm:$0xff] %v9883_v8  ;;  %726 = vrot.lane.b32.xlu0 %v724_v9, %s9884_s15  ;;  %v721_v11 = vld [vmem:[#allocation2 + $0x2] ss:$2 sm:$0xf]  ;;  %p9680_p5 = pnand %p9679_p10, %p10121_p3 }
  0xce   : > { %4034 = vst [vmem:[#allocation4 + $0x28] sm:$0xff] %v9883_v8  ;;  %4035 = vst [vmem:[#allocation4 + $0x30] sm:$0x1] %v9883_v8  ;;  %v710_v14 = vld [vmem:[#allocation2] ss:$2 sm:$0xf] }
  0xcf   : > { %8597 = vmatpush3.bf16.msra.mxu0 %v8756_v4  ;;  %4036 = vst [vmem:[#allocation4 + $0x38] sm:$0x1] %v9883_v8  ;;  %701 = vst.msk [vmem:[#allocation2 + $0x60] sm:$0xf] %vm700_vm1, %v9883_v8  ;;  %p9681_p7 = pneg %p9680_p5 }
  0xd0   : > { %722 = vst.msk [vmem:[#allocation5 + $0x8] sm:$0xf] %vm700_vm1, %v721_v11  ;;  %711 = vst.msk [vmem:[#allocation5] sm:$0xf] %vm700_vm1, %v710_v14 }
  0xd1   : > { %715 = vrot.lane.b32.xlu0 %v713_v10, %s9884_s15 }
  0xd2   : > { %8599 = vmatmul.mubr.msk.bf16.vlgmr.msra.gmra.mrb[0].mxu0 %vm504_vm0, %v8758_v5 }
  0xd3   : > { %8602 = vmatprep.mubr.msk.bf16.mxu0 %vm504_vm0, %v8759_v6 }
  0xda   : > { %8603 = vmatmul.mubr.msk.bf16.gmra.mrb[4].mxu0 %vm504_vm0, %v8760_v7 }
 0x1a5   : > { %v10211_v16 = vpop.f32.mrb[0].mxu0 }
 0x1a6   : > { %v607_v17 = vmul.f32 %v10211_v16, %v10211_v16  ;;  %v10216_v18 = vpop.f32.mrb[1].mxu0  ;;  %v585_v22 = vsel %vm504_vm0, %v10211_v16, 0.0 }
 0x1a7   : > { %v605_v20 = vmul.f32 %v10216_v18, %v10216_v18  ;;  %v10220_v21 = vpop.f32.mrb[2].mxu0  ;;  %v582_v24 = vsel %vm504_vm0, %v10216_v18, 0.0 }
 0x1a8   : > { %v10224_v23 = vpop.f32.mrb[3].mxu0  ;;  %v608_v25 = vmul.f32 %v10220_v21, %v10220_v21  ;;  %v616_v28 = vsel %vm504_vm0, %v607_v17, 0.0  ;;  %v587_v29 = vsel %vm504_vm0, %v10220_v21, 0.0 }
 0x1a9   : > { %v583_v26 = vsel %vm504_vm0, %v10224_v23, 0.0  ;;  %v606_v27 = vmul.f32 %v10224_v23, %v10224_v23  ;;  %v613_v31 = vsel %vm504_vm0, %v605_v20, 0.0 }
 0x1aa   : > { %v584_v30 = vadd.f32 %v583_v26, %v582_v24  ;;  %v618_v35 = vsel %vm504_vm0, %v608_v25, 0.0 }
 0x1ab   : > { %v614_v32 = vsel %vm504_vm0, %v606_v27, 0.0 }
 0x1ac   : > { %v586_v33 = vadd.f32 %v585_v22, %v584_v30  ;;  %v615_v34 = vadd.f32 %v614_v32, %v613_v31 }
 0x1ad   : > { %v10240_v36 = vpop.f32.mrb[4].mxu0 }
 0x1ae   : > { %v617_v37 = vadd.f32 %v616_v28, %v615_v34  ;;  %v593_v38 = vsel %vm504_vm0, %v10240_v36, 0.0  ;;  %v611_v39 = vmul.f32 %v10240_v36, %v10240_v36  ;;  %v10246_v40 = vpop.f32.mrb[5].mxu0  ;;  %v588_v41 = vadd.f32 %v587_v29, %v586_v33  ;;  %v727_v29 = vpop.permute.xlu0 %726 }
 0x1af   : > { %v589_v42 = vsel %vm504_vm0, %v10246_v40, 0.0  ;;  %v609_v43 = vmul.f32 %v10246_v40, %v10246_v40  ;;  %v8605_v44 = vpop.f32.mrb[6].mxu0  ;;  %729 = vst.msk [vmem:[#allocation5 + $0x8] sm:$0xf] %vm718_vm2, %v727_v29 }
 0x1b0   : > { %v624_v45 = vsel %vm504_vm0, %v611_v39, 0.0  ;;  %v590_v46 = vadd.f32 %v589_v42, %v588_v41  ;;  %v619_v47 = vadd.f32 %v618_v35, %v617_v37  ;;  %v595_v48 = vsel %vm504_vm0, %v8605_v44, 0.0  ;;  %v570_v49 = vpop.f32.mrb[7].mxu0  ;;  %v8766_v37 = vld [vmem:[#allocation13 + $0x10] sm:$0xff]  }
 0x1b1   : > { %v620_v50 = vsel %vm504_vm0, %v609_v43, 0.0  ;;  %v612_v51 = vmul.f32 %v8605_v44, %v8605_v44  ;;  %v591_v52 = vsel %vm504_vm0, %v570_v49, 0.0  ;;  %v610_v53 = vmul.f32 %v570_v49, %v570_v49 }
 0x1b2   : > { %v621_v54 = vadd.f32 %v620_v50, %v619_v47  ;;  %v592_v55 = vadd.f32 %v591_v52, %v590_v46  ;;  %v716_v30 = vpop.permute.xlu0 %715  ;;  %v8769_v50 = vld [vmem:[#allocation13 + $0x18] sm:$0xff]  }
 0x1b3   : > { %v626_v56 = vsel %vm504_vm0, %v612_v51, 0.0  ;;  %v622_v57 = vsel %vm504_vm0, %v610_v53, 0.0  ;;  %719 = vst.msk [vmem:[#allocation5] sm:$0xf] %vm718_vm2, %v716_v30  ;;  %v8770_v53 = vld [vmem:[#allocation13 + $0x80] sm:$0xff]  }
 0x1b4   : > { %v594_v58 = vadd.f32 %v593_v38, %v592_v55  ;;  %v623_v59 = vadd.f32 %v622_v57, %v621_v54 }
 0x1b6   : > { %v596_v60 = vadd.f32 %v595_v48, %v594_v58  ;;  %v625_v61 = vadd.f32 %v624_v45, %v623_v59  ;;  %v8767_v48 = vld [vmem:[#allocation13 + $0x58] sm:$0xff]   ;;  %v8771_v58 = vld [vmem:[#allocation13 + $0x60] sm:$0xff]   ;;  %v8772_v59 = vld [vmem:[#allocation13 + $0xc8] sm:$0xff]  }
 0x1b8   : > { %v597_v62 = vrot.slane %v596_v60, 4  ;;  %v627_v63 = vadd.f32 %v626_v56, %v625_v61  ;;  %v8774_v61 = vld [vmem:[#allocation13 + $0x88] sm:$0xff]  }
 0x1ba   : > { %v598_v0 = vadd.f32 %v597_v62, %v596_v60  ;;  %v628_v1 = vrot.slane %v627_v63, 4  ;;  %v8773_v60 = vld [vmem:[#allocation13 + $0x20] sm:$0xff]  }
 0x1bc   : > { %v599_v2 = vrot.slane %v598_v0, 2  ;;  %v629_v3 = vadd.f32 %v628_v1, %v627_v63  ;;  %v8775_v1 = vld [vmem:[#allocation13 + $0x68] sm:$0xff]  }
 0x1be   : > { %v600_v4 = vadd.f32 %v599_v2, %v598_v0  ;;  %v630_v5 = vrot.slane %v629_v3, 2 }
 0x1c0   : > { %v601_v6 = vrot.slane %v600_v4, 1  ;;  %v631_v7 = vadd.f32 %v630_v5, %v629_v3  ;;  %v8776_v3 = vld [vmem:[#allocation13 + $0xd0] sm:$0xff]  }
 0x1c2   : > { %v602_v8 = vadd.f32 %v601_v6, %v600_v4  ;;  %v632_v9 = vrot.slane %v631_v7, 1  ;;  %v8777_v4 = vld [vmem:[#allocation13 + $0x28] sm:$0xff]  }
 0x1c4   : > { %v604_v10 = vmul.f32 0.015625, %v602_v8  ;;  %v633_v11 = vadd.f32 %v632_v9, %v631_v7  ;;  %v8778_v7 = vld [vmem:[#allocation13 + $0x90] sm:$0xff]   ;;  %v8780_v9 = vld [vmem:[#allocation13 + $0xd8] sm:$0xff]  }
 0x1c5   : > { %v8779_v8 = vld [vmem:[#allocation13 + $0x70] sm:$0xff]  }
 0x1c6   : > { %v634_v12 = vmul.f32 0.015625, %v633_v11  ;;  %v635_v13 = vmul.f32 %v604_v10, %v604_v10  ;;  %v643_v14 = vsub.f32 %v570_v49, %v604_v10  ;;  %v644_v15 = vsub.f32 %v10240_v36, %v604_v10  ;;  %v8765_v36 = vld [vmem:[#allocation13 + $0x50] sm:$0xff]   ;;  %v8768_v49 = vld [vmem:[#allocation13 + $0xc0] sm:$0xff]  }
 0x1c7   : > { %v641_v17 = vsub.f32 %v10220_v21, %v604_v10  ;;  %v638_v19 = vsub.f32 %v10216_v18, %v604_v10  ;;  %v639_v20 = vsub.f32 %v10224_v23, %v604_v10  ;;  %v642_v22 = vsub.f32 %v10246_v40, %v604_v10  ;;  %8154 = vmatprep.subr.bf16.mxu1 %v8765_v36 }
 0x1c8   : > { %v636_v24 = vsub.f32 %v634_v12, %v635_v13  ;;  %v640_v25 = vsub.f32 %v10211_v16, %v604_v10  ;;  %v645_v26 = vsub.f32 %v8605_v44, %v604_v10  ;;  %8155 = vmatpush3.bf16.msra.mxu1 %v8766_v37  ;;  %8172 = vmatprep.subr.bf16.mxu0 %v8768_v49  ;;  %v8781_v13 = vld [vmem:[#allocation13 + $0x30] sm:$0xff]  }
 0x1c9   : > { %8156 = vmatprep.subr.bf16.mxu1 %v8767_v48  ;;  %8173 = vmatpush3.bf16.msra.mxu0 %v8770_v53  ;;  %v1065_v49 = vld [vmem:[#allocation2 + $0x5d] ss:$2 sm:$0xf] }
 0x1ca   : > { %v637_v27 = vmax.f32 %v636_v24, 0.0  ;;  %8174 = vmatprep.subr.bf16.mxu0 %v8772_v59  ;;  %v8786_v24 = vld [vmem:[#allocation13 + $0xa0] sm:$0xff]  }
 0x1cc   : > { %v646_v28 = vadd.f32 1e-05, %v637_v27  ;;  %8157 = vmatpush3.bf16.msra.mxu1 %v8769_v50  ;;  %v8787_v27 = vld [vmem:[#allocation13 + $0xe8] sm:$0xff]  }
 0x1cd   : > { %8158 = vmatprep.subr.bf16.mxu1 %v8771_v58  ;;  %8175 = vmatpush3.bf16.msra.mxu0 %v8774_v61  ;;  %v8800_v58 = vld [vmem:[#allocation13 + $0x1c0] sm:$0xff]  }
 0x1ce   : > { %9524 = vrsqrt.f32 %v646_v28  ;;  %8176 = vmatprep.subr.bf16.mxu0 %v8776_v3  ;;  %v8788_v28 = vld [vmem:[#allocation13 + $0x140] sm:$0xff]  }
 0x1d0   : > { %8159 = vmatpush3.bf16.msra.mxu1 %v8773_v60 }
 0x1d1   : > { %8160 = vmatprep.subr.bf16.mxu1 %v8775_v1  ;;  %8177 = vmatpush3.bf16.msra.mxu0 %v8778_v7 }
 0x1d2   : > { %8178 = vmatprep.subr.bf16.mxu0 %v8780_v9 }
 0x1d4   : > { %8161 = vmatpush3.bf16.msra.mxu1 %v8777_v4 }
 0x1d5   : > { %8162 = vmatprep.subr.bf16.mxu1 %v8779_v8 }
 0x1d8   : > { %v9525_v21 = vpop.eup %9524  ;;  %8163 = vmatpush3.bf16.msra.mxu1 %v8781_v13 }
 0x1d9   : > { %v653_v18 = vmul.f32 %v9525_v21, %v643_v14  ;;  %v654_v31 = vmul.f32 %v9525_v21, %v644_v15  ;;  %v651_v23 = vmul.f32 %v9525_v21, %v641_v17  ;;  %v648_v32 = vmul.f32 %v9525_v21, %v638_v19  ;;  %v8782_v14 = vld [vmem:[#allocation13 + $0x98] sm:$0xff]   ;;  %v8784_v17 = vld [vmem:[#allocation13 + $0xe0] sm:$0xff]  }
 0x1da   : > { %v649_v33 = vmul.f32 %v9525_v21, %v639_v20  ;;  %v652_v34 = vmul.f32 %v9525_v21, %v642_v22  ;;  %v650_v35 = vmul.f32 %v9525_v21, %v640_v25  ;;  %v655_v16 = vmul.f32 %v9525_v21, %v645_v26  ;;  %v8783_v15 = vld [vmem:[#allocation13 + $0x78] sm:$0xff]   ;;  %8179 = vmatpush3.bf16.msra.mxu0 %v8782_v14 }
 0x1db   : > { %vm661_vm3 = vcmp.ge.f32.partialorder %v653_v18, 0.0  ;;  %vm662_vm4 = vcmp.ge.f32.partialorder %v654_v31, 0.0  ;;  %v669_v38 = vmul.f32 0.2, %v653_v18  ;;  %v670_v39 = vmul.f32 0.2, %v654_v31  ;;  %8164 = vmatprep.subr.bf16.mxu1 %v8783_v15  ;;  %8180 = vmatprep.subr.bf16.mxu0 %v8784_v17 }
 0x1dc   : > { %vm659_vm5 = vcmp.ge.f32.partialorder %v651_v23, 0.0  ;;  %v667_v40 = vmul.f32 0.2, %v651_v23  ;;  %vm656_vm6 = vcmp.ge.f32.partialorder %v648_v32, 0.0  ;;  %v664_v41 = vmul.f32 0.2, %v648_v32 }
 0x1dd   : > { %v677_v42 = vsel %vm661_vm3, %v653_v18, %v669_v38  ;;  %v678_v43 = vsel %vm662_vm4, %v654_v31, %v670_v39  ;;  %vm657_vm7 = vcmp.ge.f32.partialorder %v649_v33, 0.0  ;;  %v665_v44 = vmul.f32 0.2, %v649_v33  ;;  %v8785_v22 = vld [vmem:[#allocation13 + $0x38] sm:$0xff]   ;;  %v8789_v18 = vld [vmem:[#allocation13 + $0xa8] sm:$0xff]   ;;  %v8791_v31 = vld [vmem:[#allocation13 + $0xf0] sm:$0xff]  }
 0x1de   : > { %685 = vst.msk [vmem:[%s10269_s1 + $0x28] sm:$0xff] %vm504_vm0, %v677_v42  ;;  %686 = vst.msk [vmem:[%s10269_s1 + $0x30] sm:$0xff] %vm504_vm0, %v678_v43  ;;  %v675_v45 = vsel %vm659_vm5, %v651_v23, %v667_v40  ;;  %v672_v46 = vsel %vm656_vm6, %v648_v32, %v664_v41  ;;  %vm660_vm8 = vcmp.ge.f32.partialorder %v652_v34, 0.0  ;;  %v668_v47 = vmul.f32 0.2, %v652_v34  ;;  %8165 = vmatpush3.bf16.msra.mxu1 %v8785_v22  ;;  %v8795_v41 = vld [vmem:[#allocation13 + $0xf8] sm:$0xff]  }
 0x1df   : > { %707 = vst.msk [vmem:[#allocation2 + $0x3d] sm:$0xff] %vm504_vm0, %v677_v42  ;;  %708 = vst.msk [vmem:[#allocation2 + $0x47] sm:$0xff] %vm504_vm0, %v678_v43  ;;  %v673_v51 = vsel %vm657_vm7, %v649_v33, %v665_v44  ;;  %vm658_vm9 = vcmp.ge.f32.partialorder %v650_v35, 0.0  ;;  %v666_v52 = vmul.f32 0.2, %v650_v35  ;;  %vm663_vm10 = vcmp.ge.f32.partialorder %v655_v16, 0.0  ;;  %8181 = vmatpush3.bf16.msra.mxu0 %v8786_v24  ;;  %8194 = vmatprep.subr.bf16.mxu1 %v8788_v28 }
 0x1e0   : > { %705 = vst.msk [vmem:[#allocation2 + $0x29] sm:$0xff] %vm504_vm0, %v675_v45  ;;  %683 = vst.msk [vmem:[%s10269_s1 + $0x18] sm:$0xff] %vm504_vm0, %v675_v45  ;;  %v676_v54 = vsel %vm660_vm8, %v652_v34, %v668_v47  ;;  %v671_v55 = vmul.f32 0.2, %v655_v16  ;;  %8182 = vmatprep.subr.bf16.mxu0 %v8787_v27  ;;  %vm4246_vm3 = vcmask 1046532  }
 0x1e1   : > { %702 = vst.msk [vmem:[#allocation2 + $0xb] sm:$0xff] %vm504_vm0, %v672_v46  ;;  %680 = vst.msk [vmem:[%s10269_s1] sm:$0xff] %vm504_vm0, %v672_v46  ;;  %v674_v56 = vsel %vm658_vm9, %v650_v35, %v666_v52  ;;  %v8797_v46 = vld [vmem:[#allocation13 + $0xb8] sm:$0xff]   ;;  %vm4051_vm9 = vcmask 1041408  }
 0x1e2   : > { %703 = vst.msk [vmem:[#allocation2 + $0x15] sm:$0xff] %vm504_vm0, %v673_v51  ;;  %681 = vst.msk [vmem:[%s10269_s1 + $0x8] sm:$0xff] %vm504_vm0, %v673_v51  ;;  %v679_v57 = vsel %vm663_vm10, %v655_v16, %v671_v55  ;;  %v8793_v16 = vld [vmem:[#allocation13 + $0xb0] sm:$0xff]   ;;  %vm7159_vm10 = vcmask 3072  }
 0x1e3   : > { %684 = vst.msk [vmem:[%s10269_s1 + $0x20] sm:$0xff] %vm504_vm0, %v676_v54  ;;  %706 = vst.msk [vmem:[#allocation2 + $0x33] sm:$0xff] %vm504_vm0, %v676_v54  ;;  %8183 = vmatpush3.bf16.msra.mxu0 %v8789_v18 }
 0x1e4   : > { %682 = vst.msk [vmem:[%s10269_s1 + $0x10] sm:$0xff] %vm504_vm0, %v674_v56  ;;  %704 = vst.msk [vmem:[#allocation2 + $0x1f] sm:$0xff] %vm504_vm0, %v674_v56  ;;  %8184 = vmatprep.subr.bf16.mxu0 %v8791_v31 }
 0x1e5   : > { %687 = vst.msk [vmem:[%s10269_s1 + $0x38] sm:$0xff] %vm504_vm0, %v679_v57  ;;  %709 = vst.msk [vmem:[#allocation2 + $0x51] sm:$0xff] %vm504_vm0, %v679_v57  ;;  %vm4093_vm0 = vcmask 1044484  }
 0x1e6   : > { %v985_v62 = vld [vmem:[#allocation2 + $0x3f] ss:$2 sm:$0xf]  ;;  %v1009_v21 = vld [vmem:[#allocation2 + $0x49] ss:$2 sm:$0xf] }
 0x1e7   : > { %v906_v63 = vld [vmem:[#allocation2 + $0x2b] ss:$2 sm:$0xf]  ;;  %v987_v2 = vrot.slane %v985_v62, 4  ;;  %v1011_v34 = vrot.slane %v1009_v21, 4  ;;  %8185 = vmatpush3.bf16.msra.mxu0 %v8793_v16 }
 0x1e8   : > { %v898_v0 = vld [vmem:[#allocation2 + $0x29] ss:$2 sm:$0xf]  ;;  %908 = vrot.lane.b32.xlu1 %v906_v63, %s9884_s15  ;;  %v973_v11 = vld [vmem:[#allocation2 + $0x3d] ss:$2 sm:$0xf]  ;;  %8186 = vmatprep.subr.bf16.mxu0 %v8795_v41 }
 0x1e9   : > { %900 = vrot.lane.b32.xlu0 %v898_v0, %s9884_s15  ;;  %v744_v5 = vld [vmem:[#allocation2 + $0xd] ss:$2 sm:$0xf]  ;;  %v796_v6 = vld [vmem:[#allocation2 + $0x15] ss:$2 sm:$0xf] }
 0x1ea   : > { %v798_v10 = vrot.slane %v796_v6, 4  ;;  %v922_v12 = vld [vmem:[#allocation2 + $0x35] ss:$2 sm:$0xf]  ;;  %v975_v19 = vrot.slane %v973_v11, 4  ;;  %v1067_v0 = vrot.slane %v1065_v49, 4 }
 0x1eb   : > { %v734_v20 = vld [vmem:[#allocation2 + $0xb] ss:$2 sm:$0xf]  ;;  %v833_v25 = vld [vmem:[#allocation2 + $0x21] ss:$2 sm:$0xf]  ;;  %8187 = vmatpush3.bf16.msra.mxu0 %v8797_v46 }
 0x1ec   : > { %988 = vrot.lane.b32.xlu1 %v987_v2, %s9884_s15  ;;  %v809_v26 = vld [vmem:[#allocation2 + $0x17] ss:$2 sm:$0xf]  ;;  %v835_v29 = vrot.slane %v833_v25, 4  ;;  %8216 = vmatprep.subr.bf16.mxu0 %v8800_v58 }
 0x1ed   : > { %746 = vrot.lane.b32.xlu0 %v744_v5, %s9884_s15  ;;  %v811_v30 = vrot.slane %v809_v26, 4  ;;  %v914_v23 = vld [vmem:[#allocation2 + $0x33] ss:$2 sm:$0xf] }
 0x1ee   : > { %v821_v32 = vld [vmem:[#allocation2 + $0x1f] ss:$2 sm:$0xf]  ;;  %v904_v33 = vld [vmem:[#allocation2 + $0x2a] ss:$2 sm:$0xf] }
 0x1ef   : > { %905 = vst.msk [vmem:[#allocation5 + $0x48] sm:$0xf] %vm700_vm1, %v904_v33  ;;  %v896_v35 = vld [vmem:[#allocation2 + $0x28] ss:$2 sm:$0xf]  ;;  %v823_v42 = vrot.slane %v821_v32, 4 }
 0x1f0   : > { %799 = vrot.lane.b32.xlu1 %v798_v10, %s9884_s15  ;;  %897 = vst.msk [vmem:[#allocation5 + $0x40] sm:$0xf] %vm700_vm1, %v896_v35  ;;  %v980_v36 = vld [vmem:[#allocation2 + $0x3e] ss:$2 sm:$0xf] }
 0x1f1   : > { %924 = vrot.lane.b32.xlu0 %v922_v12, %s9884_s15  ;;  %v741_v37 = vld [vmem:[#allocation2 + $0xc] ss:$2 sm:$0xf]  ;;  %v997_v38 = vld [vmem:[#allocation2 + $0x47] ss:$2 sm:$0xf] }
 0x1f2   : > { %v982_v39 = vrot.slane %v980_v36, 4  ;;  %742 = vst.msk [vmem:[#allocation5 + $0x18] sm:$0xf] %vm700_vm1, %v741_v37  ;;  %v790_v40 = vld [vmem:[#allocation2 + $0x14] ss:$2 sm:$0xf] }
 0x1f3   : > { %v764_v43 = vld [vmem:[#allocation2 + $0x17] ss:$2 sm:$0xf]  ;;  %v792_v44 = vrot.slane %v790_v40, 4  ;;  %v999_v54 = vrot.slane %v997_v38, 4 }
 0x1f4   : > { %976 = vrot.lane.b32.xlu1 %v975_v19, %s9884_s15  ;;  %v920_v45 = vld [vmem:[#allocation2 + $0x34] ss:$2 sm:$0xf]  ;;  %984 = vst.msk [vmem:[#allocation5 + $0x48] sm:$0xf0] %vm794_vm11, %v982_v39 }
 0x1f5   : > { %736 = vrot.lane.b32.xlu0 %v734_v20, %s9884_s15  ;;  %921 = vst.msk [vmem:[#allocation5 + $0x58] sm:$0xf] %vm700_vm1, %v920_v45  ;;  %v968_v47 = vld [vmem:[#allocation2 + $0x3c] ss:$2 sm:$0xf] }
 0x1f6   : > { %v731_v48 = vld [vmem:[#allocation2 + $0xa] ss:$2 sm:$0xf]  ;;  %795 = vst.msk [vmem:[#allocation5] sm:$0xf0] %vm794_vm11, %v792_v44  ;;  %v970_v50 = vrot.slane %v968_v47, 4 }
 0x1f7   : > { %732 = vst.msk [vmem:[#allocation5 + $0x10] sm:$0xf] %vm700_vm1, %v731_v48  ;;  %v828_v51 = vld [vmem:[#allocation2 + $0x20] ss:$2 sm:$0xf] }
 0x1f8   : > { %836 = vrot.lane.b32.xlu1 %v835_v29, %s9884_s15  ;;  %v830_v52 = vrot.slane %v828_v51, 4  ;;  %v804_v53 = vld [vmem:[#allocation2 + $0x16] ss:$2 sm:$0xf]  ;;  %972 = vst.msk [vmem:[#allocation5 + $0x40] sm:$0xf0] %vm794_vm11, %v970_v50 }
 0x1f9   : > { %812 = vrot.lane.b32.xlu0 %v811_v30, %s9884_s15  ;;  %v942_v55 = vld [vmem:[#allocation2 + $0x3f] ss:$2 sm:$0xf]  ;;  %v806_v56 = vrot.slane %v804_v53, 4 }
 0x1fa   : > { %v1004_v57 = vld [vmem:[#allocation2 + $0x48] ss:$2 sm:$0xf]  ;;  %832 = vst.msk [vmem:[#allocation5 + $0x18] sm:$0xf0] %vm794_vm11, %v830_v52 }
 0x1fb   : > { %v1006_v59 = vrot.slane %v1004_v57, 4  ;;  %v912_v60 = vld [vmem:[#allocation2 + $0x32] ss:$2 sm:$0xf]  ;;  %808 = vst.msk [vmem:[#allocation5 + $0x8] sm:$0xf0] %vm794_vm11, %v806_v56 }
 0x1fc   : > { %1012 = vrot.lane.b32.xlu1 %v1011_v34, %s9884_s15  ;;  %v861_v61 = vld [vmem:[#allocation2 + $0x2b] ss:$2 sm:$0xf]  ;;  %913 = vst.msk [vmem:[#allocation5 + $0x50] sm:$0xf] %vm700_vm1, %v912_v60 }
 0x1fd   : > { %916 = vrot.lane.b32.xlu0 %v914_v23, %s9884_s15  ;;  %v816_v62 = vld [vmem:[#allocation2 + $0x1e] ss:$2 sm:$0xf]  ;;  %v761_v63 = vld [vmem:[#allocation2 + $0x16] ss:$2 sm:$0xf] }
 0x1fe   : > { %1008 = vst.msk [vmem:[#allocation5 + $0x58] sm:$0xf0] %vm794_vm11, %v1006_v59  ;;  %v818_v1 = vrot.slane %v816_v62, 4  ;;  %v992_v2 = vld [vmem:[#allocation2 + $0x46] ss:$2 sm:$0xf] }
 0x1ff   : > { %762 = vst.msk [vmem:[#allocation5 + $0x28] sm:$0xf] %vm700_vm1, %v761_v63  ;;  %v754_v3 = vld [vmem:[#allocation2 + $0x15] ss:$2 sm:$0xf]  ;;  %v994_v4 = vrot.slane %v992_v2, 4 }
 0x200   : > { %824 = vrot.lane.b32.xlu1 %v823_v42, %s9884_s15  ;;  %v939_v5 = vld [vmem:[#allocation2 + $0x3e] ss:$2 sm:$0xf]  ;;  %820 = vst.msk [vmem:[#allocation5 + $0x10] sm:$0xf0] %vm794_vm11, %v818_v1  ;;  %v863_v10 = vrot.slane %v861_v61, 4 }
 0x201   : > { %766 = vrot.lane.b32.xlu0 %v764_v43, %s9884_s15  ;;  %940 = vst.msk [vmem:[#allocation5 + $0x68] sm:$0xf] %vm700_vm1, %v939_v5  ;;  %v1059_v6 = vld [vmem:[#allocation2 + $0x5c] ss:$2 sm:$0xf]  ;;  %v8790_v1 = vld [vmem:[#allocation13 + $0x100] sm:$0xff]  }
 0x202   : > { %v751_v7 = vld [vmem:[#allocation2 + $0x14] ss:$2 sm:$0xf]  ;;  %996 = vst.msk [vmem:[#allocation5 + $0x50] sm:$0xf0] %vm794_vm11, %v994_v4  ;;  %v1061_v8 = vrot.slane %v1059_v6, 4 }
 0x203   : > { %752 = vst.msk [vmem:[#allocation5 + $0x20] sm:$0xf] %vm700_vm1, %v751_v7  ;;  %v855_v9 = vld [vmem:[#allocation2 + $0x2a] ss:$2 sm:$0xf] }
 0x204   : > { %1000 = vrot.lane.b32.xlu1 %v999_v54, %s9884_s15  ;;  %v1037_v11 = vld [vmem:[#allocation2 + $0x53] ss:$2 sm:$0xf]  ;;  %v857_v12 = vrot.slane %v855_v9, 4  ;;  %1063 = vst.msk [vmem:[#allocation5 + $0x78] sm:$0xf0] %vm794_vm11, %v1061_v8 }
 0x205   : > { %944 = vrot.lane.b32.xlu0 %v942_v55, %s9884_s15  ;;  %v929_v13 = vld [vmem:[#allocation2 + $0x3c] ss:$2 sm:$0xf]  ;;  %v932_v14 = vld [vmem:[#allocation2 + $0x3d] ss:$2 sm:$0xf] }
 0x206   : > { %930 = vst.msk [vmem:[#allocation5 + $0x60] sm:$0xf] %vm700_vm1, %v929_v13  ;;  %v1031_v15 = vld [vmem:[#allocation2 + $0x52] ss:$2 sm:$0xf]  ;;  %v1039_v28 = vrot.slane %v1037_v11, 4 }
 0x207   : > { %v781_v17 = vld [vmem:[#allocation2 + $0x20] ss:$2 sm:$0xf]  ;;  %859 = vst.msk [vmem:[#allocation5 + $0x28] sm:$0xf0] %vm794_vm11, %v857_v12  ;;  %v1033_v19 = vrot.slane %v1031_v15, 4 }
 0x208   : > { %1068 = vrot.lane.b32.xlu1 %v1067_v0, %s9884_s15  ;;  %782 = vst.msk [vmem:[#allocation5 + $0x38] sm:$0xf] %vm700_vm1, %v781_v17  ;;  %v841_v20 = vld [vmem:[#allocation2 + $0x28] ss:$2 sm:$0xf]  ;;  %v8794_v9 = vld [vmem:[#allocation13 + $0x108] sm:$0xff]  }
 0x209   : > { %756 = vrot.lane.b32.xlu0 %v754_v3, %s9884_s15  ;;  %v843_v22 = vrot.slane %v841_v20, 4  ;;  %v959_v24 = vld [vmem:[#allocation2 + $0x48] ss:$2 sm:$0xf]  ;;  %1035 = vst.msk [vmem:[#allocation5 + $0x68] sm:$0xf0] %vm794_vm11, %v1033_v19 }
 0x20a   : > { %v847_v25 = vld [vmem:[#allocation2 + $0x29] ss:$2 sm:$0xf]  ;;  %960 = vst.msk [vmem:[#allocation5 + $0x78] sm:$0xf] %vm700_vm1, %v959_v24  ;;  %v8792_v3 = vld [vmem:[#allocation13 + $0x148] sm:$0xff]  }
 0x20b   : > { %v1017_v26 = vld [vmem:[#allocation2 + $0x50] ss:$2 sm:$0xf]  ;;  %v771_v27 = vld [vmem:[#allocation2 + $0x1e] ss:$2 sm:$0xf] }
 0x20c   : > { %864 = vrot.lane.b32.xlu1 %v863_v10, %s9884_s15  ;;  %845 = vst.msk [vmem:[#allocation5 + $0x20] sm:$0xf0] %vm794_vm11, %v843_v22  ;;  %v1019_v29 = vrot.slane %v1017_v26, 4  ;;  %v883_v30 = vld [vmem:[#allocation2 + $0x34] ss:$2 sm:$0xf] }
 0x20d   : > { %934 = vrot.lane.b32.xlu0 %v932_v14, %s9884_s15  ;;  %772 = vst.msk [vmem:[#allocation5 + $0x30] sm:$0xf] %vm700_vm1, %v771_v27  ;;  %v885_v21 = vrot.slane %v883_v30, 4  ;;  %v949_v18 = vld [vmem:[#allocation2 + $0x46] ss:$2 sm:$0xf] }
 0x20e   : > { %v784_v31 = vld [vmem:[#allocation2 + $0x21] ss:$2 sm:$0xf]  ;;  %1021 = vst.msk [vmem:[#allocation5 + $0x60] sm:$0xf0] %vm794_vm11, %v1019_v29  ;;  %v849_v32 = vrot.slane %v847_v25, 4 }
 0x20f   : > { %950 = vst.msk [vmem:[#allocation5 + $0x70] sm:$0xf] %vm700_vm1, %v949_v18  ;;  %v869_v23 = vld [vmem:[#allocation2 + $0x32] ss:$2 sm:$0xf]  ;;  %v8796_v10 = vld [vmem:[#allocation13 + $0x150] sm:$0xff]   ;;  %vm10393_vm1 = vmor %vm3953_vm15, %vm4093_vm0 }
 0x210   : > { %1040 = vrot.lane.b32.xlu1 %v1039_v28, %s9884_s15  ;;  %887 = vst.msk [vmem:[#allocation5 + $0x38] sm:$0xf0] %vm794_vm11, %v885_v21  ;;  %v962_v33 = vld [vmem:[#allocation2 + $0x49] ss:$2 sm:$0xf]  ;;  %v871_v34 = vrot.slane %v869_v23, 4 }
 0x211   : > { %786 = vrot.lane.b32.xlu0 %v784_v31, %s9884_s15  ;;  %v1023_v35 = vld [vmem:[#allocation2 + $0x51] ss:$2 sm:$0xf]  ;;  %v774_v16 = vld [vmem:[#allocation2 + $0x1f] ss:$2 sm:$0xf] }
 0x212   : > { %873 = vst.msk [vmem:[#allocation5 + $0x30] sm:$0xf0] %vm794_vm11, %v871_v34  ;;  %v889_v36 = vld [vmem:[#allocation2 + $0x35] ss:$2 sm:$0xf]  ;;  %v1025_v37 = vrot.slane %v1023_v35, 4 }
 0x213   : > { %v1051_v38 = vld [vmem:[#allocation2 + $0x5b] ss:$2 sm:$0xf]  ;;  %v1045_v39 = vld [vmem:[#allocation2 + $0x5a] ss:$2 sm:$0xf] }
 0x214   : > { %850 = vrot.lane.b32.xlu1 %v849_v32, %s9884_s15  ;;  %v875_v40 = vld [vmem:[#allocation2 + $0x33] ss:$2 sm:$0xf]  ;;  %v1047_v41 = vrot.slane %v1045_v39, 4  ;;  %v891_v43 = vrot.slane %v889_v36, 4  ;;  %v1053_v45 = vrot.slane %v1051_v38, 4 }
 0x215   : > { %964 = vrot.lane.b32.xlu0 %v962_v33, %s9884_s15  ;;  %v952_v42 = vld [vmem:[#allocation2 + $0x47] ss:$2 sm:$0xf]  ;;  %v877_v44 = vrot.slane %v875_v40, 4  ;;  %v8802_v22 = vld [vmem:[#allocation13 + $0x180] sm:$0xff]   ;;  %v8804_v26 = vld [vmem:[#allocation13 + $0x1c8] sm:$0xff]  }
 0x216   : > { %1049 = vst.msk [vmem:[#allocation5 + $0x70] sm:$0xf0] %vm794_vm11, %v1047_v41  ;;  %v8798_v13 = vld [vmem:[#allocation13 + $0x110] sm:$0xff]   ;;  %v8799_v14 = vld [vmem:[#allocation13 + $0x158] sm:$0xff]   ;;  %v8803_v27 = vld [vmem:[#allocation13 + $0x160] sm:$0xff]  }
 0x217   : > { %v8801_v25 = vld [vmem:[#allocation13 + $0x118] sm:$0xff]   ;;  %v8806_v30 = vld [vmem:[#allocation13 + $0x188] sm:$0xff]   ;;  %v8805_v21 = vld [vmem:[#allocation13 + $0x120] sm:$0xff]  }
 0x218   : > { %1026 = vrot.lane.b32.xlu1 %v1025_v37, %s9884_s15  ;;  %v8808_v18 = vld [vmem:[#allocation13 + $0x1d0] sm:$0xff]   ;;  %v8807_v31 = vld [vmem:[#allocation13 + $0x168] sm:$0xff]   ;;  %v8812_v35 = vld [vmem:[#allocation13 + $0x1d8] sm:$0xff]  }
 0x219   : > { %776 = vrot.lane.b32.xlu0 %v774_v16, %s9884_s15  ;;  %v8810_v33 = vld [vmem:[#allocation13 + $0x190] sm:$0xff]   ;;  %v8809_v34 = vld [vmem:[#allocation13 + $0x128] sm:$0xff]   ;;  %v8814_v40 = vld [vmem:[#allocation13 + $0x198] sm:$0xff]  }
 0x21a   : > { %v8811_v16 = vld [vmem:[#allocation13 + $0x170] sm:$0xff]  }
 0x21c   : > { %892 = vrot.lane.b32.xlu1 %v891_v43, %s9884_s15  ;;  %v8816_v43 = vld [vmem:[#allocation13 + $0x1e0] sm:$0xff]  }
 0x21d   : > { %954 = vrot.lane.b32.xlu0 %v952_v42, %s9884_s15  ;;  %v8813_v42 = vld [vmem:[#allocation13 + $0x130] sm:$0xff]  }
 0x220   : > { %878 = vrot.lane.b32.xlu1 %v877_v44, %s9884_s15  ;;  %v8815_v44 = vld [vmem:[#allocation13 + $0x178] sm:$0xff]  }
 0x224   : > { %1054 = vrot.lane.b32.xlu1 %v1053_v45, %s9884_s15  ;;  %s10450_s15 = scalar_lea.hbm %s10633_s6, %s8140_s16 }
 0x25a   : > { %v909_v46 = vpop.permute.xlu1 %908 }
 0x25b   : > { %v901_v47 = vpop.permute.xlu0 %900  ;;  %911 = vst.msk [vmem:[#allocation5 + $0x48] sm:$0xf] %vm718_vm2, %v909_v46 }
 0x25c   : > { %903 = vst.msk [vmem:[#allocation5 + $0x40] sm:$0xf] %vm718_vm2, %v901_v47  ;;  %v8818_v47 = vld [vmem:[#allocation13 + $0x1a0] sm:$0xff]  }
 0x25e   : > { %v989_v48 = vpop.permute.xlu1 %988 }
 0x25f   : > { %v747_v49 = vpop.permute.xlu0 %746  ;;  %991 = vst.msk [vmem:[#allocation5 + $0x48] sm:$0xf0] %vm802_vm12, %v989_v48  ;;  %v8817_v48 = vld [vmem:[#allocation13 + $0x138] sm:$0xff]  }
 0x260   : > { %749 = vst.msk [vmem:[#allocation5 + $0x18] sm:$0xf] %vm718_vm2, %v747_v49  ;;  %v8819_v49 = vld [vmem:[#allocation13 + $0x1e8] sm:$0xff]  }
 0x262   : > { %v800_v50 = vpop.permute.xlu1 %799 }
 0x263   : > { %v925_v51 = vpop.permute.xlu0 %924  ;;  %803 = vst.msk [vmem:[#allocation5] sm:$0xf0] %vm802_vm12, %v800_v50 }
 0x264   : > { %927 = vst.msk [vmem:[#allocation5 + $0x58] sm:$0xf] %vm718_vm2, %v925_v51 }
 0x266   : > { %v977_v52 = vpop.permute.xlu1 %976  ;;  %v1081_v62 = vld [vmem:[#allocation5 + $0x48] sm:$0xff] }
 0x267   : > { %v737_v53 = vpop.permute.xlu0 %736  ;;  %979 = vst.msk [vmem:[#allocation5 + $0x40] sm:$0xf0] %vm802_vm12, %v977_v52 }
 0x268   : > { %739 = vst.msk [vmem:[#allocation5 + $0x10] sm:$0xf] %vm718_vm2, %v737_v53  ;;  %v8820_v53 = vld [vmem:[#allocation13 + $0x1a8] sm:$0xff]  }
 0x26a   : > { %v837_v54 = vpop.permute.xlu1 %836  ;;  %v1072_v0 = vld [vmem:[#allocation5] sm:$0xff] }
 0x26b   : > { %v813_v55 = vpop.permute.xlu0 %812  ;;  %839 = vst.msk [vmem:[#allocation5 + $0x18] sm:$0xf0] %vm802_vm12, %v837_v54 }
 0x26c   : > { %815 = vst.msk [vmem:[#allocation5 + $0x8] sm:$0xf0] %vm802_vm12, %v813_v55  ;;  %v8821_v55 = vld [vmem:[#allocation13 + $0x1f0] sm:$0xff]  }
 0x26e   : > { %v1013_v56 = vpop.permute.xlu1 %1012  ;;  %v1080_v58 = vld [vmem:[#allocation5 + $0x40] sm:$0xff] }
 0x26f   : > { %v917_v57 = vpop.permute.xlu0 %916  ;;  %1015 = vst.msk [vmem:[#allocation5 + $0x58] sm:$0xf0] %vm802_vm12, %v1013_v56  ;;  %v1088_v2 = vpack.c.bf16 %v1080_v58, %v1072_v0 }
 0x270   : > { %919 = vst.msk [vmem:[#allocation5 + $0x50] sm:$0xf] %vm718_vm2, %v917_v57 }
 0x272   : > { %v825_v59 = vpop.permute.xlu1 %824  ;;  %v1075_v6 = vld [vmem:[#allocation5 + $0x18] sm:$0xff] }
 0x273   : > { %v767_v60 = vpop.permute.xlu0 %766  ;;  %v1073_v61 = vld [vmem:[#allocation5 + $0x8] sm:$0xff]  ;;  %827 = vst.msk [vmem:[#allocation5 + $0x10] sm:$0xf0] %vm802_vm12, %v825_v59  ;;  %v8822_v59 = vld [vmem:[#allocation13 + $0x1b0] sm:$0xff]  }
 0x274   : > { %769 = vst.msk [vmem:[#allocation5 + $0x28] sm:$0xf] %vm718_vm2, %v767_v60  ;;  %v1089_v63 = vpack.c.bf16 %v1081_v62, %v1073_v61  ;;  %v8823_v61 = vld [vmem:[#allocation13 + $0x1f8] sm:$0xff]  }
 0x275   : > { %v8824_v62 = vld [vmem:[#allocation13 + $0x1b8] sm:$0xff]  }
 0x276   : > { %1640 = vmatprep.mubr.bf16.mxu1 %v1089_v63  ;;  %v1001_v4 = vpop.permute.xlu1 %1000  ;;  %v1083_v7 = vld [vmem:[#allocation5 + $0x58] sm:$0xff] }
 0x277   : > { %1641 = vmatmul.mubr.bf16.vlgmr.msra.gmra.mrb[0].mxu1 %v1088_v2  ;;  %v945_v5 = vpop.permute.xlu0 %944  ;;  %1003 = vst.msk [vmem:[#allocation5 + $0x50] sm:$0xf0] %vm802_vm12, %v1001_v4  ;;  %v1091_v8 = vpack.c.bf16 %v1083_v7, %v1075_v6  ;;  %v8827_v2 = vld [vmem:[#allocation14 + $0x4] ss:$8 sps:$4 sm:$0xff]   ;;  %v8830_v4 = vld [vmem:[#allocation14 + $0x14] ss:$8 sps:$4 sm:$0xff]  }
 0x278   : > { %8195 = vmatpush3.bf16.msra.mxu1 %v8790_v1  ;;  %947 = vst.msk [vmem:[#allocation5 + $0x68] sm:$0xf] %vm718_vm2, %v945_v5  ;;  %v8828_v5 = vld [vmem:[#allocation14 + $0x10] ss:$8 sps:$4 sm:$0xff]   ;;  %v8833_v6 = vld [vmem:[#allocation14 + $0x24] ss:$8 sps:$4 sm:$0xff]  }
 0x279   : > { %8196 = vmatprep.subr.bf16.mxu1 %v8792_v3  ;;  %1681 = vmatprep.mubr.bf16.mxu0 %v1091_v8  ;;  %v8825_v3 = vld [vmem:[#allocation14] ss:$8 sps:$4 sm:$0xff]   ;;  %v8836_v8 = vld [vmem:[#allocation14 + $0x34] ss:$8 sps:$4 sm:$0xff]  }
 0x27a   : > { %v1069_v11 = vpop.permute.xlu1 %1068  ;;  %v1074_v19 = vld [vmem:[#allocation5 + $0x10] sm:$0xff]  ;;  %v8831_v7 = vld [vmem:[#allocation14 + $0x20] ss:$8 sps:$4 sm:$0xff]  }
 0x27b   : > { %v757_v12 = vpop.permute.xlu0 %756  ;;  %1071 = vst.msk [vmem:[#allocation5 + $0x78] sm:$0xf0] %vm802_vm12, %v1069_v11  ;;  %v1819_v11 = vld [vmem:[#allocation3 + $0x1] sm:$0x7] }
 0x27c   : > { %8197 = vmatpush3.bf16.msra.mxu1 %v8794_v9  ;;  %759 = vst.msk [vmem:[#allocation5 + $0x20] sm:$0xf] %vm718_vm2, %v757_v12  ;;  %v8834_v9 = vld [vmem:[#allocation14 + $0x30] ss:$8 sps:$4 sm:$0xff]   ;;  %v8837_v12 = vld [vmem:[#allocation14 + $0x40] ss:$8 sps:$4 sm:$0xff]  }
 0x27d   : > { %8198 = vmatprep.subr.bf16.mxu1 %v8796_v10  ;;  %v8839_v10 = vld [vmem:[#allocation14 + $0x44] ss:$8 sps:$4 sm:$0xff]   ;;  %1820 = vst [vmem:[#allocation6 + $0x8] sm:$0x7] %v1819_v11 }
 0x27e   : > { %v865_v15 = vpop.permute.xlu1 %864  ;;  %v1082_v20 = vld [vmem:[#allocation5 + $0x50] sm:$0xff] }
 0x27f   : > { %v935_v17 = vpop.permute.xlu0 %934  ;;  %867 = vst.msk [vmem:[#allocation5 + $0x28] sm:$0xf0] %vm802_vm12, %v865_v15  ;;  %v1090_v24 = vpack.c.bf16 %v1082_v20, %v1074_v19  ;;  %v8845_v15 = vld [vmem:[#allocation14 + $0x64] ss:$8 sps:$4 sm:$0xff]   ;;  %v8848_v19 = vld [vmem:[#allocation14 + $0x74] ss:$8 sps:$4 sm:$0xff]  }
 0x280   : > { %8199 = vmatpush3.bf16.msra.mxu1 %v8798_v13  ;;  %937 = vst.msk [vmem:[#allocation5 + $0x60] sm:$0xf] %vm718_vm2, %v935_v17  ;;  %v8842_v13 = vld [vmem:[#allocation14 + $0x54] ss:$8 sps:$4 sm:$0xff]   ;;  %v8843_v17 = vld [vmem:[#allocation14 + $0x60] ss:$8 sps:$4 sm:$0xff]  }
 0x281   : > { %8200 = vmatprep.subr.bf16.mxu1 %v8799_v14  ;;  %1682 = vmatmul.mubr.bf16.vlgmr.msra.gmra.mrb[8].mxu0 %v1090_v24  ;;  %v8840_v14 = vld [vmem:[#allocation14 + $0x50] ss:$8 sps:$4 sm:$0xff]  }
 0x282   : > { %v1041_v28 = vpop.permute.xlu1 %1040  ;;  %8217 = vmatpush3.bf16.msra.mxu0 %v8802_v22  ;;  %v1817_v20 = vld [vmem:[#allocation3] sm:$0x7]  ;;  %v1823_v24 = vld [vmem:[#allocation3 + $0x3] sm:$0x7] }
 0x283   : > { %v787_v29 = vpop.permute.xlu0 %786  ;;  %1043 = vst.msk [vmem:[#allocation5 + $0x68] sm:$0xf0] %vm802_vm12, %v1041_v28  ;;  %8218 = vmatprep.subr.bf16.mxu0 %v8804_v26  ;;  %1818 = vst [vmem:[#allocation6] sm:$0x7] %v1817_v20  ;;  %v8846_v22 = vld [vmem:[#allocation14 + $0x70] ss:$8 sps:$4 sm:$0xff]  }
 0x284   : > { %8201 = vmatpush3.bf16.msra.mxu1 %v8801_v25  ;;  %789 = vst.msk [vmem:[#allocation5 + $0x38] sm:$0xf] %vm718_vm2, %v787_v29  ;;  %v8851_v25 = vld [vmem:[#allocation14 + $0x84] ss:$8 sps:$4 sm:$0xff]   ;;  %1824 = vst [vmem:[#allocation6 + $0x18] sm:$0x7] %v1823_v24 }
 0x285   : > { %8202 = vmatprep.subr.bf16.mxu1 %v8803_v27  ;;  %v8849_v26 = vld [vmem:[#allocation14 + $0x80] ss:$8 sps:$4 sm:$0xff]   ;;  %v8854_v27 = vld [vmem:[#allocation14 + $0x94] ss:$8 sps:$4 sm:$0xff]   ;;  %v8852_v28 = vld [vmem:[#allocation14 + $0x90] ss:$8 sps:$4 sm:$0xff]  }
 0x286   : > { %v851_v23 = vpop.permute.xlu1 %850  ;;  %8219 = vmatpush3.bf16.msra.mxu0 %v8806_v30  ;;  %v1077_v38 = vld [vmem:[#allocation5 + $0x28] sm:$0xff] }
 0x287   : > { %v965_v32 = vpop.permute.xlu0 %964  ;;  %853 = vst.msk [vmem:[#allocation5 + $0x20] sm:$0xf0] %vm802_vm12, %v851_v23  ;;  %8220 = vmatprep.subr.bf16.mxu0 %v8808_v18  ;;  %v8857_v29 = vld [vmem:[#allocation14 + $0xa4] ss:$8 sps:$4 sm:$0xff]   ;;  %v8855_v30 = vld [vmem:[#allocation14 + $0xa0] ss:$8 sps:$4 sm:$0xff]  }
 0x288   : > { %8203 = vmatpush3.bf16.msra.mxu1 %v8805_v21  ;;  %967 = vst.msk [vmem:[#allocation5 + $0x78] sm:$0xf] %vm718_vm2, %v965_v32  ;;  %v8860_v21 = vld [vmem:[#allocation14 + $0xb4] ss:$8 sps:$4 sm:$0xff]   ;;  %v8858_v23 = vld [vmem:[#allocation14 + $0xb0] ss:$8 sps:$4 sm:$0xff]  }
 0x289   : > { %8204 = vmatprep.subr.bf16.mxu1 %v8807_v31 }
 0x28a   : > { %v1027_v36 = vpop.permute.xlu1 %1026  ;;  %8221 = vmatpush3.bf16.msra.mxu0 %v8810_v33  ;;  %v1085_v39 = vld [vmem:[#allocation5 + $0x68] sm:$0xff] }
 0x28b   : > { %v777_v37 = vpop.permute.xlu0 %776  ;;  %1029 = vst.msk [vmem:[#allocation5 + $0x60] sm:$0xf0] %vm802_vm12, %v1027_v36  ;;  %v1093_v41 = vpack.c.bf16 %v1085_v39, %v1077_v38  ;;  %8222 = vmatprep.subr.bf16.mxu0 %v8812_v35  ;;  %v8861_v36 = vld [vmem:[#allocation14 + $0xc0] ss:$8 sps:$4 sm:$0xff]   ;;  %v8864_v38 = vld [vmem:[#allocation14 + $0xd0] ss:$8 sps:$4 sm:$0xff]  }
 0x28c   : > { %8205 = vmatpush3.bf16.msra.mxu1 %v8809_v34  ;;  %779 = vst.msk [vmem:[#allocation5 + $0x30] sm:$0xf] %vm718_vm2, %v777_v37  ;;  %v8863_v34 = vld [vmem:[#allocation14 + $0xc4] ss:$8 sps:$4 sm:$0xff]   ;;  %v8866_v37 = vld [vmem:[#allocation14 + $0xd4] ss:$8 sps:$4 sm:$0xff]  }
 0x28d   : > { %8206 = vmatprep.subr.bf16.mxu1 %v8811_v16  ;;  %1722 = vmatprep.mubr.bf16.mxu1 %v1093_v41  ;;  %v8869_v39 = vld [vmem:[#allocation14 + $0xe4] ss:$8 sps:$4 sm:$0xff]   ;;  %v2007_v41 = vld [vmem:[#allocation3 + $0x1f] sm:$0x7] }
 0x28e   : > { %v893_v45 = vpop.permute.xlu1 %892  ;;  %8223 = vmatpush3.bf16.msra.mxu0 %v8814_v40  ;;  %v1076_v51 = vld [vmem:[#allocation5 + $0x20] sm:$0xff] }
 0x28f   : > { %v955_v46 = vpop.permute.xlu0 %954  ;;  %895 = vst.msk [vmem:[#allocation5 + $0x38] sm:$0xf0] %vm802_vm12, %v893_v45  ;;  %8224 = vmatprep.subr.bf16.mxu0 %v8816_v43  ;;  %v1087_v58 = vld [vmem:[#allocation5 + $0x78] sm:$0xff] }
 0x290   : > { %8207 = vmatpush3.bf16.msra.mxu1 %v8813_v42  ;;  %957 = vst.msk [vmem:[#allocation5 + $0x70] sm:$0xf] %vm718_vm2, %v955_v46  ;;  %v2001_v42 = vld [vmem:[#allocation3 + $0x1e] sm:$0x7]  ;;  %v2019_v46 = vld [vmem:[#allocation3 + $0x21] sm:$0x7] }
 0x291   : > { %8208 = vmatprep.subr.bf16.mxu1 %v8815_v44  ;;  %v2009_v44 = vrot.slane %v2007_v41, 2  ;;  %v2003_v45 = vrot.slane %v2001_v42, 2  ;;  %vm4245_vm2 = vcmask 1042432  }
 0x292   : > { %v879_v50 = vpop.permute.xlu1 %878  ;;  %8225 = vmatpush3.bf16.msra.mxu0 %v8818_v47  ;;  %v1084_v52 = vld [vmem:[#allocation5 + $0x60] sm:$0xff]  ;;  %vm10399_vm4 = vmor %vm4245_vm2, %vm4246_vm3 }
 0x293   : > { %881 = vst.msk [vmem:[#allocation5 + $0x30] sm:$0xf0] %vm802_vm12, %v879_v50  ;;  %v1092_v54 = vpack.c.bf16 %v1084_v52, %v1076_v51  ;;  %8226 = vmatprep.subr.bf16.mxu0 %v8819_v49  ;;  %v8867_v49 = vld [vmem:[#allocation14 + $0xe0] ss:$8 sps:$4 sm:$0xff]   ;;  %v8872_v50 = vld [vmem:[#allocation14 + $0xf4] ss:$8 sps:$4 sm:$0xff]  }
 0x294   : > { %8209 = vmatpush3.bf16.msra.mxu1 %v8817_v48  ;;  %v2021_v51 = vrot.slane %v2019_v46, 2  ;;  %2011 = vst [vmem:[#allocation6 + $0xe8] ss:$-124 sps:$4 sm:$0xc1] %v2009_v44  }
 0x295   : > { %3609 = vmatprep.subr.bf16.mxu1 %v8827_v2  ;;  %2005 = vst [vmem:[#allocation6 + $0xe0] ss:$-124 sps:$4 sm:$0xc1] %v2003_v45  }
 0x296   : > { %v1055_v56 = vpop.permute.xlu1 %1054  ;;  %8227 = vmatpush3.bf16.msra.mxu0 %v8820_v53  ;;  %v1079_v57 = vld [vmem:[#allocation5 + $0x38] sm:$0xff]  ;;  %2023 = vst [vmem:[#allocation6 + $0xf8] ss:$-124 sps:$4 sm:$0xc1] %v2021_v51  }
 0x297   : > { %1723 = vmatmul.mubr.bf16.vlgmr.msra.gmra.mrb[4].mxu1 %v1092_v54  ;;  %1057 = vst.msk [vmem:[#allocation5 + $0x70] sm:$0xf0] %vm802_vm12, %v1055_v56  ;;  %8228 = vmatprep.subr.bf16.mxu0 %v8821_v55  ;;  %v1095_v60 = vpack.c.bf16 %v1087_v58, %v1079_v57  ;;  %v1821_v53 = vld [vmem:[#allocation3 + $0x2] sm:$0x7] }
 0x298   : > { %3610 = vmatpush1.bf16.msra.mxu1 %v8825_v3  ;;  %v2013_v54 = vld [vmem:[#allocation3 + $0x20] sm:$0x7]  ;;  %1822 = vst [vmem:[#allocation6 + $0x10] sm:$0x7] %v1821_v53 }
 0x299   : > { %1763 = vmatprep.mubr.bf16.mxu0 %v1095_v60  ;;  %3611 = vmatprep.subr.bf16.mxu1 %v8830_v4  ;;  %v2015_v57 = vrot.slane %v2013_v54, 2  ;;  %v8875_v60 = vld [vmem:[#allocation14 + $0x104] ss:$8 sps:$4 sm:$0xff]  }
 0x29a   : > { %8229 = vmatpush3.bf16.msra.mxu0 %v8822_v59  ;;  %v1078_v63 = vld [vmem:[#allocation5 + $0x30] sm:$0xff] }
 0x29b   : > { %8230 = vmatprep.subr.bf16.mxu0 %v8823_v61  ;;  %v8870_v59 = vld [vmem:[#allocation14 + $0xf0] ss:$8 sps:$4 sm:$0xff]   ;;  %2017 = vst [vmem:[#allocation6 + $0xf0] ss:$-124 sps:$4 sm:$0xc1] %v2015_v57  }
 0x29c   : > { %3612 = vmatpush1.bf16.msra.mxu1 %v8828_v5 }
 0x29d   : > { %3613 = vmatprep.subr.bf16.mxu1 %v8833_v6 }
 0x29e   : > { %8231 = vmatpush3.bf16.msra.mxu0 %v8824_v62  ;;  %v1086_v0 = vld [vmem:[#allocation5 + $0x70] sm:$0xff] }
 0x29f   : > { %v1094_v1 = vpack.c.bf16 %v1086_v0, %v1078_v63 }
 0x2a0   : > { %3614 = vmatpush1.bf16.msra.mxu1 %v8831_v7 }
 0x2a1   : > { %1764 = vmatmul.mubr.bf16.vlgmr.msra.gmra.mrb[12].mxu0 %v1094_v1  ;;  %3615 = vmatprep.subr.bf16.mxu1 %v8836_v8 }
 0x2a4   : > { %3616 = vmatpush1.bf16.msra.mxu1 %v8834_v9 }
 0x2a5   : > { %3617 = vmatprep.subr.bf16.mxu1 %v8839_v10 }
 0x2a8   : > { %3618 = vmatpush1.bf16.msra.mxu1 %v8837_v12 }
 0x2a9   : > { %3619 = vmatprep.subr.bf16.mxu1 %v8842_v13 }
 0x2ac   : > { %3620 = vmatpush1.bf16.msra.mxu1 %v8840_v14 }
 0x2ad   : > { %3621 = vmatprep.subr.bf16.mxu1 %v8845_v15 }
 0x2b0   : > { %3622 = vmatpush1.bf16.msra.mxu1 %v8843_v17 }
 0x2b1   : > { %3623 = vmatprep.subr.bf16.mxu1 %v8848_v19 }
 0x2b4   : > { %3624 = vmatpush1.bf16.msra.mxu1 %v8846_v22 }
 0x2b5   : > { %3625 = vmatprep.subr.bf16.mxu1 %v8851_v25 }
 0x2b8   : > { %3626 = vmatpush1.bf16.msra.mxu1 %v8849_v26 }
 0x2b9   : > { %3627 = vmatprep.subr.bf16.mxu1 %v8854_v27 }
 0x2bc   : > { %3628 = vmatpush1.bf16.msra.mxu1 %v8852_v28 }
 0x2bd   : > { %3629 = vmatprep.subr.bf16.mxu1 %v8857_v29 }
 0x2c0   : > { %3630 = vmatpush1.bf16.msra.mxu1 %v8855_v30 }
 0x2c1   : > { %3631 = vmatprep.subr.bf16.mxu1 %v8860_v21 }
 0x2c4   : > { %3632 = vmatpush1.bf16.msra.mxu1 %v8858_v23 }
 0x2c5   : > { %3633 = vmatprep.subr.bf16.mxu1 %v8863_v34 }
 0x2c8   : > { %3634 = vmatpush1.bf16.msra.mxu1 %v8861_v36 }
 0x2c9   : > { %3635 = vmatprep.subr.bf16.mxu1 %v8866_v37 }
 0x2cc   : > { %3636 = vmatpush1.bf16.msra.mxu1 %v8864_v38 }
 0x2cd   : > { %3637 = vmatprep.subr.bf16.mxu1 %v8869_v39 }
 0x2d0   : > { %3638 = vmatpush1.bf16.msra.mxu1 %v8867_v49 }
 0x2d1   : > { %3639 = vmatprep.subr.bf16.mxu1 %v8872_v50 }
 0x2d4   : > { %3640 = vmatpush1.bf16.msra.mxu1 %v8870_v59 }
 0x2d5   : > { %3652 = vmatprep.subr.bf16.mxu1 %v8875_v60 }
 0x34a   : > { %v8166_v18 = vpop.f32.mrb[0].mxu1 }
 0x34b   : > { %v8167_v31 = vpop.f32.mrb[1].mxu1 }
 0x34c   : > { %v8168_v32 = vadd.f32 %v8167_v31, %v8166_v18  ;;  %v8169_v33 = vpop.f32.mrb[2].mxu1 }
 0x34d   : > { %v8170_v35 = vpop.f32.mrb[3].mxu1 }
 0x34e   : > { %v8171_v16 = vadd.f32 %v8170_v35, %v8169_v33 }
 0x354   : > { %v8188_v40 = vpop.f32.mrb[8].mxu0 }
 0x355   : > { %v8189_v43 = vpop.f32.mrb[9].mxu0 }
 0x356   : > { %v8190_v47 = vadd.f32 %v8189_v43, %v8188_v40  ;;  %v8191_v48 = vpop.f32.mrb[10].mxu0 }
 0x357   : > { %v8192_v52 = vpop.f32.mrb[11].mxu0 }
 0x358   : > { %v1684_v55 = vadd.f32 %v8190_v47, %v8168_v32  ;;  %v8193_v56 = vadd.f32 %v8192_v52, %v8191_v48 }
 0x35a   : > { %v1687_v58 = vadd.f32 %v8193_v56, %v8171_v16 }
 0x36a   : > { %v8210_v61 = vpop.f32.mrb[4].mxu1 }
 0x36b   : > { %v8211_v62 = vpop.f32.mrb[5].mxu1 }
 0x36c   : > { %v8212_v63 = vadd.f32 %v8211_v62, %v8210_v61  ;;  %v8213_v0 = vpop.f32.mrb[6].mxu1 }
 0x36d   : > { %v8214_v1 = vpop.f32.mrb[7].mxu1 }
 0x36e   : > { %v1725_v2 = vadd.f32 %v8212_v63, %v1684_v55  ;;  %v8215_v3 = vadd.f32 %v8214_v1, %v8213_v0 }
 0x370   : > { %v1728_v4 = vadd.f32 %v8215_v3, %v1687_v58 }
 0x374   : > { %v8232_v5 = vpop.f32.mrb[12].mxu0 }
 0x375   : > { %v8233_v6 = vpop.f32.mrb[13].mxu0 }
 0x376   : > { %v8234_v7 = vadd.f32 %v8233_v6, %v8232_v5  ;;  %v8235_v8 = vpop.f32.mrb[14].mxu0  ;;  %v8873_v6 = vld [vmem:[#allocation14 + $0x100] ss:$8 sps:$4 sm:$0xff]  }
 0x377   : > { %v8236_v9 = vpop.f32.mrb[15].mxu0 }
 0x378   : > { %v1766_v10 = vadd.f32 %v8234_v7, %v1725_v2  ;;  %v8237_v11 = vadd.f32 %v8236_v9, %v8235_v8 }
 0x37a   : > { %v1769_v12 = vadd.f32 %v8237_v11, %v1728_v4  ;;  %v1781_v13 = vmul.f32 %v1766_v10, %v1766_v10 }
 0x37c   : > { %v1772_v14 = vadd.f32 %v1769_v12, %v1766_v10  ;;  %v1782_v15 = vmul.f32 %v1769_v12, %v1769_v12 }
 0x37e   : > { %v1773_v17 = vrot.slane %v1772_v14, 4  ;;  %v1783_v19 = vadd.f32 %v1782_v15, %v1781_v13 }
 0x380   : > { %v1774_v20 = vadd.f32 %v1773_v17, %v1772_v14  ;;  %v1784_v22 = vrot.slane %v1783_v19, 4 }
 0x382   : > { %v1775_v24 = vrot.slane %v1774_v20, 2  ;;  %v1785_v25 = vadd.f32 %v1784_v22, %v1783_v19 }
 0x384   : > { %v1776_v26 = vadd.f32 %v1775_v24, %v1774_v20  ;;  %v1786_v27 = vrot.slane %v1785_v25, 2 }
 0x386   : > { %v1777_v28 = vrot.slane %v1776_v26, 1  ;;  %v1787_v29 = vadd.f32 %v1786_v27, %v1785_v25 }
 0x388   : > { %v1778_v30 = vadd.f32 %v1777_v28, %v1776_v26  ;;  %v1788_v21 = vrot.slane %v1787_v29, 1 }
 0x38a   : > { %v1780_v18 = vmul.f32 0.0625, %v1778_v30  ;;  %v1789_v31 = vadd.f32 %v1788_v21, %v1787_v29  ;;  %v8876_v21 = vld [vmem:[#allocation14 + $0x110] ss:$8 sps:$4 sm:$0xff]  }
 0x38c   : > { %v1790_v23 = vmul.f32 0.0625, %v1789_v31  ;;  %v1791_v32 = vmul.f32 %v1780_v18, %v1780_v18  ;;  %v1794_v33 = vsub.f32 %v1766_v10, %v1780_v18  ;;  %v1795_v34 = vsub.f32 %v1769_v12, %v1780_v18  ;;  %v8878_v12 = vld [vmem:[#allocation14 + $0x114] ss:$8 sps:$4 sm:$0xff]   ;;  %v8881_v18 = vld [vmem:[#allocation14 + $0x124] ss:$8 sps:$4 sm:$0xff]  }
 0x38e   : > { %v1792_v35 = vsub.f32 %v1790_v23, %v1791_v32 }
 0x390   : > { %v1793_v16 = vmax.f32 %v1792_v35, 0.0 }
 0x392   : > { %v1796_v36 = vadd.f32 1e-05, %v1793_v16 }
 0x394   : > { %9526 = vrsqrt.f32 %v1796_v36  ;;  %v8879_v36 = vld [vmem:[#allocation14 + $0x120] ss:$8 sps:$4 sm:$0xff]  }
 0x39e   : > { %v9527_v37 = vpop.eup %9526 }
 0x39f   : > { %v1798_v38 = vmul.f32 %v9527_v37, %v1794_v33  ;;  %v1799_v39 = vmul.f32 %v9527_v37, %v1795_v34 }
 0x3a1   : > { %vm1800_vm13 = vcmp.ge.f32.partialorder %v1798_v38, 0.0  ;;  %vm1801_vm14 = vcmp.ge.f32.partialorder %v1799_v39, 0.0  ;;  %v1802_v40 = vmul.f32 0.2, %v1798_v38  ;;  %v1803_v41 = vmul.f32 0.2, %v1799_v39 }
 0x3a3   : > { %v1804_v42 = vsel %vm1800_vm13, %v1798_v38, %v1802_v40  ;;  %v1805_v43 = vsel %vm1801_vm14, %v1799_v39, %v1803_v41  ;;  %v8884_v38 = vld [vmem:[#allocation14 + $0x134] ss:$8 sps:$4 sm:$0xff]  }
 0x3a4   : > { %1813 = vst [vmem:[#allocation3 + $0x7] ss:$6 sps:$4 sm:$0xff] %v1804_v42   ;;  %1815 = vst [vmem:[#allocation3 + $0x13] ss:$6 sps:$4 sm:$0xff] %v1805_v43  }
 0x3a5   : > { %1806 = vst [vmem:[%s10388_s22] sm:$0xff] %v1804_v42  ;;  %1807 = vst [vmem:[%s10388_s22 + $0x8] sm:$0xff] %v1805_v43 }
 0x3ab   : > { %v1854_v44 = vld [vmem:[#allocation3 + $0x7] sm:$0x7]  ;;  %v1935_v45 = vld [vmem:[#allocation3 + $0xd] sm:$0x7]  ;;  %v1959_v63 = vld [vmem:[#allocation3 + $0x13] sm:$0x7] }
 0x3ac   : > { %v1849_v46 = vld [vmem:[#allocation3 + $0x6] sm:$0x7]  ;;  %v1856_v47 = vrot.slane %v1854_v44, 5  ;;  %v1937_v48 = vrot.slane %v1935_v45, 2  ;;  %v1929_v50 = vld [vmem:[#allocation3 + $0xc] sm:$0x7] }
 0x3ad   : > { %v1851_v49 = vrot.slane %v1849_v46, 5  ;;  %v1931_v51 = vrot.slane %v1929_v50, 2  ;;  %v1864_v52 = vld [vmem:[#allocation3 + $0x9] sm:$0x7]  ;;  %v1947_v53 = vld [vmem:[#allocation3 + $0xf] sm:$0x7] }
 0x3ae   : > { %1858 = vst [vmem:[#allocation6 + $0x8] sm:$0x38] %v1856_v47  ;;  %1939 = vst [vmem:[#allocation6 + $0x88] ss:$-124 sps:$4 sm:$0xc1] %v1937_v48   ;;  %v1866_v54 = vrot.slane %v1864_v52, 5 }
 0x3af   : > { %1853 = vst [vmem:[#allocation6] sm:$0x38] %v1851_v49  ;;  %v1949_v55 = vrot.slane %v1947_v53, 2  ;;  %v1859_v56 = vld [vmem:[#allocation3 + $0x8] sm:$0x7]  ;;  %v1961_v0 = vrot.slane %v1959_v63, 2 }
 0x3b0   : > { %v1941_v57 = vld [vmem:[#allocation3 + $0xe] sm:$0x7]  ;;  %1933 = vst [vmem:[#allocation6 + $0x80] ss:$-124 sps:$4 sm:$0xc1] %v1931_v51   ;;  %v1861_v58 = vrot.slane %v1859_v56, 5 }
 0x3b1   : > { %v1943_v59 = vrot.slane %v1941_v57, 2  ;;  %v1827_v60 = vld [vmem:[#allocation3 + $0x7] sm:$0x7]  ;;  %v1874_v61 = vld [vmem:[#allocation3 + $0xd] sm:$0x7] }
 0x3b2   : > { %1868 = vst [vmem:[#allocation6 + $0x18] sm:$0x38] %v1866_v54  ;;  %1951 = vst [vmem:[#allocation6 + $0x98] ss:$-124 sps:$4 sm:$0xc1] %v1949_v55   ;;  %v1876_v62 = vrot.slane %v1874_v61, 5 }
 0x3b3   : > { %1828 = vst [vmem:[#allocation6 + $0x28] sm:$0x7] %v1827_v60  ;;  %1863 = vst [vmem:[#allocation6 + $0x10] sm:$0x38] %v1861_v58  ;;  %v1825_v1 = vld [vmem:[#allocation3 + $0x6] sm:$0x7] }
 0x3b4   : > { %1945 = vst [vmem:[#allocation6 + $0x90] ss:$-124 sps:$4 sm:$0xc1] %v1943_v59   ;;  %1878 = vst [vmem:[#allocation6 + $0x28] sm:$0x38] %v1876_v62 }
 0x3b5   : > { %1826 = vst [vmem:[#allocation6 + $0x20] sm:$0x7] %v1825_v1  ;;  %v1869_v2 = vld [vmem:[#allocation3 + $0xc] sm:$0x7]  ;;  %v1953_v4 = vld [vmem:[#allocation3 + $0x12] sm:$0x7] }
 0x3b6   : > { %1963 = vst [vmem:[#allocation6 + $0xa8] ss:$-124 sps:$4 sm:$0xc1] %v1961_v0   ;;  %v1871_v3 = vrot.slane %v1869_v2, 5  ;;  %v1831_v5 = vld [vmem:[#allocation3 + $0x9] sm:$0x7] }
 0x3b7   : > { %v1955_v7 = vrot.slane %v1953_v4, 2  ;;  %1832 = vst [vmem:[#allocation6 + $0x38] sm:$0x7] %v1831_v5  ;;  %v1884_v8 = vld [vmem:[#allocation3 + $0xf] sm:$0x7] }
 0x3b8   : > { %v1971_v9 = vld [vmem:[#allocation3 + $0x15] sm:$0x7]  ;;  %v2042_v11 = vld [vmem:[#allocation6 + $0x88] sm:$0x1]  ;;  %1873 = vst [vmem:[#allocation6 + $0x20] sm:$0x38] %v1871_v3 }
 0x3b9   : > { %v2026_v10 = vld [vmem:[#allocation6 + $0x8] sm:$0xff]  ;;  %v1886_v13 = vrot.slane %v1884_v8, 5  ;;  %v1973_v14 = vrot.slane %v1971_v9, 2  ;;  %v2025_v17 = vld [vmem:[#allocation6] sm:$0xff]  ;;  %v2028_v24 = vld [vmem:[#allocation6 + $0x18] sm:$0xff] }
 0x3ba   : > { %v2058_v15 = vpack.c.bf16 %v2042_v11, %v2026_v10  ;;  %v2041_v19 = vld [vmem:[#allocation6 + $0x80] sm:$0x1]  ;;  %1957 = vst [vmem:[#allocation6 + $0xa0] ss:$-124 sps:$4 sm:$0xc1] %v1955_v7  }
 0x3bb   : > { %v1829_v20 = vld [vmem:[#allocation3 + $0x8] sm:$0x7]  ;;  %v2057_v22 = vpack.c.bf16 %v2041_v19, %v2025_v17  ;;  %v2044_v25 = vld [vmem:[#allocation6 + $0x98] sm:$0x1]  ;;  %1888 = vst [vmem:[#allocation6 + $0x38] sm:$0x38] %v1886_v13 }
 0x3bc   : > { %1975 = vst [vmem:[#allocation6 + $0xb8] ss:$-124 sps:$4 sm:$0xc1] %v1973_v14   ;;  %1830 = vst [vmem:[#allocation6 + $0x30] sm:$0x7] %v1829_v20  ;;  %3641 = vmatprep.mubr.bf16.mxu1 %v2058_v15  ;;  %v2060_v27 = vpack.c.bf16 %v2044_v25, %v2028_v24 }
 0x3bd   : > { %v1879_v26 = vld [vmem:[#allocation3 + $0xe] sm:$0x7]  ;;  %v1965_v29 = vld [vmem:[#allocation3 + $0x14] sm:$0x7]  ;;  %3642 = vmatmul.mubr.bf16.vlgmr.msra.gmra.mrb[8].mxu1 %v2057_v22  ;;  %v1983_v33 = vld [vmem:[#allocation3 + $0x19] sm:$0x7] }
 0x3be   : > { %v1881_v28 = vrot.slane %v1879_v26, 5  ;;  %v1967_v30 = vrot.slane %v1965_v29, 2  ;;  %3653 = vmatpush1.bf16.msra.mxu1 %v8873_v6  ;;  %3684 = vmatprep.mubr.bf16.mxu1 %v2060_v27  ;;  %v1835_v31 = vld [vmem:[#allocation3 + $0xd] sm:$0x7]  ;;  %v1894_v23 = vld [vmem:[#allocation3 + $0x13] sm:$0x7] }
 0x3bf   : > { %3654 = vmatprep.subr.bf16.mxu1 %v8878_v12  ;;  %1836 = vst [vmem:[#allocation6 + $0x48] sm:$0x7] %v1835_v31  ;;  %v1896_v32 = vrot.slane %v1894_v23, 5  ;;  %v1833_v34 = vld [vmem:[#allocation3 + $0xc] sm:$0x7]  ;;  %v1985_v35 = vrot.slane %v1983_v33, 2 }
 0x3c0   : > { %1883 = vst [vmem:[#allocation6 + $0x30] sm:$0x38] %v1881_v28  ;;  %1969 = vst [vmem:[#allocation6 + $0xb0] ss:$-124 sps:$4 sm:$0xc1] %v1967_v30   ;;  %v2027_v29 = vld [vmem:[#allocation6 + $0x10] sm:$0xff] }
 0x3c1   : > { %1834 = vst [vmem:[#allocation6 + $0x40] sm:$0x7] %v1833_v34  ;;  %v1889_v16 = vld [vmem:[#allocation3 + $0x12] sm:$0x7]  ;;  %1898 = vst [vmem:[#allocation6 + $0x48] sm:$0x38] %v1896_v32 }
 0x3c2   : > { %3655 = vmatpush1.bf16.msra.mxu1 %v8876_v21  ;;  %v1891_v37 = vrot.slane %v1889_v16, 5  ;;  %1987 = vst [vmem:[#allocation6 + $0xc8] ss:$-124 sps:$4 sm:$0xc1] %v1985_v35   ;;  %v1977_v39 = vld [vmem:[#allocation3 + $0x18] sm:$0x7] }
 0x3c3   : > { %3656 = vmatprep.subr.bf16.mxu1 %v8881_v18  ;;  %v1839_v40 = vld [vmem:[#allocation3 + $0xf] sm:$0x7]  ;;  %v1979_v41 = vrot.slane %v1977_v39, 2  ;;  %v1904_v42 = vld [vmem:[#allocation3 + $0x15] sm:$0x7] }
 0x3c4   : > { %1893 = vst [vmem:[#allocation6 + $0x40] sm:$0x38] %v1891_v37  ;;  %1840 = vst [vmem:[#allocation6 + $0x58] sm:$0x7] %v1839_v40  ;;  %v1995_v43 = vld [vmem:[#allocation3 + $0x1b] sm:$0x7] }
 0x3c5   : > { %v1906_v44 = vrot.slane %v1904_v42, 5  ;;  %v1997_v45 = vrot.slane %v1995_v43, 2  ;;  %v1837_v46 = vld [vmem:[#allocation3 + $0xe] sm:$0x7]  ;;  %v1899_v47 = vld [vmem:[#allocation3 + $0x14] sm:$0x7] }
 0x3c6   : > { %3657 = vmatpush1.bf16.msra.mxu1 %v8879_v36  ;;  %v8882_v48 = vld [vmem:[#allocation14 + $0x130] ss:$8 sps:$4 sm:$0xff]   ;;  %1981 = vst [vmem:[#allocation6 + $0xc0] ss:$-124 sps:$4 sm:$0xc1] %v1979_v41   ;;  %v1901_v49 = vrot.slane %v1899_v47, 5 }
 0x3c7   : > { %1838 = vst [vmem:[#allocation6 + $0x50] sm:$0x7] %v1837_v46  ;;  %3658 = vmatprep.subr.bf16.mxu1 %v8884_v38  ;;  %v8887_v50 = vld [vmem:[#allocation14 + $0x144] ss:$8 sps:$4 sm:$0xff]   ;;  %1908 = vst [vmem:[#allocation6 + $0x58] sm:$0x38] %v1906_v44 }
 0x3c8   : > { %1999 = vst [vmem:[#allocation6 + $0xd8] ss:$-124 sps:$4 sm:$0xc1] %v1997_v45   ;;  %v1989_v51 = vld [vmem:[#allocation3 + $0x1a] sm:$0x7]  ;;  %v2030_v21 = vld [vmem:[#allocation6 + $0x28] sm:$0xff] }
 0x3c9   : > { %v1843_v52 = vld [vmem:[#allocation3 + $0x13] sm:$0x7]  ;;  %1903 = vst [vmem:[#allocation6 + $0x50] sm:$0x38] %v1901_v49  ;;  %v1991_v53 = vrot.slane %v1989_v51, 2 }
 0x3ca   : > { %1844 = vst [vmem:[#allocation6 + $0x68] sm:$0x7] %v1843_v52  ;;  %v1914_v54 = vld [vmem:[#allocation3 + $0x19] sm:$0x7]  ;;  %v1841_v55 = vld [vmem:[#allocation3 + $0x12] sm:$0x7]  ;;  %3659 = vmatpush1.bf16.msra.mxu1 %v8882_v48 }
 0x3cb   : > { %v1916_v56 = vrot.slane %v1914_v54, 5  ;;  %1842 = vst [vmem:[#allocation6 + $0x60] sm:$0x7] %v1841_v55  ;;  %v1909_v57 = vld [vmem:[#allocation3 + $0x18] sm:$0x7]  ;;  %3660 = vmatprep.subr.bf16.mxu1 %v8887_v50 }
 0x3cc   : > { %v1847_v58 = vld [vmem:[#allocation3 + $0x15] sm:$0x7]  ;;  %v8885_v59 = vld [vmem:[#allocation14 + $0x140] ss:$8 sps:$4 sm:$0xff]   ;;  %v1911_v60 = vrot.slane %v1909_v57, 5 }
 0x3cd   : > { %1993 = vst [vmem:[#allocation6 + $0xd0] ss:$-124 sps:$4 sm:$0xc1] %v1991_v53   ;;  %1848 = vst [vmem:[#allocation6 + $0x78] sm:$0x7] %v1847_v58 }
 0x3ce   : > { %v8890_v61 = vld [vmem:[#allocation14 + $0x154] ss:$8 sps:$4 sm:$0xff]   ;;  %1918 = vst [vmem:[#allocation6 + $0x68] sm:$0x38] %v1916_v56  ;;  %v1845_v63 = vld [vmem:[#allocation3 + $0x14] sm:$0x7]  ;;  %3661 = vmatpush1.bf16.msra.mxu1 %v8885_v59 }
 0x3cf   : > { %v1924_v62 = vld [vmem:[#allocation3 + $0x1b] sm:$0x7]  ;;  %1913 = vst [vmem:[#allocation6 + $0x60] sm:$0x38] %v1911_v60  ;;  %1846 = vst [vmem:[#allocation6 + $0x70] sm:$0x7] %v1845_v63  ;;  %3662 = vmatprep.subr.bf16.mxu1 %v8890_v61 }
 0x3d0   : > { %v1926_v0 = vrot.slane %v1924_v62, 5  ;;  %v1919_v1 = vld [vmem:[#allocation3 + $0x1a] sm:$0x7]  ;;  %v8893_v4 = vld [vmem:[#allocation14 + $0x164] ss:$8 sps:$4 sm:$0xff]  }
 0x3d1   : > { %v1921_v2 = vrot.slane %v1919_v1, 5  ;;  %v8888_v3 = vld [vmem:[#allocation14 + $0x150] ss:$8 sps:$4 sm:$0xff]   ;;  %v8891_v5 = vld [vmem:[#allocation14 + $0x160] ss:$8 sps:$4 sm:$0xff]  }
 0x3d2   : > { %1928 = vst [vmem:[#allocation6 + $0x78] sm:$0x38] %v1926_v0  ;;  %3663 = vmatpush1.bf16.msra.mxu1 %v8888_v3  ;;  %v8896_v6 = vld [vmem:[#allocation14 + $0x174] ss:$8 sps:$4 sm:$0xff]   ;;  %v8894_v7 = vld [vmem:[#allocation14 + $0x170] ss:$8 sps:$4 sm:$0xff]  }
 0x3d3   : > { %1923 = vst [vmem:[#allocation6 + $0x70] sm:$0x38] %v1921_v2  ;;  %3664 = vmatprep.subr.bf16.mxu1 %v8893_v4  ;;  %v8899_v8 = vld [vmem:[#allocation14 + $0x184] ss:$8 sps:$4 sm:$0xff]   ;;  %v8897_v9 = vld [vmem:[#allocation14 + $0x180] ss:$8 sps:$4 sm:$0xff]  }
 0x3d4   : > { %v8902_v10 = vld [vmem:[#allocation14 + $0x194] ss:$8 sps:$4 sm:$0xff]   ;;  %v8900_v11 = vld [vmem:[#allocation14 + $0x190] ss:$8 sps:$4 sm:$0xff]   ;;  %v8905_v12 = vld [vmem:[#allocation14 + $0x1a4] ss:$8 sps:$4 sm:$0xff]  }
 0x3d5   : > { %v8903_v13 = vld [vmem:[#allocation14 + $0x1a0] ss:$8 sps:$4 sm:$0xff]   ;;  %v8908_v14 = vld [vmem:[#allocation14 + $0x1b4] ss:$8 sps:$4 sm:$0xff]   ;;  %v8906_v15 = vld [vmem:[#allocation14 + $0x1b0] ss:$8 sps:$4 sm:$0xff]  }
 0x3d6   : > { %3665 = vmatpush1.bf16.msra.mxu1 %v8891_v5  ;;  %v8911_v17 = vld [vmem:[#allocation14 + $0x1c4] ss:$8 sps:$4 sm:$0xff]   ;;  %v8909_v19 = vld [vmem:[#allocation14 + $0x1c0] ss:$8 sps:$4 sm:$0xff]   ;;  %v8914_v20 = vld [vmem:[#allocation14 + $0x1d4] ss:$8 sps:$4 sm:$0xff]  }
 0x3d7   : > { %3666 = vmatprep.subr.bf16.mxu1 %v8896_v6  ;;  %v8912_v22 = vld [vmem:[#allocation14 + $0x1d0] ss:$8 sps:$4 sm:$0xff]   ;;  %v8917_v24 = vld [vmem:[#allocation14 + $0x1e4] ss:$8 sps:$4 sm:$0xff]   ;;  %v8915_v25 = vld [vmem:[#allocation14 + $0x1e0] ss:$8 sps:$4 sm:$0xff]  }
 0x3d8   : > { %v8920_v26 = vld [vmem:[#allocation14 + $0x1f4] ss:$8 sps:$4 sm:$0xff]   ;;  %v8918_v27 = vld [vmem:[#allocation14 + $0x1f0] ss:$8 sps:$4 sm:$0xff]   ;;  %v8923_v28 = vld [vmem:[#allocation14 + $0x204] ss:$8 sps:$4 sm:$0xff]  }
 0x3d9   : > { %v2043_v30 = vld [vmem:[#allocation6 + $0x90] sm:$0x1]  ;;  %v2046_v18 = vld [vmem:[#allocation6 + $0xa8] sm:$0x1]  ;;  %v8926_v32 = vld [vmem:[#allocation14 + $0x214] ss:$8 sps:$4 sm:$0xff]  }
 0x3da   : > { %3667 = vmatpush1.bf16.msra.mxu1 %v8894_v7  ;;  %v8921_v31 = vld [vmem:[#allocation14 + $0x200] ss:$8 sps:$4 sm:$0xff]   ;;  %v2059_v23 = vpack.c.bf16 %v2043_v30, %v2027_v29  ;;  %v2062_v33 = vpack.c.bf16 %v2046_v18, %v2030_v21  ;;  %v8924_v34 = vld [vmem:[#allocation14 + $0x210] ss:$8 sps:$4 sm:$0xff]   ;;  %v8929_v35 = vld [vmem:[#allocation14 + $0x224] ss:$8 sps:$4 sm:$0xff]  }
 0x3db   : > { %3668 = vmatprep.subr.bf16.mxu1 %v8899_v8  ;;  %v8927_v16 = vld [vmem:[#allocation14 + $0x220] ss:$8 sps:$4 sm:$0xff]   ;;  %v8932_v36 = vld [vmem:[#allocation14 + $0x234] ss:$8 sps:$4 sm:$0xff]   ;;  %v8930_v37 = vld [vmem:[#allocation14 + $0x230] ss:$8 sps:$4 sm:$0xff]  }
 0x3dc   : > { %v8935_v38 = vld [vmem:[#allocation14 + $0x244] ss:$8 sps:$4 sm:$0xff]   ;;  %v8933_v39 = vld [vmem:[#allocation14 + $0x240] ss:$8 sps:$4 sm:$0xff]   ;;  %v8938_v40 = vld [vmem:[#allocation14 + $0x254] ss:$8 sps:$4 sm:$0xff]  }
 0x3dd   : > { %v8936_v41 = vld [vmem:[#allocation14 + $0x250] ss:$8 sps:$4 sm:$0xff]   ;;  %v8941_v42 = vld [vmem:[#allocation14 + $0x264] ss:$8 sps:$4 sm:$0xff]   ;;  %v8939_v43 = vld [vmem:[#allocation14 + $0x260] ss:$8 sps:$4 sm:$0xff]  }
 0x3de   : > { %3669 = vmatpush1.bf16.msra.mxu1 %v8897_v9  ;;  %v8944_v44 = vld [vmem:[#allocation14 + $0x274] ss:$8 sps:$4 sm:$0xff]   ;;  %v8942_v45 = vld [vmem:[#allocation14 + $0x270] ss:$8 sps:$4 sm:$0xff]   ;;  %v8947_v46 = vld [vmem:[#allocation14 + $0x284] ss:$8 sps:$4 sm:$0xff]  }
 0x3df   : > { %3670 = vmatprep.subr.bf16.mxu1 %v8902_v10  ;;  %v8945_v47 = vld [vmem:[#allocation14 + $0x280] ss:$8 sps:$4 sm:$0xff]   ;;  %v8950_v48 = vld [vmem:[#allocation14 + $0x294] ss:$8 sps:$4 sm:$0xff]   ;;  %v8948_v49 = vld [vmem:[#allocation14 + $0x290] ss:$8 sps:$4 sm:$0xff]  }
 0x3e0   : > { %v8953_v50 = vld [vmem:[#allocation14 + $0x2a4] ss:$8 sps:$4 sm:$0xff]   ;;  %v8951_v51 = vld [vmem:[#allocation14 + $0x2a0] ss:$8 sps:$4 sm:$0xff]   ;;  %v8956_v52 = vld [vmem:[#allocation14 + $0x2b4] ss:$8 sps:$4 sm:$0xff]  }
 0x3e1   : > { %v8954_v53 = vld [vmem:[#allocation14 + $0x2b0] ss:$8 sps:$4 sm:$0xff]   ;;  %v8959_v54 = vld [vmem:[#allocation14 + $0x2c4] ss:$8 sps:$4 sm:$0xff]   ;;  %v8957_v55 = vld [vmem:[#allocation14 + $0x2c0] ss:$8 sps:$4 sm:$0xff]  }
 0x3e2   : > { %3671 = vmatpush1.bf16.msra.mxu1 %v8900_v11  ;;  %v8962_v56 = vld [vmem:[#allocation14 + $0x2d4] ss:$8 sps:$4 sm:$0xff]   ;;  %v8960_v57 = vld [vmem:[#allocation14 + $0x2d0] ss:$8 sps:$4 sm:$0xff]   ;;  %v8965_v58 = vld [vmem:[#allocation14 + $0x2e4] ss:$8 sps:$4 sm:$0xff]  }
 0x3e3   : > { %3672 = vmatprep.subr.bf16.mxu1 %v8905_v12  ;;  %v8963_v59 = vld [vmem:[#allocation14 + $0x2e0] ss:$8 sps:$4 sm:$0xff]   ;;  %v8968_v60 = vld [vmem:[#allocation14 + $0x2f4] ss:$8 sps:$4 sm:$0xff]   ;;  %v8966_v61 = vld [vmem:[#allocation14 + $0x2f0] ss:$8 sps:$4 sm:$0xff]  }
 0x3e4   : > { %v8971_v62 = vld [vmem:[#allocation14 + $0x304] ss:$8 sps:$4 sm:$0xff]   ;;  %v2045_v0 = vld [vmem:[#allocation6 + $0xa0] sm:$0x1]  ;;  %v2032_v1 = vld [vmem:[#allocation6 + $0x38] sm:$0xff] }
 0x3e5   : > { %v2029_v63 = vld [vmem:[#allocation6 + $0x20] sm:$0xff]  ;;  %v2048_v2 = vld [vmem:[#allocation6 + $0xb8] sm:$0x1]  ;;  %v8974_v5 = vld [vmem:[#allocation14 + $0x314] ss:$8 sps:$4 sm:$0xff]  }
 0x3e6   : > { %3673 = vmatpush1.bf16.msra.mxu1 %v8903_v13  ;;  %v8969_v3 = vld [vmem:[#allocation14 + $0x300] ss:$8 sps:$4 sm:$0xff]   ;;  %v2061_v4 = vpack.c.bf16 %v2045_v0, %v2029_v63  ;;  %v2064_v6 = vpack.c.bf16 %v2048_v2, %v2032_v1  ;;  %v8972_v7 = vld [vmem:[#allocation14 + $0x310] ss:$8 sps:$4 sm:$0xff]   ;;  %v8977_v8 = vld [vmem:[#allocation14 + $0x324] ss:$8 sps:$4 sm:$0xff]  }
 0x3e7   : > { %3674 = vmatprep.subr.bf16.mxu1 %v8908_v14  ;;  %v8975_v9 = vld [vmem:[#allocation14 + $0x320] ss:$8 sps:$4 sm:$0xff]   ;;  %v8980_v10 = vld [vmem:[#allocation14 + $0x334] ss:$8 sps:$4 sm:$0xff]   ;;  %v8978_v11 = vld [vmem:[#allocation14 + $0x330] ss:$8 sps:$4 sm:$0xff]  }
 0x3e8   : > { %v8983_v12 = vld [vmem:[#allocation14 + $0x344] ss:$8 sps:$4 sm:$0xff]   ;;  %v8981_v13 = vld [vmem:[#allocation14 + $0x340] ss:$8 sps:$4 sm:$0xff]   ;;  %v8986_v14 = vld [vmem:[#allocation14 + $0x354] ss:$8 sps:$4 sm:$0xff]  }
 0x3e9   : > { %v8999_v29 = vld [vmem:[#allocation14 + $0x3a0] ss:$8 sps:$4 sm:$0xff]   ;;  %v9004_v30 = vld [vmem:[#allocation14 + $0x3b4] ss:$8 sps:$4 sm:$0xff]   ;;  %v9002_v21 = vld [vmem:[#allocation14 + $0x3b0] ss:$8 sps:$4 sm:$0xff]  }
 0x3ea   : > { %3675 = vmatpush1.bf16.msra.mxu1 %v8906_v15  ;;  %v8984_v15 = vld [vmem:[#allocation14 + $0x350] ss:$8 sps:$4 sm:$0xff]   ;;  %v9007_v18 = vld [vmem:[#allocation14 + $0x3c4] ss:$8 sps:$4 sm:$0xff]   ;;  %v9047_v63 = vld [vmem:[#allocation14 + $0x4a0] ss:$8 sps:$4 sm:$0xff]  }
 0x3eb   : > { %3676 = vmatprep.subr.bf16.mxu1 %v8911_v17  ;;  %v8989_v17 = vld [vmem:[#allocation14 + $0x364] ss:$8 sps:$4 sm:$0xff]   ;;  %v9052_v0 = vld [vmem:[#allocation14 + $0x4b4] ss:$8 sps:$4 sm:$0xff]   ;;  %v9050_v1 = vld [vmem:[#allocation14 + $0x4b0] ss:$8 sps:$4 sm:$0xff]  }
 0x3ec   : > { %v9055_v2 = vld [vmem:[#allocation14 + $0x4c4] ss:$8 sps:$4 sm:$0xff]  }
 0x3ee   : > { %3677 = vmatpush1.bf16.msra.mxu1 %v8909_v19  ;;  %v8987_v19 = vld [vmem:[#allocation14 + $0x360] ss:$8 sps:$4 sm:$0xff]  }
 0x3ef   : > { %3678 = vmatprep.subr.bf16.mxu1 %v8914_v20  ;;  %v8992_v20 = vld [vmem:[#allocation14 + $0x374] ss:$8 sps:$4 sm:$0xff]  }
 0x3f2   : > { %3679 = vmatpush1.bf16.msra.mxu1 %v8912_v22  ;;  %v8990_v22 = vld [vmem:[#allocation14 + $0x370] ss:$8 sps:$4 sm:$0xff]  }
 0x3f3   : > { %3680 = vmatprep.subr.bf16.mxu1 %v8917_v24  ;;  %v8995_v24 = vld [vmem:[#allocation14 + $0x384] ss:$8 sps:$4 sm:$0xff]  }
 0x3f6   : > { %3681 = vmatpush1.bf16.msra.mxu1 %v8915_v25  ;;  %v8993_v25 = vld [vmem:[#allocation14 + $0x380] ss:$8 sps:$4 sm:$0xff]  }
 0x3f7   : > { %3682 = vmatprep.subr.bf16.mxu1 %v8920_v26  ;;  %v8998_v26 = vld [vmem:[#allocation14 + $0x394] ss:$8 sps:$4 sm:$0xff]  }
 0x3fa   : > { %3683 = vmatpush1.bf16.msra.mxu1 %v8918_v27  ;;  %v8996_v27 = vld [vmem:[#allocation14 + $0x390] ss:$8 sps:$4 sm:$0xff]  }
 0x3fb   : > { %3695 = vmatprep.subr.bf16.mxu1 %v8923_v28  ;;  %v9001_v28 = vld [vmem:[#allocation14 + $0x3a4] ss:$8 sps:$4 sm:$0xff]  }
 0x3fd   : > { %3685 = vmatmul.mubr.bf16.vlgmr.msra.gmra.mrb[8].mxu1 %v2059_v23  ;;  %v9010_v23 = vld [vmem:[#allocation14 + $0x3d4] ss:$8 sps:$4 sm:$0xff]  }
 0x3fe   : > { %3696 = vmatpush1.bf16.msra.mxu1 %v8921_v31  ;;  %3727 = vmatprep.mubr.bf16.mxu1 %v2062_v33  ;;  %v9005_v31 = vld [vmem:[#allocation14 + $0x3c0] ss:$8 sps:$4 sm:$0xff]   ;;  %v9013_v33 = vld [vmem:[#allocation14 + $0x3e4] ss:$8 sps:$4 sm:$0xff]  }
 0x3ff   : > { %3697 = vmatprep.subr.bf16.mxu1 %v8926_v32  ;;  %v9008_v32 = vld [vmem:[#allocation14 + $0x3d0] ss:$8 sps:$4 sm:$0xff]  }
 0x402   : > { %3698 = vmatpush1.bf16.msra.mxu1 %v8924_v34  ;;  %v9011_v34 = vld [vmem:[#allocation14 + $0x3e0] ss:$8 sps:$4 sm:$0xff]  }
 0x403   : > { %3699 = vmatprep.subr.bf16.mxu1 %v8929_v35  ;;  %v9016_v35 = vld [vmem:[#allocation14 + $0x3f4] ss:$8 sps:$4 sm:$0xff]  }
 0x406   : > { %3700 = vmatpush1.bf16.msra.mxu1 %v8927_v16  ;;  %v9014_v16 = vld [vmem:[#allocation14 + $0x3f0] ss:$8 sps:$4 sm:$0xff]  }
 0x407   : > { %3701 = vmatprep.subr.bf16.mxu1 %v8932_v36  ;;  %v9019_v36 = vld [vmem:[#allocation14 + $0x404] ss:$8 sps:$4 sm:$0xff]  }
 0x40a   : > { %3702 = vmatpush1.bf16.msra.mxu1 %v8930_v37  ;;  %v2031_v37 = vld [vmem:[#allocation6 + $0x30] sm:$0xff] }
 0x40b   : > { %3703 = vmatprep.subr.bf16.mxu1 %v8935_v38  ;;  %v2047_v38 = vld [vmem:[#allocation6 + $0xb0] sm:$0x1] }
 0x40e   : > { %3704 = vmatpush1.bf16.msra.mxu1 %v8933_v39  ;;  %v2034_v39 = vld [vmem:[#allocation6 + $0x48] sm:$0xff] }
 0x40f   : > { %3705 = vmatprep.subr.bf16.mxu1 %v8938_v40  ;;  %v2050_v40 = vld [vmem:[#allocation6 + $0xc8] sm:$0x1] }
 0x412   : > { %3706 = vmatpush1.bf16.msra.mxu1 %v8936_v41  ;;  %v9017_v41 = vld [vmem:[#allocation14 + $0x400] ss:$8 sps:$4 sm:$0xff]  }
 0x413   : > { %3707 = vmatprep.subr.bf16.mxu1 %v8941_v42  ;;  %v2063_v42 = vpack.c.bf16 %v2047_v38, %v2031_v37  ;;  %v9095_v37 = vld [vmem:[#allocation14 + $0x5a0] ss:$8 sps:$4 sm:$0xff]   ;;  %v9100_v38 = vld [vmem:[#allocation14 + $0x5b4] ss:$8 sps:$4 sm:$0xff]  }
 0x416   : > { %3708 = vmatpush1.bf16.msra.mxu1 %v8939_v43  ;;  %v9022_v43 = vld [vmem:[#allocation14 + $0x414] ss:$8 sps:$4 sm:$0xff]  }
 0x417   : > { %3709 = vmatprep.subr.bf16.mxu1 %v8944_v44  ;;  %v2066_v44 = vpack.c.bf16 %v2050_v40, %v2034_v39  ;;  %v9098_v39 = vld [vmem:[#allocation14 + $0x5b0] ss:$8 sps:$4 sm:$0xff]   ;;  %v9103_v40 = vld [vmem:[#allocation14 + $0x5c4] ss:$8 sps:$4 sm:$0xff]  }
 0x41a   : > { %3710 = vmatpush1.bf16.msra.mxu1 %v8942_v45  ;;  %v9020_v45 = vld [vmem:[#allocation14 + $0x410] ss:$8 sps:$4 sm:$0xff]  }
 0x41b   : > { %3711 = vmatprep.subr.bf16.mxu1 %v8947_v46  ;;  %v9025_v46 = vld [vmem:[#allocation14 + $0x424] ss:$8 sps:$4 sm:$0xff]  }
 0x41e   : > { %3712 = vmatpush1.bf16.msra.mxu1 %v8945_v47  ;;  %v9023_v47 = vld [vmem:[#allocation14 + $0x420] ss:$8 sps:$4 sm:$0xff]  }
 0x41f   : > { %3713 = vmatprep.subr.bf16.mxu1 %v8950_v48  ;;  %v9028_v48 = vld [vmem:[#allocation14 + $0x434] ss:$8 sps:$4 sm:$0xff]  }
 0x422   : > { %3714 = vmatpush1.bf16.msra.mxu1 %v8948_v49  ;;  %v9026_v49 = vld [vmem:[#allocation14 + $0x430] ss:$8 sps:$4 sm:$0xff]  }
 0x423   : > { %3715 = vmatprep.subr.bf16.mxu1 %v8953_v50  ;;  %v9031_v50 = vld [vmem:[#allocation14 + $0x444] ss:$8 sps:$4 sm:$0xff]  }
 0x426   : > { %3716 = vmatpush1.bf16.msra.mxu1 %v8951_v51  ;;  %v9029_v51 = vld [vmem:[#allocation14 + $0x440] ss:$8 sps:$4 sm:$0xff]  }
 0x427   : > { %3717 = vmatprep.subr.bf16.mxu1 %v8956_v52  ;;  %v9034_v52 = vld [vmem:[#allocation14 + $0x454] ss:$8 sps:$4 sm:$0xff]  }
 0x42a   : > { %3718 = vmatpush1.bf16.msra.mxu1 %v8954_v53  ;;  %v9032_v53 = vld [vmem:[#allocation14 + $0x450] ss:$8 sps:$4 sm:$0xff]  }
 0x42b   : > { %3719 = vmatprep.subr.bf16.mxu1 %v8959_v54  ;;  %v9037_v54 = vld [vmem:[#allocation14 + $0x464] ss:$8 sps:$4 sm:$0xff]  }
 0x42e   : > { %3720 = vmatpush1.bf16.msra.mxu1 %v8957_v55  ;;  %v9035_v55 = vld [vmem:[#allocation14 + $0x460] ss:$8 sps:$4 sm:$0xff]  }
 0x42f   : > { %3721 = vmatprep.subr.bf16.mxu1 %v8962_v56  ;;  %v9040_v56 = vld [vmem:[#allocation14 + $0x474] ss:$8 sps:$4 sm:$0xff]  }
 0x432   : > { %3722 = vmatpush1.bf16.msra.mxu1 %v8960_v57  ;;  %v9038_v57 = vld [vmem:[#allocation14 + $0x470] ss:$8 sps:$4 sm:$0xff]  }
 0x433   : > { %3723 = vmatprep.subr.bf16.mxu1 %v8965_v58  ;;  %v9043_v58 = vld [vmem:[#allocation14 + $0x484] ss:$8 sps:$4 sm:$0xff]  }
 0x436   : > { %3724 = vmatpush1.bf16.msra.mxu1 %v8963_v59  ;;  %v9041_v59 = vld [vmem:[#allocation14 + $0x480] ss:$8 sps:$4 sm:$0xff]  }
 0x437   : > { %3725 = vmatprep.subr.bf16.mxu1 %v8968_v60  ;;  %v9046_v60 = vld [vmem:[#allocation14 + $0x494] ss:$8 sps:$4 sm:$0xff]  }
 0x43a   : > { %3726 = vmatpush1.bf16.msra.mxu1 %v8966_v61  ;;  %v9044_v61 = vld [vmem:[#allocation14 + $0x490] ss:$8 sps:$4 sm:$0xff]  }
 0x43b   : > { %3738 = vmatprep.subr.bf16.mxu1 %v8971_v62  ;;  %v9049_v62 = vld [vmem:[#allocation14 + $0x4a4] ss:$8 sps:$4 sm:$0xff]  }
 0x43d   : > { %3728 = vmatmul.mubr.bf16.vlgmr.msra.gmra.mrb[8].mxu1 %v2061_v4  ;;  %v9058_v4 = vld [vmem:[#allocation14 + $0x4d4] ss:$8 sps:$4 sm:$0xff]  }
 0x43e   : > { %3739 = vmatpush1.bf16.msra.mxu1 %v8969_v3  ;;  %3770 = vmatprep.mubr.bf16.mxu1 %v2064_v6  ;;  %v9053_v3 = vld [vmem:[#allocation14 + $0x4c0] ss:$8 sps:$4 sm:$0xff]   ;;  %v9061_v6 = vld [vmem:[#allocation14 + $0x4e4] ss:$8 sps:$4 sm:$0xff]  }
 0x43f   : > { %3740 = vmatprep.subr.bf16.mxu1 %v8974_v5  ;;  %v9056_v5 = vld [vmem:[#allocation14 + $0x4d0] ss:$8 sps:$4 sm:$0xff]  }
 0x442   : > { %3741 = vmatpush1.bf16.msra.mxu1 %v8972_v7  ;;  %v9059_v7 = vld [vmem:[#allocation14 + $0x4e0] ss:$8 sps:$4 sm:$0xff]  }
 0x443   : > { %3742 = vmatprep.subr.bf16.mxu1 %v8977_v8  ;;  %v9064_v8 = vld [vmem:[#allocation14 + $0x4f4] ss:$8 sps:$4 sm:$0xff]  }
 0x446   : > { %3743 = vmatpush1.bf16.msra.mxu1 %v8975_v9  ;;  %v9062_v9 = vld [vmem:[#allocation14 + $0x4f0] ss:$8 sps:$4 sm:$0xff]  }
 0x447   : > { %3744 = vmatprep.subr.bf16.mxu1 %v8980_v10  ;;  %v9067_v10 = vld [vmem:[#allocation14 + $0x504] ss:$8 sps:$4 sm:$0xff]  }
 0x44a   : > { %3745 = vmatpush1.bf16.msra.mxu1 %v8978_v11  ;;  %v2033_v11 = vld [vmem:[#allocation6 + $0x40] sm:$0xff] }
 0x44b   : > { %3746 = vmatprep.subr.bf16.mxu1 %v8983_v12  ;;  %v2049_v12 = vld [vmem:[#allocation6 + $0xc0] sm:$0x1] }
 0x44e   : > { %3747 = vmatpush1.bf16.msra.mxu1 %v8981_v13  ;;  %v2036_v13 = vld [vmem:[#allocation6 + $0x58] sm:$0xff] }
 0x44f   : > { %3748 = vmatprep.subr.bf16.mxu1 %v8986_v14  ;;  %v2052_v14 = vld [vmem:[#allocation6 + $0xd8] sm:$0x1] }
 0x452   : > { %3749 = vmatpush1.bf16.msra.mxu1 %v8984_v15  ;;  %v9065_v15 = vld [vmem:[#allocation14 + $0x500] ss:$8 sps:$4 sm:$0xff]  }
 0x453   : > { %3750 = vmatprep.subr.bf16.mxu1 %v8989_v17  ;;  %v2065_v17 = vpack.c.bf16 %v2049_v12, %v2033_v11  ;;  %v9143_v11 = vld [vmem:[#allocation14 + $0x6a0] ss:$8 sps:$4 sm:$0xff]   ;;  %v9148_v12 = vld [vmem:[#allocation14 + $0x6b4] ss:$8 sps:$4 sm:$0xff]  }
 0x456   : > { %3751 = vmatpush1.bf16.msra.mxu1 %v8987_v19  ;;  %v9070_v19 = vld [vmem:[#allocation14 + $0x514] ss:$8 sps:$4 sm:$0xff]  }
 0x457   : > { %3752 = vmatprep.subr.bf16.mxu1 %v8992_v20  ;;  %v2068_v20 = vpack.c.bf16 %v2052_v14, %v2036_v13  ;;  %v9146_v13 = vld [vmem:[#allocation14 + $0x6b0] ss:$8 sps:$4 sm:$0xff]   ;;  %v9151_v14 = vld [vmem:[#allocation14 + $0x6c4] ss:$8 sps:$4 sm:$0xff]  }
 0x45a   : > { %3753 = vmatpush1.bf16.msra.mxu1 %v8990_v22  ;;  %v9068_v22 = vld [vmem:[#allocation14 + $0x510] ss:$8 sps:$4 sm:$0xff]  }
 0x45b   : > { %3754 = vmatprep.subr.bf16.mxu1 %v8995_v24  ;;  %v9073_v24 = vld [vmem:[#allocation14 + $0x524] ss:$8 sps:$4 sm:$0xff]  }
 0x45e   : > { %3755 = vmatpush1.bf16.msra.mxu1 %v8993_v25  ;;  %v9071_v25 = vld [vmem:[#allocation14 + $0x520] ss:$8 sps:$4 sm:$0xff]  }
 0x45f   : > { %3756 = vmatprep.subr.bf16.mxu1 %v8998_v26  ;;  %v9076_v26 = vld [vmem:[#allocation14 + $0x534] ss:$8 sps:$4 sm:$0xff]  }
 0x462   : > { %3757 = vmatpush1.bf16.msra.mxu1 %v8996_v27  ;;  %v9074_v27 = vld [vmem:[#allocation14 + $0x530] ss:$8 sps:$4 sm:$0xff]  }
 0x463   : > { %3758 = vmatprep.subr.bf16.mxu1 %v9001_v28  ;;  %v9079_v28 = vld [vmem:[#allocation14 + $0x544] ss:$8 sps:$4 sm:$0xff]  }
 0x466   : > { %3759 = vmatpush1.bf16.msra.mxu1 %v8999_v29  ;;  %v9077_v29 = vld [vmem:[#allocation14 + $0x540] ss:$8 sps:$4 sm:$0xff]  }
 0x467   : > { %3760 = vmatprep.subr.bf16.mxu1 %v9004_v30  ;;  %v9082_v30 = vld [vmem:[#allocation14 + $0x554] ss:$8 sps:$4 sm:$0xff]  }
 0x46a   : > { %3761 = vmatpush1.bf16.msra.mxu1 %v9002_v21  ;;  %v9080_v21 = vld [vmem:[#allocation14 + $0x550] ss:$8 sps:$4 sm:$0xff]  }
 0x46b   : > { %3762 = vmatprep.subr.bf16.mxu1 %v9007_v18  ;;  %v9085_v18 = vld [vmem:[#allocation14 + $0x564] ss:$8 sps:$4 sm:$0xff]  }
 0x46e   : > { %3763 = vmatpush1.bf16.msra.mxu1 %v9005_v31  ;;  %v9083_v31 = vld [vmem:[#allocation14 + $0x560] ss:$8 sps:$4 sm:$0xff]  }
 0x46f   : > { %3764 = vmatprep.subr.bf16.mxu1 %v9010_v23  ;;  %v9088_v23 = vld [vmem:[#allocation14 + $0x574] ss:$8 sps:$4 sm:$0xff]  }
 0x472   : > { %3765 = vmatpush1.bf16.msra.mxu1 %v9008_v32  ;;  %v9086_v32 = vld [vmem:[#allocation14 + $0x570] ss:$8 sps:$4 sm:$0xff]  }
 0x473   : > { %3766 = vmatprep.subr.bf16.mxu1 %v9013_v33  ;;  %v9091_v33 = vld [vmem:[#allocation14 + $0x584] ss:$8 sps:$4 sm:$0xff]  }
 0x476   : > { %3767 = vmatpush1.bf16.msra.mxu1 %v9011_v34  ;;  %v9089_v34 = vld [vmem:[#allocation14 + $0x580] ss:$8 sps:$4 sm:$0xff]  }
 0x477   : > { %3768 = vmatprep.subr.bf16.mxu1 %v9016_v35  ;;  %v9094_v35 = vld [vmem:[#allocation14 + $0x594] ss:$8 sps:$4 sm:$0xff]  }
 0x47a   : > { %3769 = vmatpush1.bf16.msra.mxu1 %v9014_v16  ;;  %v9092_v16 = vld [vmem:[#allocation14 + $0x590] ss:$8 sps:$4 sm:$0xff]  }
 0x47b   : > { %3781 = vmatprep.subr.bf16.mxu1 %v9019_v36  ;;  %v9097_v36 = vld [vmem:[#allocation14 + $0x5a4] ss:$8 sps:$4 sm:$0xff]  }
 0x47d   : > { %3771 = vmatmul.mubr.bf16.vlgmr.msra.gmra.mrb[8].mxu1 %v2063_v42  ;;  %v9106_v42 = vld [vmem:[#allocation14 + $0x5d4] ss:$8 sps:$4 sm:$0xff]  }
 0x47e   : > { %3782 = vmatpush1.bf16.msra.mxu1 %v9017_v41  ;;  %3813 = vmatprep.mubr.bf16.mxu1 %v2066_v44  ;;  %v9101_v41 = vld [vmem:[#allocation14 + $0x5c0] ss:$8 sps:$4 sm:$0xff]   ;;  %v9109_v44 = vld [vmem:[#allocation14 + $0x5e4] ss:$8 sps:$4 sm:$0xff]  }
 0x47f   : > { %3783 = vmatprep.subr.bf16.mxu1 %v9022_v43  ;;  %v9104_v43 = vld [vmem:[#allocation14 + $0x5d0] ss:$8 sps:$4 sm:$0xff]  }
 0x482   : > { %3784 = vmatpush1.bf16.msra.mxu1 %v9020_v45  ;;  %v9107_v45 = vld [vmem:[#allocation14 + $0x5e0] ss:$8 sps:$4 sm:$0xff]  }
 0x483   : > { %3785 = vmatprep.subr.bf16.mxu1 %v9025_v46  ;;  %v9112_v46 = vld [vmem:[#allocation14 + $0x5f4] ss:$8 sps:$4 sm:$0xff]  }
 0x486   : > { %3786 = vmatpush1.bf16.msra.mxu1 %v9023_v47  ;;  %v9110_v47 = vld [vmem:[#allocation14 + $0x5f0] ss:$8 sps:$4 sm:$0xff]  }
 0x487   : > { %3787 = vmatprep.subr.bf16.mxu1 %v9028_v48  ;;  %v9115_v48 = vld [vmem:[#allocation14 + $0x604] ss:$8 sps:$4 sm:$0xff]  }
 0x48a   : > { %3788 = vmatpush1.bf16.msra.mxu1 %v9026_v49  ;;  %v2035_v49 = vld [vmem:[#allocation6 + $0x50] sm:$0xff] }
 0x48b   : > { %3789 = vmatprep.subr.bf16.mxu1 %v9031_v50  ;;  %v2051_v50 = vld [vmem:[#allocation6 + $0xd0] sm:$0x1] }
 0x48e   : > { %3790 = vmatpush1.bf16.msra.mxu1 %v9029_v51  ;;  %v2038_v51 = vld [vmem:[#allocation6 + $0x68] sm:$0xff] }
 0x48f   : > { %3791 = vmatprep.subr.bf16.mxu1 %v9034_v52  ;;  %v2054_v52 = vld [vmem:[#allocation6 + $0xe8] sm:$0x1] }
 0x492   : > { %3792 = vmatpush1.bf16.msra.mxu1 %v9032_v53  ;;  %v9113_v53 = vld [vmem:[#allocation14 + $0x600] ss:$8 sps:$4 sm:$0xff]  }
 0x493   : > { %3793 = vmatprep.subr.bf16.mxu1 %v9037_v54  ;;  %v2067_v54 = vpack.c.bf16 %v2051_v50, %v2035_v49  ;;  %v9191_v49 = vld [vmem:[#allocation14 + $0x7a0] ss:$8 sps:$4 sm:$0xff]   ;;  %v9196_v50 = vld [vmem:[#allocation14 + $0x7b4] ss:$8 sps:$4 sm:$0xff]  }
 0x496   : > { %3794 = vmatpush1.bf16.msra.mxu1 %v9035_v55  ;;  %v9118_v55 = vld [vmem:[#allocation14 + $0x614] ss:$8 sps:$4 sm:$0xff]  }
 0x497   : > { %3795 = vmatprep.subr.bf16.mxu1 %v9040_v56  ;;  %v2070_v56 = vpack.c.bf16 %v2054_v52, %v2038_v51  ;;  %v9194_v51 = vld [vmem:[#allocation14 + $0x7b0] ss:$8 sps:$4 sm:$0xff]   ;;  %v9199_v52 = vld [vmem:[#allocation14 + $0x7c4] ss:$8 sps:$4 sm:$0xff]  }
 0x49a   : > { %3796 = vmatpush1.bf16.msra.mxu1 %v9038_v57  ;;  %v9116_v57 = vld [vmem:[#allocation14 + $0x610] ss:$8 sps:$4 sm:$0xff]  }
 0x49b   : > { %3797 = vmatprep.subr.bf16.mxu1 %v9043_v58  ;;  %v9121_v58 = vld [vmem:[#allocation14 + $0x624] ss:$8 sps:$4 sm:$0xff]  }
 0x49e   : > { %3798 = vmatpush1.bf16.msra.mxu1 %v9041_v59  ;;  %v9119_v59 = vld [vmem:[#allocation14 + $0x620] ss:$8 sps:$4 sm:$0xff]  }
 0x49f   : > { %3799 = vmatprep.subr.bf16.mxu1 %v9046_v60  ;;  %v9124_v60 = vld [vmem:[#allocation14 + $0x634] ss:$8 sps:$4 sm:$0xff]  }
 0x4a2   : > { %3800 = vmatpush1.bf16.msra.mxu1 %v9044_v61  ;;  %v9122_v61 = vld [vmem:[#allocation14 + $0x630] ss:$8 sps:$4 sm:$0xff]  }
 0x4a3   : > { %3801 = vmatprep.subr.bf16.mxu1 %v9049_v62  ;;  %v9127_v62 = vld [vmem:[#allocation14 + $0x644] ss:$8 sps:$4 sm:$0xff]  }
 0x4a6   : > { %3802 = vmatpush1.bf16.msra.mxu1 %v9047_v63  ;;  %v9125_v63 = vld [vmem:[#allocation14 + $0x640] ss:$8 sps:$4 sm:$0xff]  }
 0x4a7   : > { %3803 = vmatprep.subr.bf16.mxu1 %v9052_v0  ;;  %v9130_v0 = vld [vmem:[#allocation14 + $0x654] ss:$8 sps:$4 sm:$0xff]  }
 0x4aa   : > { %3804 = vmatpush1.bf16.msra.mxu1 %v9050_v1  ;;  %v9128_v1 = vld [vmem:[#allocation14 + $0x650] ss:$8 sps:$4 sm:$0xff]  }
 0x4ab   : > { %3805 = vmatprep.subr.bf16.mxu1 %v9055_v2  ;;  %v9133_v2 = vld [vmem:[#allocation14 + $0x664] ss:$8 sps:$4 sm:$0xff]  }
 0x4ae   : > { %3806 = vmatpush1.bf16.msra.mxu1 %v9053_v3  ;;  %v9131_v3 = vld [vmem:[#allocation14 + $0x660] ss:$8 sps:$4 sm:$0xff]  }
 0x4af   : > { %3807 = vmatprep.subr.bf16.mxu1 %v9058_v4  ;;  %v9136_v4 = vld [vmem:[#allocation14 + $0x674] ss:$8 sps:$4 sm:$0xff]  }
 0x4b2   : > { %3808 = vmatpush1.bf16.msra.mxu1 %v9056_v5  ;;  %v9134_v5 = vld [vmem:[#allocation14 + $0x670] ss:$8 sps:$4 sm:$0xff]  }
 0x4b3   : > { %3809 = vmatprep.subr.bf16.mxu1 %v9061_v6  ;;  %v9139_v6 = vld [vmem:[#allocation14 + $0x684] ss:$8 sps:$4 sm:$0xff]  }
 0x4b6   : > { %3810 = vmatpush1.bf16.msra.mxu1 %v9059_v7  ;;  %v9137_v7 = vld [vmem:[#allocation14 + $0x680] ss:$8 sps:$4 sm:$0xff]  }
 0x4b7   : > { %3811 = vmatprep.subr.bf16.mxu1 %v9064_v8  ;;  %v9142_v8 = vld [vmem:[#allocation14 + $0x694] ss:$8 sps:$4 sm:$0xff]  }
 0x4ba   : > { %3812 = vmatpush1.bf16.msra.mxu1 %v9062_v9  ;;  %v9140_v9 = vld [vmem:[#allocation14 + $0x690] ss:$8 sps:$4 sm:$0xff]  }
 0x4bb   : > { %3824 = vmatprep.subr.bf16.mxu1 %v9067_v10  ;;  %v9145_v10 = vld [vmem:[#allocation14 + $0x6a4] ss:$8 sps:$4 sm:$0xff]  }
 0x4bd   : > { %3814 = vmatmul.mubr.bf16.vlgmr.msra.gmra.mrb[8].mxu1 %v2065_v17  ;;  %v9154_v17 = vld [vmem:[#allocation14 + $0x6d4] ss:$8 sps:$4 sm:$0xff]  }
 0x4be   : > { %3825 = vmatpush1.bf16.msra.mxu1 %v9065_v15  ;;  %3856 = vmatprep.mubr.bf16.mxu1 %v2068_v20  ;;  %v9149_v15 = vld [vmem:[#allocation14 + $0x6c0] ss:$8 sps:$4 sm:$0xff]   ;;  %v9157_v20 = vld [vmem:[#allocation14 + $0x6e4] ss:$8 sps:$4 sm:$0xff]  }
 0x4bf   : > { %3826 = vmatprep.subr.bf16.mxu1 %v9070_v19  ;;  %v9152_v19 = vld [vmem:[#allocation14 + $0x6d0] ss:$8 sps:$4 sm:$0xff]  }
 0x4c2   : > { %3827 = vmatpush1.bf16.msra.mxu1 %v9068_v22  ;;  %v9155_v22 = vld [vmem:[#allocation14 + $0x6e0] ss:$8 sps:$4 sm:$0xff]  }
 0x4c3   : > { %3828 = vmatprep.subr.bf16.mxu1 %v9073_v24  ;;  %v9160_v24 = vld [vmem:[#allocation14 + $0x6f4] ss:$8 sps:$4 sm:$0xff]  }
 0x4c6   : > { %3829 = vmatpush1.bf16.msra.mxu1 %v9071_v25  ;;  %v9158_v25 = vld [vmem:[#allocation14 + $0x6f0] ss:$8 sps:$4 sm:$0xff]  }
 0x4c7   : > { %3830 = vmatprep.subr.bf16.mxu1 %v9076_v26  ;;  %v9163_v26 = vld [vmem:[#allocation14 + $0x704] ss:$8 sps:$4 sm:$0xff]  }
 0x4ca   : > { %3831 = vmatpush1.bf16.msra.mxu1 %v9074_v27  ;;  %v2037_v27 = vld [vmem:[#allocation6 + $0x60] sm:$0xff] }
 0x4cb   : > { %3832 = vmatprep.subr.bf16.mxu1 %v9079_v28  ;;  %v2053_v28 = vld [vmem:[#allocation6 + $0xe0] sm:$0x1] }
 0x4ce   : > { %3833 = vmatpush1.bf16.msra.mxu1 %v9077_v29  ;;  %v2040_v29 = vld [vmem:[#allocation6 + $0x78] sm:$0xff] }
 0x4cf   : > { %3834 = vmatprep.subr.bf16.mxu1 %v9082_v30  ;;  %v2056_v30 = vld [vmem:[#allocation6 + $0xf8] sm:$0x1] }
 0x4d2   : > { %3835 = vmatpush1.bf16.msra.mxu1 %v9080_v21  ;;  %v9161_v21 = vld [vmem:[#allocation14 + $0x700] ss:$8 sps:$4 sm:$0xff]  }
 0x4d3   : > { %3836 = vmatprep.subr.bf16.mxu1 %v9085_v18  ;;  %v2069_v18 = vpack.c.bf16 %v2053_v28, %v2037_v27  ;;  %v9227_v27 = vld [vmem:[#allocation16 + $0x38] sm:$0xff]   ;;  %v9231_v28 = vld [vmem:[#allocation16 + $0xc0] sm:$0xff]  }
 0x4d6   : > { %3837 = vmatpush1.bf16.msra.mxu1 %v9083_v31  ;;  %v9166_v31 = vld [vmem:[#allocation14 + $0x714] ss:$8 sps:$4 sm:$0xff]  }
 0x4d7   : > { %3838 = vmatprep.subr.bf16.mxu1 %v9088_v23  ;;  %v2072_v23 = vpack.c.bf16 %v2056_v30, %v2040_v29  ;;  %v9469_v29 = vld [vmem:[#allocation4 + $0x24] ss:$8 sps:$4 sm:$0x66]   ;;  %v9252_v30 = vld [vmem:[#allocation4] ss:$8 sps:$4 sm:$0xcc]  }
 0x4da   : > { %3839 = vmatpush1.bf16.msra.mxu1 %v9086_v32  ;;  %v9164_v32 = vld [vmem:[#allocation14 + $0x710] ss:$8 sps:$4 sm:$0xff]  }
 0x4db   : > { %3840 = vmatprep.subr.bf16.mxu1 %v9091_v33  ;;  %v9169_v33 = vld [vmem:[#allocation14 + $0x724] ss:$8 sps:$4 sm:$0xff]  }
 0x4de   : > { %3841 = vmatpush1.bf16.msra.mxu1 %v9089_v34  ;;  %v9167_v34 = vld [vmem:[#allocation14 + $0x720] ss:$8 sps:$4 sm:$0xff]  }
 0x4df   : > { %3842 = vmatprep.subr.bf16.mxu1 %v9094_v35  ;;  %v9172_v35 = vld [vmem:[#allocation14 + $0x734] ss:$8 sps:$4 sm:$0xff]  }
 0x4e2   : > { %3843 = vmatpush1.bf16.msra.mxu1 %v9092_v16  ;;  %v9170_v16 = vld [vmem:[#allocation14 + $0x730] ss:$8 sps:$4 sm:$0xff]  }
 0x4e3   : > { %3844 = vmatprep.subr.bf16.mxu1 %v9097_v36  ;;  %v9175_v36 = vld [vmem:[#allocation14 + $0x744] ss:$8 sps:$4 sm:$0xff]  }
 0x4e6   : > { %3845 = vmatpush1.bf16.msra.mxu1 %v9095_v37  ;;  %v9173_v37 = vld [vmem:[#allocation14 + $0x740] ss:$8 sps:$4 sm:$0xff]  }
 0x4e7   : > { %3846 = vmatprep.subr.bf16.mxu1 %v9100_v38  ;;  %v9178_v38 = vld [vmem:[#allocation14 + $0x754] ss:$8 sps:$4 sm:$0xff]  }
 0x4ea   : > { %3847 = vmatpush1.bf16.msra.mxu1 %v9098_v39  ;;  %v9176_v39 = vld [vmem:[#allocation14 + $0x750] ss:$8 sps:$4 sm:$0xff]  }
 0x4eb   : > { %3848 = vmatprep.subr.bf16.mxu1 %v9103_v40  ;;  %v9181_v40 = vld [vmem:[#allocation14 + $0x764] ss:$8 sps:$4 sm:$0xff]  }
 0x4ee   : > { %3849 = vmatpush1.bf16.msra.mxu1 %v9101_v41  ;;  %v9179_v41 = vld [vmem:[#allocation14 + $0x760] ss:$8 sps:$4 sm:$0xff]  }
 0x4ef   : > { %3850 = vmatprep.subr.bf16.mxu1 %v9106_v42  ;;  %v9184_v42 = vld [vmem:[#allocation14 + $0x774] ss:$8 sps:$4 sm:$0xff]  }
 0x4f2   : > { %3851 = vmatpush1.bf16.msra.mxu1 %v9104_v43  ;;  %v9182_v43 = vld [vmem:[#allocation14 + $0x770] ss:$8 sps:$4 sm:$0xff]  }
 0x4f3   : > { %3852 = vmatprep.subr.bf16.mxu1 %v9109_v44  ;;  %v9187_v44 = vld [vmem:[#allocation14 + $0x784] ss:$8 sps:$4 sm:$0xff]  }
 0x4f6   : > { %3853 = vmatpush1.bf16.msra.mxu1 %v9107_v45  ;;  %v9185_v45 = vld [vmem:[#allocation14 + $0x780] ss:$8 sps:$4 sm:$0xff]  }
 0x4f7   : > { %3854 = vmatprep.subr.bf16.mxu1 %v9112_v46  ;;  %v9190_v46 = vld [vmem:[#allocation14 + $0x794] ss:$8 sps:$4 sm:$0xff]  }
 0x4fa   : > { %3855 = vmatpush1.bf16.msra.mxu1 %v9110_v47  ;;  %v9188_v47 = vld [vmem:[#allocation14 + $0x790] ss:$8 sps:$4 sm:$0xff]  }
 0x4fb   : > { %3867 = vmatprep.subr.bf16.mxu1 %v9115_v48  ;;  %v9193_v48 = vld [vmem:[#allocation14 + $0x7a4] ss:$8 sps:$4 sm:$0xff]  }
 0x4fd   : > { %3857 = vmatmul.mubr.bf16.vlgmr.msra.gmra.mrb[8].mxu1 %v2067_v54  ;;  %v9202_v54 = vld [vmem:[#allocation14 + $0x7d4] ss:$8 sps:$4 sm:$0xff]  }
 0x4fe   : > { %3868 = vmatpush1.bf16.msra.mxu1 %v9113_v53  ;;  %3899 = vmatprep.mubr.bf16.mxu1 %v2070_v56  ;;  %v9197_v53 = vld [vmem:[#allocation14 + $0x7c0] ss:$8 sps:$4 sm:$0xff]   ;;  %v9205_v56 = vld [vmem:[#allocation14 + $0x7e4] ss:$8 sps:$4 sm:$0xff]  }
 0x4ff   : > { %3869 = vmatprep.subr.bf16.mxu1 %v9118_v55  ;;  %v9200_v55 = vld [vmem:[#allocation14 + $0x7d0] ss:$8 sps:$4 sm:$0xff]  }
 0x502   : > { %3870 = vmatpush1.bf16.msra.mxu1 %v9116_v57  ;;  %v9203_v57 = vld [vmem:[#allocation14 + $0x7e0] ss:$8 sps:$4 sm:$0xff]  }
 0x503   : > { %3871 = vmatprep.subr.bf16.mxu1 %v9121_v58  ;;  %v9208_v58 = vld [vmem:[#allocation14 + $0x7f4] ss:$8 sps:$4 sm:$0xff]  }
 0x506   : > { %3872 = vmatpush1.bf16.msra.mxu1 %v9119_v59  ;;  %v9206_v59 = vld [vmem:[#allocation14 + $0x7f0] ss:$8 sps:$4 sm:$0xff]  }
 0x507   : > { %3873 = vmatprep.subr.bf16.mxu1 %v9124_v60  ;;  %v2039_v60 = vld [vmem:[#allocation6 + $0x70] sm:$0xff] }
 0x50a   : > { %3874 = vmatpush1.bf16.msra.mxu1 %v9122_v61  ;;  %v2055_v61 = vld [vmem:[#allocation6 + $0xf0] sm:$0x1] }
 0x50b   : > { %3875 = vmatprep.subr.bf16.mxu1 %v9127_v62  ;;  %v2071_v62 = vpack.c.bf16 %v2055_v61, %v2039_v60 }
 0x50e   : > { %3876 = vmatpush1.bf16.msra.mxu1 %v9125_v63  ;;  %v9209_v63 = vld [vmem:[#allocation4] ss:$8 sps:$4 sm:$0x88]  }
 0x50f   : > { %3877 = vmatprep.subr.bf16.mxu1 %v9130_v0  ;;  %v9211_v0 = vld [vmem:[#allocation4 + $0x4] ss:$8 sps:$4 sm:$0x11]  }
 0x512   : > { %3878 = vmatpush1.bf16.msra.mxu1 %v9128_v1  ;;  %v9256_v1 = vld [vmem:[#allocation16 + $0x148] sm:$0xff]  }
 0x513   : > { %3879 = vmatprep.subr.bf16.mxu1 %v9133_v2  ;;  %v7854_v2 = vrot.slane %v9209_v63, 11 }
 0x516   : > { %3880 = vmatpush1.bf16.msra.mxu1 %v9131_v3  ;;  %v4097_v3 = vrot.slane %v9211_v0, 7 }
 0x517   : > { %3881 = vmatprep.subr.bf16.mxu1 %v9136_v4  ;;  %v9212_v4 = vld [vmem:[#allocation16 + $0x40] sm:$0xff]  }
 0x518   : > { %8238 = vmatprep.subr.bf16.mxu0 %v9212_v4 }
 0x51a   : > { %3882 = vmatpush1.bf16.msra.mxu1 %v9134_v5  ;;  %v9213_v5 = vld [vmem:[#allocation16] sm:$0xff]  }
 0x51b   : > { %3883 = vmatprep.subr.bf16.mxu1 %v9139_v6  ;;  %v9214_v6 = vld [vmem:[#allocation16 + $0x48] sm:$0xff]   ;;  %8239 = vmatpush3.bf16.msra.mxu0 %v9213_v5 }
 0x51c   : > { %8240 = vmatprep.subr.bf16.mxu0 %v9214_v6 }
 0x51e   : > { %3884 = vmatpush1.bf16.msra.mxu1 %v9137_v7  ;;  %v4098_v7 = vsel %vm10393_vm1, %v7854_v2, %v4097_v3 }
 0x51f   : > { %3885 = vmatprep.subr.bf16.mxu1 %v9142_v8  ;;  %4100 = vst [vmem:[#allocation7 + $0x18] sm:$0x33] %v4098_v7  ;;  %v9215_v8 = vld [vmem:[#allocation16 + $0x8] sm:$0xff]  }
 0x520   : > { %8241 = vmatpush3.bf16.msra.mxu0 %v9215_v8 }
 0x522   : > { %3886 = vmatpush1.bf16.msra.mxu1 %v9140_v9  ;;  %v9216_v9 = vld [vmem:[#allocation16 + $0x50] sm:$0xff]  }
 0x523   : > { %3887 = vmatprep.subr.bf16.mxu1 %v9145_v10  ;;  %v9228_v10 = vld [vmem:[#allocation4] ss:$8 sps:$4 sm:$0x33]   ;;  %8242 = vmatprep.subr.bf16.mxu0 %v9216_v9 }
 0x524   : > { %4068 = vst [vmem:[#allocation7] sm:$0x33] %v9228_v10 }
 0x526   : > { %3888 = vmatpush1.bf16.msra.mxu1 %v9143_v11  ;;  %v9217_v11 = vld [vmem:[#allocation16 + $0x10] sm:$0xff]  }
 0x527   : > { %3889 = vmatprep.subr.bf16.mxu1 %v9148_v12  ;;  %v9218_v12 = vld [vmem:[#allocation16 + $0x58] sm:$0xff]   ;;  %8243 = vmatpush3.bf16.msra.mxu0 %v9217_v11 }
 0x528   : > { %8244 = vmatprep.subr.bf16.mxu0 %v9218_v12 }
 0x52a   : > { %3890 = vmatpush1.bf16.msra.mxu1 %v9146_v13  ;;  %v9219_v13 = vld [vmem:[#allocation16 + $0x18] sm:$0xff]  }
 0x52b   : > { %3891 = vmatprep.subr.bf16.mxu1 %v9151_v14  ;;  %v9220_v14 = vld [vmem:[#allocation16 + $0x60] sm:$0xff]   ;;  %8245 = vmatpush3.bf16.msra.mxu0 %v9219_v13 }
 0x52c   : > { %8246 = vmatprep.subr.bf16.mxu0 %v9220_v14 }
 0x52e   : > { %3892 = vmatpush1.bf16.msra.mxu1 %v9149_v15  ;;  %v9221_v15 = vld [vmem:[#allocation16 + $0x20] sm:$0xff]  }
 0x52f   : > { %3893 = vmatprep.subr.bf16.mxu1 %v9154_v17  ;;  %v9222_v17 = vld [vmem:[#allocation16 + $0x68] sm:$0xff]   ;;  %8247 = vmatpush3.bf16.msra.mxu0 %v9221_v15 }
 0x530   : > { %8248 = vmatprep.subr.bf16.mxu0 %v9222_v17 }
 0x532   : > { %3894 = vmatpush1.bf16.msra.mxu1 %v9152_v19  ;;  %v9223_v19 = vld [vmem:[#allocation16 + $0x28] sm:$0xff]  }
 0x533   : > { %3895 = vmatprep.subr.bf16.mxu1 %v9157_v20  ;;  %v9224_v20 = vld [vmem:[#allocation16 + $0x70] sm:$0xff]   ;;  %8249 = vmatpush3.bf16.msra.mxu0 %v9223_v19 }
 0x534   : > { %8250 = vmatprep.subr.bf16.mxu0 %v9224_v20 }
 0x536   : > { %3896 = vmatpush1.bf16.msra.mxu1 %v9155_v22  ;;  %v9225_v22 = vld [vmem:[#allocation16 + $0x30] sm:$0xff]  }
 0x537   : > { %3897 = vmatprep.subr.bf16.mxu1 %v9160_v24  ;;  %v9233_v24 = vld [vmem:[#allocation4] ss:$8 sps:$4 sm:$0x66]   ;;  %8251 = vmatpush3.bf16.msra.mxu0 %v9225_v22 }
 0x53a   : > { %3898 = vmatpush1.bf16.msra.mxu1 %v9158_v25  ;;  %v9226_v25 = vld [vmem:[#allocation16 + $0x78] sm:$0xff]  }
 0x53b   : > { %3910 = vmatprep.subr.bf16.mxu1 %v9163_v26  ;;  %v7852_v26 = vrot.slane %v9233_v24, 9  ;;  %8252 = vmatprep.subr.bf16.mxu0 %v9226_v25 }
 0x53c   : > { %8253 = vmatpush3.bf16.msra.mxu0 %v9227_v27 }
 0x53d   : > { %3900 = vmatmul.mubr.bf16.vlgmr.msra.gmra.mrb[8].mxu1 %v2069_v18  ;;  %4077 = vst [vmem:[#allocation7 + $0x8] sm:$0x33] %v7852_v26  ;;  %8260 = vmatprep.subr.bf16.mxu0 %v9231_v28  ;;  %v4349_v18 = vrot.slane %v9469_v29, 7 }
 0x53e   : > { %3911 = vmatpush1.bf16.msra.mxu1 %v9161_v21  ;;  %3942 = vmatprep.mubr.bf16.mxu1 %v2072_v23  ;;  %v9507_v21 = vld [vmem:[#allocation4 + $0x24] ss:$8 sps:$4 sm:$0x88]   ;;  %v9450_v23 = vld [vmem:[#allocation4 + $0x24] ss:$8 sps:$4 sm:$0x33]  }
 0x53f   : > { %3912 = vmatprep.subr.bf16.mxu1 %v9166_v31  ;;  %v7853_v31 = vrot.slane %v9252_v30, 10  ;;  %4351 = vst [vmem:[#allocation7 + $0x68] sm:$0xcc] %v4349_v18 }
 0x541   : > { %4086 = vst [vmem:[#allocation7 + $0x10] sm:$0x33] %v7853_v31 }
 0x542   : > { %3913 = vmatpush1.bf16.msra.mxu1 %v9164_v32  ;;  %v9488_v32 = vld [vmem:[#allocation4 + $0x24] ss:$8 sps:$4 sm:$0xcc]  }
 0x543   : > { %3914 = vmatprep.subr.bf16.mxu1 %v9169_v33  ;;  %v4341_v33 = vrot.slane %v9450_v23, 6  ;;  %4358 = vst [vmem:[#allocation7 + $0x70] sm:$0xcc] %v9488_v32 }
 0x545   : > { %4343 = vst [vmem:[#allocation7 + $0x60] sm:$0xcc] %v4341_v33 }
 0x546   : > { %3915 = vmatpush1.bf16.msra.mxu1 %v9167_v34  ;;  %v9508_v34 = vld [vmem:[#allocation4 + $0x30] ss:$8 sps:$4 sm:$0x11]  }
 0x547   : > { %3916 = vmatprep.subr.bf16.mxu1 %v9172_v35  ;;  %v7867_v35 = vrot.slane %v9507_v21, 9 }
 0x54a   : > { %3917 = vmatpush1.bf16.msra.mxu1 %v9170_v16  ;;  %v4371_v16 = vrot.slane %v9508_v34, 5 }
 0x54b   : > { %3918 = vmatprep.subr.bf16.mxu1 %v9175_v36  ;;  %v9244_v36 = vld [vmem:[#allocation16 + $0xe8] sm:$0xff]  }
 0x54e   : > { %3919 = vmatpush1.bf16.msra.mxu1 %v9173_v37  ;;  %v4372_v37 = vsel %vm10399_vm4, %v7867_v35, %v4371_v16 }
 0x54f   : > { %3920 = vmatprep.subr.bf16.mxu1 %v9178_v38  ;;  %4374 = vst [vmem:[#allocation7 + $0x78] sm:$0xcc] %v4372_v37 }
 0x552   : > { %3921 = vmatpush1.bf16.msra.mxu1 %v9176_v39 }
 0x553   : > { %3922 = vmatprep.subr.bf16.mxu1 %v9181_v40 }
 0x556   : > { %3923 = vmatpush1.bf16.msra.mxu1 %v9179_v41 }
 0x557   : > { %3924 = vmatprep.subr.bf16.mxu1 %v9184_v42 }
 0x55a   : > { %3925 = vmatpush1.bf16.msra.mxu1 %v9182_v43 }
 0x55b   : > { %3926 = vmatprep.subr.bf16.mxu1 %v9187_v44 }
 0x55e   : > { %3927 = vmatpush1.bf16.msra.mxu1 %v9185_v45 }
 0x55f   : > { %3928 = vmatprep.subr.bf16.mxu1 %v9190_v46 }
 0x562   : > { %3929 = vmatpush1.bf16.msra.mxu1 %v9188_v47 }
 0x563   : > { %3930 = vmatprep.subr.bf16.mxu1 %v9193_v48 }
 0x566   : > { %3931 = vmatpush1.bf16.msra.mxu1 %v9191_v49 }
 0x567   : > { %3932 = vmatprep.subr.bf16.mxu1 %v9196_v50 }
 0x56a   : > { %3933 = vmatpush1.bf16.msra.mxu1 %v9194_v51 }
 0x56b   : > { %3934 = vmatprep.subr.bf16.mxu1 %v9199_v52 }
 0x56e   : > { %3935 = vmatpush1.bf16.msra.mxu1 %v9197_v53 }
 0x56f   : > { %3936 = vmatprep.subr.bf16.mxu1 %v9202_v54 }
 0x572   : > { %3937 = vmatpush1.bf16.msra.mxu1 %v9200_v55 }
 0x573   : > { %3938 = vmatprep.subr.bf16.mxu1 %v9205_v56 }
 0x576   : > { %3939 = vmatpush1.bf16.msra.mxu1 %v9203_v57 }
 0x577   : > { %3940 = vmatprep.subr.bf16.mxu1 %v9208_v58 }
 0x57a   : > { %3941 = vmatpush1.bf16.msra.mxu1 %v9206_v59 }
 0x57d   : > { %3943 = vmatmul.mubr.bf16.vlgmr.msra.gmra.mrb[8].mxu1 %v2071_v62 }
 0x650   : > { %v3944_v38 = vpop.f32.mrb[8].mxu1 }
 0x651   : > { %v3946_v39 = vpop.f32.mrb[9].mxu1  ;;  %v3973_v44 = vmul.f32 %v3944_v38, %v3944_v38 }
 0x652   : > { %v3948_v40 = vpop.f32.mrb[10].mxu1  ;;  %v3974_v48 = vmul.f32 %v3946_v39, %v3946_v39 }
 0x653   : > { %v3954_v41 = vsel %vm3953_vm15, %v3948_v40, 0.0  ;;  %v3975_v42 = vmul.f32 %v3948_v40, %v3948_v40  ;;  %v3950_v43 = vpop.f32.mrb[11].mxu1 }
 0x654   : > { %v3955_v45 = vadd.f32 %v3954_v41, %v3944_v38  ;;  %v3962_v46 = vsel %vm3953_vm15, %v3950_v43, 0.0  ;;  %v3976_v47 = vmul.f32 %v3950_v43, %v3950_v43 }
 0x655   : > { %v3977_v49 = vsel %vm3953_vm15, %v3975_v42, 0.0  ;;  %v3963_v50 = vadd.f32 %v3962_v46, %v3946_v39 }
 0x656   : > { %v3956_v51 = vrot.slane %v3955_v45, 4  ;;  %v3978_v52 = vadd.f32 %v3977_v49, %v3973_v44  ;;  %v3985_v53 = vsel %vm3953_vm15, %v3976_v47, 0.0 }
 0x657   : > { %v3964_v54 = vrot.slane %v3963_v50, 4  ;;  %v3986_v55 = vadd.f32 %v3985_v53, %v3974_v48 }
 0x658   : > { %v3957_v56 = vadd.f32 %v3956_v51, %v3955_v45  ;;  %v3979_v57 = vrot.slane %v3978_v52, 4 }
 0x659   : > { %v3965_v58 = vadd.f32 %v3964_v54, %v3963_v50  ;;  %v3987_v59 = vrot.slane %v3986_v55, 4 }
 0x65a   : > { %v3958_v60 = vrot.slane %v3957_v56, 2  ;;  %v3980_v61 = vadd.f32 %v3979_v57, %v3978_v52 }
 0x65b   : > { %v3966_v62 = vrot.slane %v3965_v58, 2  ;;  %v3988_v63 = vadd.f32 %v3987_v59, %v3986_v55 }
 0x65c   : > { %v3959_v0 = vadd.f32 %v3958_v60, %v3957_v56  ;;  %v3981_v2 = vrot.slane %v3980_v61, 2 }
 0x65d   : > { %v3967_v3 = vadd.f32 %v3966_v62, %v3965_v58  ;;  %v3989_v4 = vrot.slane %v3988_v63, 2 }
 0x65e   : > { %v3960_v5 = vrot.slane %v3959_v0, 1  ;;  %v3982_v6 = vadd.f32 %v3981_v2, %v3980_v61 }
 0x65f   : > { %v3968_v7 = vrot.slane %v3967_v3, 1  ;;  %v3990_v8 = vadd.f32 %v3989_v4, %v3988_v63 }
 0x660   : > { %v3961_v9 = vadd.f32 %v3960_v5, %v3959_v0  ;;  %v3983_v10 = vrot.slane %v3982_v6, 1 }
 0x661   : > { %v3969_v11 = vadd.f32 %v3968_v7, %v3967_v3  ;;  %v3991_v12 = vrot.slane %v3990_v8, 1 }
 0x662   : > { %v3971_v13 = vmul.f32 0.11111111, %v3961_v9  ;;  %v3984_v14 = vadd.f32 %v3983_v10, %v3982_v6 }
 0x663   : > { %v3972_v15 = vmul.f32 0.11111111, %v3969_v11  ;;  %v3992_v17 = vadd.f32 %v3991_v12, %v3990_v8  ;;  %v9232_v11 = vld [vmem:[#allocation16 + $0x80] sm:$0xff]  }
 0x664   : > { %v3993_v19 = vmul.f32 0.11111111, %v3984_v14  ;;  %v3995_v20 = vmul.f32 %v3971_v13, %v3971_v13  ;;  %v4001_v22 = vsub.f32 %v3944_v38, %v3971_v13  ;;  %v4003_v24 = vsub.f32 %v3948_v40, %v3971_v13 }
 0x665   : > { %v3994_v25 = vmul.f32 0.11111111, %v3992_v17  ;;  %v3996_v26 = vmul.f32 %v3972_v15, %v3972_v15  ;;  %v4002_v27 = vsub.f32 %v3946_v39, %v3972_v15  ;;  %v4004_v28 = vsub.f32 %v3950_v43, %v3972_v15 }
 0x666   : > { %v3997_v29 = vsub.f32 %v3993_v19, %v3995_v20  ;;  %v9236_v19 = vld [vmem:[#allocation16 + $0xc8] sm:$0xff]  }
 0x667   : > { %v3998_v30 = vsub.f32 %v3994_v25, %v3996_v26 }
 0x668   : > { %v3999_v21 = vmax.f32 %v3997_v29, 0.0  ;;  %v9237_v29 = vld [vmem:[#allocation16 + $0x88] sm:$0xff]  }
 0x669   : > { %v4000_v18 = vmax.f32 %v3998_v30, 0.0 }
 0x66a   : > { %v4005_v31 = vadd.f32 1e-05, %v3999_v21 }
 0x66b   : > { %v4006_v23 = vadd.f32 1e-05, %v4000_v18 }
 0x66c   : > { %9528 = vrsqrt.f32 %v4005_v31  ;;  %v9370_v31 = vld [vmem:[#allocation4 + $0x14] ss:$8 sps:$4 sm:$0x88]  }
 0x66d   : > { %9530 = vrsqrt.f32 %v4006_v23  ;;  %v9238_v23 = vld [vmem:[#allocation16 + $0xd0] sm:$0xff]  }
 0x676   : > { %v9529_v32 = vpop.eup %9528 }
 0x677   : > { %v9531_v33 = vpop.eup %9530  ;;  %v4009_v34 = vmul.f32 %v9529_v32, %v4001_v22  ;;  %v4011_v35 = vmul.f32 %v9529_v32, %v4003_v24 }
 0x678   : > { %v4010_v16 = vmul.f32 %v9531_v33, %v4002_v27  ;;  %v4012_v37 = vmul.f32 %v9531_v33, %v4004_v28  ;;  %v9239_v33 = vld [vmem:[#allocation16 + $0x90] sm:$0xff]  }
 0x679   : > { %vm4013_vm5 = vcmp.ge.f32.partialorder %v4009_v34, 0.0  ;;  %vm4015_vm6 = vcmp.ge.f32.partialorder %v4011_v35, 0.0  ;;  %v4017_v38 = vmul.f32 0.2, %v4009_v34  ;;  %v4019_v39 = vmul.f32 0.2, %v4011_v35 }
 0x67a   : > { %vm4014_vm7 = vcmp.ge.f32.partialorder %v4010_v16, 0.0  ;;  %vm4016_vm8 = vcmp.ge.f32.partialorder %v4012_v37, 0.0  ;;  %v4018_v40 = vmul.f32 0.2, %v4010_v16  ;;  %v4020_v41 = vmul.f32 0.2, %v4012_v37 }
 0x67b   : > { %v4021_v42 = vsel %vm4013_vm5, %v4009_v34, %v4017_v38  ;;  %v4023_v43 = vsel %vm4015_vm6, %v4011_v35, %v4019_v39  ;;  %v9240_v38 = vld [vmem:[#allocation16 + $0xd8] sm:$0xff]  }
 0x67c   : > { %4025 = vst [vmem:[%s10411_s14] sm:$0xff] %v4021_v42  ;;  %4027 = vst [vmem:[%s10411_s14 + $0x10] sm:$0x1] %v4023_v43  ;;  %v4039_v44 = vrot.slane %v4021_v42, 2  ;;  %v4052_v45 = vrot.slane %v4021_v42, 6  ;;  %v4053_v46 = vrot.slane %v4023_v43, 6  ;;  %v4022_v47 = vsel %vm4014_vm7, %v4010_v16, %v4018_v40  ;;  %v9241_v43 = vld [vmem:[#allocation16 + $0x98] sm:$0xff]  }
 0x67d   : > { %4047 = vst [vmem:[#allocation4 + $0x10] sm:$0x38] %v4021_v42  ;;  %v4024_v48 = vsel %vm4016_vm8, %v4012_v37, %v4020_v41  ;;  %4026 = vst [vmem:[%s10411_s14 + $0x8] sm:$0xff] %v4022_v47  ;;  %v4040_v49 = vrot.slane %v4022_v47, 2  ;;  %v4055_v50 = vrot.slane %v4022_v47, 6  ;;  %v7866_v37 = vrot.slane %v9370_v31, 9 }
 0x67e   : > { %4048 = vst [vmem:[#allocation4 + $0x18] sm:$0x38] %v4022_v47  ;;  %4043 = vst [vmem:[#allocation4 + $0x10] ss:$-12 sps:$4 sm:$0xc1] %v4039_v44   ;;  %v4054_v51 = vsel %vm4051_vm9, %v4052_v45, %v4053_v46  ;;  %v4056_v52 = vrot.slane %v4024_v48, 6 }
 0x67f   : > { %4028 = vst [vmem:[%s10411_s14 + $0x18] sm:$0x1] %v4024_v48  ;;  %4060 = vst [vmem:[#allocation4 + $0x20] sm:$0x7] %v4054_v51  ;;  %v9242_v47 = vld [vmem:[#allocation16 + $0xe0] sm:$0xff]   ;;  %v9269_v31 = vld [vmem:[#allocation16 + $0x138] sm:$0xff]  }
 0x680   : > { %4044 = vst [vmem:[#allocation4 + $0x18] ss:$-12 sps:$4 sm:$0xc1] %v4040_v49   ;;  %v4057_v53 = vsel %vm4051_vm9, %v4055_v50, %v4056_v52  ;;  %v9243_v49 = vld [vmem:[#allocation16 + $0xa0] sm:$0xff]   ;;  %s9885_s14 = smov [#allocation18]  }
 0x681   : > { %4061 = vst [vmem:[#allocation4 + $0x28] sm:$0x7] %v4057_v53  ;;  %s9682_s22 = sshll.u32 %s9885_s14, 4  ;;  %s9683_s22 = int_to_ptr.vmem [resolvable:$false] %s9682_s22 }
 0x682   : > { %s9684_s28 = scalar_lea.vmem %s9683_s22, 512  ;;  %p9685_p12 = scmp.lt.s32.totalorder %s10452_s19, %s9683_s22 }
 0x683   : > { %p9686_p1 = scmp.lt.s32.totalorder %s9684_s28, %s9678_s24 }
 0x685   : > { %v9291_v54 = vld [vmem:[#allocation4 + $0x10] ss:$8 sps:$4 sm:$0xcc]   ;;  %v9312_v9 = vld [vmem:[#allocation4 + $0x14] ss:$8 sps:$4 sm:$0x11]   ;;  %p9687_p2 = por %p9686_p1, %p9685_p12 }
 0x686   : > { %4268 = vst [vmem:[#allocation7 + $0x20] sm:$0xcc] %v9291_v54  ;;  %v9310_v6 = vld [vmem:[#allocation4 + $0x10] ss:$8 sps:$4 sm:$0x88]   ;;  %v4277_v14 = vrot.slane %v9312_v9, 5 }
 0x687   : > { %v9229_v55 = vld [vmem:[#allocation4 + $0x4] ss:$8 sps:$4 sm:$0x66]   ;;  %v9253_v58 = vld [vmem:[#allocation4 + $0x4] ss:$8 sps:$4 sm:$0x88]   ;;  %p9688_p13 = pnand %p9687_p2, %p9681_p7 }
 0x688   : > { %v9234_v56 = vld [vmem:[#allocation4 + $0x4] ss:$8 sps:$4 sm:$0xcc]   ;;  %v4225_v57 = vrot.slane %v9229_v55, 7  ;;  %v7864_v60 = vrot.slane %v9253_v58, 9  ;;  %v7865_v13 = vrot.slane %v9310_v6, 9 }
 0x689   : > { %4234 = vst [vmem:[#allocation7 + $0x8] sm:$0xcc] %v9234_v56  ;;  %v9254_v59 = vld [vmem:[#allocation4 + $0x10] ss:$8 sps:$4 sm:$0x11]  }
 0x68a   : > { %4227 = vst [vmem:[#allocation7] sm:$0xcc] %v4225_v57  ;;  %v9272_v61 = vld [vmem:[#allocation4 + $0x10] ss:$8 sps:$4 sm:$0x33]   ;;  %v4250_v62 = vrot.slane %v9254_v59, 5  ;;  %v4278_v24 = vsel %vm10399_vm4, %v7865_v13, %v4277_v14 }
 0x68b   : > { %v4259_v63 = vrot.slane %v9272_v61, 6  ;;  %v9290_v0 = vld [vmem:[#allocation4 + $0x4] ss:$8 sps:$4 sm:$0x66]   ;;  %4280 = vst [vmem:[#allocation7 + $0x28] sm:$0xcc] %v4278_v24 }
 0x68c   : > { %v4251_v2 = vsel %vm10399_vm4, %v7864_v60, %v4250_v62  ;;  %v7855_v3 = vrot.slane %v9290_v0, 9  ;;  %v9309_v4 = vld [vmem:[#allocation4 + $0x4] ss:$8 sps:$4 sm:$0xcc]   ;;  %v9246_v60 = vld [vmem:[#allocation16 + $0xf0] sm:$0xff]   ;;  %v9260_v24 = vld [vmem:[#allocation16 + $0x158] sm:$0xff]  }
 0x68d   : > { %4253 = vst [vmem:[#allocation7 + $0x10] sm:$0xcc] %v4251_v2  ;;  %4261 = vst [vmem:[#allocation7 + $0x18] sm:$0xcc] %v4259_v63  ;;  %v7856_v8 = vrot.slane %v9309_v4, 10  ;;  %v9245_v59 = vld [vmem:[#allocation16 + $0xa8] sm:$0xff]  }
 0x68e   : > { %4109 = vst [vmem:[#allocation7 + $0x20] sm:$0x33] %v7855_v3  ;;  %v9330_v15 = vld [vmem:[#allocation4 + $0x4] ss:$8 sps:$4 sm:$0x88]   ;;  %v9247_v2 = vld [vmem:[#allocation16 + $0xb0] sm:$0xff]  }
 0x68f   : > { %4118 = vst [vmem:[#allocation7 + $0x28] sm:$0x33] %v7856_v8  ;;  %v9331_v20 = vld [vmem:[#allocation4 + $0x10] ss:$8 sps:$4 sm:$0x11]   ;;  %v7857_v25 = vrot.slane %v9330_v15, 11 }
 0x690   : > { %v10421_v5 = vld [vmem:[#allocation7 + $0x8] sm:$0xff]  ;;  %v9332_v26 = vld [vmem:[#allocation4 + $0x14] ss:$8 sps:$4 sm:$0x33]   ;;  %v4131_v28 = vrot.slane %v9331_v20, 7  ;;  %v9251_v14 = vld [vmem:[#allocation16 + $0x100] sm:$0xff]  }
 0x691   : > { %v4375_v7 = vld [vmem:[#allocation7] sm:$0xff]  ;;  %v4408_v12 = vcombine.high %v10421_v5, %v10421_v5  ;;  %v9350_v30 = vld [vmem:[#allocation4 + $0x10] ss:$8 sps:$4 sm:$0x33]   ;;  %v4286_v18 = vrot.slane %v9332_v26, 6  ;;  %v4441_v15 = vpack.c.bf16 %v10421_v5, %v10421_v5  ;;  %v9264_v5 = vld [vmem:[#allocation16 + $0x168] sm:$0xff]  }
 0x692   : > { %v4407_v10 = vcombine.high %v4375_v7, %v4375_v7  ;;  %v4439_v22 = vpack.c.bf16 %v4375_v7, %v4375_v7  ;;  %v4132_v21 = vsel %vm10393_vm1, %v7857_v25, %v4131_v28  ;;  %4141 = vst [vmem:[#allocation7 + $0x38] sm:$0x33] %v9350_v30  ;;  %v9351_v32 = vld [vmem:[#allocation4 + $0x14] ss:$8 sps:$4 sm:$0x66]   ;;  %v9262_v26 = vld [vmem:[#allocation16 + $0x160] sm:$0xff]  }
 0x693   : > { %v4442_v27 = vpack.c.bf16 %v4408_v12, %v4408_v12  ;;  %4134 = vst [vmem:[#allocation7 + $0x30] sm:$0x33] %v4132_v21  ;;  %4288 = vst [vmem:[#allocation7 + $0x30] sm:$0xcc] %v4286_v18  ;;  %v4294_v34 = vrot.slane %v9351_v32, 7  ;;  %v9248_v4 = vld [vmem:[#allocation16 + $0xf8] sm:$0xff]  }
 0x694   : > { %v4440_v17 = vpack.c.bf16 %v4407_v10, %v4407_v10  ;;  %v9369_v35 = vld [vmem:[#allocation4 + $0x10] ss:$8 sps:$4 sm:$0xcc]   ;;  %v9371_v16 = vld [vmem:[#allocation4 + $0x20] ss:$8 sps:$4 sm:$0x11]  }
 0x695   : > { %4296 = vst [vmem:[#allocation7 + $0x38] sm:$0xcc] %v4294_v34  ;;  %v7858_v39 = vrot.slane %v9369_v35, 10  ;;  %v4309_v40 = vrot.slane %v9371_v16, 5  ;;  %v4377_v9 = vld [vmem:[#allocation7 + $0x10] sm:$0xff]  ;;  %v9250_v12 = vld [vmem:[#allocation16 + $0x140] sm:$0xff]  }
 0x696   : > { %6551 = vmatprep.mubr.bf16.mxu0 %v4440_v17  ;;  %v9389_v41 = vld [vmem:[#allocation4 + $0x10] ss:$8 sps:$4 sm:$0x88]   ;;  %v9391_v42 = vld [vmem:[#allocation4 + $0x14] ss:$8 sps:$4 sm:$0x11]   ;;  %v4409_v13 = vcombine.high %v4377_v9, %v4377_v9  ;;  %v4443_v34 = vpack.c.bf16 %v4377_v9, %v4377_v9 }
 0x697   : > { %6552 = vmatmul.mubr.bf16.vlgmr.msra.gmra.mrb[16].mxu0 %v4439_v22  ;;  %4150 = vst [vmem:[#allocation7 + $0x40] sm:$0x33] %v7858_v39  ;;  %v4310_v44 = vsel %vm10399_vm4, %v7866_v37, %v4309_v40  ;;  %v7859_v45 = vrot.slane %v9389_v41, 11  ;;  %v9392_v46 = vld [vmem:[#allocation4 + $0x20] ss:$8 sps:$4 sm:$0x33]  }
 0x698   : > { %8261 = vmatpush3.bf16.msra.mxu0 %v9232_v11  ;;  %6591 = vmatprep.mubr.bf16.mxu0 %v4442_v27  ;;  %4312 = vst [vmem:[#allocation7 + $0x40] sm:$0xcc] %v4310_v44  ;;  %v4159_v48 = vrot.slane %v9391_v42, 7  ;;  %v4318_v50 = vrot.slane %v9392_v46, 6  ;;  %v9249_v11 = vld [vmem:[#allocation16 + $0xb8] sm:$0xff]   ;;  %v4444_v17 = vpack.c.bf16 %v4409_v13, %v4409_v13  ;;  %v9258_v20 = vld [vmem:[#allocation16 + $0x150] sm:$0xff]  }
 0x699   : > { %8262 = vmatprep.subr.bf16.mxu0 %v9236_v19  ;;  %v9410_v51 = vld [vmem:[#allocation4 + $0x14] ss:$8 sps:$4 sm:$0x33]   ;;  %v9411_v53 = vld [vmem:[#allocation4 + $0x20] ss:$8 sps:$4 sm:$0x66]  }
 0x69a   : > { %v4160_v52 = vsel %vm10393_vm1, %v7859_v45, %v4159_v48  ;;  %4320 = vst [vmem:[#allocation7 + $0x48] sm:$0xcc] %v4318_v50  ;;  %4169 = vst [vmem:[#allocation7 + $0x50] sm:$0x33] %v9410_v51  ;;  %v4326_v56 = vrot.slane %v9411_v53, 7  ;;  %v9257_v19 = vld [vmem:[#allocation16 + $0x108] sm:$0xff]  }
 0x69b   : > { %4162 = vst [vmem:[#allocation7 + $0x48] sm:$0x33] %v4160_v52  ;;  %v9448_v54 = vld [vmem:[#allocation4 + $0x14] ss:$8 sps:$4 sm:$0x88]   ;;  %v9263_v27 = vld [vmem:[#allocation16 + $0x120] sm:$0xff]  }
 0x69c   : > { %8263 = vmatpush3.bf16.msra.mxu0 %v9237_v29  ;;  %v9429_v55 = vld [vmem:[#allocation4 + $0x14] ss:$8 sps:$4 sm:$0x66]   ;;  %v9430_v58 = vld [vmem:[#allocation4 + $0x20] ss:$8 sps:$4 sm:$0xcc]  }
 0x69d   : > { %8264 = vmatprep.subr.bf16.mxu0 %v9238_v23  ;;  %v7860_v57 = vrot.slane %v9429_v55, 9  ;;  %4328 = vst [vmem:[#allocation7 + $0x50] sm:$0xcc] %v4326_v56  ;;  %4335 = vst [vmem:[#allocation7 + $0x58] sm:$0xcc] %v9430_v58  ;;  %v7861_v62 = vrot.slane %v9448_v54, 11 }
 0x69e   : > { %v9449_v61 = vld [vmem:[#allocation4 + $0x20] ss:$8 sps:$4 sm:$0x11]   ;;  %v9487_v3 = vld [vmem:[#allocation4 + $0x20] ss:$8 sps:$4 sm:$0x66]  }
 0x69f   : > { %4178 = vst [vmem:[#allocation7 + $0x58] sm:$0x33] %v7860_v57  ;;  %v9468_v63 = vld [vmem:[#allocation4 + $0x20] ss:$8 sps:$4 sm:$0x33]   ;;  %v4191_v0 = vrot.slane %v9449_v61, 7 }
 0x6a0   : > { %8265 = vmatpush3.bf16.msra.mxu0 %v9239_v33  ;;  %4201 = vst [vmem:[#allocation7 + $0x68] sm:$0x33] %v9468_v63  ;;  %v9506_v7 = vld [vmem:[#allocation4 + $0x20] ss:$8 sps:$4 sm:$0xcc]   ;;  %v7862_v8 = vrot.slane %v9487_v3, 9 }
 0x6a1   : > { %8266 = vmatprep.subr.bf16.mxu0 %v9240_v38  ;;  %v4192_v6 = vsel %vm10393_vm1, %v7861_v62, %v4191_v0  ;;  %v7863_v10 = vrot.slane %v9506_v7, 10  ;;  %v9259_v22 = vld [vmem:[#allocation16 + $0x110] sm:$0xff]   ;;  %v9261_v25 = vld [vmem:[#allocation16 + $0x118] sm:$0xff]   ;;  %v9265_v28 = vld [vmem:[#allocation16 + $0x128] sm:$0xff]  }
 0x6a2   : > { %4194 = vst [vmem:[#allocation7 + $0x60] sm:$0x33] %v4192_v6  ;;  %4210 = vst [vmem:[#allocation7 + $0x70] sm:$0x33] %v7862_v8  ;;  %v9266_v29 = vld [vmem:[#allocation16 + $0x170] sm:$0xff]   ;;  %v9268_v21 = vld [vmem:[#allocation16 + $0x178] sm:$0xff]  }
 0x6a3   : > { %4219 = vst [vmem:[#allocation7 + $0x78] sm:$0x33] %v7863_v10  ;;  %v9267_v30 = vld [vmem:[#allocation16 + $0x130] sm:$0xff]   ;;  %v4378_v18 = vld [vmem:[#allocation7 + $0x18] sm:$0xff]  ;;  %v9270_v23 = vld [vmem:[#allocation16 + $0x1c0] sm:$0xff]  }
 0x6a4   : > { %8267 = vmatpush3.bf16.msra.mxu0 %v9241_v43  ;;  %v4410_v32 = vcombine.high %v4378_v18, %v4378_v18  ;;  %v9271_v33 = vld [vmem:[#allocation16 + $0x180] sm:$0xff]   ;;  %v9274_v35 = vld [vmem:[#allocation16 + $0x1c8] sm:$0xff]   ;;  %v9276_v38 = vld [vmem:[#allocation16 + $0x1d0] sm:$0xff]   ;;  %v4445_v54 = vpack.c.bf16 %v4378_v18, %v4378_v18 }
 0x6a5   : > { %8268 = vmatprep.subr.bf16.mxu0 %v9242_v47  ;;  %v9275_v37 = vld [vmem:[#allocation16 + $0x188] sm:$0xff]   ;;  %v9277_v39 = vld [vmem:[#allocation16 + $0x190] sm:$0xff]   ;;  %v9278_v40 = vld [vmem:[#allocation16 + $0x1d8] sm:$0xff]  }
 0x6a6   : > { %v4446_v16 = vpack.c.bf16 %v4410_v32, %v4410_v32  ;;  %v9279_v41 = vld [vmem:[#allocation16 + $0x198] sm:$0xff]   ;;  %v9280_v42 = vld [vmem:[#allocation16 + $0x1e0] sm:$0xff]   ;;  %v9282_v44 = vld [vmem:[#allocation16 + $0x1e8] sm:$0xff]  }
 0x6a7   : > { %v9281_v43 = vld [vmem:[#allocation16 + $0x1a0] sm:$0xff]   ;;  %v9283_v45 = vld [vmem:[#allocation16 + $0x1a8] sm:$0xff]   ;;  %v9284_v46 = vld [vmem:[#allocation16 + $0x1f0] sm:$0xff]  }
 0x6a8   : > { %8269 = vmatpush3.bf16.msra.mxu0 %v9243_v49  ;;  %v9285_v47 = vld [vmem:[#allocation16 + $0x1b0] sm:$0xff]   ;;  %v9286_v48 = vld [vmem:[#allocation16 + $0x1f8] sm:$0xff]   ;;  %v4379_v49 = vld [vmem:[#allocation7 + $0x20] sm:$0xff] }
 0x6a9   : > { %8270 = vmatprep.subr.bf16.mxu0 %v9244_v36  ;;  %v9287_v50 = vld [vmem:[#allocation16 + $0x1b8] sm:$0xff]   ;;  %v9288_v51 = vld [vmem:[#allocation16 + $0x240] sm:$0xff]   ;;  %v4411_v52 = vcombine.high %v4379_v49, %v4379_v49  ;;  %v9293_v36 = vld [vmem:[#allocation16 + $0x248] sm:$0xff]  }
 0x6aa   : > { %v9289_v53 = vld [vmem:[#allocation16 + $0x200] sm:$0xff]   ;;  %v9294_v56 = vld [vmem:[#allocation16 + $0x208] sm:$0xff]   ;;  %v9295_v57 = vld [vmem:[#allocation16 + $0x250] sm:$0xff]  }
 0x6ab   : > { %v4448_v55 = vpack.c.bf16 %v4411_v52, %v4411_v52  ;;  %v9296_v58 = vld [vmem:[#allocation16 + $0x210] sm:$0xff]   ;;  %v9299_v61 = vld [vmem:[#allocation16 + $0x260] sm:$0xff]   ;;  %v9301_v63 = vld [vmem:[#allocation16 + $0x268] sm:$0xff]  }
 0x6ac   : > { %8271 = vmatpush3.bf16.msra.mxu0 %v9245_v59  ;;  %v9297_v59 = vld [vmem:[#allocation16 + $0x258] sm:$0xff]   ;;  %v9300_v62 = vld [vmem:[#allocation16 + $0x220] sm:$0xff]   ;;  %v9302_v0 = vld [vmem:[#allocation16 + $0x228] sm:$0xff]  }
 0x6ad   : > { %8272 = vmatprep.subr.bf16.mxu0 %v9246_v60  ;;  %v9298_v60 = vld [vmem:[#allocation16 + $0x218] sm:$0xff]   ;;  %v9304_v3 = vld [vmem:[#allocation16 + $0x230] sm:$0xff]   ;;  %v4380_v6 = vld [vmem:[#allocation7 + $0x28] sm:$0xff] }
 0x6ae   : > { %v9306_v7 = vld [vmem:[#allocation16 + $0x238] sm:$0xff]   ;;  %v9307_v8 = vld [vmem:[#allocation16 + $0x2c0] sm:$0xff]   ;;  %v4412_v9 = vcombine.high %v4380_v6, %v4380_v6 }
 0x6af   : > { %v9308_v10 = vld [vmem:[#allocation16 + $0x280] sm:$0xff]  }
 0x6b0   : > { %8273 = vmatpush3.bf16.msra.mxu0 %v9247_v2  ;;  %v9303_v2 = vld [vmem:[#allocation16 + $0x270] sm:$0xff]   ;;  %v4450_v13 = vpack.c.bf16 %v4412_v9, %v4412_v9  ;;  %v9329_v18 = vld [vmem:[#allocation16 + $0x300] sm:$0xff]  }
 0x6b1   : > { %8274 = vmatprep.subr.bf16.mxu0 %v9248_v4  ;;  %v9305_v4 = vld [vmem:[#allocation16 + $0x278] sm:$0xff]   ;;  %v9367_v9 = vld [vmem:[#allocation16 + $0x440] sm:$0xff]  }
 0x6b4   : > { %8275 = vmatpush3.bf16.msra.mxu0 %v9249_v11  ;;  %v4447_v11 = vpack.c.bf16 %v4379_v49, %v4379_v49  ;;  %v9349_v49 = vld [vmem:[#allocation16 + $0x380] sm:$0xff]  }
 0x6b5   : > { %8282 = vmatprep.subr.bf16.mxu0 %v9250_v12  ;;  %v9314_v12 = vld [vmem:[#allocation16 + $0x2c8] sm:$0xff]  }
 0x6b7   : > { %6592 = vmatmul.mubr.bf16.vlgmr.msra.gmra.mrb[20].mxu0 %v4441_v15  ;;  %v9316_v15 = vld [vmem:[#allocation16 + $0x2d0] sm:$0xff]  }
 0x6b8   : > { %8283 = vmatpush3.bf16.msra.mxu0 %v9251_v14  ;;  %6631 = vmatprep.mubr.bf16.mxu0 %v4444_v17  ;;  %v9315_v14 = vld [vmem:[#allocation16 + $0x288] sm:$0xff]   ;;  %v9318_v17 = vld [vmem:[#allocation16 + $0x2d8] sm:$0xff]  }
 0x6b9   : > { %8284 = vmatprep.subr.bf16.mxu0 %v9256_v1  ;;  %v9317_v1 = vld [vmem:[#allocation16 + $0x290] sm:$0xff]  }
 0x6bc   : > { %8285 = vmatpush3.bf16.msra.mxu0 %v9257_v19  ;;  %v9319_v19 = vld [vmem:[#allocation16 + $0x298] sm:$0xff]  }
 0x6bd   : > { %8286 = vmatprep.subr.bf16.mxu0 %v9258_v20  ;;  %v9320_v20 = vld [vmem:[#allocation16 + $0x2e0] sm:$0xff]  }
 0x6c0   : > { %8287 = vmatpush3.bf16.msra.mxu0 %v9259_v22  ;;  %v9321_v22 = vld [vmem:[#allocation16 + $0x2a0] sm:$0xff]  }
 0x6c1   : > { %8288 = vmatprep.subr.bf16.mxu0 %v9260_v24  ;;  %v9322_v24 = vld [vmem:[#allocation16 + $0x2e8] sm:$0xff]  }
 0x6c4   : > { %8289 = vmatpush3.bf16.msra.mxu0 %v9261_v25  ;;  %v9323_v25 = vld [vmem:[#allocation16 + $0x2a8] sm:$0xff]  }
 0x6c5   : > { %8290 = vmatprep.subr.bf16.mxu0 %v9262_v26  ;;  %v9324_v26 = vld [vmem:[#allocation16 + $0x2f0] sm:$0xff]  }
 0x6c8   : > { %8291 = vmatpush3.bf16.msra.mxu0 %v9263_v27  ;;  %v9325_v27 = vld [vmem:[#allocation16 + $0x2b0] sm:$0xff]  }
 0x6c9   : > { %8292 = vmatprep.subr.bf16.mxu0 %v9264_v5  ;;  %v9326_v5 = vld [vmem:[#allocation16 + $0x2f8] sm:$0xff]  }
 0x6cc   : > { %8293 = vmatpush3.bf16.msra.mxu0 %v9265_v28  ;;  %v4381_v28 = vld [vmem:[#allocation7 + $0x30] sm:$0xff] }
 0x6cd   : > { %8294 = vmatprep.subr.bf16.mxu0 %v9266_v29  ;;  %v9327_v29 = vld [vmem:[#allocation16 + $0x2b8] sm:$0xff]  }
 0x6d0   : > { %8295 = vmatpush3.bf16.msra.mxu0 %v9267_v30  ;;  %v9328_v30 = vld [vmem:[#allocation16 + $0x340] sm:$0xff]  }
 0x6d1   : > { %8296 = vmatprep.subr.bf16.mxu0 %v9268_v21  ;;  %v4413_v21 = vcombine.high %v4381_v28, %v4381_v28 }
 0x6d3   : > { %v4452_v32 = vpack.c.bf16 %v4413_v21, %v4413_v21  ;;  %v9384_v21 = vld [vmem:[#allocation16 + $0x430] sm:$0xff]  }
 0x6d4   : > { %8297 = vmatpush3.bf16.msra.mxu0 %v9269_v31  ;;  %v4449_v31 = vpack.c.bf16 %v4380_v6, %v4380_v6  ;;  %v9365_v6 = vld [vmem:[#allocation16 + $0x3f8] sm:$0xff]  }
 0x6d5   : > { %8304 = vmatprep.subr.bf16.mxu0 %v9270_v23  ;;  %v9334_v23 = vld [vmem:[#allocation16 + $0x348] sm:$0xff]  }
 0x6d7   : > { %6632 = vmatmul.mubr.bf16.vlgmr.msra.gmra.mrb[24].mxu0 %v4443_v34  ;;  %v9336_v34 = vld [vmem:[#allocation16 + $0x350] sm:$0xff]  }
 0x6d8   : > { %8305 = vmatpush3.bf16.msra.mxu0 %v9271_v33  ;;  %6671 = vmatprep.mubr.bf16.mxu0 %v4446_v16  ;;  %v9335_v33 = vld [vmem:[#allocation16 + $0x308] sm:$0xff]   ;;  %v9338_v16 = vld [vmem:[#allocation16 + $0x358] sm:$0xff]  }
 0x6d9   : > { %8306 = vmatprep.subr.bf16.mxu0 %v9274_v35  ;;  %v9337_v35 = vld [vmem:[#allocation16 + $0x310] sm:$0xff]  }
 0x6dc   : > { %8307 = vmatpush3.bf16.msra.mxu0 %v9275_v37  ;;  %v9339_v37 = vld [vmem:[#allocation16 + $0x318] sm:$0xff]  }
 0x6dd   : > { %8308 = vmatprep.subr.bf16.mxu0 %v9276_v38  ;;  %v9340_v38 = vld [vmem:[#allocation16 + $0x360] sm:$0xff]  }
 0x6e0   : > { %8309 = vmatpush3.bf16.msra.mxu0 %v9277_v39  ;;  %v9341_v39 = vld [vmem:[#allocation16 + $0x320] sm:$0xff]  }
 0x6e1   : > { %8310 = vmatprep.subr.bf16.mxu0 %v9278_v40  ;;  %v9342_v40 = vld [vmem:[#allocation16 + $0x368] sm:$0xff]  }
 0x6e4   : > { %8311 = vmatpush3.bf16.msra.mxu0 %v9279_v41  ;;  %v9343_v41 = vld [vmem:[#allocation16 + $0x328] sm:$0xff]  }
 0x6e5   : > { %8312 = vmatprep.subr.bf16.mxu0 %v9280_v42  ;;  %v9344_v42 = vld [vmem:[#allocation16 + $0x370] sm:$0xff]  }
 0x6e8   : > { %8313 = vmatpush3.bf16.msra.mxu0 %v9281_v43  ;;  %v9345_v43 = vld [vmem:[#allocation16 + $0x330] sm:$0xff]  }
 0x6e9   : > { %8314 = vmatprep.subr.bf16.mxu0 %v9282_v44  ;;  %v9346_v44 = vld [vmem:[#allocation16 + $0x378] sm:$0xff]  }
 0x6ec   : > { %8315 = vmatpush3.bf16.msra.mxu0 %v9283_v45  ;;  %v4382_v45 = vld [vmem:[#allocation7 + $0x38] sm:$0xff] }
 0x6ed   : > { %8316 = vmatprep.subr.bf16.mxu0 %v9284_v46  ;;  %v9347_v46 = vld [vmem:[#allocation16 + $0x338] sm:$0xff]  }
 0x6f0   : > { %8317 = vmatpush3.bf16.msra.mxu0 %v9285_v47  ;;  %v9348_v47 = vld [vmem:[#allocation16 + $0x3c0] sm:$0xff]  }
 0x6f1   : > { %8318 = vmatprep.subr.bf16.mxu0 %v9286_v48  ;;  %v4414_v48 = vcombine.high %v4382_v45, %v4382_v45 }
 0x6f3   : > { %v4454_v52 = vpack.c.bf16 %v4414_v48, %v4414_v48  ;;  %v9403_v48 = vld [vmem:[#allocation16 + $0x4a8] sm:$0xff]  }
 0x6f4   : > { %8319 = vmatpush3.bf16.msra.mxu0 %v9287_v50  ;;  %v4451_v50 = vpack.c.bf16 %v4381_v28, %v4381_v28 }
 0x6f5   : > { %8326 = vmatprep.subr.bf16.mxu0 %v9288_v51  ;;  %v9353_v51 = vld [vmem:[#allocation16 + $0x3c8] sm:$0xff]  }
 0x6f7   : > { %6672 = vmatmul.mubr.bf16.vlgmr.msra.gmra.mrb[28].mxu0 %v4445_v54  ;;  %v9355_v54 = vld [vmem:[#allocation16 + $0x3d0] sm:$0xff]  }
 0x6f8   : > { %8327 = vmatpush3.bf16.msra.mxu0 %v9289_v53  ;;  %6711 = vmatprep.mubr.bf16.mxu0 %v4448_v55  ;;  %v9354_v53 = vld [vmem:[#allocation16 + $0x388] sm:$0xff]   ;;  %v9357_v55 = vld [vmem:[#allocation16 + $0x3d8] sm:$0xff]  }
 0x6f9   : > { %8328 = vmatprep.subr.bf16.mxu0 %v9293_v36  ;;  %v9356_v36 = vld [vmem:[#allocation16 + $0x390] sm:$0xff]  }
 0x6fc   : > { %8329 = vmatpush3.bf16.msra.mxu0 %v9294_v56  ;;  %v9358_v56 = vld [vmem:[#allocation16 + $0x398] sm:$0xff]  }
 0x6fd   : > { %8330 = vmatprep.subr.bf16.mxu0 %v9295_v57  ;;  %v9359_v57 = vld [vmem:[#allocation16 + $0x3e0] sm:$0xff]  }
 0x700   : > { %8331 = vmatpush3.bf16.msra.mxu0 %v9296_v58  ;;  %v9360_v58 = vld [vmem:[#allocation16 + $0x3a0] sm:$0xff]  }
 0x701   : > { %8332 = vmatprep.subr.bf16.mxu0 %v9297_v59  ;;  %v9361_v59 = vld [vmem:[#allocation16 + $0x3e8] sm:$0xff]  }
 0x704   : > { %8333 = vmatpush3.bf16.msra.mxu0 %v9298_v60  ;;  %v9362_v60 = vld [vmem:[#allocation16 + $0x3a8] sm:$0xff]  }
 0x705   : > { %8334 = vmatprep.subr.bf16.mxu0 %v9299_v61  ;;  %v9363_v61 = vld [vmem:[#allocation16 + $0x3f0] sm:$0xff]  }
 0x708   : > { %8335 = vmatpush3.bf16.msra.mxu0 %v9300_v62 }
 0x709   : > { %8336 = vmatprep.subr.bf16.mxu0 %v9301_v63 }
 0x70c   : > { %8337 = vmatpush3.bf16.msra.mxu0 %v9302_v0 }
 0x70d   : > { %8338 = vmatprep.subr.bf16.mxu0 %v9303_v2 }
 0x710   : > { %8339 = vmatpush3.bf16.msra.mxu0 %v9304_v3  ;;  %v9364_v3 = vld [vmem:[#allocation16 + $0x3b0] sm:$0xff]  }
 0x711   : > { %8340 = vmatprep.subr.bf16.mxu0 %v9305_v4 }
 0x714   : > { %8341 = vmatpush3.bf16.msra.mxu0 %v9306_v7  ;;  %v4383_v7 = vld [vmem:[#allocation7 + $0x40] sm:$0xff] }
 0x715   : > { %8348 = vmatprep.subr.bf16.mxu0 %v9307_v8  ;;  %v9366_v8 = vld [vmem:[#allocation16 + $0x3b8] sm:$0xff]  }
 0x717   : > { %6712 = vmatmul.mubr.bf16.vlgmr.msra.gmra.mrb[32].mxu0 %v4447_v11  ;;  %v9368_v11 = vld [vmem:[#allocation16 + $0x400] sm:$0xff]  }
 0x718   : > { %8349 = vmatpush3.bf16.msra.mxu0 %v9308_v10  ;;  %6751 = vmatprep.mubr.bf16.mxu0 %v4450_v13  ;;  %v4415_v10 = vcombine.high %v4383_v7, %v4383_v7  ;;  %v9373_v13 = vld [vmem:[#allocation16 + $0x448] sm:$0xff]  }
 0x719   : > { %8350 = vmatprep.subr.bf16.mxu0 %v9314_v12  ;;  %v4453_v12 = vpack.c.bf16 %v4382_v45, %v4382_v45  ;;  %v9400_v45 = vld [vmem:[#allocation16 + $0x4e0] sm:$0xff]  }
 0x71c   : > { %8351 = vmatpush3.bf16.msra.mxu0 %v9315_v14  ;;  %v4456_v14 = vpack.c.bf16 %v4415_v10, %v4415_v10  ;;  %v9421_v10 = vld [vmem:[#allocation16 + $0x568] sm:$0xff]  }
 0x71d   : > { %8352 = vmatprep.subr.bf16.mxu0 %v9316_v15  ;;  %v9374_v15 = vld [vmem:[#allocation16 + $0x408] sm:$0xff]  }
 0x720   : > { %8353 = vmatpush3.bf16.msra.mxu0 %v9317_v1  ;;  %v9375_v1 = vld [vmem:[#allocation16 + $0x450] sm:$0xff]  }
 0x721   : > { %8354 = vmatprep.subr.bf16.mxu0 %v9318_v17  ;;  %v9376_v17 = vld [vmem:[#allocation16 + $0x410] sm:$0xff]  }
 0x724   : > { %8355 = vmatpush3.bf16.msra.mxu0 %v9319_v19  ;;  %v9377_v19 = vld [vmem:[#allocation16 + $0x458] sm:$0xff]  }
 0x725   : > { %8356 = vmatprep.subr.bf16.mxu0 %v9320_v20  ;;  %v9378_v20 = vld [vmem:[#allocation16 + $0x418] sm:$0xff]  }
 0x728   : > { %8357 = vmatpush3.bf16.msra.mxu0 %v9321_v22  ;;  %v9379_v22 = vld [vmem:[#allocation16 + $0x460] sm:$0xff]  }
 0x729   : > { %8358 = vmatprep.subr.bf16.mxu0 %v9322_v24  ;;  %v9380_v24 = vld [vmem:[#allocation16 + $0x420] sm:$0xff]  }
 0x72c   : > { %8359 = vmatpush3.bf16.msra.mxu0 %v9323_v25  ;;  %v9381_v25 = vld [vmem:[#allocation16 + $0x468] sm:$0xff]  }
 0x72d   : > { %8360 = vmatprep.subr.bf16.mxu0 %v9324_v26  ;;  %v9382_v26 = vld [vmem:[#allocation16 + $0x428] sm:$0xff]  }
 0x730   : > { %8361 = vmatpush3.bf16.msra.mxu0 %v9325_v27  ;;  %v9383_v27 = vld [vmem:[#allocation16 + $0x470] sm:$0xff]  }
 0x731   : > { %8362 = vmatprep.subr.bf16.mxu0 %v9326_v5 }
 0x734   : > { %8363 = vmatpush3.bf16.msra.mxu0 %v9327_v29 }
 0x735   : > { %8370 = vmatprep.subr.bf16.mxu0 %v9328_v30 }
 0x737   : > { %6752 = vmatmul.mubr.bf16.vlgmr.msra.gmra.mrb[36].mxu0 %v4449_v31  ;;  %v9385_v31 = vld [vmem:[#allocation16 + $0x478] sm:$0xff]  }
 0x738   : > { %8371 = vmatpush3.bf16.msra.mxu0 %v9329_v18  ;;  %6791 = vmatprep.mubr.bf16.mxu0 %v4452_v32  ;;  %v4384_v32 = vld [vmem:[#allocation7 + $0x48] sm:$0xff] }
 0x739   : > { %8372 = vmatprep.subr.bf16.mxu0 %v9334_v23 }
 0x73c   : > { %8373 = vmatpush3.bf16.msra.mxu0 %v9335_v33  ;;  %v9386_v33 = vld [vmem:[#allocation16 + $0x438] sm:$0xff]  }
 0x73d   : > { %8374 = vmatprep.subr.bf16.mxu0 %v9336_v34  ;;  %v9387_v34 = vld [vmem:[#allocation16 + $0x4c0] sm:$0xff]  }
 0x740   : > { %8375 = vmatpush3.bf16.msra.mxu0 %v9337_v35  ;;  %v4416_v35 = vcombine.high %v4384_v32, %v4384_v32 }
 0x741   : > { %8376 = vmatprep.subr.bf16.mxu0 %v9338_v16  ;;  %v9388_v16 = vld [vmem:[#allocation16 + $0x480] sm:$0xff]  }
 0x744   : > { %8377 = vmatpush3.bf16.msra.mxu0 %v9339_v37  ;;  %v4455_v37 = vpack.c.bf16 %v4383_v7, %v4383_v7  ;;  %v9418_v7 = vld [vmem:[#allocation16 + $0x518] sm:$0xff]  }
 0x745   : > { %8378 = vmatprep.subr.bf16.mxu0 %v9340_v38  ;;  %v9394_v38 = vld [vmem:[#allocation16 + $0x4c8] sm:$0xff]  }
 0x748   : > { %8379 = vmatpush3.bf16.msra.mxu0 %v9341_v39  ;;  %v4458_v39 = vpack.c.bf16 %v4416_v35, %v4416_v35  ;;  %v9440_v35 = vld [vmem:[#allocation16 + $0x5e8] sm:$0xff]  }
 0x749   : > { %8380 = vmatprep.subr.bf16.mxu0 %v9342_v40  ;;  %v9395_v40 = vld [vmem:[#allocation16 + $0x488] sm:$0xff]  }
 0x74c   : > { %8381 = vmatpush3.bf16.msra.mxu0 %v9343_v41  ;;  %v9396_v41 = vld [vmem:[#allocation16 + $0x4d0] sm:$0xff]  }
 0x74d   : > { %8382 = vmatprep.subr.bf16.mxu0 %v9344_v42  ;;  %v9397_v42 = vld [vmem:[#allocation16 + $0x490] sm:$0xff]  }
 0x750   : > { %8383 = vmatpush3.bf16.msra.mxu0 %v9345_v43  ;;  %v9398_v43 = vld [vmem:[#allocation16 + $0x4d8] sm:$0xff]  }
 0x751   : > { %8384 = vmatprep.subr.bf16.mxu0 %v9346_v44  ;;  %v9399_v44 = vld [vmem:[#allocation16 + $0x498] sm:$0xff]  }
 0x754   : > { %8385 = vmatpush3.bf16.msra.mxu0 %v9347_v46  ;;  %v9401_v46 = vld [vmem:[#allocation16 + $0x4a0] sm:$0xff]  }
 0x755   : > { %8392 = vmatprep.subr.bf16.mxu0 %v9348_v47  ;;  %v9402_v47 = vld [vmem:[#allocation16 + $0x4e8] sm:$0xff]  }
 0x757   : > { %6792 = vmatmul.mubr.bf16.vlgmr.msra.gmra.mrb[40].mxu0 %v4451_v50 }
 0x758   : > { %8393 = vmatpush3.bf16.msra.mxu0 %v9349_v49  ;;  %6831 = vmatprep.mubr.bf16.mxu0 %v4454_v52  ;;  %v9404_v49 = vld [vmem:[#allocation16 + $0x4f0] sm:$0xff]  }
 0x759   : > { %8394 = vmatprep.subr.bf16.mxu0 %v9353_v51 }
 0x75c   : > { %8395 = vmatpush3.bf16.msra.mxu0 %v9354_v53 }
 0x75d   : > { %8396 = vmatprep.subr.bf16.mxu0 %v9355_v54  ;;  %v9405_v54 = vld [vmem:[#allocation16 + $0x4b0] sm:$0xff]  }
 0x760   : > { %8397 = vmatpush3.bf16.msra.mxu0 %v9356_v36 }
 0x761   : > { %8398 = vmatprep.subr.bf16.mxu0 %v9357_v55  ;;  %v9406_v55 = vld [vmem:[#allocation16 + $0x4f8] sm:$0xff]  }
 0x764   : > { %8399 = vmatpush3.bf16.msra.mxu0 %v9358_v56 }
 0x765   : > { %8400 = vmatprep.subr.bf16.mxu0 %v9359_v57  ;;  %v4385_v57 = vld [vmem:[#allocation7 + $0x50] sm:$0xff] }
 0x768   : > { %8401 = vmatpush3.bf16.msra.mxu0 %v9360_v58  ;;  %v9407_v58 = vld [vmem:[#allocation16 + $0x4b8] sm:$0xff]  }
 0x769   : > { %8402 = vmatprep.subr.bf16.mxu0 %v9361_v59  ;;  %v9408_v59 = vld [vmem:[#allocation16 + $0x540] sm:$0xff]  }
 0x76a   : > { %v8254_v62 = vpop.f32.mrb[16].mxu0 }
 0x76b   : > { %v8255_v63 = vpop.f32.mrb[17].mxu0 }
 0x76c   : > { %v8256_v0 = vadd.f32 %v8255_v63, %v8254_v62  ;;  %8403 = vmatpush3.bf16.msra.mxu0 %v9362_v60  ;;  %v8257_v2 = vpop.f32.mrb[18].mxu0  ;;  %v4417_v60 = vcombine.high %v4385_v57, %v4385_v57  ;;  %v4457_v62 = vpack.c.bf16 %v4384_v32, %v4384_v32  ;;  %v9413_v63 = vld [vmem:[#allocation16 + $0x548] sm:$0xff]   ;;  %v9437_v32 = vld [vmem:[#allocation16 + $0x598] sm:$0xff]  }
 0x76d   : > { %v8258_v4 = vpop.f32.mrb[19].mxu0  ;;  %8404 = vmatprep.subr.bf16.mxu0 %v9363_v61  ;;  %v9409_v61 = vld [vmem:[#allocation16 + $0x500] sm:$0xff]   ;;  %v9414_v2 = vld [vmem:[#allocation16 + $0x508] sm:$0xff]  }
 0x76e   : > { %v9416_v4 = vld [vmem:[#allocation16 + $0x510] sm:$0xff]  }
 0x770   : > { %8405 = vmatpush3.bf16.msra.mxu0 %v9364_v3  ;;  %v9415_v3 = vld [vmem:[#allocation16 + $0x550] sm:$0xff]  }
 0x771   : > { %8406 = vmatprep.subr.bf16.mxu0 %v9365_v6  ;;  %v9417_v6 = vld [vmem:[#allocation16 + $0x558] sm:$0xff]  }
 0x774   : > { %8407 = vmatpush3.bf16.msra.mxu0 %v9366_v8  ;;  %v9419_v8 = vld [vmem:[#allocation16 + $0x560] sm:$0xff]  }
 0x775   : > { %8414 = vmatprep.subr.bf16.mxu0 %v9367_v9  ;;  %v9420_v9 = vld [vmem:[#allocation16 + $0x520] sm:$0xff]  }
 0x777   : > { %6832 = vmatmul.mubr.bf16.vlgmr.msra.gmra.mrb[44].mxu0 %v4453_v12  ;;  %v9423_v12 = vld [vmem:[#allocation16 + $0x570] sm:$0xff]  }
 0x778   : > { %8415 = vmatpush3.bf16.msra.mxu0 %v9368_v11  ;;  %6871 = vmatprep.mubr.bf16.mxu0 %v4456_v14  ;;  %v9422_v11 = vld [vmem:[#allocation16 + $0x528] sm:$0xff]  }
 0x779   : > { %8416 = vmatprep.subr.bf16.mxu0 %v9373_v13 }
 0x77c   : > { %8417 = vmatpush3.bf16.msra.mxu0 %v9374_v15 }
 0x77d   : > { %8418 = vmatprep.subr.bf16.mxu0 %v9375_v1 }
 0x780   : > { %8419 = vmatpush3.bf16.msra.mxu0 %v9376_v17  ;;  %v9424_v17 = vld [vmem:[#allocation16 + $0x530] sm:$0xff]  }
 0x781   : > { %8420 = vmatprep.subr.bf16.mxu0 %v9377_v19 }
 0x784   : > { %8421 = vmatpush3.bf16.msra.mxu0 %v9378_v20  ;;  %v9425_v20 = vld [vmem:[#allocation16 + $0x578] sm:$0xff]  }
 0x785   : > { %8422 = vmatprep.subr.bf16.mxu0 %v9379_v22 }
 0x788   : > { %8423 = vmatpush3.bf16.msra.mxu0 %v9380_v24  ;;  %v4386_v24 = vld [vmem:[#allocation7 + $0x58] sm:$0xff] }
 0x789   : > { %8424 = vmatprep.subr.bf16.mxu0 %v9381_v25  ;;  %v9426_v25 = vld [vmem:[#allocation16 + $0x538] sm:$0xff]  }
 0x78a   : > { %v8276_v5 = vpop.f32.mrb[20].mxu0 }
 0x78b   : > { %v8277_v28 = vpop.f32.mrb[21].mxu0 }
 0x78c   : > { %v8278_v29 = vadd.f32 %v8277_v28, %v8276_v5  ;;  %v8279_v30 = vpop.f32.mrb[22].mxu0  ;;  %8425 = vmatpush3.bf16.msra.mxu0 %v9382_v26  ;;  %v9427_v26 = vld [vmem:[#allocation16 + $0x5c0] sm:$0xff]   ;;  %v4459_v28 = vpack.c.bf16 %v4385_v57, %v4385_v57  ;;  %v9457_v57 = vld [vmem:[#allocation16 + $0x618] sm:$0xff]  }
 0x78d   : > { %v8280_v18 = vpop.f32.mrb[23].mxu0  ;;  %8426 = vmatprep.subr.bf16.mxu0 %v9383_v27  ;;  %v4418_v27 = vcombine.high %v4386_v24, %v4386_v24  ;;  %v9428_v5 = vld [vmem:[#allocation16 + $0x580] sm:$0xff]  }
 0x78e   : > { %v6594_v23 = vadd.f32 %v8278_v29, %v8256_v0  ;;  %v4460_v0 = vpack.c.bf16 %v4417_v60, %v4417_v60  ;;  %v9432_v29 = vld [vmem:[#allocation16 + $0x5c8] sm:$0xff]   ;;  %v9434_v18 = vld [vmem:[#allocation16 + $0x5d0] sm:$0xff]  }
 0x78f   : > { %v4462_v30 = vpack.c.bf16 %v4418_v27, %v4418_v27  ;;  %v9460_v60 = vld [vmem:[#allocation16 + $0x668] sm:$0xff]  }
 0x790   : > { %8427 = vmatpush3.bf16.msra.mxu0 %v9384_v21  ;;  %v9433_v21 = vld [vmem:[#allocation16 + $0x588] sm:$0xff]  }
 0x791   : > { %8428 = vmatprep.subr.bf16.mxu0 %v9385_v31  ;;  %v9435_v31 = vld [vmem:[#allocation16 + $0x590] sm:$0xff]   ;;  %v9479_v27 = vld [vmem:[#allocation16 + $0x6e8] sm:$0xff]  }
 0x794   : > { %8429 = vmatpush3.bf16.msra.mxu0 %v9386_v33  ;;  %v9438_v33 = vld [vmem:[#allocation16 + $0x5e0] sm:$0xff]  }
 0x795   : > { %8436 = vmatprep.subr.bf16.mxu0 %v9387_v34  ;;  %v9439_v34 = vld [vmem:[#allocation16 + $0x5a0] sm:$0xff]  }
 0x797   : > { %6872 = vmatmul.mubr.bf16.vlgmr.msra.gmra.mrb[48].mxu0 %v4455_v37  ;;  %v9442_v37 = vld [vmem:[#allocation16 + $0x5f0] sm:$0xff]  }
 0x798   : > { %8437 = vmatpush3.bf16.msra.mxu0 %v9388_v16  ;;  %6911 = vmatprep.mubr.bf16.mxu0 %v4458_v39  ;;  %v9441_v16 = vld [vmem:[#allocation16 + $0x5a8] sm:$0xff]  }
 0x799   : > { %8438 = vmatprep.subr.bf16.mxu0 %v9394_v38 }
 0x79c   : > { %8439 = vmatpush3.bf16.msra.mxu0 %v9395_v40 }
 0x79d   : > { %8440 = vmatprep.subr.bf16.mxu0 %v9396_v41 }
 0x7a0   : > { %8441 = vmatpush3.bf16.msra.mxu0 %v9397_v42  ;;  %v9443_v42 = vld [vmem:[#allocation16 + $0x5b0] sm:$0xff]  }
 0x7a1   : > { %8442 = vmatprep.subr.bf16.mxu0 %v9398_v43 }
 0x7a4   : > { %8443 = vmatpush3.bf16.msra.mxu0 %v9399_v44  ;;  %v9444_v44 = vld [vmem:[#allocation16 + $0x5f8] sm:$0xff]  }
 0x7a5   : > { %8444 = vmatprep.subr.bf16.mxu0 %v9400_v45 }
 0x7a8   : > { %8445 = vmatpush3.bf16.msra.mxu0 %v9401_v46  ;;  %v4387_v46 = vld [vmem:[#allocation7 + $0x60] sm:$0xff] }
 0x7a9   : > { %8446 = vmatprep.subr.bf16.mxu0 %v9402_v47  ;;  %v9445_v47 = vld [vmem:[#allocation16 + $0x5b8] sm:$0xff]  }
 0x7aa   : > { %v8298_v50 = vpop.f32.mrb[24].mxu0 }
 0x7ab   : > { %v8299_v51 = vpop.f32.mrb[25].mxu0 }
 0x7ac   : > { %v8300_v52 = vadd.f32 %v8299_v51, %v8298_v50  ;;  %v8301_v53 = vpop.f32.mrb[26].mxu0  ;;  %8447 = vmatpush3.bf16.msra.mxu0 %v9403_v48  ;;  %v9446_v48 = vld [vmem:[#allocation16 + $0x640] sm:$0xff]   ;;  %v4461_v51 = vpack.c.bf16 %v4386_v24, %v4386_v24  ;;  %v9476_v24 = vld [vmem:[#allocation16 + $0x698] sm:$0xff]  }
 0x7ad   : > { %v8302_v36 = vpop.f32.mrb[27].mxu0  ;;  %8448 = vmatprep.subr.bf16.mxu0 %v9404_v49  ;;  %v4419_v49 = vcombine.high %v4387_v46, %v4387_v46  ;;  %v9447_v50 = vld [vmem:[#allocation16 + $0x600] sm:$0xff]  }
 0x7ae   : > { %v6634_v56 = vadd.f32 %v8300_v52, %v6594_v23  ;;  %v9436_v23 = vld [vmem:[#allocation16 + $0x5d8] sm:$0xff]   ;;  %v9452_v52 = vld [vmem:[#allocation16 + $0x648] sm:$0xff]   ;;  %v9454_v36 = vld [vmem:[#allocation16 + $0x650] sm:$0xff]  }
 0x7af   : > { %v4464_v53 = vpack.c.bf16 %v4419_v49, %v4419_v49  ;;  %v9498_v49 = vld [vmem:[#allocation16 + $0x768] sm:$0xff]  }
 0x7b0   : > { %8449 = vmatpush3.bf16.msra.mxu0 %v9405_v54  ;;  %v9453_v54 = vld [vmem:[#allocation16 + $0x608] sm:$0xff]  }
 0x7b1   : > { %8450 = vmatprep.subr.bf16.mxu0 %v9406_v55  ;;  %v9455_v55 = vld [vmem:[#allocation16 + $0x610] sm:$0xff]  }
 0x7b4   : > { %8451 = vmatpush3.bf16.msra.mxu0 %v9407_v58  ;;  %v9458_v58 = vld [vmem:[#allocation16 + $0x660] sm:$0xff]  }
 0x7b5   : > { %8458 = vmatprep.subr.bf16.mxu0 %v9408_v59  ;;  %v9459_v59 = vld [vmem:[#allocation16 + $0x620] sm:$0xff]  }
 0x7b7   : > { %6912 = vmatmul.mubr.bf16.vlgmr.msra.gmra.mrb[52].mxu0 %v4457_v62  ;;  %v9462_v62 = vld [vmem:[#allocation16 + $0x670] sm:$0xff]  }
 0x7b8   : > { %8459 = vmatpush3.bf16.msra.mxu0 %v9409_v61  ;;  %6951 = vmatprep.mubr.bf16.mxu0 %v4460_v0  ;;  %v9461_v61 = vld [vmem:[#allocation16 + $0x628] sm:$0xff]  }
 0x7b9   : > { %8460 = vmatprep.subr.bf16.mxu0 %v9413_v63 }
 0x7bc   : > { %8461 = vmatpush3.bf16.msra.mxu0 %v9414_v2 }
 0x7bd   : > { %8462 = vmatprep.subr.bf16.mxu0 %v9415_v3 }
 0x7c0   : > { %8463 = vmatpush3.bf16.msra.mxu0 %v9416_v4  ;;  %v9463_v4 = vld [vmem:[#allocation16 + $0x630] sm:$0xff]  }
 0x7c1   : > { %8464 = vmatprep.subr.bf16.mxu0 %v9417_v6 }
 0x7c4   : > { %8465 = vmatpush3.bf16.msra.mxu0 %v9418_v7  ;;  %v9464_v7 = vld [vmem:[#allocation16 + $0x678] sm:$0xff]  }
 0x7c5   : > { %8466 = vmatprep.subr.bf16.mxu0 %v9419_v8 }
 0x7c8   : > { %8467 = vmatpush3.bf16.msra.mxu0 %v9420_v9  ;;  %v4388_v9 = vld [vmem:[#allocation7 + $0x68] sm:$0xff] }
 0x7c9   : > { %8468 = vmatprep.subr.bf16.mxu0 %v9421_v10  ;;  %v9465_v10 = vld [vmem:[#allocation16 + $0x638] sm:$0xff]  }
 0x7ca   : > { %v8320_v13 = vpop.f32.mrb[28].mxu0 }
 0x7cb   : > { %v8321_v14 = vpop.f32.mrb[29].mxu0 }
 0x7cc   : > { %v8322_v15 = vadd.f32 %v8321_v14, %v8320_v13  ;;  %v8323_v1 = vpop.f32.mrb[30].mxu0  ;;  %8469 = vmatpush3.bf16.msra.mxu0 %v9422_v11  ;;  %v9466_v11 = vld [vmem:[#allocation16 + $0x6c0] sm:$0xff]   ;;  %v4463_v14 = vpack.c.bf16 %v4387_v46, %v4387_v46  ;;  %v9495_v46 = vld [vmem:[#allocation16 + $0x718] sm:$0xff]  }
 0x7cd   : > { %v8324_v19 = vpop.f32.mrb[31].mxu0  ;;  %8470 = vmatprep.subr.bf16.mxu0 %v9423_v12  ;;  %v4420_v12 = vcombine.high %v4388_v9, %v4388_v9  ;;  %v9467_v13 = vld [vmem:[#allocation16 + $0x680] sm:$0xff]  }
 0x7ce   : > { %v6674_v22 = vadd.f32 %v8322_v15, %v6634_v56  ;;  %v9456_v56 = vld [vmem:[#allocation16 + $0x658] sm:$0xff]   ;;  %v9471_v15 = vld [vmem:[#allocation16 + $0x6c8] sm:$0xff]   ;;  %v9473_v19 = vld [vmem:[#allocation16 + $0x6d0] sm:$0xff]  }
 0x7cf   : > { %v4466_v1 = vpack.c.bf16 %v4420_v12, %v4420_v12  ;;  %v9518_v12 = vld [vmem:[#allocation16 + $0x7e8] sm:$0xff]  }
 0x7d0   : > { %8471 = vmatpush3.bf16.msra.mxu0 %v9424_v17  ;;  %v9472_v17 = vld [vmem:[#allocation16 + $0x688] sm:$0xff]  }
 0x7d1   : > { %8472 = vmatprep.subr.bf16.mxu0 %v9425_v20  ;;  %v9474_v20 = vld [vmem:[#allocation16 + $0x690] sm:$0xff]  }
 0x7d4   : > { %8473 = vmatpush3.bf16.msra.mxu0 %v9426_v25  ;;  %v9477_v25 = vld [vmem:[#allocation16 + $0x6e0] sm:$0xff]  }
 0x7d5   : > { %8480 = vmatprep.subr.bf16.mxu0 %v9427_v26  ;;  %v9478_v26 = vld [vmem:[#allocation16 + $0x6a0] sm:$0xff]  }
 0x7d7   : > { %6952 = vmatmul.mubr.bf16.vlgmr.msra.gmra.mrb[56].mxu0 %v4459_v28  ;;  %v9481_v28 = vld [vmem:[#allocation16 + $0x6f0] sm:$0xff]  }
 0x7d8   : > { %8481 = vmatpush3.bf16.msra.mxu0 %v9428_v5  ;;  %6991 = vmatprep.mubr.bf16.mxu0 %v4462_v30  ;;  %v9480_v5 = vld [vmem:[#allocation16 + $0x6a8] sm:$0xff]  }
 0x7d9   : > { %8482 = vmatprep.subr.bf16.mxu0 %v9432_v29 }
 0x7dc   : > { %8483 = vmatpush3.bf16.msra.mxu0 %v9433_v21 }
 0x7dd   : > { %8484 = vmatprep.subr.bf16.mxu0 %v9434_v18 }
 0x7e0   : > { %8485 = vmatpush3.bf16.msra.mxu0 %v9435_v31  ;;  %v9482_v31 = vld [vmem:[#allocation16 + $0x6b0] sm:$0xff]  }
 0x7e1   : > { %8486 = vmatprep.subr.bf16.mxu0 %v9436_v23 }
 0x7e4   : > { %8487 = vmatpush3.bf16.msra.mxu0 %v9437_v32  ;;  %v9483_v32 = vld [vmem:[#allocation16 + $0x6f8] sm:$0xff]  }
 0x7e5   : > { %8488 = vmatprep.subr.bf16.mxu0 %v9438_v33 }
 0x7e8   : > { %8489 = vmatpush3.bf16.msra.mxu0 %v9439_v34  ;;  %v4389_v34 = vld [vmem:[#allocation7 + $0x70] sm:$0xff] }
 0x7e9   : > { %8490 = vmatprep.subr.bf16.mxu0 %v9440_v35  ;;  %v9484_v35 = vld [vmem:[#allocation16 + $0x6b8] sm:$0xff]  }
 0x7ea   : > { %v8342_v38 = vpop.f32.mrb[32].mxu0 }
 0x7eb   : > { %v8343_v39 = vpop.f32.mrb[33].mxu0 }
 0x7ec   : > { %v8344_v40 = vadd.f32 %v8343_v39, %v8342_v38  ;;  %v8345_v41 = vpop.f32.mrb[34].mxu0  ;;  %8491 = vmatpush3.bf16.msra.mxu0 %v9441_v16  ;;  %v9485_v16 = vld [vmem:[#allocation16 + $0x740] sm:$0xff]   ;;  %v4465_v39 = vpack.c.bf16 %v4388_v9, %v4388_v9  ;;  %v9515_v9 = vld [vmem:[#allocation16 + $0x798] sm:$0xff]  }
 0x7ed   : > { %v8346_v43 = vpop.f32.mrb[35].mxu0  ;;  %8492 = vmatprep.subr.bf16.mxu0 %v9442_v37  ;;  %v4421_v37 = vcombine.high %v4389_v34, %v4389_v34  ;;  %v9486_v38 = vld [vmem:[#allocation16 + $0x700] sm:$0xff]  }
 0x7ee   : > { %v6714_v45 = vadd.f32 %v8344_v40, %v6674_v22  ;;  %v9475_v22 = vld [vmem:[#allocation16 + $0x6d8] sm:$0xff]   ;;  %v9490_v40 = vld [vmem:[#allocation16 + $0x748] sm:$0xff]   ;;  %v9492_v43 = vld [vmem:[#allocation16 + $0x750] sm:$0xff]  }
 0x7ef   : > { %v4468_v41 = vpack.c.bf16 %v4421_v37, %v4421_v37 }
 0x7f0   : > { %8493 = vmatpush3.bf16.msra.mxu0 %v9443_v42  ;;  %v9491_v42 = vld [vmem:[#allocation16 + $0x708] sm:$0xff]  }
 0x7f1   : > { %8494 = vmatprep.subr.bf16.mxu0 %v9444_v44  ;;  %v9493_v44 = vld [vmem:[#allocation16 + $0x710] sm:$0xff]  }
 0x7f4   : > { %8495 = vmatpush3.bf16.msra.mxu0 %v9445_v47  ;;  %v9496_v47 = vld [vmem:[#allocation16 + $0x760] sm:$0xff]  }
 0x7f5   : > { %8502 = vmatprep.subr.bf16.mxu0 %v9446_v48  ;;  %v9497_v48 = vld [vmem:[#allocation16 + $0x720] sm:$0xff]  }
 0x7f7   : > { %6992 = vmatmul.mubr.bf16.vlgmr.msra.gmra.mrb[60].mxu0 %v4461_v51  ;;  %v9500_v51 = vld [vmem:[#allocation16 + $0x770] sm:$0xff]  }
 0x7f8   : > { %8503 = vmatpush3.bf16.msra.mxu0 %v9447_v50  ;;  %7031 = vmatprep.mubr.bf16.mxu0 %v4464_v53  ;;  %v9499_v50 = vld [vmem:[#allocation16 + $0x728] sm:$0xff]  }
 0x7f9   : > { %8504 = vmatprep.subr.bf16.mxu0 %v9452_v52 }
 0x7fc   : > { %8505 = vmatpush3.bf16.msra.mxu0 %v9453_v54 }
 0x7fd   : > { %8506 = vmatprep.subr.bf16.mxu0 %v9454_v36 }
 0x800   : > { %8507 = vmatpush3.bf16.msra.mxu0 %v9455_v55  ;;  %v9501_v55 = vld [vmem:[#allocation16 + $0x730] sm:$0xff]  }
 0x801   : > { %8508 = vmatprep.subr.bf16.mxu0 %v9456_v56 }
 0x804   : > { %8509 = vmatpush3.bf16.msra.mxu0 %v9457_v57  ;;  %v9502_v57 = vld [vmem:[#allocation16 + $0x778] sm:$0xff]  }
 0x805   : > { %8510 = vmatprep.subr.bf16.mxu0 %v9458_v58 }
 0x808   : > { %8511 = vmatpush3.bf16.msra.mxu0 %v9459_v59  ;;  %v4390_v59 = vld [vmem:[#allocation7 + $0x78] sm:$0xff] }
 0x809   : > { %8512 = vmatprep.subr.bf16.mxu0 %v9460_v60  ;;  %v9503_v60 = vld [vmem:[#allocation16 + $0x738] sm:$0xff]  }
 0x80a   : > { %v8364_v63 = vpop.f32.mrb[36].mxu0 }
 0x80b   : > { %v8365_v0 = vpop.f32.mrb[37].mxu0 }
 0x80c   : > { %v8366_v2 = vadd.f32 %v8365_v0, %v8364_v63  ;;  %v8367_v3 = vpop.f32.mrb[38].mxu0  ;;  %8513 = vmatpush3.bf16.msra.mxu0 %v9461_v61  ;;  %v9504_v61 = vld [vmem:[#allocation16 + $0x7c0] sm:$0xff]   ;;  %v4467_v0 = vpack.c.bf16 %v4389_v34, %v4389_v34 }
 0x80d   : > { %v8368_v6 = vpop.f32.mrb[39].mxu0  ;;  %8514 = vmatprep.subr.bf16.mxu0 %v9462_v62  ;;  %v4422_v62 = vcombine.high %v4390_v59, %v4390_v59  ;;  %v9505_v63 = vld [vmem:[#allocation16 + $0x780] sm:$0xff]  }
 0x80e   : > { %v6754_v8 = vadd.f32 %v8366_v2, %v6714_v45  ;;  %v9494_v45 = vld [vmem:[#allocation16 + $0x758] sm:$0xff]   ;;  %v9510_v2 = vld [vmem:[#allocation16 + $0x7c8] sm:$0xff]   ;;  %v9512_v6 = vld [vmem:[#allocation16 + $0x7d0] sm:$0xff]  }
 0x80f   : > { %v4470_v3 = vpack.c.bf16 %v4422_v62, %v4422_v62 }
 0x810   : > { %8515 = vmatpush3.bf16.msra.mxu0 %v9463_v4  ;;  %v9511_v4 = vld [vmem:[#allocation16 + $0x788] sm:$0xff]  }
 0x811   : > { %8516 = vmatprep.subr.bf16.mxu0 %v9464_v7  ;;  %v9513_v7 = vld [vmem:[#allocation16 + $0x790] sm:$0xff]  }
 0x814   : > { %8517 = vmatpush3.bf16.msra.mxu0 %v9465_v10  ;;  %v9516_v10 = vld [vmem:[#allocation16 + $0x7e0] sm:$0xff]  }
 0x815   : > { %8524 = vmatprep.subr.bf16.mxu0 %v9466_v11  ;;  %v9517_v11 = vld [vmem:[#allocation16 + $0x7a0] sm:$0xff]  }
 0x817   : > { %7032 = vmatmul.mubr.bf16.vlgmr.msra.gmra.mrb[64].mxu0 %v4463_v14  ;;  %v9520_v14 = vld [vmem:[#allocation16 + $0x7f0] sm:$0xff]  }
 0x818   : > { %8525 = vmatpush3.bf16.msra.mxu0 %v9467_v13  ;;  %7071 = vmatprep.mubr.bf16.mxu0 %v4466_v1  ;;  %v9519_v13 = vld [vmem:[#allocation16 + $0x7a8] sm:$0xff]  }
 0x819   : > { %8526 = vmatprep.subr.bf16.mxu0 %v9471_v15 }
 0x81c   : > { %8527 = vmatpush3.bf16.msra.mxu0 %v9472_v17 }
 0x81d   : > { %8528 = vmatprep.subr.bf16.mxu0 %v9473_v19 }
 0x820   : > { %8529 = vmatpush3.bf16.msra.mxu0 %v9474_v20  ;;  %v9521_v20 = vld [vmem:[#allocation16 + $0x7b0] sm:$0xff]  }
 0x821   : > { %8530 = vmatprep.subr.bf16.mxu0 %v9475_v22 }
 0x824   : > { %8531 = vmatpush3.bf16.msra.mxu0 %v9476_v24  ;;  %v9522_v24 = vld [vmem:[#allocation16 + $0x7f8] sm:$0xff]  }
 0x825   : > { %8532 = vmatprep.subr.bf16.mxu0 %v9477_v25 }
 0x828   : > { %8533 = vmatpush3.bf16.msra.mxu0 %v9478_v26  ;;  %v9523_v26 = vld [vmem:[#allocation16 + $0x7b8] sm:$0xff]  }
 0x829   : > { %8534 = vmatprep.subr.bf16.mxu0 %v9479_v27  ;;  %v4469_v27 = vpack.c.bf16 %v4390_v59, %v4390_v59 }
 0x82a   : > { %v8386_v29 = vpop.f32.mrb[40].mxu0 }
 0x82b   : > { %v8387_v30 = vpop.f32.mrb[41].mxu0 }
 0x82c   : > { %v8388_v21 = vadd.f32 %v8387_v30, %v8386_v29  ;;  %v8389_v18 = vpop.f32.mrb[42].mxu0  ;;  %8535 = vmatpush3.bf16.msra.mxu0 %v9480_v5 }
 0x82d   : > { %v8390_v23 = vpop.f32.mrb[43].mxu0  ;;  %8536 = vmatprep.subr.bf16.mxu0 %v9481_v28 }
 0x82e   : > { %v6794_v33 = vadd.f32 %v8388_v21, %v6754_v8  ;;  %v9514_v8 = vld [vmem:[#allocation16 + $0x7d8] sm:$0xff]  }
 0x830   : > { %8537 = vmatpush3.bf16.msra.mxu0 %v9482_v31 }
 0x831   : > { %8538 = vmatprep.subr.bf16.mxu0 %v9483_v32 }
 0x834   : > { %8539 = vmatpush3.bf16.msra.mxu0 %v9484_v35 }
 0x835   : > { %8546 = vmatprep.subr.bf16.mxu0 %v9485_v16 }
 0x837   : > { %7072 = vmatmul.mubr.bf16.vlgmr.msra.gmra.mrb[68].mxu0 %v4465_v39 }
 0x838   : > { %8547 = vmatpush3.bf16.msra.mxu0 %v9486_v38  ;;  %7111 = vmatprep.mubr.bf16.mxu0 %v4468_v41 }
 0x839   : > { %8548 = vmatprep.subr.bf16.mxu0 %v9490_v40 }
 0x83c   : > { %8549 = vmatpush3.bf16.msra.mxu0 %v9491_v42 }
 0x83d   : > { %8550 = vmatprep.subr.bf16.mxu0 %v9492_v43 }
 0x840   : > { %8551 = vmatpush3.bf16.msra.mxu0 %v9493_v44 }
 0x841   : > { %8552 = vmatprep.subr.bf16.mxu0 %v9494_v45 }
 0x844   : > { %8553 = vmatpush3.bf16.msra.mxu0 %v9495_v46 }
 0x845   : > { %8554 = vmatprep.subr.bf16.mxu0 %v9496_v47 }
 0x848   : > { %8555 = vmatpush3.bf16.msra.mxu0 %v9497_v48 }
 0x849   : > { %8556 = vmatprep.subr.bf16.mxu0 %v9498_v49 }
 0x84a   : > { %v8408_v52 = vpop.f32.mrb[44].mxu0 }
 0x84b   : > { %v8409_v53 = vpop.f32.mrb[45].mxu0 }
 0x84c   : > { %v8410_v54 = vadd.f32 %v8409_v53, %v8408_v52  ;;  %v8411_v36 = vpop.f32.mrb[46].mxu0  ;;  %8557 = vmatpush3.bf16.msra.mxu0 %v9499_v50 }
 0x84d   : > { %v8412_v56 = vpop.f32.mrb[47].mxu0  ;;  %8558 = vmatprep.subr.bf16.mxu0 %v9500_v51 }
 0x84e   : > { %v6834_v58 = vadd.f32 %v8410_v54, %v6794_v33 }
 0x850   : > { %8559 = vmatpush3.bf16.msra.mxu0 %v9501_v55 }
 0x851   : > { %8560 = vmatprep.subr.bf16.mxu0 %v9502_v57 }
 0x854   : > { %8561 = vmatpush3.bf16.msra.mxu0 %v9503_v60 }
 0x855   : > { %8568 = vmatprep.subr.bf16.mxu0 %v9504_v61 }
 0x857   : > { %7112 = vmatmul.mubr.bf16.vlgmr.msra.gmra.mrb[72].mxu0 %v4467_v0 }
 0x858   : > { %8569 = vmatpush3.bf16.msra.mxu0 %v9505_v63  ;;  %7151 = vmatprep.mubr.bf16.mxu0 %v4470_v3 }
 0x859   : > { %8570 = vmatprep.subr.bf16.mxu0 %v9510_v2 }
 0x85c   : > { %8571 = vmatpush3.bf16.msra.mxu0 %v9511_v4 }
 0x85d   : > { %8572 = vmatprep.subr.bf16.mxu0 %v9512_v6 }
 0x860   : > { %8573 = vmatpush3.bf16.msra.mxu0 %v9513_v7 }
 0x861   : > { %8574 = vmatprep.subr.bf16.mxu0 %v9514_v8 }
 0x864   : > { %8575 = vmatpush3.bf16.msra.mxu0 %v9515_v9 }
 0x865   : > { %8576 = vmatprep.subr.bf16.mxu0 %v9516_v10 }
 0x868   : > { %8577 = vmatpush3.bf16.msra.mxu0 %v9517_v11 }
 0x869   : > { %8578 = vmatprep.subr.bf16.mxu0 %v9518_v12 }
 0x86a   : > { %v8430_v15 = vpop.f32.mrb[48].mxu0 }
 0x86b   : > { %v8431_v1 = vpop.f32.mrb[49].mxu0 }
 0x86c   : > { %v8432_v17 = vadd.f32 %v8431_v1, %v8430_v15  ;;  %v8433_v19 = vpop.f32.mrb[50].mxu0  ;;  %8579 = vmatpush3.bf16.msra.mxu0 %v9519_v13 }
 0x86d   : > { %v8434_v22 = vpop.f32.mrb[51].mxu0  ;;  %8580 = vmatprep.subr.bf16.mxu0 %v9520_v14 }
 0x86e   : > { %v6874_v25 = vadd.f32 %v8432_v17, %v6834_v58 }
 0x870   : > { %8581 = vmatpush3.bf16.msra.mxu0 %v9521_v20 }
 0x871   : > { %8582 = vmatprep.subr.bf16.mxu0 %v9522_v24 }
 0x874   : > { %8583 = vmatpush3.bf16.msra.mxu0 %v9523_v26 }
 0x877   : > { %7152 = vmatmul.mubr.bf16.vlgmr.msra.gmra.mrb[76].mxu0 %v4469_v27 }
 0x88a   : > { %v8452_v5 = vpop.f32.mrb[52].mxu0 }
 0x88b   : > { %v8453_v28 = vpop.f32.mrb[53].mxu0 }
 0x88c   : > { %v8454_v29 = vadd.f32 %v8453_v28, %v8452_v5  ;;  %v8455_v30 = vpop.f32.mrb[54].mxu0 }
 0x88d   : > { %v8456_v21 = vpop.f32.mrb[55].mxu0 }
 0x88e   : > { %v6914_v18 = vadd.f32 %v8454_v29, %v6874_v25 }
 0x8aa   : > { %v8474_v31 = vpop.f32.mrb[56].mxu0 }
 0x8ab   : > { %v8475_v23 = vpop.f32.mrb[57].mxu0 }
 0x8ac   : > { %v8476_v32 = vadd.f32 %v8475_v23, %v8474_v31  ;;  %v8477_v33 = vpop.f32.mrb[58].mxu0 }
 0x8ad   : > { %v8478_v34 = vpop.f32.mrb[59].mxu0 }
 0x8ae   : > { %v6954_v35 = vadd.f32 %v8476_v32, %v6914_v18 }
 0x8ca   : > { %v8496_v16 = vpop.f32.mrb[60].mxu0 }
 0x8cb   : > { %v8497_v37 = vpop.f32.mrb[61].mxu0 }
 0x8cc   : > { %v8498_v38 = vadd.f32 %v8497_v37, %v8496_v16  ;;  %v8499_v39 = vpop.f32.mrb[62].mxu0 }
 0x8cd   : > { %v8500_v40 = vpop.f32.mrb[63].mxu0 }
 0x8ce   : > { %v6994_v41 = vadd.f32 %v8498_v38, %v6954_v35 }
 0x8ea   : > { %v8518_v42 = vpop.f32.mrb[64].mxu0 }
 0x8eb   : > { %v8519_v43 = vpop.f32.mrb[65].mxu0 }
 0x8ec   : > { %v8520_v44 = vadd.f32 %v8519_v43, %v8518_v42  ;;  %v8521_v45 = vpop.f32.mrb[66].mxu0 }
 0x8ed   : > { %v8522_v46 = vpop.f32.mrb[67].mxu0 }
 0x8ee   : > { %v7034_v47 = vadd.f32 %v8520_v44, %v6994_v41 }
 0x90a   : > { %v8540_v48 = vpop.f32.mrb[68].mxu0 }
 0x90b   : > { %v8541_v49 = vpop.f32.mrb[69].mxu0 }
 0x90c   : > { %v8542_v50 = vadd.f32 %v8541_v49, %v8540_v48  ;;  %v8543_v51 = vpop.f32.mrb[70].mxu0 }
 0x90d   : > { %v8544_v52 = vpop.f32.mrb[71].mxu0 }
 0x90e   : > { %v7074_v53 = vadd.f32 %v8542_v50, %v7034_v47 }
 0x92a   : > { %v8562_v54 = vpop.f32.mrb[72].mxu0 }
 0x92b   : > { %v8563_v36 = vpop.f32.mrb[73].mxu0 }
 0x92c   : > { %v8564_v55 = vadd.f32 %v8563_v36, %v8562_v54  ;;  %v8565_v56 = vpop.f32.mrb[74].mxu0 }
 0x92d   : > { %v8566_v57 = vpop.f32.mrb[75].mxu0 }
 0x92e   : > { %v7114_v58 = vadd.f32 %v8564_v55, %v7074_v53 }
 0x94a   : > { %v8584_v59 = vpop.f32.mrb[76].mxu0 }
 0x94b   : > { %v8585_v60 = vpop.f32.mrb[77].mxu0 }
 0x94c   : > { %v8586_v61 = vadd.f32 %v8585_v60, %v8584_v59  ;;  %v8587_v62 = vpop.f32.mrb[78].mxu0 }
 0x94d   : > { %v8588_v63 = vpop.f32.mrb[79].mxu0 }
 0x94e   : > { %v7154_v0 = vadd.f32 %v8586_v61, %v7114_v58 }
 0x950   : > { %v7161_v2 = vsub.f32 0.0, %v7154_v0  ;;  %7160 = vst.msk [vmem:[%s10438_s29] sm:$0xf] %vm7159_vm10, %v7154_v0 }
 0x952   : > { %v7162_v3 = vmul.f32 1.442695, %v7161_v2 }
 0x954   : > { %9532 = vpow2.f32 %v7162_v3 }
 0x95e   : > { %v9533_v4 = vpop.eup %9532 }
 0x95f   : > { %v7164_v6 = vadd.f32 1.0, %v9533_v4 }
 0x961   : > { %9534 = vrcp.f32 %v7164_v6 }
 0x96b   : > { %v9535_v7 = vpop.eup %9534 }
 0x96c   : > { %v7167_v8 = vsel %vm7159_vm10, %v9535_v7, 0.0 }
 0x96d   : > { %7168 = vadd.xlane.f32.xlu0 %v7167_v8 }
 0x96e   : > { %9691 = shalt.err (!%p9688_p13)
}
 0x96f   : > { %s9692_s16 = scalar_lea.hbm %s10450_s15, 256  ;;  %s9696_s14 = scalar_lea.hbm %s10633_s6, 512 }
 0x970   : > { %p9693_p9 = scmp.ne.s32.totalorder %s10450_s15, %s9692_s16  ;;  %p9697_p6 = scmp.lt.u32.totalorder %s10450_s15, %s10633_s6 }
 0x971   : > { %p9698_p4 = scmp.lt.u32.totalorder %s9696_s14, %s9692_s16  ;;  %p9700_p10 = scmp.lt.u32.totalorder %s9692_s16, %s10450_s15 }
 0x972   : > { %p9694_p0 = pnand %p9693_p9, %p10121_p3 }
 0x973   : > { %p9699_p8 = por %p9698_p4, %p9697_p6 }
 0x974   : > { %p9695_p11 = pneg %p9694_p0 }
 0x975   : > { %p9701_p5 = por %p9700_p10, %p9699_p8 }
 0x977   : > { %p9702_p7 = pnand %p9701_p5, %p9695_p11 }
 0x979   : > { %9705 = shalt.err (!%p9702_p7)
}
 0x97a   : > { %s9886_s24 = smov 128   ;;  %s9887_s28 = smov 8  }
 0x97b   : > { %8655 = dma.vmem_to_hbm [thread:$0]  (%p10121_p3), %s10452_s19, 256, %s10450_s15, %s10456_s17, %s9886_s24, %s9886_s24, %s9887_s28  }
 0x97c   : > { %s8134_s18 = sshll.u32 %s9965_s13, 6  ;;  %s7261_s14 = sshll.u32 %s10438_s29, 4  ;;  %s7262_s14 = int_to_ptr.vmem [resolvable:$true] %s7261_s14 }
 0x97d   : > { %s10487_s30 = scalar_lea.hbm %s10635_s8, %s8134_s18  ;;  %s10680_s22 = sand.u32 1, %s9965_s13  }
 0x97e   : > { %s10492_s0 = scalar_lea.sflag [#allocation22], %s10680_s22  ;;  %s9706_s2 = scalar_lea.vmem %s7262_s14, 64 }
 0x97f   : > { %p9707_p12 = scmp.ne.s32.totalorder %s7262_s14, %s9706_s2  ;;  %s9888_s3 = smov [#allocation21]  }
 0x980   : > { %s9710_s4 = sshll.u32 %s9888_s3, 4  ;;  %s9711_s4 = int_to_ptr.vmem [resolvable:$false] %s9710_s4 }
 0x981   : > { %p9708_p1 = pnand %p9707_p12, %p10121_p3  ;;  %s9712_s19 = scalar_lea.vmem %s9711_s4, 128 }
 0x982   : > { %p9713_p13 = scmp.lt.s32.totalorder %s7262_s14, %s9711_s4  ;;  %p9714_p9 = scmp.lt.s32.totalorder %s9712_s19, %s9706_s2 }
 0x983   : > { %p9709_p2 = pneg %p9708_p1 }
 0x984   : > { %p9715_p0 = por %p9714_p9, %p9713_p13 }
 0x986   : > { %p9716_p11 = pnand %p9715_p0, %p9709_p2 }
 0x988   : > { %9719 = shalt.err (!%p9716_p11)
}
 0x989   : > { %s9720_s29 = scalar_lea.hbm %s10487_s30, 64  ;;  %s9724_s3 = scalar_lea.hbm %s10635_s8, 128 }
 0x98a   : > { %p9721_p6 = scmp.ne.s32.totalorder %s10487_s30, %s9720_s29  ;;  %p9725_p10 = scmp.lt.u32.totalorder %s10487_s30, %s10635_s8 }
 0x98b   : > { %p9726_p5 = scmp.lt.u32.totalorder %s9724_s3, %s9720_s29  ;;  %p9728_p12 = scmp.lt.u32.totalorder %s9720_s29, %s10487_s30 }
 0x98c   : > { %p9722_p4 = pnand %p9721_p6, %p10121_p3 }
 0x98d   : > { %p9727_p7 = por %p9726_p5, %p9725_p10 }
 0x98e   : > { %p9723_p8 = pneg %p9722_p4 }
 0x98f   : > { %p9729_p1 = por %p9728_p12, %p9727_p7 }
 0x991   : > { %p9730_p2 = pnand %p9729_p1, %p9723_p8 }
 0x993   : > { %9733 = shalt.err (!%p9730_p2)
}
 0x994   : > { %8657 = dma.vmem_to_hbm [thread:$0]  (%p10121_p3), %s7262_s14, 64, %s10487_s30, %s10492_s0  }
 0x995   : > { %s8139_s2 = sshll.u32 %s9965_s13, 10  ;;  %s7213_s27 = sshll.u32 %s10269_s1, 4  ;;  %s10519_s27 = int_to_ptr.vmem [resolvable:$true] %s7213_s27 }
 0x996   : > { %s10517_s15 = scalar_lea.hbm %s10632_s5, %s8139_s2  ;;  %s7181_s29 = scalar_lea.sflag [#allocation10], %s10173_s23 }
 0x997   : > { %s9734_s18 = scalar_lea.vmem %s10519_s27, 1024  ;;  %s9889_s3 = smov [#allocation17]  }
 0x998   : > { %p9735_p13 = scmp.ne.s32.totalorder %s10519_s27, %s9734_s18  ;;  %s9738_s30 = sshll.u32 %s9889_s3, 4  ;;  %s9739_s30 = int_to_ptr.vmem [resolvable:$false] %s9738_s30 }
 0x999   : > { %s9740_s1 = scalar_lea.vmem %s9739_s30, 2048  ;;  %p9741_p11 = scmp.lt.s32.totalorder %s10519_s27, %s9739_s30 }
 0x99a   : > { %p9736_p9 = pnand %p9735_p13, %p10121_p3  ;;  %p9742_p6 = scmp.lt.s32.totalorder %s9740_s1, %s9734_s18 }
 0x99c   : > { %p9737_p0 = pneg %p9736_p9  ;;  %p9743_p4 = por %p9742_p6, %p9741_p11 }
 0x99e   : > { %p9744_p8 = pnand %p9743_p4, %p9737_p0 }
 0x9a0   : > { %9747 = shalt.err (!%p9744_p8)
}
 0x9a1   : > { %s9748_s14 = scalar_lea.hbm %s10517_s15, 1024  ;;  %s9752_s2 = scalar_lea.hbm %s10632_s5, 2048 }
 0x9a2   : > { %p9749_p10 = scmp.ne.s32.totalorder %s10517_s15, %s9748_s14  ;;  %p9753_p12 = scmp.lt.u32.totalorder %s10517_s15, %s10632_s5 }
 0x9a3   : > { %p9754_p1 = scmp.lt.u32.totalorder %s9752_s2, %s9748_s14  ;;  %p9756_p13 = scmp.lt.u32.totalorder %s9748_s14, %s10517_s15 }
 0x9a4   : > { %p9750_p5 = pnand %p9749_p10, %p10121_p3 }
 0x9a5   : > { %p9755_p2 = por %p9754_p1, %p9753_p12 }
 0x9a6   : > { %p9751_p7 = pneg %p9750_p5 }
 0x9a7   : > { %p9757_p9 = por %p9756_p13, %p9755_p2 }
 0x9a9   : > { %p9758_p0 = pnand %p9757_p9, %p9751_p7 }
 0x9ab   : > { %9761 = shalt.err (!%p9758_p0)
}
 0x9ac   : > { %8654 = dma.vmem_to_hbm [thread:$0]  (%p10121_p3), %s10519_s27, 1024, %s10517_s15, %s7181_s29, %s9886_s24, %s9886_s24, %s9887_s28  }
 0x9ad   : > { %s8141_s18 = sshll.u32 %s9965_s13, 9  ;;  %s9762_s14 = scalar_lea.vmem %s10442_s21, 512 }
 0x9ae   : > { %s10552_s1 = scalar_lea.hbm %s10634_s7, %s8141_s18  ;;  %p9763_p11 = scmp.ne.s32.totalorder %s10442_s21, %s9762_s14 }
 0x9af   : > { %s9890_s16 = smov [#allocation20]  }
 0x9b0   : > { %p9764_p6 = pnand %p9763_p11, %p10121_p3  ;;  %s9766_s4 = sshll.u32 %s9890_s16, 4  ;;  %s9767_s4 = int_to_ptr.vmem [resolvable:$false] %s9766_s4 }
 0x9b1   : > { %s9768_s2 = scalar_lea.vmem %s9767_s4, 1024  ;;  %p9769_p8 = scmp.lt.s32.totalorder %s10442_s21, %s9767_s4 }
 0x9b2   : > { %p9765_p4 = pneg %p9764_p6  ;;  %p9770_p10 = scmp.lt.s32.totalorder %s9768_s2, %s9762_s14 }
 0x9b4   : > { %p9771_p5 = por %p9770_p10, %p9769_p8 }
 0x9b6   : > { %p9772_p7 = pnand %p9771_p5, %p9765_p4 }
 0x9b8   : > { %9775 = shalt.err (!%p9772_p7)
}
 0x9b9   : > { %s9776_s24 = scalar_lea.hbm %s10552_s1, 512  ;;  %s9780_s15 = scalar_lea.hbm %s10634_s7, 1024 }
 0x9ba   : > { %p9777_p12 = scmp.ne.s32.totalorder %s10552_s1, %s9776_s24  ;;  %p9781_p13 = scmp.lt.u32.totalorder %s10552_s1, %s10634_s7 }
 0x9bb   : > { %p9782_p9 = scmp.lt.u32.totalorder %s9780_s15, %s9776_s24  ;;  %p9784_p11 = scmp.lt.u32.totalorder %s9776_s24, %s10552_s1 }
 0x9bc   : > { %p9778_p1 = pnand %p9777_p12, %p10121_p3 }
 0x9bd   : > { %p9783_p0 = por %p9782_p9, %p9781_p13 }
 0x9be   : > { %p9779_p2 = pneg %p9778_p1 }
 0x9bf   : > { %p9785_p6 = por %p9784_p11, %p9783_p0 }
 0x9c1   : > { %p9786_p4 = pnand %p9785_p6, %p9779_p2 }
 0x9c3   : > { %9789 = shalt.err (!%p9786_p4)
}
 0x9c4   : > { %s9891_s19 = smov 256   ;;  %s9892_s18 = smov 16   ;;  %vm7178_vm11 = vcmask 0  }
 0x9c5   : > { %8656 = dma.vmem_to_hbm [thread:$0]  (%p10121_p3), %s10442_s21, 512, %s10552_s1, %s10456_s17, %s9891_s19, %s9891_s19, %s9892_s18  }
 0x9c6   : > { %s8135_s3 = sshll.u32 %s9965_s13, 4  ;;  %s442_s30 = scalar_lea.vmem [#allocation23], %s10173_s23 }
 0x9c7   : > { %s7274_s14 = sshll.u32 %s442_s30, 4  ;;  %s10581_s2 = scalar_lea.hbm %s10636_s9, %s8135_s3  ;;  %s10583_s14 = int_to_ptr.vmem [resolvable:$true] %s7274_s14 }
 0x9c8   : > { %s9790_s21 = scalar_lea.vmem %s10583_s14, 16  ;;  %s9893_s13 = smov [#allocation23]  }
 0x9c9   : > { %p9791_p8 = scmp.ne.s32.totalorder %s10583_s14, %s9790_s21  ;;  %s9794_s23 = sshll.u32 %s9893_s13, 4  ;;  %s9795_s23 = int_to_ptr.vmem [resolvable:$false] %s9794_s23 }
 0x9ca   : > { %s9796_s17 = scalar_lea.vmem %s9795_s23, 32  ;;  %p9797_p7 = scmp.lt.s32.totalorder %s10583_s14, %s9795_s23 }
 0x9cb   : > { %p9792_p10 = pnand %p9791_p8, %p10121_p3  ;;  %p9798_p12 = scmp.lt.s32.totalorder %s9796_s17, %s9790_s21 }
 0x9cd   : > { %p9793_p5 = pneg %p9792_p10  ;;  %p9799_p1 = por %p9798_p12, %p9797_p7 }
 0x9cf   : > { %p9800_p2 = pnand %p9799_p1, %p9793_p5 }
 0x9fa   : > { %v7169_v9 = vpop.xlane.xlu0 %7168 }
 0x9fb   : > { %v7170_v10 = vrot.slane %v7169_v9, 4 }
 0x9fd   : > { %v7171_v11 = vadd.f32 %v7170_v10, %v7169_v9 }
 0x9ff   : > { %v7172_v12 = vrot.slane %v7171_v11, 2 }
 0xa01   : > { %v7173_v13 = vadd.f32 %v7172_v12, %v7171_v11 }
 0xa03   : > { %v7174_v14 = vrot.slane %v7173_v13, 1 }
 0xa05   : > { %v7175_v15 = vadd.f32 %v7174_v14, %v7173_v13 }
 0xa07   : > { %8634 = vpush %v7175_v15 }
 0xa38   : > { %s8635_s24 = spop %8634 }
 0xa39   : > { %v7177_v1 = vstv %s8635_s24 }
 0xa3a   : > { %7179 = vst.msk [vmem:[%s442_s30] sm:$0x1] %vm7178_vm11, %v7177_v1 }
 0xa3b   : > { %9803 = shalt.err (!%p9800_p2)
}
 0xa3c   : > { %s9804_s1 = scalar_lea.hbm %s10581_s2, 16  ;;  %s9808_s15 = scalar_lea.hbm %s10636_s9, 32 }
 0xa3d   : > { %p9805_p13 = scmp.ne.s32.totalorder %s10581_s2, %s9804_s1  ;;  %p9809_p11 = scmp.lt.u32.totalorder %s10581_s2, %s10636_s9 }
 0xa3e   : > { %p9810_p6 = scmp.lt.u32.totalorder %s9808_s15, %s9804_s1  ;;  %p9812_p8 = scmp.lt.u32.totalorder %s9804_s1, %s10581_s2 }
 0xa3f   : > { %p9806_p9 = pnand %p9805_p13, %p10121_p3 }
 0xa40   : > { %p9811_p4 = por %p9810_p6, %p9809_p11 }
 0xa41   : > { %p9807_p0 = pneg %p9806_p9 }
 0xa42   : > { %p9813_p10 = por %p9812_p8, %p9811_p4 }
 0xa44   : > { %p9814_p5 = pnand %p9813_p10, %p9807_p0 }
 0xa46   : > { %9817 = shalt.err (!%p9814_p5)
}
 0xa47   : > { %8658 = dma.vmem_to_hbm [thread:$0]  (%p10121_p3), %s10583_s14, 16, %s10581_s2, %s10492_s0  }
 0xa48 PF: > { %s10681_s19 = sld [smem:[#allocation30_spill]]  ;;  %s10682_s18 = sld [smem:[#allocation31_spill]] }
 0xa49   : > { %p10684_p12 = scmp.ge.s32.totalorder %s9872_s12, 2 }
 0xa4e   : > { %s7286_s3 = sand.u32 1, %s10681_s19   ;;  %p10683_p7 = scmp.ne.s32.totalorder %s10682_s18, 0 }
 0xa4f   : > { %s7287_s30 = scalar_lea.sflag [#allocation10], %s7286_s3 }
 0xa50   : > { %p8682_p1 = pnand %p10684_p12, %p10683_p7 }
 0xa52   : > { %9847 = dma.done.wait (!%p8682_p1), %s7287_s30, 1024  }
 0xa53   : > { %9849 = vsyncadd (!%p8682_p1), %s7287_s30, 4294966272  ;;  %s10685_s16 = sadd.s32 4294967294, %s9872_s12  }
 0xa54   : > { %s7295_s4 = sand.u32 1, %s10685_s16  }
 0xa55   : > { %s7296_s24 = scalar_lea.sflag [#allocation19], %s7295_s4 }
 0xa56   : > { %9851 = dma.done.wait (!%p8682_p1), %s7296_s24, 768  }
 0xa57   : > { %9853 = vsyncadd (!%p8682_p1), %s7296_s24, 4294966528  ;;  %s7314_s26 = scalar_lea.sflag [#allocation22], %s7295_s4 }
 0xa58   : > { %9855 = dma.done.wait (!%p8682_p1), %s7314_s26, 80  }
 0xa59   : > { %9857 = vsyncadd (!%p8682_p1), %s7314_s26, 4294967216  ;;  %p31_p3 = scmp.ge.s32.totalorder %s10108_s20, 4   ;;  %s10686_s30 = smov %s9864_s10 }
 0xa5a   : > { %s10687_s10 = smov %s9868_s11  ;;  %s10688_s11 = smov %s10117_s25 }
 0xa5b   : > { %s10689_s12 = smov %s10108_s20  ;;  %33 = sbr.rel (!%p31_p3) target bundleno = 17 (0x11), region = 204 }
 0xa62   :  { %7327 = vsyncpa [#allocation9], 1 }
 0xa63   :  { %7329 = vsyncpa [#allocation9 + $0x1], 1 }
 0xa64   :  { %7330 = vsyncpa [#allocation12], 1 }
 0xa65   :  { %7331 = vsyncpa [#allocation15], 1 }
 0xa66   :  { %7332 = vsyncpa [#allocation10], 1 }
 0xa67   :  { %7334 = vsyncpa [#allocation10 + $0x1], 1 }
 0xa68   :  { %7335 = vsyncpa [#allocation19], 1 }
 0xa69   :  { %7337 = vsyncpa [#allocation19 + $0x1], 1 }
 0xa6a   :  { %7338 = vsyncpa [#allocation22], 1 }
 0xa6b   :  { %7340 = vsyncpa [#allocation22 + $0x1], 1 }

</bundles_post_ra>
